<compile_context>
chip_gen: v5e
topology: v5e:2x2
jax: 0.10.0
libtpu: 0.0.40
codegen_flags: <defaults>
</compile_context>

<pallas_src>
import math

import numpy as np
import jax
import jax.numpy as jnp
from jax.experimental import pallas as pl
from jax.experimental.pallas import tpu as pltpu

# ---------------- scaled-down hyperparameters (analogues of the original) ----
NUM_CLASSES = 2
IMG_SIZE = 32          # analogue of img_size=512
VIT_INPUT = 16         # analogue of 224
PATCH = 4              # analogue of patch16
EMBED = 64             # analogue of 768
HEADS = 4
HEAD_DIM = EMBED // HEADS
DEPTH = 2              # analogue of 12 transformer blocks
MLP_DIM = 4 * EMBED
HEAD_H1 = 48           # analogue of 512
HEAD_H2 = 32           # analogue of 256
UP_CHANNELS = [(32, 16), (16, 8), (8, 4), (4, 2)]   # analogue of 256->128->64->32->16
FINAL_CT = (2, 1)      # analogue of 16->8 (k5, s2, p2, op1)
BN_EPS = 1e-5
LN_EPS = 1e-6

GRID_HW = VIT_INPUT // PATCH              # 4
NUM_PATCHES = GRID_HW * GRID_HW           # 16
NUM_TOKENS = NUM_PATCHES + 1              # 17 (CLS + patches)
PATCH_DIM = 3 * PATCH * PATCH             # 48

VMEM_LIMIT = 32 << 20


def _full_spec(a):
    """BlockSpec covering the whole array (same block every grid step)."""
    zeros = (0,) * a.ndim
    return pl.BlockSpec(a.shape, lambda b, _z=zeros: _z)


# ============================ input bilinear resize ==========================
def bilinear_matrix(in_size, out_size):
    """Interpolation matrix matching F.interpolate(mode='bilinear', align_corners=False)."""
    dst = np.arange(out_size, dtype=np.float64)
    src = (dst + 0.5) * (in_size / out_size) - 0.5
    src = np.clip(src, 0.0, in_size - 1)
    i0 = np.floor(src).astype(np.int64)
    i1 = np.minimum(i0 + 1, in_size - 1)
    w1 = src - i0
    w0 = 1.0 - w1
    R = np.zeros((out_size, in_size), np.float32)
    R[np.arange(out_size), i0] += w0.astype(np.float32)
    R[np.arange(out_size), i1] += w1.astype(np.float32)
    return R


def _resize_kernel(rh_ref, rwt_ref, x_ref, o_ref):
    # all C planes of one batch element per grid step (amortizes the per-step overhead)
    for c in range(x_ref.shape[1]):
        t = jnp.dot(rh_ref[...], x_ref[0, c], preferred_element_type=jnp.float32)
        o_ref[0, c] = jnp.dot(t, rwt_ref[...], preferred_element_type=jnp.float32)


def bilinear_resize_nchw(x, out_h, out_w):
    B, C, H, W = x.shape
    if (H, W) == (out_h, out_w):
        return x.astype(jnp.float32)
    Rh = jnp.asarray(bilinear_matrix(H, out_h))
    RwT = jnp.asarray(bilinear_matrix(W, out_w).T)
    return pl.pallas_call(
        _resize_kernel,
        out_shape=jax.ShapeDtypeStruct((B, C, out_h, out_w), jnp.float32),
        grid=(B,),
        in_specs=[pl.BlockSpec((out_h, H), lambda b: (0, 0)),
                  pl.BlockSpec((W, out_w), lambda b: (0, 0)),
                  pl.BlockSpec((1, C, H, W), lambda b: (b, 0, 0, 0))],
        out_specs=pl.BlockSpec((1, C, out_h, out_w), lambda b: (b, 0, 0, 0)),
        compiler_params=pltpu.CompilerParams(dimension_semantics=("parallel",),
                                             vmem_limit_bytes=VMEM_LIMIT),
    )(Rh, RwT, x.astype(jnp.float32))


# ====================== fused ViT backbone + segmentation head ===============
def _vit_backbone_kernel(xp_ref, pos_ref, pw_ref,
                         wqkv_ref, bqkv_ref, wpj_ref, bpj_ref,
                         ln1g_ref, ln1b_ref, ln2g_ref, ln2b_ref,
                         wf1_ref, bf1_ref, wf2_ref, bf2_ref,
                         lnfg_ref, lnfb_ref,
                         hw1_ref, hb1_ref, hw2_ref, hb2_ref,
                         o_ref):
    f32 = jnp.float32
    bf16 = jnp.bfloat16

    def layer_norm(z, g, b):
        mu = jnp.mean(z, axis=-1, keepdims=True)
        zc = z - mu
        var = jnp.mean(zc * zc, axis=-1, keepdims=True)
        return zc * jax.lax.rsqrt(var + LN_EPS) * g + b

    def bdot(a, w):
        # bf16 operands, f32 MXU accumulation
        return jnp.dot(a.astype(bf16), w, preferred_element_type=f32)

    # Patch embedding.  xp row 0 is a zero "CLS slot"; CLS token and the patch-embed bias are
    # pre-folded into pos_ref by the wrapper, so a single matmul + add builds the token tensor.
    tok = bdot(xp_ref[0], pw_ref[...]) + pos_ref[...]                 # [NT, D] f32

    for l in range(DEPTH):
        # ---- attention sub-block (pre-LN), single fused QKV matmul + single projection ----
        h = layer_norm(tok, ln1g_ref[l], ln1b_ref[l])
        qkv = bdot(h, wqkv_ref[l]) + bqkv_ref[l]                      # [NT, 3D] (q pre-scaled)
        heads = []
        for hh in range(HEADS):
            q = qkv[:, hh * HEAD_DIM:(hh + 1) * HEAD_DIM]
            k = qkv[:, EMBED + hh * HEAD_DIM:EMBED + (hh + 1) * HEAD_DIM]
            v = qkv[:, 2 * EMBED + hh * HEAD_DIM:2 * EMBED + (hh + 1) * HEAD_DIM]
            s = jax.lax.dot_general(q.astype(bf16), k.astype(bf16),
                                    (((1,), (1,)), ((), ())),
                                    preferred_element_type=f32)       # [NT, NT]
            s = s - jnp.max(s, axis=-1, keepdims=True)
            p = jnp.exp(s)
            p = p * pl.reciprocal(jnp.sum(p, axis=-1, keepdims=True), approx=True)
            heads.append(jnp.dot(p.astype(bf16), v.astype(bf16),
                                 preferred_element_type=f32))         # [NT, HD]
        ho = jnp.concatenate(heads, axis=-1)                          # [NT, D]
        tok = tok + bdot(ho, wpj_ref[l]) + bpj_ref[l]
        # ---- MLP sub-block (pre-LN) ----
        h = layer_norm(tok, ln2g_ref[l], ln2b_ref[l])
        h = bdot(h, wf1_ref[l]) + bf1_ref[l]
        h = jax.nn.gelu(h, approximate=True)                          # TODO(synk): exact erf
        tok = tok + bdot(h, wf2_ref[l]) + bf2_ref[l]

    tok = layer_norm(tok, lnfg_ref[...], lnfb_ref[...])
    # segmentation head (Linear-ReLU-Dropout(eval)-Linear-ReLU) applied to all tokens
    h1 = jnp.maximum(bdot(tok, hw1_ref[...]) + hb1_ref[...], 0.0)
    h2 = jnp.maximum(bdot(h1, hw2_ref[...]) + hb2_ref[...], 0.0)
    # drop the CLS row in-kernel; store token-major (lane dim = HEAD_H2), no transpose
    o_ref[0] = h2[1:, :].astype(o_ref.dtype)                          # [NP, H2]


def vit_backbone_and_head(params, patches):
    """patches: [B, NUM_PATCHES, PATCH_DIM] -> token features [B, NUM_PATCHES, HEAD_H2] (bf16)."""
    B = patches.shape[0]
    D = EMBED
    bf16 = jnp.bfloat16
    # zero "CLS slot" row so the kernel needs no in-kernel concat for the CLS token
    xp_pad = jnp.pad(patches.astype(jnp.float32), ((0, 0), (1, 0), (0, 0)))   # [B, NT, PD]
    pos = params["pos"].reshape(NUM_TOKENS, D)
    pos_adj = jnp.concatenate(
        [pos[0:1] + params["cls"].reshape(1, D),
         pos[1:] + params["patch_b"].reshape(1, D)], axis=0)                  # [NT, D]

    blocks = params["blocks"]
    stack = lambda key: jnp.stack([blk[key] for blk in blocks], axis=0)
    # fold 1/sqrt(head_dim) attention scale into the Q columns of the fused QKV weights/bias
    # NOTE: head split assumes QKV output layout [q|k|v] with heads contiguous inside each; this
    # is self-consistent for the synthetic weights but a real timm checkpoint needs remapping.
    qscale = jnp.concatenate([jnp.full((D,), 1.0 / math.sqrt(HEAD_DIM), jnp.float32),
                              jnp.ones((2 * D,), jnp.float32)])
    wqkv = (stack("w_qkv") * qscale[None, None, :]).astype(bf16)              # [L, D, 3D]
    bqkv = (stack("b_qkv") * qscale[None, :]).reshape(DEPTH, 1, 3 * D)
    wpj = stack("w_proj").astype(bf16)
    bpj = stack("b_proj").reshape(DEPTH, 1, D)
    ln1g = stack("ln1_g").reshape(DEPTH, 1, D)
    ln1b = stack("ln1_b").reshape(DEPTH, 1, D)
    ln2g = stack("ln2_g").reshape(DEPTH, 1, D)
    ln2b = stack("ln2_b").reshape(DEPTH, 1, D)
    wf1 = stack("w_fc1").astype(bf16)
    bf1 = stack("b_fc1").reshape(DEPTH, 1, MLP_DIM)
    wf2 = stack("w_fc2").astype(bf16)
    bf2 = stack("b_fc2").reshape(DEPTH, 1, D)

    args = [xp_pad, pos_adj, params["patch_w"].astype(bf16),
            wqkv, bqkv, wpj, bpj,
            ln1g, ln1b, ln2g, ln2b, wf1, bf1, wf2, bf2,
            params["ln_f_g"].reshape(1, D), params["ln_f_b"].reshape(1, D),
            params["head_w1"].astype(bf16), params["head_b1"].reshape(1, HEAD_H1),
            params["head_w2"].astype(bf16), params["head_b2"].reshape(1, HEAD_H2)]

    in_specs = [pl.BlockSpec((1, NUM_TOKENS, PATCH_DIM), lambda b: (b, 0, 0))]
    in_specs += [_full_spec(a) for a in args[1:]]

    # grid=(B,) "parallel": at B=2 this keeps both v7x TensorCores busy; for larger B the batch
    # could additionally be folded into the token axis per grid step (TODO(synk)).
    return pl.pallas_call(
        _vit_backbone_kernel,
        out_shape=jax.ShapeDtypeStruct((B, NUM_PATCHES, HEAD_H2), jnp.bfloat16),
        grid=(B,),
        in_specs=in_specs,
        out_specs=pl.BlockSpec((1, NUM_PATCHES, HEAD_H2), lambda b: (b, 0, 0)),
        compiler_params=pltpu.CompilerParams(dimension_semantics=("parallel",),
                                             vmem_limit_bytes=VMEM_LIMIT),
    )(*args)


# =================== fused decoder (conv-transpose chain as matmul sandwiches) ===============
# Activation layout inside the decoder kernel: A[c*H + y, x]  (shape [C*H, W]).
# Every stage is  out = sum_kx  ML_kx @ A @ SR_kx  (+ bias, ReLU), where:
#   ConvTranspose2d(stride 2): ML_kx[o*Ho+oy, ci*H+iy] = w_bn[ci,o, oy-2*iy+p, kx] (if valid)
#                              SR_kx[ix, ox]           = [ox == 2*ix - p + kx]
#   Conv2d(stride 1, final):   ML_kx[o*H+y,  ci*H+iy]  = w[o,ci, iy-y+p, kx]       (if valid)
#                              SR_kx[ix, xo]           = [ix == xo + kx - p]
# BatchNorm(eval) scale is folded into ML rows, BN/conv bias into a per-row bias vector, and the
# final bilinear resize matrices are folded into the last stage's ML/SR.

def _ct_sandwich(p, k, stride, pad, out_pad, H, W):
    w = p["w"]                                       # [Cin, Cout, k, k]
    Cin, Cout = w.shape[0], w.shape[1]
    Hout = (H - 1) * stride - 2 * pad + k + out_pad
    Wout = (W - 1) * stride - 2 * pad + k + out_pad
    scale = p["gamma"] / jnp.sqrt(p["var"] + BN_EPS)
    bias_ch = (p["b"] - p["mean"]) * scale + p["beta"]           # [Cout]
    w_s = w * scale[None, :, None, None]

    oy = np.arange(Hout)
    iy = np.arange(H)
    ky = oy[:, None] - stride * iy[None, :] + pad                # [Hout, H]
    valid = (ky >= 0) & (ky < k)
    ky_c = np.clip(ky, 0, k - 1)
    ox = np.arange(Wout)
    ix = np.arange(W)

    mls, srs = [], []
    for kx in range(k):
        wk = w_s[:, :, :, kx]                                    # [Cin, Cout, k]
        m = wk[:, :, ky_c] * valid[None, None]                   # [Cin, Cout, Hout, H]
        mls.append(m.transpose(1, 2, 0, 3).reshape(Cout * Hout, Cin * H))
        srs.append(jnp.asarray(
            (ox[None, :] == stride * ix[:, None] - pad + kx).astype(np.float32)))  # [W, Wout]
    ML = jnp.stack(mls, 0).astype(jnp.bfloat16)
    SR = jnp.stack(srs, 0).astype(jnp.bfloat16)
    bias = jnp.repeat(bias_ch, Hout).reshape(Cout * Hout, 1).astype(jnp.float32)
    return ML, SR, bias, Cout, Hout, Wout


def _conv_resize_sandwich(w, b, pad, H, W, out_h, out_w):
    Cout, Cin, k, _ = w.shape
    y = np.arange(H)
    iy = np.arange(H)
    ky = iy[None, :] - y[:, None] + pad
    valid = (ky >= 0) & (ky < k)
    ky_c = np.clip(ky, 0, k - 1)
    Rh = bilinear_matrix(H, out_h)                               # [out_h, H]
    RwT = bilinear_matrix(W, out_w).T                            # [W, out_w]
    RK = np.kron(np.eye(Cout, dtype=np.float32), Rh)             # [Cout*out_h, Cout*H]
    ix = np.arange(W)
    xo = np.arange(W)

    mls, srs = [], []
    for kx in range(k):
        wk = w[:, :, :, kx]                                      # [Cout, Cin, k]
        m = wk[:, :, ky_c] * valid[None, None]                   # [Cout, Cin, H, H]
        ml = m.transpose(0, 2, 1, 3).reshape(Cout * H, Cin * H)
        mls.append(jnp.dot(jnp.asarray(RK), ml))                 # fold row resize
        sc_t = (ix[:, None] == xo[None, :] + kx - pad).astype(np.float32)   # Sc^T [W, W]
        srs.append(jnp.asarray(sc_t @ RwT))                      # fold column resize -> [W, out_w]
    ML = jnp.stack(mls, 0).astype(jnp.bfloat16)
    SR = jnp.stack(srs, 0).astype(jnp.bfloat16)
    bias = jnp.repeat(b, out_h).reshape(Cout * out_h, 1).astype(jnp.float32)
    return ML, SR, bias


_STAGE_TAPS = (3, 3, 3, 3, 5, 3)   # 4 up-blocks (k3), final ConvTranspose (k5), final Conv (k3)


def _decoder_kernel(a_ref, *refs):
    o_ref = refs[-1]
    wrefs = refs[:-1]
    f32 = jnp.float32
    bf16 = jnp.bfloat16

    A = a_ref[0].astype(f32)                         # [C0*H0, W0]
    idx = 0
    for si, taps in enumerate(_STAGE_TAPS):
        ml_ref, sr_ref, b_ref = wrefs[idx], wrefs[idx + 1], wrefs[idx + 2]
        idx += 3
        A16 = A.astype(bf16)
        acc = None
        for t in range(taps):
            u = jnp.dot(A16, sr_ref[t], preferred_element_type=f32)        # [Cin*H, Wout]
            v = jnp.dot(ml_ref[t], u.astype(bf16), preferred_element_type=f32)
            acc = v if acc is None else acc + v
        acc = acc + b_ref[...]
        if si < len(_STAGE_TAPS) - 1:                # final Conv2d has no BN/ReLU
            acc = jnp.maximum(acc, 0.0)
        A = acc
    o_ref[0] = A.astype(o_ref.dtype)                 # [NUM_CLASSES*out_h, out_w]


def decoder_forward(params, a0, out_h, out_w):
    """a0: [B, HEAD_H2*gh, gh] -> logits [B, NUM_CLASSES, out_h, out_w] (decoder fully fused)."""
    B = a0.shape[0]
    H = W = GRID_HW
    weight_args = []
    for up in params["ups"]:
        ML, SR, bias, _, H, W = _ct_sandwich(up, k=3, stride=2, pad=1, out_pad=1, H=H, W=W)
        weight_args += [ML, SR, bias]
    ML, SR, bias, _, H, W = _ct_sandwich(params["final_ct"], k=5, stride=2, pad=2, out_pad=1,
                                         H=H, W=W)
    weight_args += [ML, SR, bias]
    MLc, SRc, biasc = _conv_resize_sandwich(params["final_conv_w"], params["final_conv_b"],
                                            pad=1, H=H, W=W, out_h=out_h, out_w=out_w)
    weight_args += [MLc, SRc, biasc]

    out_rows = NUM_CLASSES * out_h
    in_specs = [pl.BlockSpec((1,) + a0.shape[1:], lambda b: (b, 0, 0))]
    in_specs += [_full_spec(a) for a in weight_args]

    out = pl.pallas_call(
        _decoder_kernel,
        out_shape=jax.ShapeDtypeStruct((B, out_rows, out_w), jnp.float32),
        grid=(B,),
        in_specs=in_specs,
        out_specs=pl.BlockSpec((1, out_rows, out_w), lambda b: (b, 0, 0)),
        compiler_params=pltpu.CompilerParams(dimension_semantics=("parallel",),
                                             vmem_limit_bytes=VMEM_LIMIT),
    )(a0, *weight_args)
    return out.reshape(B, NUM_CLASSES, out_h, out_w)


# =============================== parameters ==================================
def _normal(key, shape, scale=0.02):
    return scale * jax.random.normal(key, shape, dtype=jnp.float32)


def init_params(key):
    keys = iter(jax.random.split(key, 64))
    p = {}
    p["patch_w"] = _normal(next(keys), (PATCH_DIM, EMBED))
    p["patch_b"] = jnp.zeros((EMBED,), jnp.float32)
    p["cls"] = _normal(next(keys), (1, 1, EMBED))
    p["pos"] = _normal(next(keys), (1, NUM_TOKENS, EMBED))
    blocks = []
    for _ in range(DEPTH):
        blocks.append({
            "ln1_g": jnp.ones((EMBED,), jnp.float32), "ln1_b": jnp.zeros((EMBED,), jnp.float32),
            "w_qkv": _normal(next(keys), (EMBED, 3 * EMBED)), "b_qkv": jnp.zeros((3 * EMBED,), jnp.float32),
            "w_proj": _normal(next(keys), (EMBED, EMBED)), "b_proj": jnp.zeros((EMBED,), jnp.float32),
            "ln2_g": jnp.ones((EMBED,), jnp.float32), "ln2_b": jnp.zeros((EMBED,), jnp.float32),
            "w_fc1": _normal(next(keys), (EMBED, MLP_DIM)), "b_fc1": jnp.zeros((MLP_DIM,), jnp.float32),
            "w_fc2": _normal(next(keys), (MLP_DIM, EMBED)), "b_fc2": jnp.zeros((EMBED,), jnp.float32),
        })
    p["blocks"] = blocks
    p["ln_f_g"] = jnp.ones((EMBED,), jnp.float32)
    p["ln_f_b"] = jnp.zeros((EMBED,), jnp.float32)
    # segmentation head
    p["head_w1"] = _normal(next(keys), (EMBED, HEAD_H1)); p["head_b1"] = jnp.zeros((HEAD_H1,), jnp.float32)
    p["head_w2"] = _normal(next(keys), (HEAD_H1, HEAD_H2)); p["head_b2"] = jnp.zeros((HEAD_H2,), jnp.float32)
    # upsample decoder
    ups = []
    for cin, cout in UP_CHANNELS:
        ups.append({
            "w": _normal(next(keys), (cin, cout, 3, 3)),
            "b": jnp.zeros((cout,), jnp.float32),
            "gamma": jnp.ones((cout,), jnp.float32), "beta": jnp.zeros((cout,), jnp.float32),
            "mean": jnp.zeros((cout,), jnp.float32), "var": jnp.ones((cout,), jnp.float32),
        })
    p["ups"] = ups
    cin, cout = FINAL_CT
    p["final_ct"] = {
        "w": _normal(next(keys), (cin, cout, 5, 5)), "b": jnp.zeros((cout,), jnp.float32),
        "gamma": jnp.ones((cout,), jnp.float32), "beta": jnp.zeros((cout,), jnp.float32),
        "mean": jnp.zeros((cout,), jnp.float32), "var": jnp.ones((cout,), jnp.float32),
    }
    p["final_conv_w"] = _normal(next(keys), (NUM_CLASSES, cout, 3, 3))
    p["final_conv_b"] = jnp.zeros((NUM_CLASSES,), jnp.float32)
    return p


# =============================== model =======================================
def forward(params, x):
    B = x.shape[0]
    original_size = x.shape[-2:]
    # 1. bilinear resize to the ViT input size (analogue of 224x224)
    xr = bilinear_resize_nchw(x, VIT_INPUT, VIT_INPUT)
    # 2. patchify (tiny XLA glue)
    patches = xr.reshape(B, 3, GRID_HW, PATCH, GRID_HW, PATCH).transpose(0, 2, 4, 1, 3, 5)
    patches = patches.reshape(B, NUM_PATCHES, PATCH_DIM)          # (c, py, px) flatten order
    # 3-4. fused ViT backbone + final LN + segmentation head (one pallas_call)
    feat = vit_backbone_and_head(params, patches)                 # [B, NP, HEAD_H2] bf16
    # rearrange to the decoder's [C*H, W] activation layout (tiny bf16 XLA shuffle)
    a0 = feat.transpose(0, 2, 1).reshape(B, HEAD_H2 * GRID_HW, GRID_HW)
    # 5-7. fully fused decoder: 4x (ConvTranspose2d+BN+ReLU), final ConvTranspose2d+BN+ReLU,
    #      final Conv2d, final bilinear resize back to the original resolution (one pallas_call)
    return decoder_forward(params, a0, original_size[0], original_size[1])


if __name__ == "__main__":
    key = jax.random.PRNGKey(0)
    pkey, xkey = jax.random.split(key)
    params = init_params(pkey)
    x = jax.random.normal(xkey, (2, 3, IMG_SIZE, IMG_SIZE), dtype=jnp.float32)
    fwd = jax.jit(forward)
    out = jax.block_until_ready(fwd(params, x))
    assert out.shape == (2, NUM_CLASSES, IMG_SIZE, IMG_SIZE), out.shape
    assert bool(jnp.all(jnp.isfinite(out)))
    print("KERNEL_OK")
</pallas_src>

<mosaic_0001>
module attributes {stable_mosaic.version = 11 : i64} {
  func.func @_resize_kernel(%arg0: i32, %arg1: memref<16x32xf32, #tpu.memory_space<vmem>>, %arg2: memref<32x16xf32, #tpu.memory_space<vmem>>, %arg3: memref<1x3x32x32xf32, #tpu.memory_space<vmem>>, %arg4: memref<1x3x16x16xf32, #tpu.memory_space<vmem>>) attributes {dimension_semantics = [#tpu.dimension_semantics<parallel>], iteration_bounds = array<i64: 2>, scalar_prefetch = 0 : i64, scratch_operands = 0 : i64, tpu.core_type = #tpu.core_type<tc>, window_params = [{pipeline_mode = #tpu.pipeline_mode<synchronous>, transform_indices = @transform_0, window_bounds = array<i64: 16, 32>}, {pipeline_mode = #tpu.pipeline_mode<synchronous>, transform_indices = @transform_1, window_bounds = array<i64: 32, 16>}, {transform_indices = @transform_2, window_bounds = array<i64: 1, 3, 32, 32>}, {transform_indices = @transform_3, window_bounds = array<i64: 1, 3, 16, 16>}]} {
    %c0 = arith.constant 0 : index
    %c0_0 = arith.constant 0 : index
    %0 = vector.load %arg1[%c0, %c0_0] : memref<16x32xf32, #tpu.memory_space<vmem>>, vector<16x32xf32>
    %c0_1 = arith.constant 0 : index
    %c0_2 = arith.constant 0 : index
    %c0_3 = arith.constant 0 : index
    %c0_4 = arith.constant 0 : index
    %1 = vector.load %arg3[%c0_1, %c0_2, %c0_3, %c0_4] : memref<1x3x32x32xf32, #tpu.memory_space<vmem>>, vector<1x1x32x32xf32>
    %2 = vector.shape_cast %1 : vector<1x1x32x32xf32> to vector<32x32xf32>
    %cst = arith.constant dense<0.000000e+00> : vector<16x32xf32>
    %3 = tpu.matmul %0, %2, %cst {dimension_numbers = #tpu.dot_dimension_numbers<[1], [0], [0], [1], [0, 0, 1, 1], [], []>} : vector<16x32xf32>, vector<32x32xf32>, vector<16x32xf32> -> vector<16x32xf32>
    %c0_5 = arith.constant 0 : index
    %c0_6 = arith.constant 0 : index
    %4 = vector.load %arg2[%c0_5, %c0_6] : memref<32x16xf32, #tpu.memory_space<vmem>>, vector<32x16xf32>
    %cst_7 = arith.constant dense<0.000000e+00> : vector<16x16xf32>
    %5 = tpu.matmul %3, %4, %cst_7 {dimension_numbers = #tpu.dot_dimension_numbers<[1], [0], [0], [1], [0, 0, 1, 1], [], []>} : vector<16x32xf32>, vector<32x16xf32>, vector<16x16xf32> -> vector<16x16xf32>
    %c0_8 = arith.constant 0 : index
    %c0_9 = arith.constant 0 : index
    %c0_10 = arith.constant 0 : index
    %c0_11 = arith.constant 0 : index
    %6 = vector.load %arg4[%c0_8, %c0_9, %c0_10, %c0_11] : memref<1x3x16x16xf32, #tpu.memory_space<vmem>>, vector<1x1x16x16xf32>
    %7 = vector.shape_cast %6 : vector<1x1x16x16xf32> to vector<16x16xf32>
    %8 = vector.shape_cast %5 : vector<16x16xf32> to vector<1x1x16x16xf32>
    tpu.vector_store %arg4[%c0_8, %c0_9, %c0_10, %c0_11], %8 {strides = array<i32>} : memref<1x3x16x16xf32, #tpu.memory_space<vmem>>, vector<1x1x16x16xf32>,
    %c0_12 = arith.constant 0 : index
    %c0_13 = arith.constant 0 : index
    %9 = vector.load %arg1[%c0_12, %c0_13] : memref<16x32xf32, #tpu.memory_space<vmem>>, vector<16x32xf32>
    %c0_14 = arith.constant 0 : index
    %c1 = arith.constant 1 : index
    %c0_15 = arith.constant 0 : index
    %c0_16 = arith.constant 0 : index
    %10 = vector.load %arg3[%c0_14, %c1, %c0_15, %c0_16] : memref<1x3x32x32xf32, #tpu.memory_space<vmem>>, vector<1x1x32x32xf32>
    %11 = vector.shape_cast %10 : vector<1x1x32x32xf32> to vector<32x32xf32>
    %cst_17 = arith.constant dense<0.000000e+00> : vector<16x32xf32>
    %12 = tpu.matmul %9, %11, %cst_17 {dimension_numbers = #tpu.dot_dimension_numbers<[1], [0], [0], [1], [0, 0, 1, 1], [], []>} : vector<16x32xf32>, vector<32x32xf32>, vector<16x32xf32> -> vector<16x32xf32>
    %c0_18 = arith.constant 0 : index
    %c0_19 = arith.constant 0 : index
    %13 = vector.load %arg2[%c0_18, %c0_19] : memref<32x16xf32, #tpu.memory_space<vmem>>, vector<32x16xf32>
    %cst_20 = arith.constant dense<0.000000e+00> : vector<16x16xf32>
    %14 = tpu.matmul %12, %13, %cst_20 {dimension_numbers = #tpu.dot_dimension_numbers<[1], [0], [0], [1], [0, 0, 1, 1], [], []>} : vector<16x32xf32>, vector<32x16xf32>, vector<16x16xf32> -> vector<16x16xf32>
    %c0_21 = arith.constant 0 : index
    %c1_22 = arith.constant 1 : index
    %c0_23 = arith.constant 0 : index
    %c0_24 = arith.constant 0 : index
    %15 = vector.load %arg4[%c0_21, %c1_22, %c0_23, %c0_24] : memref<1x3x16x16xf32, #tpu.memory_space<vmem>>, vector<1x1x16x16xf32>
    %16 = vector.shape_cast %15 : vector<1x1x16x16xf32> to vector<16x16xf32>
    %17 = vector.shape_cast %14 : vector<16x16xf32> to vector<1x1x16x16xf32>
    tpu.vector_store %arg4[%c0_21, %c1_22, %c0_23, %c0_24], %17 {strides = array<i32>} : memref<1x3x16x16xf32, #tpu.memory_space<vmem>>, vector<1x1x16x16xf32>,
    %c0_25 = arith.constant 0 : index
    %c0_26 = arith.constant 0 : index
    %18 = vector.load %arg1[%c0_25, %c0_26] : memref<16x32xf32, #tpu.memory_space<vmem>>, vector<16x32xf32>
    %c0_27 = arith.constant 0 : index
    %c2 = arith.constant 2 : index
    %c0_28 = arith.constant 0 : index
    %c0_29 = arith.constant 0 : index
    %19 = vector.load %arg3[%c0_27, %c2, %c0_28, %c0_29] : memref<1x3x32x32xf32, #tpu.memory_space<vmem>>, vector<1x1x32x32xf32>
    %20 = vector.shape_cast %19 : vector<1x1x32x32xf32> to vector<32x32xf32>
    %cst_30 = arith.constant dense<0.000000e+00> : vector<16x32xf32>
    %21 = tpu.matmul %18, %20, %cst_30 {dimension_numbers = #tpu.dot_dimension_numbers<[1], [0], [0], [1], [0, 0, 1, 1], [], []>} : vector<16x32xf32>, vector<32x32xf32>, vector<16x32xf32> -> vector<16x32xf32>
    %c0_31 = arith.constant 0 : index
    %c0_32 = arith.constant 0 : index
    %22 = vector.load %arg2[%c0_31, %c0_32] : memref<32x16xf32, #tpu.memory_space<vmem>>, vector<32x16xf32>
    %cst_33 = arith.constant dense<0.000000e+00> : vector<16x16xf32>
    %23 = tpu.matmul %21, %22, %cst_33 {dimension_numbers = #tpu.dot_dimension_numbers<[1], [0], [0], [1], [0, 0, 1, 1], [], []>} : vector<16x32xf32>, vector<32x16xf32>, vector<16x16xf32> -> vector<16x16xf32>
    %c0_34 = arith.constant 0 : index
    %c2_35 = arith.constant 2 : index
    %c0_36 = arith.constant 0 : index
    %c0_37 = arith.constant 0 : index
    %24 = vector.load %arg4[%c0_34, %c2_35, %c0_36, %c0_37] : memref<1x3x16x16xf32, #tpu.memory_space<vmem>>, vector<1x1x16x16xf32>
    %25 = vector.shape_cast %24 : vector<1x1x16x16xf32> to vector<16x16xf32>
    %26 = vector.shape_cast %23 : vector<16x16xf32> to vector<1x1x16x16xf32>
    tpu.vector_store %arg4[%c0_34, %c2_35, %c0_36, %c0_37], %26 {strides = array<i32>} : memref<1x3x16x16xf32, #tpu.memory_space<vmem>>, vector<1x1x16x16xf32>,
    return
  }
  func.func @transform_0(%arg0: i32) -> (i32, i32) {
    %c0_i32 = arith.constant 0 : i32
    %c0_i32_0 = arith.constant 0 : i32
    %c0_i32_1 = arith.constant 0 : i32
    return %c0_i32, %c0_i32_0 : i32, i32
  }
  func.func @transform_1(%arg0: i32) -> (i32, i32) {
    %c0_i32 = arith.constant 0 : i32
    %c0_i32_0 = arith.constant 0 : i32
    %c0_i32_1 = arith.constant 0 : i32
    return %c0_i32, %c0_i32_0 : i32, i32
  }
  func.func @transform_2(%arg0: i32) -> (i32, i32, i32, i32) {
    %c0_i32 = arith.constant 0 : i32
    %c0_i32_0 = arith.constant 0 : i32
    %c0_i32_1 = arith.constant 0 : i32
    %c0_i32_2 = arith.constant 0 : i32
    return %arg0, %c0_i32, %c0_i32_0, %c0_i32_1 : i32, i32, i32, i32
  }
  func.func @transform_3(%arg0: i32) -> (i32, i32, i32, i32) {
    %c0_i32 = arith.constant 0 : i32
    %c0_i32_0 = arith.constant 0 : i32
    %c0_i32_1 = arith.constant 0 : i32
    %c0_i32_2 = arith.constant 0 : i32
    return %arg0, %c0_i32, %c0_i32_0, %c0_i32_1 : i32, i32, i32, i32
  }
}

module attributes {stable_mosaic.version = 11 : i64} {
  func.func @_vit_backbone_kernel(%arg0: i32, %arg1: memref<1x17x48xf32, #tpu.memory_space<vmem>>, %arg2: memref<17x64xf32, #tpu.memory_space<vmem>>, %arg3: memref<48x64xbf16, #tpu.memory_space<vmem>>, %arg4: memref<2x64x192xbf16, #tpu.memory_space<vmem>>, %arg5: memref<2x1x192xf32, #tpu.memory_space<vmem>>, %arg6: memref<2x64x64xbf16, #tpu.memory_space<vmem>>, %arg7: memref<2x1x64xf32, #tpu.memory_space<vmem>>, %arg8: memref<2x1x64xf32, #tpu.memory_space<vmem>>, %arg9: memref<2x1x64xf32, #tpu.memory_space<vmem>>, %arg10: memref<2x1x64xf32, #tpu.memory_space<vmem>>, %arg11: memref<2x1x64xf32, #tpu.memory_space<vmem>>, %arg12: memref<2x64x256xbf16, #tpu.memory_space<vmem>>, %arg13: memref<2x1x256xf32, #tpu.memory_space<vmem>>, %arg14: memref<2x256x64xbf16, #tpu.memory_space<vmem>>, %arg15: memref<2x1x64xf32, #tpu.memory_space<vmem>>, %arg16: memref<1x64xf32, #tpu.memory_space<vmem>>, %arg17: memref<1x64xf32, #tpu.memory_space<vmem>>, %arg18: memref<64x48xbf16, #tpu.memory_space<vmem>>, %arg19: memref<1x48xf32, #tpu.memory_space<vmem>>, %arg20: memref<48x32xbf16, #tpu.memory_space<vmem>>, %arg21: memref<1x32xf32, #tpu.memory_space<vmem>>, %arg22: memref<1x16x32xbf16, #tpu.memory_space<vmem>>) attributes {dimension_semantics = [#tpu.dimension_semantics<parallel>], iteration_bounds = array<i64: 2>, scalar_prefetch = 0 : i64, scratch_operands = 0 : i64, tpu.core_type = #tpu.core_type<tc>, window_params = [{transform_indices = @transform_0, window_bounds = array<i64: 1, 17, 48>}, {pipeline_mode = #tpu.pipeline_mode<synchronous>, transform_indices = @transform_1, window_bounds = array<i64: 17, 64>}, {pipeline_mode = #tpu.pipeline_mode<synchronous>, transform_indices = @transform_2, window_bounds = array<i64: 48, 64>}, {pipeline_mode = #tpu.pipeline_mode<synchronous>, transform_indices = @transform_3, window_bounds = array<i64: 2, 64, 192>}, {pipeline_mode = #tpu.pipeline_mode<synchronous>, transform_indices = @transform_4, window_bounds = array<i64: 2, 1, 192>}, {pipeline_mode = #tpu.pipeline_mode<synchronous>, transform_indices = @transform_5, window_bounds = array<i64: 2, 64, 64>}, {pipeline_mode = #tpu.pipeline_mode<synchronous>, transform_indices = @transform_6, window_bounds = array<i64: 2, 1, 64>}, {pipeline_mode = #tpu.pipeline_mode<synchronous>, transform_indices = @transform_7, window_bounds = array<i64: 2, 1, 64>}, {pipeline_mode = #tpu.pipeline_mode<synchronous>, transform_indices = @transform_8, window_bounds = array<i64: 2, 1, 64>}, {pipeline_mode = #tpu.pipeline_mode<synchronous>, transform_indices = @transform_9, window_bounds = array<i64: 2, 1, 64>}, {pipeline_mode = #tpu.pipeline_mode<synchronous>, transform_indices = @transform_10, window_bounds = array<i64: 2, 1, 64>}, {pipeline_mode = #tpu.pipeline_mode<synchronous>, transform_indices = @transform_11, window_bounds = array<i64: 2, 64, 256>}, {pipeline_mode = #tpu.pipeline_mode<synchronous>, transform_indices = @transform_12, window_bounds = array<i64: 2, 1, 256>}, {pipeline_mode = #tpu.pipeline_mode<synchronous>, transform_indices = @transform_13, window_bounds = array<i64: 2, 256, 64>}, {pipeline_mode = #tpu.pipeline_mode<synchronous>, transform_indices = @transform_14, window_bounds = array<i64: 2, 1, 64>}, {pipeline_mode = #tpu.pipeline_mode<synchronous>, transform_indices = @transform_15, window_bounds = array<i64: 1, 64>}, {pipeline_mode = #tpu.pipeline_mode<synchronous>, transform_indices = @transform_16, window_bounds = array<i64: 1, 64>}, {pipeline_mode = #tpu.pipeline_mode<synchronous>, transform_indices = @transform_17, window_bounds = array<i64: 64, 48>}, {pipeline_mode = #tpu.pipeline_mode<synchronous>, transform_indices = @transform_18, window_bounds = array<i64: 1, 48>}, {pipeline_mode = #tpu.pipeline_mode<synchronous>, transform_indices = @transform_19, window_bounds = array<i64: 48, 32>}, {pipeline_mode = #tpu.pipeline_mode<synchronous>, transform_indices = @transform_20, window_bounds = array<i64: 1, 32>}, {transform_indices = @transform_21, window_bounds = array<i64: 1, 16, 32>}]} {
    %c0 = arith.constant 0 : index
    %c0_0 = arith.constant 0 : index
    %c0_1 = arith.constant 0 : index
    %0 = vector.load %arg1[%c0, %c0_0, %c0_1] : memref<1x17x48xf32, #tpu.memory_space<vmem>>, vector<1x17x48xf32>
    %1 = vector.shape_cast %0 : vector<1x17x48xf32> to vector<17x48xf32>
    %c0_2 = arith.constant 0 : index
    %c0_3 = arith.constant 0 : index
    %2 = vector.load %arg3[%c0_2, %c0_3] : memref<48x64xbf16, #tpu.memory_space<vmem>>, vector<48x64xbf16>
    %3 = arith.truncf %1 : vector<17x48xf32> to vector<17x48xbf16>
    %cst = arith.constant dense<0.000000e+00> : vector<17x64xf32>
    %4 = tpu.matmul %3, %2, %cst {dimension_numbers = #tpu.dot_dimension_numbers<[1], [0], [0], [1], [0, 0, 1, 1], [], []>} : vector<17x48xbf16>, vector<48x64xbf16>, vector<17x64xf32> -> vector<17x64xf32>
    %c0_4 = arith.constant 0 : index
    %c0_5 = arith.constant 0 : index
    %5 = vector.load %arg2[%c0_4, %c0_5] : memref<17x64xf32, #tpu.memory_space<vmem>>, vector<17x64xf32>
    %6 = arith.addf %4, %5 : vector<17x64xf32>
    %c0_6 = arith.constant 0 : index
    %c0_7 = arith.constant 0 : index
    %c0_8 = arith.constant 0 : index
    %7 = vector.load %arg8[%c0_6, %c0_7, %c0_8] : memref<2x1x64xf32, #tpu.memory_space<vmem>>, vector<1x1x64xf32>
    %8 = vector.shape_cast %7 : vector<1x1x64xf32> to vector<1x64xf32>
    %c0_9 = arith.constant 0 : index
    %c0_10 = arith.constant 0 : index
    %c0_11 = arith.constant 0 : index
    %9 = vector.load %arg9[%c0_9, %c0_10, %c0_11] : memref<2x1x64xf32, #tpu.memory_space<vmem>>, vector<1x1x64xf32>
    %10 = vector.shape_cast %9 : vector<1x1x64xf32> to vector<1x64xf32>
    %cst_12 = arith.constant dense<0.000000e+00> : vector<17xf32>
    %11 = vector.multi_reduction <add>, %6, %cst_12 [1] : vector<17x64xf32> to vector<17xf32>
    %12 = vector.shape_cast %11 : vector<17xf32> to vector<17x1xf32>
    %cst_13 = arith.constant 6.400000e+01 : f32
    %13 = vector.broadcast %cst_13 : f32 to vector<17x1xf32>
    %14 = arith.divf %12, %13 : vector<17x1xf32>
    %15 = vector.broadcast %14 : vector<17x1xf32> to vector<17x64xf32>
    %16 = arith.subf %6, %15 : vector<17x64xf32>
    %17 = arith.mulf %16, %16 : vector<17x64xf32>
    %cst_14 = arith.constant dense<0.000000e+00> : vector<17xf32>
    %18 = vector.multi_reduction <add>, %17, %cst_14 [1] : vector<17x64xf32> to vector<17xf32>
    %19 = vector.shape_cast %18 : vector<17xf32> to vector<17x1xf32>
    %cst_15 = arith.constant 6.400000e+01 : f32
    %20 = vector.broadcast %cst_15 : f32 to vector<17x1xf32>
    %21 = arith.divf %19, %20 : vector<17x1xf32>
    %cst_16 = arith.constant 9.99999997E-7 : f32
    %22 = vector.broadcast %cst_16 : f32 to vector<17x1xf32>
    %23 = arith.addf %21, %22 : vector<17x1xf32>
    %24 = math.rsqrt %23 : vector<17x1xf32>
    %25 = vector.broadcast %24 : vector<17x1xf32> to vector<17x64xf32>
    %26 = arith.mulf %16, %25 : vector<17x64xf32>
    %27 = vector.broadcast %8 : vector<1x64xf32> to vector<17x64xf32>
    %28 = arith.mulf %26, %27 : vector<17x64xf32>
    %29 = vector.broadcast %10 : vector<1x64xf32> to vector<17x64xf32>
    %30 = arith.addf %28, %29 : vector<17x64xf32>
    %c0_17 = arith.constant 0 : index
    %c0_18 = arith.constant 0 : index
    %c0_19 = arith.constant 0 : index
    %31 = vector.load %arg4[%c0_17, %c0_18, %c0_19] : memref<2x64x192xbf16, #tpu.memory_space<vmem>>, vector<1x64x192xbf16>
    %32 = vector.shape_cast %31 : vector<1x64x192xbf16> to vector<64x192xbf16>
    %33 = arith.truncf %30 : vector<17x64xf32> to vector<17x64xbf16>
    %cst_20 = arith.constant dense<0.000000e+00> : vector<17x192xf32>
    %34 = tpu.matmul %33, %32, %cst_20 {dimension_numbers = #tpu.dot_dimension_numbers<[1], [0], [0], [1], [0, 0, 1, 1], [], []>} : vector<17x64xbf16>, vector<64x192xbf16>, vector<17x192xf32> -> vector<17x192xf32>
    %c0_21 = arith.constant 0 : index
    %c0_22 = arith.constant 0 : index
    %c0_23 = arith.constant 0 : index
    %35 = vector.load %arg5[%c0_21, %c0_22, %c0_23] : memref<2x1x192xf32, #tpu.memory_space<vmem>>, vector<1x1x192xf32>
    %36 = vector.shape_cast %35 : vector<1x1x192xf32> to vector<1x192xf32>
    %37 = vector.broadcast %36 : vector<1x192xf32> to vector<17x192xf32>
    %38 = arith.addf %34, %37 : vector<17x192xf32>
    %39 = vector.extract_strided_slice %38 {offsets = [0, 0], sizes = [17, 16], strides = [1, 1]} : vector<17x192xf32> to vector<17x16xf32>
    %40 = vector.extract_strided_slice %38 {offsets = [0, 64], sizes = [17, 16], strides = [1, 1]} : vector<17x192xf32> to vector<17x16xf32>
    %41 = vector.extract_strided_slice %38 {offsets = [0, 128], sizes = [17, 16], strides = [1, 1]} : vector<17x192xf32> to vector<17x16xf32>
    %42 = arith.truncf %39 : vector<17x16xf32> to vector<17x16xbf16>
    %43 = arith.truncf %40 : vector<17x16xf32> to vector<17x16xbf16>
    %cst_24 = arith.constant dense<0.000000e+00> : vector<17x17xf32>
    %44 = tpu.matmul %42, %43, %cst_24 {dimension_numbers = #tpu.dot_dimension_numbers<[1], [1], [0], [0], [0, 0, 1, 0], [], []>} : vector<17x16xbf16>, vector<17x16xbf16>, vector<17x17xf32> -> vector<17x17xf32>
    %cst_25 = arith.constant dense<0xFF800000> : vector<17xf32>
    %45 = vector.multi_reduction <maximumf>, %44, %cst_25 [1] : vector<17x17xf32> to vector<17xf32>
    %46 = vector.shape_cast %45 : vector<17xf32> to vector<17x1xf32>
    %47 = vector.broadcast %46 : vector<17x1xf32> to vector<17x17xf32>
    %48 = arith.subf %44, %47 : vector<17x17xf32>
    %49 = math.exp %48 : vector<17x17xf32>
    %cst_26 = arith.constant dense<0.000000e+00> : vector<17xf32>
    %50 = vector.multi_reduction <add>, %49, %cst_26 [1] : vector<17x17xf32> to vector<17xf32>
    %51 = vector.shape_cast %50 : vector<17xf32> to vector<17x1xf32>
    %52 = tpu.reciprocal %51 {approx = true} : vector<17x1xf32> -> vector<17x1xf32>
    %53 = vector.broadcast %52 : vector<17x1xf32> to vector<17x17xf32>
    %54 = arith.mulf %49, %53 : vector<17x17xf32>
    %55 = arith.truncf %54 : vector<17x17xf32> to vector<17x17xbf16>
    %56 = arith.truncf %41 : vector<17x16xf32> to vector<17x16xbf16>
    %cst_27 = arith.constant dense<0.000000e+00> : vector<17x16xf32>
    %57 = tpu.matmul %55, %56, %cst_27 {dimension_numbers = #tpu.dot_dimension_numbers<[1], [0], [0], [1], [0, 0, 1, 1], [], []>} : vector<17x17xbf16>, vector<17x16xbf16>, vector<17x16xf32> -> vector<17x16xf32>
    %58 = vector.extract_strided_slice %38 {offsets = [0, 16], sizes = [17, 16], strides = [1, 1]} : vector<17x192xf32> to vector<17x16xf32>
    %59 = vector.extract_strided_slice %38 {offsets = [0, 80], sizes = [17, 16], strides = [1, 1]} : vector<17x192xf32> to vector<17x16xf32>
    %60 = vector.extract_strided_slice %38 {offsets = [0, 144], sizes = [17, 16], strides = [1, 1]} : vector<17x192xf32> to vector<17x16xf32>
    %61 = arith.truncf %58 : vector<17x16xf32> to vector<17x16xbf16>
    %62 = arith.truncf %59 : vector<17x16xf32> to vector<17x16xbf16>
    %cst_28 = arith.constant dense<0.000000e+00> : vector<17x17xf32>
    %63 = tpu.matmul %61, %62, %cst_28 {dimension_numbers = #tpu.dot_dimension_numbers<[1], [1], [0], [0], [0, 0, 1, 0], [], []>} : vector<17x16xbf16>, vector<17x16xbf16>, vector<17x17xf32> -> vector<17x17xf32>
    %cst_29 = arith.constant dense<0xFF800000> : vector<17xf32>
    %64 = vector.multi_reduction <maximumf>, %63, %cst_29 [1] : vector<17x17xf32> to vector<17xf32>
    %65 = vector.shape_cast %64 : vector<17xf32> to vector<17x1xf32>
    %66 = vector.broadcast %65 : vector<17x1xf32> to vector<17x17xf32>
    %67 = arith.subf %63, %66 : vector<17x17xf32>
    %68 = math.exp %67 : vector<17x17xf32>
    %cst_30 = arith.constant dense<0.000000e+00> : vector<17xf32>
    %69 = vector.multi_reduction <add>, %68, %cst_30 [1] : vector<17x17xf32> to vector<17xf32>
    %70 = vector.shape_cast %69 : vector<17xf32> to vector<17x1xf32>
    %71 = tpu.reciprocal %70 {approx = true} : vector<17x1xf32> -> vector<17x1xf32>
    %72 = vector.broadcast %71 : vector<17x1xf32> to vector<17x17xf32>
    %73 = arith.mulf %68, %72 : vector<17x17xf32>
    %74 = arith.truncf %73 : vector<17x17xf32> to vector<17x17xbf16>
    %75 = arith.truncf %60 : vector<17x16xf32> to vector<17x16xbf16>
    %cst_31 = arith.constant dense<0.000000e+00> : vector<17x16xf32>
    %76 = tpu.matmul %74, %75, %cst_31 {dimension_numbers = #tpu.dot_dimension_numbers<[1], [0], [0], [1], [0, 0, 1, 1], [], []>} : vector<17x17xbf16>, vector<17x16xbf16>, vector<17x16xf32> -> vector<17x16xf32>
    %77 = vector.extract_strided_slice %38 {offsets = [0, 32], sizes = [17, 16], strides = [1, 1]} : vector<17x192xf32> to vector<17x16xf32>
    %78 = vector.extract_strided_slice %38 {offsets = [0, 96], sizes = [17, 16], strides = [1, 1]} : vector<17x192xf32> to vector<17x16xf32>
    %79 = vector.extract_strided_slice %38 {offsets = [0, 160], sizes = [17, 16], strides = [1, 1]} : vector<17x192xf32> to vector<17x16xf32>
    %80 = arith.truncf %77 : vector<17x16xf32> to vector<17x16xbf16>
    %81 = arith.truncf %78 : vector<17x16xf32> to vector<17x16xbf16>
    %cst_32 = arith.constant dense<0.000000e+00> : vector<17x17xf32>
    %82 = tpu.matmul %80, %81, %cst_32 {dimension_numbers = #tpu.dot_dimension_numbers<[1], [1], [0], [0], [0, 0, 1, 0], [], []>} : vector<17x16xbf16>, vector<17x16xbf16>, vector<17x17xf32> -> vector<17x17xf32>
    %cst_33 = arith.constant dense<0xFF800000> : vector<17xf32>
    %83 = vector.multi_reduction <maximumf>, %82, %cst_33 [1] : vector<17x17xf32> to vector<17xf32>
    %84 = vector.shape_cast %83 : vector<17xf32> to vector<17x1xf32>
    %85 = vector.broadcast %84 : vector<17x1xf32> to vector<17x17xf32>
    %86 = arith.subf %82, %85 : vector<17x17xf32>
    %87 = math.exp %86 : vector<17x17xf32>
    %cst_34 = arith.constant dense<0.000000e+00> : vector<17xf32>
    %88 = vector.multi_reduction <add>, %87, %cst_34 [1] : vector<17x17xf32> to vector<17xf32>
    %89 = vector.shape_cast %88 : vector<17xf32> to vector<17x1xf32>
    %90 = tpu.reciprocal %89 {approx = true} : vector<17x1xf32> -> vector<17x1xf32>
    %91 = vector.broadcast %90 : vector<17x1xf32> to vector<17x17xf32>
    %92 = arith.mulf %87, %91 : vector<17x17xf32>
    %93 = arith.truncf %92 : vector<17x17xf32> to vector<17x17xbf16>
    %94 = arith.truncf %79 : vector<17x16xf32> to vector<17x16xbf16>
    %cst_35 = arith.constant dense<0.000000e+00> : vector<17x16xf32>
    %95 = tpu.matmul %93, %94, %cst_35 {dimension_numbers = #tpu.dot_dimension_numbers<[1], [0], [0], [1], [0, 0, 1, 1], [], []>} : vector<17x17xbf16>, vector<17x16xbf16>, vector<17x16xf32> -> vector<17x16xf32>
    %96 = vector.extract_strided_slice %38 {offsets = [0, 48], sizes = [17, 16], strides = [1, 1]} : vector<17x192xf32> to vector<17x16xf32>
    %97 = vector.extract_strided_slice %38 {offsets = [0, 112], sizes = [17, 16], strides = [1, 1]} : vector<17x192xf32> to vector<17x16xf32>
    %98 = vector.extract_strided_slice %38 {offsets = [0, 176], sizes = [17, 16], strides = [1, 1]} : vector<17x192xf32> to vector<17x16xf32>
    %99 = arith.truncf %96 : vector<17x16xf32> to vector<17x16xbf16>
    %100 = arith.truncf %97 : vector<17x16xf32> to vector<17x16xbf16>
    %cst_36 = arith.constant dense<0.000000e+00> : vector<17x17xf32>
    %101 = tpu.matmul %99, %100, %cst_36 {dimension_numbers = #tpu.dot_dimension_numbers<[1], [1], [0], [0], [0, 0, 1, 0], [], []>} : vector<17x16xbf16>, vector<17x16xbf16>, vector<17x17xf32> -> vector<17x17xf32>
    %cst_37 = arith.constant dense<0xFF800000> : vector<17xf32>
    %102 = vector.multi_reduction <maximumf>, %101, %cst_37 [1] : vector<17x17xf32> to vector<17xf32>
    %103 = vector.shape_cast %102 : vector<17xf32> to vector<17x1xf32>
    %104 = vector.broadcast %103 : vector<17x1xf32> to vector<17x17xf32>
    %105 = arith.subf %101, %104 : vector<17x17xf32>
    %106 = math.exp %105 : vector<17x17xf32>
    %cst_38 = arith.constant dense<0.000000e+00> : vector<17xf32>
    %107 = vector.multi_reduction <add>, %106, %cst_38 [1] : vector<17x17xf32> to vector<17xf32>
    %108 = vector.shape_cast %107 : vector<17xf32> to vector<17x1xf32>
    %109 = tpu.reciprocal %108 {approx = true} : vector<17x1xf32> -> vector<17x1xf32>
    %110 = vector.broadcast %109 : vector<17x1xf32> to vector<17x17xf32>
    %111 = arith.mulf %106, %110 : vector<17x17xf32>
    %112 = arith.truncf %111 : vector<17x17xf32> to vector<17x17xbf16>
    %113 = arith.truncf %98 : vector<17x16xf32> to vector<17x16xbf16>
    %cst_39 = arith.constant dense<0.000000e+00> : vector<17x16xf32>
    %114 = tpu.matmul %112, %113, %cst_39 {dimension_numbers = #tpu.dot_dimension_numbers<[1], [0], [0], [1], [0, 0, 1, 1], [], []>} : vector<17x17xbf16>, vector<17x16xbf16>, vector<17x16xf32> -> vector<17x16xf32>
    %115 = tpu.concatenate %57, %76, %95, %114 in 1 : vector<17x16xf32>, vector<17x16xf32>, vector<17x16xf32>, vector<17x16xf32> -> vector<17x64xf32>
    %c0_40 = arith.constant 0 : index
    %c0_41 = arith.constant 0 : index
    %c0_42 = arith.constant 0 : index
    %116 = vector.load %arg6[%c0_40, %c0_41, %c0_42] : memref<2x64x64xbf16, #tpu.memory_space<vmem>>, vector<1x64x64xbf16>
    %117 = vector.shape_cast %116 : vector<1x64x64xbf16> to vector<64x64xbf16>
    %118 = arith.truncf %115 : vector<17x64xf32> to vector<17x64xbf16>
    %cst_43 = arith.constant dense<0.000000e+00> : vector<17x64xf32>
    %119 = tpu.matmul %118, %117, %cst_43 {dimension_numbers = #tpu.dot_dimension_numbers<[1], [0], [0], [1], [0, 0, 1, 1], [], []>} : vector<17x64xbf16>, vector<64x64xbf16>, vector<17x64xf32> -> vector<17x64xf32>
    %120 = arith.addf %6, %119 : vector<17x64xf32>
    %c0_44 = arith.constant 0 : index
    %c0_45 = arith.constant 0 : index
    %c0_46 = arith.constant 0 : index
    %121 = vector.load %arg7[%c0_44, %c0_45, %c0_46] : memref<2x1x64xf32, #tpu.memory_space<vmem>>, vector<1x1x64xf32>
    %122 = vector.shape_cast %121 : vector<1x1x64xf32> to vector<1x64xf32>
    %123 = vector.broadcast %122 : vector<1x64xf32> to vector<17x64xf32>
    %124 = arith.addf %120, %123 : vector<17x64xf32>
    %c0_47 = arith.constant 0 : index
    %c0_48 = arith.constant 0 : index
    %c0_49 = arith.constant 0 : index
    %125 = vector.load %arg10[%c0_47, %c0_48, %c0_49] : memref<2x1x64xf32, #tpu.memory_space<vmem>>, vector<1x1x64xf32>
    %126 = vector.shape_cast %125 : vector<1x1x64xf32> to vector<1x64xf32>
    %c0_50 = arith.constant 0 : index
    %c0_51 = arith.constant 0 : index
    %c0_52 = arith.constant 0 : index
    %127 = vector.load %arg11[%c0_50, %c0_51, %c0_52] : memref<2x1x64xf32, #tpu.memory_space<vmem>>, vector<1x1x64xf32>
    %128 = vector.shape_cast %127 : vector<1x1x64xf32> to vector<1x64xf32>
    %cst_53 = arith.constant dense<0.000000e+00> : vector<17xf32>
    %129 = vector.multi_reduction <add>, %124, %cst_53 [1] : vector<17x64xf32> to vector<17xf32>
    %130 = vector.shape_cast %129 : vector<17xf32> to vector<17x1xf32>
    %cst_54 = arith.constant 6.400000e+01 : f32
    %131 = vector.broadcast %cst_54 : f32 to vector<17x1xf32>
    %132 = arith.divf %130, %131 : vector<17x1xf32>
    %133 = vector.broadcast %132 : vector<17x1xf32> to vector<17x64xf32>
    %134 = arith.subf %124, %133 : vector<17x64xf32>
    %135 = arith.mulf %134, %134 : vector<17x64xf32>
    %cst_55 = arith.constant dense<0.000000e+00> : vector<17xf32>
    %136 = vector.multi_reduction <add>, %135, %cst_55 [1] : vector<17x64xf32> to vector<17xf32>
    %137 = vector.shape_cast %136 : vector<17xf32> to vector<17x1xf32>
    %cst_56 = arith.constant 6.400000e+01 : f32
    %138 = vector.broadcast %cst_56 : f32 to vector<17x1xf32>
    %139 = arith.divf %137, %138 : vector<17x1xf32>
    %cst_57 = arith.constant 9.99999997E-7 : f32
    %140 = vector.broadcast %cst_57 : f32 to vector<17x1xf32>
    %141 = arith.addf %139, %140 : vector<17x1xf32>
    %142 = math.rsqrt %141 : vector<17x1xf32>
    %143 = vector.broadcast %142 : vector<17x1xf32> to vector<17x64xf32>
    %144 = arith.mulf %134, %143 : vector<17x64xf32>
    %145 = vector.broadcast %126 : vector<1x64xf32> to vector<17x64xf32>
    %146 = arith.mulf %144, %145 : vector<17x64xf32>
    %147 = vector.broadcast %128 : vector<1x64xf32> to vector<17x64xf32>
    %148 = arith.addf %146, %147 : vector<17x64xf32>
    %c0_58 = arith.constant 0 : index
    %c0_59 = arith.constant 0 : index
    %c0_60 = arith.constant 0 : index
    %149 = vector.load %arg12[%c0_58, %c0_59, %c0_60] : memref<2x64x256xbf16, #tpu.memory_space<vmem>>, vector<1x64x256xbf16>
    %150 = vector.shape_cast %149 : vector<1x64x256xbf16> to vector<64x256xbf16>
    %151 = arith.truncf %148 : vector<17x64xf32> to vector<17x64xbf16>
    %cst_61 = arith.constant dense<0.000000e+00> : vector<17x256xf32>
    %152 = tpu.matmul %151, %150, %cst_61 {dimension_numbers = #tpu.dot_dimension_numbers<[1], [0], [0], [1], [0, 0, 1, 1], [], []>} : vector<17x64xbf16>, vector<64x256xbf16>, vector<17x256xf32> -> vector<17x256xf32>
    %c0_62 = arith.constant 0 : index
    %c0_63 = arith.constant 0 : index
    %c0_64 = arith.constant 0 : index
    %153 = vector.load %arg13[%c0_62, %c0_63, %c0_64] : memref<2x1x256xf32, #tpu.memory_space<vmem>>, vector<1x1x256xf32>
    %154 = vector.shape_cast %153 : vector<1x1x256xf32> to vector<1x256xf32>
    %155 = vector.broadcast %154 : vector<1x256xf32> to vector<17x256xf32>
    %156 = arith.addf %152, %155 : vector<17x256xf32>
    %157 = arith.mulf %156, %156 : vector<17x256xf32>
    %158 = arith.mulf %156, %157 : vector<17x256xf32>
    %cst_65 = arith.constant 4.471500e-02 : f32
    %159 = vector.broadcast %cst_65 : f32 to vector<17x256xf32>
    %160 = arith.mulf %159, %158 : vector<17x256xf32>
    %161 = arith.addf %156, %160 : vector<17x256xf32>
    %cst_66 = arith.constant 0.797884583 : f32
    %162 = vector.broadcast %cst_66 : f32 to vector<17x256xf32>
    %163 = arith.mulf %162, %161 : vector<17x256xf32>
    %164 = math.tanh %163 : vector<17x256xf32>
    %cst_67 = arith.constant 1.000000e+00 : f32
    %165 = vector.broadcast %cst_67 : f32 to vector<17x256xf32>
    %166 = arith.addf %165, %164 : vector<17x256xf32>
    %cst_68 = arith.constant 5.000000e-01 : f32
    %167 = vector.broadcast %cst_68 : f32 to vector<17x256xf32>
    %168 = arith.mulf %167, %166 : vector<17x256xf32>
    %169 = arith.mulf %156, %168 : vector<17x256xf32>
    %c0_69 = arith.constant 0 : index
    %c0_70 = arith.constant 0 : index
    %c0_71 = arith.constant 0 : index
    %170 = vector.load %arg14[%c0_69, %c0_70, %c0_71] : memref<2x256x64xbf16, #tpu.memory_space<vmem>>, vector<1x256x64xbf16>
    %171 = vector.shape_cast %170 : vector<1x256x64xbf16> to vector<256x64xbf16>
    %172 = arith.truncf %169 : vector<17x256xf32> to vector<17x256xbf16>
    %cst_72 = arith.constant dense<0.000000e+00> : vector<17x64xf32>
    %173 = tpu.matmul %172, %171, %cst_72 {dimension_numbers = #tpu.dot_dimension_numbers<[1], [0], [0], [1], [0, 0, 1, 1], [], []>} : vector<17x256xbf16>, vector<256x64xbf16>, vector<17x64xf32> -> vector<17x64xf32>
    %174 = arith.addf %124, %173 : vector<17x64xf32>
    %c0_73 = arith.constant 0 : index
    %c0_74 = arith.constant 0 : index
    %c0_75 = arith.constant 0 : index
    %175 = vector.load %arg15[%c0_73, %c0_74, %c0_75] : memref<2x1x64xf32, #tpu.memory_space<vmem>>, vector<1x1x64xf32>
    %176 = vector.shape_cast %175 : vector<1x1x64xf32> to vector<1x64xf32>
    %177 = vector.broadcast %176 : vector<1x64xf32> to vector<17x64xf32>
    %178 = arith.addf %174, %177 : vector<17x64xf32>
    %c1 = arith.constant 1 : index
    %c0_76 = arith.constant 0 : index
    %c0_77 = arith.constant 0 : index
    %179 = vector.load %arg8[%c1, %c0_76, %c0_77] : memref<2x1x64xf32, #tpu.memory_space<vmem>>, vector<1x1x64xf32>
    %180 = vector.shape_cast %179 : vector<1x1x64xf32> to vector<1x64xf32>
    %c1_78 = arith.constant 1 : index
    %c0_79 = arith.constant 0 : index
    %c0_80 = arith.constant 0 : index
    %181 = vector.load %arg9[%c1_78, %c0_79, %c0_80] : memref<2x1x64xf32, #tpu.memory_space<vmem>>, vector<1x1x64xf32>
    %182 = vector.shape_cast %181 : vector<1x1x64xf32> to vector<1x64xf32>
    %cst_81 = arith.constant dense<0.000000e+00> : vector<17xf32>
    %183 = vector.multi_reduction <add>, %178, %cst_81 [1] : vector<17x64xf32> to vector<17xf32>
    %184 = vector.shape_cast %183 : vector<17xf32> to vector<17x1xf32>
    %cst_82 = arith.constant 6.400000e+01 : f32
    %185 = vector.broadcast %cst_82 : f32 to vector<17x1xf32>
    %186 = arith.divf %184, %185 : vector<17x1xf32>
    %187 = vector.broadcast %186 : vector<17x1xf32> to vector<17x64xf32>
    %188 = arith.subf %178, %187 : vector<17x64xf32>
    %189 = arith.mulf %188, %188 : vector<17x64xf32>
    %cst_83 = arith.constant dense<0.000000e+00> : vector<17xf32>
    %190 = vector.multi_reduction <add>, %189, %cst_83 [1] : vector<17x64xf32> to vector<17xf32>
    %191 = vector.shape_cast %190 : vector<17xf32> to vector<17x1xf32>
    %cst_84 = arith.constant 6.400000e+01 : f32
    %192 = vector.broadcast %cst_84 : f32 to vector<17x1xf32>
    %193 = arith.divf %191, %192 : vector<17x1xf32>
    %cst_85 = arith.constant 9.99999997E-7 : f32
    %194 = vector.broadcast %cst_85 : f32 to vector<17x1xf32>
    %195 = arith.addf %193, %194 : vector<17x1xf32>
    %196 = math.rsqrt %195 : vector<17x1xf32>
    %197 = vector.broadcast %196 : vector<17x1xf32> to vector<17x64xf32>
    %198 = arith.mulf %188, %197 : vector<17x64xf32>
    %199 = vector.broadcast %180 : vector<1x64xf32> to vector<17x64xf32>
    %200 = arith.mulf %198, %199 : vector<17x64xf32>
    %201 = vector.broadcast %182 : vector<1x64xf32> to vector<17x64xf32>
    %202 = arith.addf %200, %201 : vector<17x64xf32>
    %c1_86 = arith.constant 1 : index
    %c0_87 = arith.constant 0 : index
    %c0_88 = arith.constant 0 : index
    %203 = vector.load %arg4[%c1_86, %c0_87, %c0_88] : memref<2x64x192xbf16, #tpu.memory_space<vmem>>, vector<1x64x192xbf16>
    %204 = vector.shape_cast %203 : vector<1x64x192xbf16> to vector<64x192xbf16>
    %205 = arith.truncf %202 : vector<17x64xf32> to vector<17x64xbf16>
    %cst_89 = arith.constant dense<0.000000e+00> : vector<17x192xf32>
    %206 = tpu.matmul %205, %204, %cst_89 {dimension_numbers = #tpu.dot_dimension_numbers<[1], [0], [0], [1], [0, 0, 1, 1], [], []>} : vector<17x64xbf16>, vector<64x192xbf16>, vector<17x192xf32> -> vector<17x192xf32>
    %c1_90 = arith.constant 1 : index
    %c0_91 = arith.constant 0 : index
    %c0_92 = arith.constant 0 : index
    %207 = vector.load %arg5[%c1_90, %c0_91, %c0_92] : memref<2x1x192xf32, #tpu.memory_space<vmem>>, vector<1x1x192xf32>
    %208 = vector.shape_cast %207 : vector<1x1x192xf32> to vector<1x192xf32>
    %209 = vector.broadcast %208 : vector<1x192xf32> to vector<17x192xf32>
    %210 = arith.addf %206, %209 : vector<17x192xf32>
    %211 = vector.extract_strided_slice %210 {offsets = [0, 0], sizes = [17, 16], strides = [1, 1]} : vector<17x192xf32> to vector<17x16xf32>
    %212 = vector.extract_strided_slice %210 {offsets = [0, 64], sizes = [17, 16], strides = [1, 1]} : vector<17x192xf32> to vector<17x16xf32>
    %213 = vector.extract_strided_slice %210 {offsets = [0, 128], sizes = [17, 16], strides = [1, 1]} : vector<17x192xf32> to vector<17x16xf32>
    %214 = arith.truncf %211 : vector<17x16xf32> to vector<17x16xbf16>
    %215 = arith.truncf %212 : vector<17x16xf32> to vector<17x16xbf16>
    %cst_93 = arith.constant dense<0.000000e+00> : vector<17x17xf32>
    %216 = tpu.matmul %214, %215, %cst_93 {dimension_numbers = #tpu.dot_dimension_numbers<[1], [1], [0], [0], [0, 0, 1, 0], [], []>} : vector<17x16xbf16>, vector<17x16xbf16>, vector<17x17xf32> -> vector<17x17xf32>
    %cst_94 = arith.constant dense<0xFF800000> : vector<17xf32>
    %217 = vector.multi_reduction <maximumf>, %216, %cst_94 [1] : vector<17x17xf32> to vector<17xf32>
    %218 = vector.shape_cast %217 : vector<17xf32> to vector<17x1xf32>
    %219 = vector.broadcast %218 : vector<17x1xf32> to vector<17x17xf32>
    %220 = arith.subf %216, %219 : vector<17x17xf32>
    %221 = math.exp %220 : vector<17x17xf32>
    %cst_95 = arith.constant dense<0.000000e+00> : vector<17xf32>
    %222 = vector.multi_reduction <add>, %221, %cst_95 [1] : vector<17x17xf32> to vector<17xf32>
    %223 = vector.shape_cast %222 : vector<17xf32> to vector<17x1xf32>
    %224 = tpu.reciprocal %223 {approx = true} : vector<17x1xf32> -> vector<17x1xf32>
    %225 = vector.broadcast %224 : vector<17x1xf32> to vector<17x17xf32>
    %226 = arith.mulf %221, %225 : vector<17x17xf32>
    %227 = arith.truncf %226 : vector<17x17xf32> to vector<17x17xbf16>
    %228 = arith.truncf %213 : vector<17x16xf32> to vector<17x16xbf16>
    %cst_96 = arith.constant dense<0.000000e+00> : vector<17x16xf32>
    %229 = tpu.matmul %227, %228, %cst_96 {dimension_numbers = #tpu.dot_dimension_numbers<[1], [0], [0], [1], [0, 0, 1, 1], [], []>} : vector<17x17xbf16>, vector<17x16xbf16>, vector<17x16xf32> -> vector<17x16xf32>
    %230 = vector.extract_strided_slice %210 {offsets = [0, 16], sizes = [17, 16], strides = [1, 1]} : vector<17x192xf32> to vector<17x16xf32>
    %231 = vector.extract_strided_slice %210 {offsets = [0, 80], sizes = [17, 16], strides = [1, 1]} : vector<17x192xf32> to vector<17x16xf32>
    %232 = vector.extract_strided_slice %210 {offsets = [0, 144], sizes = [17, 16], strides = [1, 1]} : vector<17x192xf32> to vector<17x16xf32>
    %233 = arith.truncf %230 : vector<17x16xf32> to vector<17x16xbf16>
    %234 = arith.truncf %231 : vector<17x16xf32> to vector<17x16xbf16>
    %cst_97 = arith.constant dense<0.000000e+00> : vector<17x17xf32>
    %235 = tpu.matmul %233, %234, %cst_97 {dimension_numbers = #tpu.dot_dimension_numbers<[1], [1], [0], [0], [0, 0, 1, 0], [], []>} : vector<17x16xbf16>, vector<17x16xbf16>, vector<17x17xf32> -> vector<17x17xf32>
    %cst_98 = arith.constant dense<0xFF800000> : vector<17xf32>
    %236 = vector.multi_reduction <maximumf>, %235, %cst_98 [1] : vector<17x17xf32> to vector<17xf32>
    %237 = vector.shape_cast %236 : vector<17xf32> to vector<17x1xf32>
    %238 = vector.broadcast %237 : vector<17x1xf32> to vector<17x17xf32>
    %239 = arith.subf %235, %238 : vector<17x17xf32>
    %240 = math.exp %239 : vector<17x17xf32>
    %cst_99 = arith.constant dense<0.000000e+00> : vector<17xf32>
    %241 = vector.multi_reduction <add>, %240, %cst_99 [1] : vector<17x17xf32> to vector<17xf32>
    %242 = vector.shape_cast %241 : vector<17xf32> to vector<17x1xf32>
    %243 = tpu.reciprocal %242 {approx = true} : vector<17x1xf32> -> vector<17x1xf32>
    %244 = vector.broadcast %243 : vector<17x1xf32> to vector<17x17xf32>
    %245 = arith.mulf %240, %244 : vector<17x17xf32>
    %246 = arith.truncf %245 : vector<17x17xf32> to vector<17x17xbf16>
    %247 = arith.truncf %232 : vector<17x16xf32> to vector<17x16xbf16>
    %cst_100 = arith.constant dense<0.000000e+00> : vector<17x16xf32>
    %248 = tpu.matmul %246, %247, %cst_100 {dimension_numbers = #tpu.dot_dimension_numbers<[1], [0], [0], [1], [0, 0, 1, 1], [], []>} : vector<17x17xbf16>, vector<17x16xbf16>, vector<17x16xf32> -> vector<17x16xf32>
    %249 = vector.extract_strided_slice %210 {offsets = [0, 32], sizes = [17, 16], strides = [1, 1]} : vector<17x192xf32> to vector<17x16xf32>
    %250 = vector.extract_strided_slice %210 {offsets = [0, 96], sizes = [17, 16], strides = [1, 1]} : vector<17x192xf32> to vector<17x16xf32>
    %251 = vector.extract_strided_slice %210 {offsets = [0, 160], sizes = [17, 16], strides = [1, 1]} : vector<17x192xf32> to vector<17x16xf32>
    %252 = arith.truncf %249 : vector<17x16xf32> to vector<17x16xbf16>
    %253 = arith.truncf %250 : vector<17x16xf32> to vector<17x16xbf16>
    %cst_101 = arith.constant dense<0.000000e+00> : vector<17x17xf32>
    %254 = tpu.matmul %252, %253, %cst_101 {dimension_numbers = #tpu.dot_dimension_numbers<[1], [1], [0], [0], [0, 0, 1, 0], [], []>} : vector<17x16xbf16>, vector<17x16xbf16>, vector<17x17xf32> -> vector<17x17xf32>
    %cst_102 = arith.constant dense<0xFF800000> : vector<17xf32>
    %255 = vector.multi_reduction <maximumf>, %254, %cst_102 [1] : vector<17x17xf32> to vector<17xf32>
    %256 = vector.shape_cast %255 : vector<17xf32> to vector<17x1xf32>
    %257 = vector.broadcast %256 : vector<17x1xf32> to vector<17x17xf32>
    %258 = arith.subf %254, %257 : vector<17x17xf32>
    %259 = math.exp %258 : vector<17x17xf32>
    %cst_103 = arith.constant dense<0.000000e+00> : vector<17xf32>
    %260 = vector.multi_reduction <add>, %259, %cst_103 [1] : vector<17x17xf32> to vector<17xf32>
    %261 = vector.shape_cast %260 : vector<17xf32> to vector<17x1xf32>
    %262 = tpu.reciprocal %261 {approx = true} : vector<17x1xf32> -> vector<17x1xf32>
    %263 = vector.broadcast %262 : vector<17x1xf32> to vector<17x17xf32>
    %264 = arith.mulf %259, %263 : vector<17x17xf32>
    %265 = arith.truncf %264 : vector<17x17xf32> to vector<17x17xbf16>
    %266 = arith.truncf %251 : vector<17x16xf32> to vector<17x16xbf16>
    %cst_104 = arith.constant dense<0.000000e+00> : vector<17x16xf32>
    %267 = tpu.matmul %265, %266, %cst_104 {dimension_numbers = #tpu.dot_dimension_numbers<[1], [0], [0], [1], [0, 0, 1, 1], [], []>} : vector<17x17xbf16>, vector<17x16xbf16>, vector<17x16xf32> -> vector<17x16xf32>
    %268 = vector.extract_strided_slice %210 {offsets = [0, 48], sizes = [17, 16], strides = [1, 1]} : vector<17x192xf32> to vector<17x16xf32>
    %269 = vector.extract_strided_slice %210 {offsets = [0, 112], sizes = [17, 16], strides = [1, 1]} : vector<17x192xf32> to vector<17x16xf32>
    %270 = vector.extract_strided_slice %210 {offsets = [0, 176], sizes = [17, 16], strides = [1, 1]} : vector<17x192xf32> to vector<17x16xf32>
    %271 = arith.truncf %268 : vector<17x16xf32> to vector<17x16xbf16>
    %272 = arith.truncf %269 : vector<17x16xf32> to vector<17x16xbf16>
    %cst_105 = arith.constant dense<0.000000e+00> : vector<17x17xf32>
    %273 = tpu.matmul %271, %272, %cst_105 {dimension_numbers = #tpu.dot_dimension_numbers<[1], [1], [0], [0], [0, 0, 1, 0], [], []>} : vector<17x16xbf16>, vector<17x16xbf16>, vector<17x17xf32> -> vector<17x17xf32>
    %cst_106 = arith.constant dense<0xFF800000> : vector<17xf32>
    %274 = vector.multi_reduction <maximumf>, %273, %cst_106 [1] : vector<17x17xf32> to vector<17xf32>
    %275 = vector.shape_cast %274 : vector<17xf32> to vector<17x1xf32>
    %276 = vector.broadcast %275 : vector<17x1xf32> to vector<17x17xf32>
    %277 = arith.subf %273, %276 : vector<17x17xf32>
    %278 = math.exp %277 : vector<17x17xf32>
    %cst_107 = arith.constant dense<0.000000e+00> : vector<17xf32>
    %279 = vector.multi_reduction <add>, %278, %cst_107 [1] : vector<17x17xf32> to vector<17xf32>
    %280 = vector.shape_cast %279 : vector<17xf32> to vector<17x1xf32>
    %281 = tpu.reciprocal %280 {approx = true} : vector<17x1xf32> -> vector<17x1xf32>
    %282 = vector.broadcast %281 : vector<17x1xf32> to vector<17x17xf32>
    %283 = arith.mulf %278, %282 : vector<17x17xf32>
    %284 = arith.truncf %283 : vector<17x17xf32> to vector<17x17xbf16>
    %285 = arith.truncf %270 : vector<17x16xf32> to vector<17x16xbf16>
    %cst_108 = arith.constant dense<0.000000e+00> : vector<17x16xf32>
    %286 = tpu.matmul %284, %285, %cst_108 {dimension_numbers = #tpu.dot_dimension_numbers<[1], [0], [0], [1], [0, 0, 1, 1], [], []>} : vector<17x17xbf16>, vector<17x16xbf16>, vector<17x16xf32> -> vector<17x16xf32>
    %287 = tpu.concatenate %229, %248, %267, %286 in 1 : vector<17x16xf32>, vector<17x16xf32>, vector<17x16xf32>, vector<17x16xf32> -> vector<17x64xf32>
    %c1_109 = arith.constant 1 : index
    %c0_110 = arith.constant 0 : index
    %c0_111 = arith.constant 0 : index
    %288 = vector.load %arg6[%c1_109, %c0_110, %c0_111] : memref<2x64x64xbf16, #tpu.memory_space<vmem>>, vector<1x64x64xbf16>
    %289 = vector.shape_cast %288 : vector<1x64x64xbf16> to vector<64x64xbf16>
    %290 = arith.truncf %287 : vector<17x64xf32> to vector<17x64xbf16>
    %cst_112 = arith.constant dense<0.000000e+00> : vector<17x64xf32>
    %291 = tpu.matmul %290, %289, %cst_112 {dimension_numbers = #tpu.dot_dimension_numbers<[1], [0], [0], [1], [0, 0, 1, 1], [], []>} : vector<17x64xbf16>, vector<64x64xbf16>, vector<17x64xf32> -> vector<17x64xf32>
    %292 = arith.addf %178, %291 : vector<17x64xf32>
    %c1_113 = arith.constant 1 : index
    %c0_114 = arith.constant 0 : index
    %c0_115 = arith.constant 0 : index
    %293 = vector.load %arg7[%c1_113, %c0_114, %c0_115] : memref<2x1x64xf32, #tpu.memory_space<vmem>>, vector<1x1x64xf32>
    %294 = vector.shape_cast %293 : vector<1x1x64xf32> to vector<1x64xf32>
    %295 = vector.broadcast %294 : vector<1x64xf32> to vector<17x64xf32>
    %296 = arith.addf %292, %295 : vector<17x64xf32>
    %c1_116 = arith.constant 1 : index
    %c0_117 = arith.constant 0 : index
    %c0_118 = arith.constant 0 : index
    %297 = vector.load %arg10[%c1_116, %c0_117, %c0_118] : memref<2x1x64xf32, #tpu.memory_space<vmem>>, vector<1x1x64xf32>
    %298 = vector.shape_cast %297 : vector<1x1x64xf32> to vector<1x64xf32>
    %c1_119 = arith.constant 1 : index
    %c0_120 = arith.constant 0 : index
    %c0_121 = arith.constant 0 : index
    %299 = vector.load %arg11[%c1_119, %c0_120, %c0_121] : memref<2x1x64xf32, #tpu.memory_space<vmem>>, vector<1x1x64xf32>
    %300 = vector.shape_cast %299 : vector<1x1x64xf32> to vector<1x64xf32>
    %cst_122 = arith.constant dense<0.000000e+00> : vector<17xf32>
    %301 = vector.multi_reduction <add>, %296, %cst_122 [1] : vector<17x64xf32> to vector<17xf32>
    %302 = vector.shape_cast %301 : vector<17xf32> to vector<17x1xf32>
    %cst_123 = arith.constant 6.400000e+01 : f32
    %303 = vector.broadcast %cst_123 : f32 to vector<17x1xf32>
    %304 = arith.divf %302, %303 : vector<17x1xf32>
    %305 = vector.broadcast %304 : vector<17x1xf32> to vector<17x64xf32>
    %306 = arith.subf %296, %305 : vector<17x64xf32>
    %307 = arith.mulf %306, %306 : vector<17x64xf32>
    %cst_124 = arith.constant dense<0.000000e+00> : vector<17xf32>
    %308 = vector.multi_reduction <add>, %307, %cst_124 [1] : vector<17x64xf32> to vector<17xf32>
    %309 = vector.shape_cast %308 : vector<17xf32> to vector<17x1xf32>
    %cst_125 = arith.constant 6.400000e+01 : f32
    %310 = vector.broadcast %cst_125 : f32 to vector<17x1xf32>
    %311 = arith.divf %309, %310 : vector<17x1xf32>
    %cst_126 = arith.constant 9.99999997E-7 : f32
    %312 = vector.broadcast %cst_126 : f32 to vector<17x1xf32>
    %313 = arith.addf %311, %312 : vector<17x1xf32>
    %314 = math.rsqrt %313 : vector<17x1xf32>
    %315 = vector.broadcast %314 : vector<17x1xf32> to vector<17x64xf32>
    %316 = arith.mulf %306, %315 : vector<17x64xf32>
    %317 = vector.broadcast %298 : vector<1x64xf32> to vector<17x64xf32>
    %318 = arith.mulf %316, %317 : vector<17x64xf32>
    %319 = vector.broadcast %300 : vector<1x64xf32> to vector<17x64xf32>
    %320 = arith.addf %318, %319 : vector<17x64xf32>
    %c1_127 = arith.constant 1 : index
    %c0_128 = arith.constant 0 : index
    %c0_129 = arith.constant 0 : index
    %321 = vector.load %arg12[%c1_127, %c0_128, %c0_129] : memref<2x64x256xbf16, #tpu.memory_space<vmem>>, vector<1x64x256xbf16>
    %322 = vector.shape_cast %321 : vector<1x64x256xbf16> to vector<64x256xbf16>
    %323 = arith.truncf %320 : vector<17x64xf32> to vector<17x64xbf16>
    %cst_130 = arith.constant dense<0.000000e+00> : vector<17x256xf32>
    %324 = tpu.matmul %323, %322, %cst_130 {dimension_numbers = #tpu.dot_dimension_numbers<[1], [0], [0], [1], [0, 0, 1, 1], [], []>} : vector<17x64xbf16>, vector<64x256xbf16>, vector<17x256xf32> -> vector<17x256xf32>
    %c1_131 = arith.constant 1 : index
    %c0_132 = arith.constant 0 : index
    %c0_133 = arith.constant 0 : index
    %325 = vector.load %arg13[%c1_131, %c0_132, %c0_133] : memref<2x1x256xf32, #tpu.memory_space<vmem>>, vector<1x1x256xf32>
    %326 = vector.shape_cast %325 : vector<1x1x256xf32> to vector<1x256xf32>
    %327 = vector.broadcast %326 : vector<1x256xf32> to vector<17x256xf32>
    %328 = arith.addf %324, %327 : vector<17x256xf32>
    %329 = arith.mulf %328, %328 : vector<17x256xf32>
    %330 = arith.mulf %328, %329 : vector<17x256xf32>
    %cst_134 = arith.constant 4.471500e-02 : f32
    %331 = vector.broadcast %cst_134 : f32 to vector<17x256xf32>
    %332 = arith.mulf %331, %330 : vector<17x256xf32>
    %333 = arith.addf %328, %332 : vector<17x256xf32>
    %cst_135 = arith.constant 0.797884583 : f32
    %334 = vector.broadcast %cst_135 : f32 to vector<17x256xf32>
    %335 = arith.mulf %334, %333 : vector<17x256xf32>
    %336 = math.tanh %335 : vector<17x256xf32>
    %cst_136 = arith.constant 1.000000e+00 : f32
    %337 = vector.broadcast %cst_136 : f32 to vector<17x256xf32>
    %338 = arith.addf %337, %336 : vector<17x256xf32>
    %cst_137 = arith.constant 5.000000e-01 : f32
    %339 = vector.broadcast %cst_137 : f32 to vector<17x256xf32>
    %340 = arith.mulf %339, %338 : vector<17x256xf32>
    %341 = arith.mulf %328, %340 : vector<17x256xf32>
    %c1_138 = arith.constant 1 : index
    %c0_139 = arith.constant 0 : index
    %c0_140 = arith.constant 0 : index
    %342 = vector.load %arg14[%c1_138, %c0_139, %c0_140] : memref<2x256x64xbf16, #tpu.memory_space<vmem>>, vector<1x256x64xbf16>
    %343 = vector.shape_cast %342 : vector<1x256x64xbf16> to vector<256x64xbf16>
    %344 = arith.truncf %341 : vector<17x256xf32> to vector<17x256xbf16>
    %cst_141 = arith.constant dense<0.000000e+00> : vector<17x64xf32>
    %345 = tpu.matmul %344, %343, %cst_141 {dimension_numbers = #tpu.dot_dimension_numbers<[1], [0], [0], [1], [0, 0, 1, 1], [], []>} : vector<17x256xbf16>, vector<256x64xbf16>, vector<17x64xf32> -> vector<17x64xf32>
    %346 = arith.addf %296, %345 : vector<17x64xf32>
    %c1_142 = arith.constant 1 : index
    %c0_143 = arith.constant 0 : index
    %c0_144 = arith.constant 0 : index
    %347 = vector.load %arg15[%c1_142, %c0_143, %c0_144] : memref<2x1x64xf32, #tpu.memory_space<vmem>>, vector<1x1x64xf32>
    %348 = vector.shape_cast %347 : vector<1x1x64xf32> to vector<1x64xf32>
    %349 = vector.broadcast %348 : vector<1x64xf32> to vector<17x64xf32>
    %350 = arith.addf %346, %349 : vector<17x64xf32>
    %c0_145 = arith.constant 0 : index
    %c0_146 = arith.constant 0 : index
    %351 = vector.load %arg16[%c0_145, %c0_146] : memref<1x64xf32, #tpu.memory_space<vmem>>, vector<1x64xf32>
    %c0_147 = arith.constant 0 : index
    %c0_148 = arith.constant 0 : index
    %352 = vector.load %arg17[%c0_147, %c0_148] : memref<1x64xf32, #tpu.memory_space<vmem>>, vector<1x64xf32>
    %cst_149 = arith.constant dense<0.000000e+00> : vector<17xf32>
    %353 = vector.multi_reduction <add>, %350, %cst_149 [1] : vector<17x64xf32> to vector<17xf32>
    %354 = vector.shape_cast %353 : vector<17xf32> to vector<17x1xf32>
    %cst_150 = arith.constant 6.400000e+01 : f32
    %355 = vector.broadcast %cst_150 : f32 to vector<17x1xf32>
    %356 = arith.divf %354, %355 : vector<17x1xf32>
    %357 = vector.broadcast %356 : vector<17x1xf32> to vector<17x64xf32>
    %358 = arith.subf %350, %357 : vector<17x64xf32>
    %359 = arith.mulf %358, %358 : vector<17x64xf32>
    %cst_151 = arith.constant dense<0.000000e+00> : vector<17xf32>
    %360 = vector.multi_reduction <add>, %359, %cst_151 [1] : vector<17x64xf32> to vector<17xf32>
    %361 = vector.shape_cast %360 : vector<17xf32> to vector<17x1xf32>
    %cst_152 = arith.constant 6.400000e+01 : f32
    %362 = vector.broadcast %cst_152 : f32 to vector<17x1xf32>
    %363 = arith.divf %361, %362 : vector<17x1xf32>
    %cst_153 = arith.constant 9.99999997E-7 : f32
    %364 = vector.broadcast %cst_153 : f32 to vector<17x1xf32>
    %365 = arith.addf %363, %364 : vector<17x1xf32>
    %366 = math.rsqrt %365 : vector<17x1xf32>
    %367 = vector.broadcast %366 : vector<17x1xf32> to vector<17x64xf32>
    %368 = arith.mulf %358, %367 : vector<17x64xf32>
    %369 = vector.broadcast %351 : vector<1x64xf32> to vector<17x64xf32>
    %370 = arith.mulf %368, %369 : vector<17x64xf32>
    %371 = vector.broadcast %352 : vector<1x64xf32> to vector<17x64xf32>
    %372 = arith.addf %370, %371 : vector<17x64xf32>
    %c0_154 = arith.constant 0 : index
    %c0_155 = arith.constant 0 : index
    %373 = vector.load %arg18[%c0_154, %c0_155] : memref<64x48xbf16, #tpu.memory_space<vmem>>, vector<64x48xbf16>
    %374 = arith.truncf %372 : vector<17x64xf32> to vector<17x64xbf16>
    %cst_156 = arith.constant dense<0.000000e+00> : vector<17x48xf32>
    %375 = tpu.matmul %374, %373, %cst_156 {dimension_numbers = #tpu.dot_dimension_numbers<[1], [0], [0], [1], [0, 0, 1, 1], [], []>} : vector<17x64xbf16>, vector<64x48xbf16>, vector<17x48xf32> -> vector<17x48xf32>
    %c0_157 = arith.constant 0 : index
    %c0_158 = arith.constant 0 : index
    %376 = vector.load %arg19[%c0_157, %c0_158] : memref<1x48xf32, #tpu.memory_space<vmem>>, vector<1x48xf32>
    %377 = vector.broadcast %376 : vector<1x48xf32> to vector<17x48xf32>
    %378 = arith.addf %375, %377 : vector<17x48xf32>
    %cst_159 = arith.constant 0.000000e+00 : f32
    %379 = vector.broadcast %cst_159 : f32 to vector<17x48xf32>
    %380 = arith.maximumf %378, %379 : vector<17x48xf32>
    %c0_160 = arith.constant 0 : index
    %c0_161 = arith.constant 0 : index
    %381 = vector.load %arg20[%c0_160, %c0_161] : memref<48x32xbf16, #tpu.memory_space<vmem>>, vector<48x32xbf16>
    %382 = arith.truncf %380 : vector<17x48xf32> to vector<17x48xbf16>
    %cst_162 = arith.constant dense<0.000000e+00> : vector<17x32xf32>
    %383 = tpu.matmul %382, %381, %cst_162 {dimension_numbers = #tpu.dot_dimension_numbers<[1], [0], [0], [1], [0, 0, 1, 1], [], []>} : vector<17x48xbf16>, vector<48x32xbf16>, vector<17x32xf32> -> vector<17x32xf32>
    %c0_163 = arith.constant 0 : index
    %c0_164 = arith.constant 0 : index
    %384 = vector.load %arg21[%c0_163, %c0_164] : memref<1x32xf32, #tpu.memory_space<vmem>>, vector<1x32xf32>
    %385 = vector.broadcast %384 : vector<1x32xf32> to vector<17x32xf32>
    %386 = arith.addf %383, %385 : vector<17x32xf32>
    %cst_165 = arith.constant 0.000000e+00 : f32
    %387 = vector.broadcast %cst_165 : f32 to vector<17x32xf32>
    %388 = arith.maximumf %386, %387 : vector<17x32xf32>
    %389 = vector.extract_strided_slice %388 {offsets = [1, 0], sizes = [16, 32], strides = [1, 1]} : vector<17x32xf32> to vector<16x32xf32>
    %390 = arith.truncf %389 : vector<16x32xf32> to vector<16x32xbf16>
    %c0_166 = arith.constant 0 : index
    %c0_167 = arith.constant 0 : index
    %c0_168 = arith.constant 0 : index
    %391 = vector.load %arg22[%c0_166, %c0_167, %c0_168] : memref<1x16x32xbf16, #tpu.memory_space<vmem>>, vector<1x16x32xbf16>
    %392 = vector.shape_cast %391 : vector<1x16x32xbf16> to vector<16x32xbf16>
    %393 = vector.shape_cast %390 : vector<16x32xbf16> to vector<1x16x32xbf16>
    tpu.vector_store %arg22[%c0_166, %c0_167, %c0_168], %393 {strides = array<i32>} : memref<1x16x32xbf16, #tpu.memory_space<vmem>>, vector<1x16x32xbf16>,
    return
  }
  func.func @transform_0(%arg0: i32) -> (i32, i32, i32) {
    %c0_i32 = arith.constant 0 : i32
    %c0_i32_0 = arith.constant 0 : i32
    %c0_i32_1 = arith.constant 0 : i32
    return %arg0, %c0_i32, %c0_i32_0 : i32, i32, i32
  }
  func.func @transform_1(%arg0: i32) -> (i32, i32) {
    %c0_i32 = arith.constant 0 : i32
    %c0_i32_0 = arith.constant 0 : i32
    %c0_i32_1 = arith.constant 0 : i32
    return %c0_i32, %c0_i32_0 : i32, i32
  }
  func.func @transform_2(%arg0: i32) -> (i32, i32) {
    %c0_i32 = arith.constant 0 : i32
    %c0_i32_0 = arith.constant 0 : i32
    %c0_i32_1 = arith.constant 0 : i32
    return %c0_i32, %c0_i32_0 : i32, i32
  }
  func.func @transform_3(%arg0: i32) -> (i32, i32, i32) {
    %c0_i32 = arith.constant 0 : i32
    %c0_i32_0 = arith.constant 0 : i32
    %c0_i32_1 = arith.constant 0 : i32
    %c0_i32_2 = arith.constant 0 : i32
    return %c0_i32, %c0_i32_0, %c0_i32_1 : i32, i32, i32
  }
  func.func @transform_4(%arg0: i32) -> (i32, i32, i32) {
    %c0_i32 = arith.constant 0 : i32
    %c0_i32_0 = arith.constant 0 : i32
    %c0_i32_1 = arith.constant 0 : i32
    %c0_i32_2 = arith.constant 0 : i32
    return %c0_i32, %c0_i32_0, %c0_i32_1 : i32, i32, i32
  }
  func.func @transform_5(%arg0: i32) -> (i32, i32, i32) {
    %c0_i32 = arith.constant 0 : i32
    %c0_i32_0 = arith.constant 0 : i32
    %c0_i32_1 = arith.constant 0 : i32
    %c0_i32_2 = arith.constant 0 : i32
    return %c0_i32, %c0_i32_0, %c0_i32_1 : i32, i32, i32
  }
  func.func @transform_6(%arg0: i32) -> (i32, i32, i32) {
    %c0_i32 = arith.constant 0 : i32
    %c0_i32_0 = arith.constant 0 : i32
    %c0_i32_1 = arith.constant 0 : i32
    %c0_i32_2 = arith.constant 0 : i32
    return %c0_i32, %c0_i32_0, %c0_i32_1 : i32, i32, i32
  }
  func.func @transform_7(%arg0: i32) -> (i32, i32, i32) {
    %c0_i32 = arith.constant 0 : i32
    %c0_i32_0 = arith.constant 0 : i32
    %c0_i32_1 = arith.constant 0 : i32
    %c0_i32_2 = arith.constant 0 : i32
    return %c0_i32, %c0_i32_0, %c0_i32_1 : i32, i32, i32
  }
  func.func @transform_8(%arg0: i32) -> (i32, i32, i32) {
    %c0_i32 = arith.constant 0 : i32
    %c0_i32_0 = arith.constant 0 : i32
    %c0_i32_1 = arith.constant 0 : i32
    %c0_i32_2 = arith.constant 0 : i32
    return %c0_i32, %c0_i32_0, %c0_i32_1 : i32, i32, i32
  }
  func.func @transform_9(%arg0: i32) -> (i32, i32, i32) {
    %c0_i32 = arith.constant 0 : i32
    %c0_i32_0 = arith.constant 0 : i32
    %c0_i32_1 = arith.constant 0 : i32
    %c0_i32_2 = arith.constant 0 : i32
    return %c0_i32, %c0_i32_0, %c0_i32_1 : i32, i32, i32
  }
  func.func @transform_10(%arg0: i32) -> (i32, i32, i32) {
    %c0_i32 = arith.constant 0 : i32
    %c0_i32_0 = arith.constant 0 : i32
    %c0_i32_1 = arith.constant 0 : i32
    %c0_i32_2 = arith.constant 0 : i32
    return %c0_i32, %c0_i32_0, %c0_i32_1 : i32, i32, i32
  }
  func.func @transform_11(%arg0: i32) -> (i32, i32, i32) {
    %c0_i32 = arith.constant 0 : i32
    %c0_i32_0 = arith.constant 0 : i32
    %c0_i32_1 = arith.constant 0 : i32
    %c0_i32_2 = arith.constant 0 : i32
    return %c0_i32, %c0_i32_0, %c0_i32_1 : i32, i32, i32
  }
  func.func @transform_12(%arg0: i32) -> (i32, i32, i32) {
    %c0_i32 = arith.constant 0 : i32
    %c0_i32_0 = arith.constant 0 : i32
    %c0_i32_1 = arith.constant 0 : i32
    %c0_i32_2 = arith.constant 0 : i32
    return %c0_i32, %c0_i32_0, %c0_i32_1 : i32, i32, i32
  }
  func.func @transform_13(%arg0: i32) -> (i32, i32, i32) {
    %c0_i32 = arith.constant 0 : i32
    %c0_i32_0 = arith.constant 0 : i32
    %c0_i32_1 = arith.constant 0 : i32
    %c0_i32_2 = arith.constant 0 : i32
    return %c0_i32, %c0_i32_0, %c0_i32_1 : i32, i32, i32
  }
  func.func @transform_14(%arg0: i32) -> (i32, i32, i32) {
    %c0_i32 = arith.constant 0 : i32
    %c0_i32_0 = arith.constant 0 : i32
    %c0_i32_1 = arith.constant 0 : i32
    %c0_i32_2 = arith.constant 0 : i32
    return %c0_i32, %c0_i32_0, %c0_i32_1 : i32, i32, i32
  }
  func.func @transform_15(%arg0: i32) -> (i32, i32) {
    %c0_i32 = arith.constant 0 : i32
    %c0_i32_0 = arith.constant 0 : i32
    %c0_i32_1 = arith.constant 0 : i32
    return %c0_i32, %c0_i32_0 : i32, i32
  }
  func.func @transform_16(%arg0: i32) -> (i32, i32) {
    %c0_i32 = arith.constant 0 : i32
    %c0_i32_0 = arith.constant 0 : i32
    %c0_i32_1 = arith.constant 0 : i32
    return %c0_i32, %c0_i32_0 : i32, i32
  }
  func.func @transform_17(%arg0: i32) -> (i32, i32) {
    %c0_i32 = arith.constant 0 : i32
    %c0_i32_0 = arith.constant 0 : i32
    %c0_i32_1 = arith.constant 0 : i32
    return %c0_i32, %c0_i32_0 : i32, i32
  }
  func.func @transform_18(%arg0: i32) -> (i32, i32) {
    %c0_i32 = arith.constant 0 : i32
    %c0_i32_0 = arith.constant 0 : i32
    %c0_i32_1 = arith.constant 0 : i32
    return %c0_i32, %c0_i32_0 : i32, i32
  }
  func.func @transform_19(%arg0: i32) -> (i32, i32) {
    %c0_i32 = arith.constant 0 : i32
    %c0_i32_0 = arith.constant 0 : i32
    %c0_i32_1 = arith.constant 0 : i32
    return %c0_i32, %c0_i32_0 : i32, i32
  }
  func.func @transform_20(%arg0: i32) -> (i32, i32) {
    %c0_i32 = arith.constant 0 : i32
    %c0_i32_0 = arith.constant 0 : i32
    %c0_i32_1 = arith.constant 0 : i32
    return %c0_i32, %c0_i32_0 : i32, i32
  }
  func.func @transform_21(%arg0: i32) -> (i32, i32, i32) {
    %c0_i32 = arith.constant 0 : i32
    %c0_i32_0 = arith.constant 0 : i32
    %c0_i32_1 = arith.constant 0 : i32
    return %arg0, %c0_i32, %c0_i32_0 : i32, i32, i32
  }
}

module attributes {stable_mosaic.version = 11 : i64} {
  func.func @_decoder_kernel(%arg0: i32, %arg1: memref<1x128x4xbf16, #tpu.memory_space<vmem>>, %arg2: memref<3x128x128xbf16, #tpu.memory_space<vmem>>, %arg3: memref<3x4x8xbf16, #tpu.memory_space<vmem>>, %arg4: memref<128x1xf32, #tpu.memory_space<vmem>>, %arg5: memref<3x128x128xbf16, #tpu.memory_space<vmem>>, %arg6: memref<3x8x16xbf16, #tpu.memory_space<vmem>>, %arg7: memref<128x1xf32, #tpu.memory_space<vmem>>, %arg8: memref<3x128x128xbf16, #tpu.memory_space<vmem>>, %arg9: memref<3x16x32xbf16, #tpu.memory_space<vmem>>, %arg10: memref<128x1xf32, #tpu.memory_space<vmem>>, %arg11: memref<3x128x128xbf16, #tpu.memory_space<vmem>>, %arg12: memref<3x32x64xbf16, #tpu.memory_space<vmem>>, %arg13: memref<128x1xf32, #tpu.memory_space<vmem>>, %arg14: memref<5x128x128xbf16, #tpu.memory_space<vmem>>, %arg15: memref<5x64x128xbf16, #tpu.memory_space<vmem>>, %arg16: memref<128x1xf32, #tpu.memory_space<vmem>>, %arg17: memref<3x64x128xbf16, #tpu.memory_space<vmem>>, %arg18: memref<3x128x32xbf16, #tpu.memory_space<vmem>>, %arg19: memref<64x1xf32, #tpu.memory_space<vmem>>, %arg20: memref<1x64x32xf32, #tpu.memory_space<vmem>>) attributes {dimension_semantics = [#tpu.dimension_semantics<parallel>], iteration_bounds = array<i64: 2>, scalar_prefetch = 0 : i64, scratch_operands = 0 : i64, tpu.core_type = #tpu.core_type<tc>, window_params = [{transform_indices = @transform_0, window_bounds = array<i64: 1, 128, 4>}, {pipeline_mode = #tpu.pipeline_mode<synchronous>, transform_indices = @transform_1, window_bounds = array<i64: 3, 128, 128>}, {pipeline_mode = #tpu.pipeline_mode<synchronous>, transform_indices = @transform_2, window_bounds = array<i64: 3, 4, 8>}, {pipeline_mode = #tpu.pipeline_mode<synchronous>, transform_indices = @transform_3, window_bounds = array<i64: 128, 1>}, {pipeline_mode = #tpu.pipeline_mode<synchronous>, transform_indices = @transform_4, window_bounds = array<i64: 3, 128, 128>}, {pipeline_mode = #tpu.pipeline_mode<synchronous>, transform_indices = @transform_5, window_bounds = array<i64: 3, 8, 16>}, {pipeline_mode = #tpu.pipeline_mode<synchronous>, transform_indices = @transform_6, window_bounds = array<i64: 128, 1>}, {pipeline_mode = #tpu.pipeline_mode<synchronous>, transform_indices = @transform_7, window_bounds = array<i64: 3, 128, 128>}, {pipeline_mode = #tpu.pipeline_mode<synchronous>, transform_indices = @transform_8, window_bounds = array<i64: 3, 16, 32>}, {pipeline_mode = #tpu.pipeline_mode<synchronous>, transform_indices = @transform_9, window_bounds = array<i64: 128, 1>}, {pipeline_mode = #tpu.pipeline_mode<synchronous>, transform_indices = @transform_10, window_bounds = array<i64: 3, 128, 128>}, {pipeline_mode = #tpu.pipeline_mode<synchronous>, transform_indices = @transform_11, window_bounds = array<i64: 3, 32, 64>}, {pipeline_mode = #tpu.pipeline_mode<synchronous>, transform_indices = @transform_12, window_bounds = array<i64: 128, 1>}, {pipeline_mode = #tpu.pipeline_mode<synchronous>, transform_indices = @transform_13, window_bounds = array<i64: 5, 128, 128>}, {pipeline_mode = #tpu.pipeline_mode<synchronous>, transform_indices = @transform_14, window_bounds = array<i64: 5, 64, 128>}, {pipeline_mode = #tpu.pipeline_mode<synchronous>, transform_indices = @transform_15, window_bounds = array<i64: 128, 1>}, {pipeline_mode = #tpu.pipeline_mode<synchronous>, transform_indices = @transform_16, window_bounds = array<i64: 3, 64, 128>}, {pipeline_mode = #tpu.pipeline_mode<synchronous>, transform_indices = @transform_17, window_bounds = array<i64: 3, 128, 32>}, {pipeline_mode = #tpu.pipeline_mode<synchronous>, transform_indices = @transform_18, window_bounds = array<i64: 64, 1>}, {transform_indices = @transform_19, window_bounds = array<i64: 1, 64, 32>}]} {
    %c0 = arith.constant 0 : index
    %c0_0 = arith.constant 0 : index
    %c0_1 = arith.constant 0 : index
    %0 = vector.load %arg1[%c0, %c0_0, %c0_1] : memref<1x128x4xbf16, #tpu.memory_space<vmem>>, vector<1x128x4xbf16>
    %1 = vector.shape_cast %0 : vector<1x128x4xbf16> to vector<128x4xbf16>
    %2 = arith.extf %1 : vector<128x4xbf16> to vector<128x4xf32>
    %3 = arith.truncf %2 : vector<128x4xf32> to vector<128x4xbf16>
    %c0_2 = arith.constant 0 : index
    %c0_3 = arith.constant 0 : index
    %c0_4 = arith.constant 0 : index
    %4 = vector.load %arg3[%c0_2, %c0_3, %c0_4] : memref<3x4x8xbf16, #tpu.memory_space<vmem>>, vector<1x4x8xbf16>
    %5 = vector.shape_cast %4 : vector<1x4x8xbf16> to vector<4x8xbf16>
    %cst = arith.constant dense<0.000000e+00> : vector<128x8xf32>
    %6 = tpu.matmul %3, %5, %cst {dimension_numbers = #tpu.dot_dimension_numbers<[1], [0], [0], [1], [0, 0, 1, 1], [], []>} : vector<128x4xbf16>, vector<4x8xbf16>, vector<128x8xf32> -> vector<128x8xf32>
    %c0_5 = arith.constant 0 : index
    %c0_6 = arith.constant 0 : index
    %c0_7 = arith.constant 0 : index
    %7 = vector.load %arg2[%c0_5, %c0_6, %c0_7] : memref<3x128x128xbf16, #tpu.memory_space<vmem>>, vector<1x128x128xbf16>
    %8 = vector.shape_cast %7 : vector<1x128x128xbf16> to vector<128x128xbf16>
    %9 = arith.truncf %6 : vector<128x8xf32> to vector<128x8xbf16>
    %cst_8 = arith.constant dense<0.000000e+00> : vector<128x8xf32>
    %10 = tpu.matmul %8, %9, %cst_8 {dimension_numbers = #tpu.dot_dimension_numbers<[1], [0], [0], [1], [0, 0, 1, 1], [], []>} : vector<128x128xbf16>, vector<128x8xbf16>, vector<128x8xf32> -> vector<128x8xf32>
    %c1 = arith.constant 1 : index
    %c0_9 = arith.constant 0 : index
    %c0_10 = arith.constant 0 : index
    %11 = vector.load %arg3[%c1, %c0_9, %c0_10] : memref<3x4x8xbf16, #tpu.memory_space<vmem>>, vector<1x4x8xbf16>
    %12 = vector.shape_cast %11 : vector<1x4x8xbf16> to vector<4x8xbf16>
    %cst_11 = arith.constant dense<0.000000e+00> : vector<128x8xf32>
    %13 = tpu.matmul %3, %12, %cst_11 {dimension_numbers = #tpu.dot_dimension_numbers<[1], [0], [0], [1], [0, 0, 1, 1], [], []>} : vector<128x4xbf16>, vector<4x8xbf16>, vector<128x8xf32> -> vector<128x8xf32>
    %c1_12 = arith.constant 1 : index
    %c0_13 = arith.constant 0 : index
    %c0_14 = arith.constant 0 : index
    %14 = vector.load %arg2[%c1_12, %c0_13, %c0_14] : memref<3x128x128xbf16, #tpu.memory_space<vmem>>, vector<1x128x128xbf16>
    %15 = vector.shape_cast %14 : vector<1x128x128xbf16> to vector<128x128xbf16>
    %16 = arith.truncf %13 : vector<128x8xf32> to vector<128x8xbf16>
    %cst_15 = arith.constant dense<0.000000e+00> : vector<128x8xf32>
    %17 = tpu.matmul %15, %16, %cst_15 {dimension_numbers = #tpu.dot_dimension_numbers<[1], [0], [0], [1], [0, 0, 1, 1], [], []>} : vector<128x128xbf16>, vector<128x8xbf16>, vector<128x8xf32> -> vector<128x8xf32>
    %18 = arith.addf %10, %17 : vector<128x8xf32>
    %c2 = arith.constant 2 : index
    %c0_16 = arith.constant 0 : index
    %c0_17 = arith.constant 0 : index
    %19 = vector.load %arg3[%c2, %c0_16, %c0_17] : memref<3x4x8xbf16, #tpu.memory_space<vmem>>, vector<1x4x8xbf16>
    %20 = vector.shape_cast %19 : vector<1x4x8xbf16> to vector<4x8xbf16>
    %cst_18 = arith.constant dense<0.000000e+00> : vector<128x8xf32>
    %21 = tpu.matmul %3, %20, %cst_18 {dimension_numbers = #tpu.dot_dimension_numbers<[1], [0], [0], [1], [0, 0, 1, 1], [], []>} : vector<128x4xbf16>, vector<4x8xbf16>, vector<128x8xf32> -> vector<128x8xf32>
    %c2_19 = arith.constant 2 : index
    %c0_20 = arith.constant 0 : index
    %c0_21 = arith.constant 0 : index
    %22 = vector.load %arg2[%c2_19, %c0_20, %c0_21] : memref<3x128x128xbf16, #tpu.memory_space<vmem>>, vector<1x128x128xbf16>
    %23 = vector.shape_cast %22 : vector<1x128x128xbf16> to vector<128x128xbf16>
    %24 = arith.truncf %21 : vector<128x8xf32> to vector<128x8xbf16>
    %cst_22 = arith.constant dense<0.000000e+00> : vector<128x8xf32>
    %25 = tpu.matmul %23, %24, %cst_22 {dimension_numbers = #tpu.dot_dimension_numbers<[1], [0], [0], [1], [0, 0, 1, 1], [], []>} : vector<128x128xbf16>, vector<128x8xbf16>, vector<128x8xf32> -> vector<128x8xf32>
    %26 = arith.addf %18, %25 : vector<128x8xf32>
    %c0_23 = arith.constant 0 : index
    %c0_24 = arith.constant 0 : index
    %27 = vector.load %arg4[%c0_23, %c0_24] : memref<128x1xf32, #tpu.memory_space<vmem>>, vector<128x1xf32>
    %28 = vector.broadcast %27 : vector<128x1xf32> to vector<128x8xf32>
    %29 = arith.addf %26, %28 : vector<128x8xf32>
    %cst_25 = arith.constant 0.000000e+00 : f32
    %30 = vector.broadcast %cst_25 : f32 to vector<128x8xf32>
    %31 = arith.maximumf %29, %30 : vector<128x8xf32>
    %32 = arith.truncf %31 : vector<128x8xf32> to vector<128x8xbf16>
    %c0_26 = arith.constant 0 : index
    %c0_27 = arith.constant 0 : index
    %c0_28 = arith.constant 0 : index
    %33 = vector.load %arg6[%c0_26, %c0_27, %c0_28] : memref<3x8x16xbf16, #tpu.memory_space<vmem>>, vector<1x8x16xbf16>
    %34 = vector.shape_cast %33 : vector<1x8x16xbf16> to vector<8x16xbf16>
    %cst_29 = arith.constant dense<0.000000e+00> : vector<128x16xf32>
    %35 = tpu.matmul %32, %34, %cst_29 {dimension_numbers = #tpu.dot_dimension_numbers<[1], [0], [0], [1], [0, 0, 1, 1], [], []>} : vector<128x8xbf16>, vector<8x16xbf16>, vector<128x16xf32> -> vector<128x16xf32>
    %c0_30 = arith.constant 0 : index
    %c0_31 = arith.constant 0 : index
    %c0_32 = arith.constant 0 : index
    %36 = vector.load %arg5[%c0_30, %c0_31, %c0_32] : memref<3x128x128xbf16, #tpu.memory_space<vmem>>, vector<1x128x128xbf16>
    %37 = vector.shape_cast %36 : vector<1x128x128xbf16> to vector<128x128xbf16>
    %38 = arith.truncf %35 : vector<128x16xf32> to vector<128x16xbf16>
    %cst_33 = arith.constant dense<0.000000e+00> : vector<128x16xf32>
    %39 = tpu.matmul %37, %38, %cst_33 {dimension_numbers = #tpu.dot_dimension_numbers<[1], [0], [0], [1], [0, 0, 1, 1], [], []>} : vector<128x128xbf16>, vector<128x16xbf16>, vector<128x16xf32> -> vector<128x16xf32>
    %c1_34 = arith.constant 1 : index
    %c0_35 = arith.constant 0 : index
    %c0_36 = arith.constant 0 : index
    %40 = vector.load %arg6[%c1_34, %c0_35, %c0_36] : memref<3x8x16xbf16, #tpu.memory_space<vmem>>, vector<1x8x16xbf16>
    %41 = vector.shape_cast %40 : vector<1x8x16xbf16> to vector<8x16xbf16>
    %cst_37 = arith.constant dense<0.000000e+00> : vector<128x16xf32>
    %42 = tpu.matmul %32, %41, %cst_37 {dimension_numbers = #tpu.dot_dimension_numbers<[1], [0], [0], [1], [0, 0, 1, 1], [], []>} : vector<128x8xbf16>, vector<8x16xbf16>, vector<128x16xf32> -> vector<128x16xf32>
    %c1_38 = arith.constant 1 : index
    %c0_39 = arith.constant 0 : index
    %c0_40 = arith.constant 0 : index
    %43 = vector.load %arg5[%c1_38, %c0_39, %c0_40] : memref<3x128x128xbf16, #tpu.memory_space<vmem>>, vector<1x128x128xbf16>
    %44 = vector.shape_cast %43 : vector<1x128x128xbf16> to vector<128x128xbf16>
    %45 = arith.truncf %42 : vector<128x16xf32> to vector<128x16xbf16>
    %cst_41 = arith.constant dense<0.000000e+00> : vector<128x16xf32>
    %46 = tpu.matmul %44, %45, %cst_41 {dimension_numbers = #tpu.dot_dimension_numbers<[1], [0], [0], [1], [0, 0, 1, 1], [], []>} : vector<128x128xbf16>, vector<128x16xbf16>, vector<128x16xf32> -> vector<128x16xf32>
    %47 = arith.addf %39, %46 : vector<128x16xf32>
    %c2_42 = arith.constant 2 : index
    %c0_43 = arith.constant 0 : index
    %c0_44 = arith.constant 0 : index
    %48 = vector.load %arg6[%c2_42, %c0_43, %c0_44] : memref<3x8x16xbf16, #tpu.memory_space<vmem>>, vector<1x8x16xbf16>
    %49 = vector.shape_cast %48 : vector<1x8x16xbf16> to vector<8x16xbf16>
    %cst_45 = arith.constant dense<0.000000e+00> : vector<128x16xf32>
    %50 = tpu.matmul %32, %49, %cst_45 {dimension_numbers = #tpu.dot_dimension_numbers<[1], [0], [0], [1], [0, 0, 1, 1], [], []>} : vector<128x8xbf16>, vector<8x16xbf16>, vector<128x16xf32> -> vector<128x16xf32>
    %c2_46 = arith.constant 2 : index
    %c0_47 = arith.constant 0 : index
    %c0_48 = arith.constant 0 : index
    %51 = vector.load %arg5[%c2_46, %c0_47, %c0_48] : memref<3x128x128xbf16, #tpu.memory_space<vmem>>, vector<1x128x128xbf16>
    %52 = vector.shape_cast %51 : vector<1x128x128xbf16> to vector<128x128xbf16>
    %53 = arith.truncf %50 : vector<128x16xf32> to vector<128x16xbf16>
    %cst_49 = arith.constant dense<0.000000e+00> : vector<128x16xf32>
    %54 = tpu.matmul %52, %53, %cst_49 {dimension_numbers = #tpu.dot_dimension_numbers<[1], [0], [0], [1], [0, 0, 1, 1], [], []>} : vector<128x128xbf16>, vector<128x16xbf16>, vector<128x16xf32> -> vector<128x16xf32>
    %55 = arith.addf %47, %54 : vector<128x16xf32>
    %c0_50 = arith.constant 0 : index
    %c0_51 = arith.constant 0 : index
    %56 = vector.load %arg7[%c0_50, %c0_51] : memref<128x1xf32, #tpu.memory_space<vmem>>, vector<128x1xf32>
    %57 = vector.broadcast %56 : vector<128x1xf32> to vector<128x16xf32>
    %58 = arith.addf %55, %57 : vector<128x16xf32>
    %cst_52 = arith.constant 0.000000e+00 : f32
    %59 = vector.broadcast %cst_52 : f32 to vector<128x16xf32>
    %60 = arith.maximumf %58, %59 : vector<128x16xf32>
    %61 = arith.truncf %60 : vector<128x16xf32> to vector<128x16xbf16>
    %c0_53 = arith.constant 0 : index
    %c0_54 = arith.constant 0 : index
    %c0_55 = arith.constant 0 : index
    %62 = vector.load %arg9[%c0_53, %c0_54, %c0_55] : memref<3x16x32xbf16, #tpu.memory_space<vmem>>, vector<1x16x32xbf16>
    %63 = vector.shape_cast %62 : vector<1x16x32xbf16> to vector<16x32xbf16>
    %cst_56 = arith.constant dense<0.000000e+00> : vector<128x32xf32>
    %64 = tpu.matmul %61, %63, %cst_56 {dimension_numbers = #tpu.dot_dimension_numbers<[1], [0], [0], [1], [0, 0, 1, 1], [], []>} : vector<128x16xbf16>, vector<16x32xbf16>, vector<128x32xf32> -> vector<128x32xf32>
    %c0_57 = arith.constant 0 : index
    %c0_58 = arith.constant 0 : index
    %c0_59 = arith.constant 0 : index
    %65 = vector.load %arg8[%c0_57, %c0_58, %c0_59] : memref<3x128x128xbf16, #tpu.memory_space<vmem>>, vector<1x128x128xbf16>
    %66 = vector.shape_cast %65 : vector<1x128x128xbf16> to vector<128x128xbf16>
    %67 = arith.truncf %64 : vector<128x32xf32> to vector<128x32xbf16>
    %cst_60 = arith.constant dense<0.000000e+00> : vector<128x32xf32>
    %68 = tpu.matmul %66, %67, %cst_60 {dimension_numbers = #tpu.dot_dimension_numbers<[1], [0], [0], [1], [0, 0, 1, 1], [], []>} : vector<128x128xbf16>, vector<128x32xbf16>, vector<128x32xf32> -> vector<128x32xf32>
    %c1_61 = arith.constant 1 : index
    %c0_62 = arith.constant 0 : index
    %c0_63 = arith.constant 0 : index
    %69 = vector.load %arg9[%c1_61, %c0_62, %c0_63] : memref<3x16x32xbf16, #tpu.memory_space<vmem>>, vector<1x16x32xbf16>
    %70 = vector.shape_cast %69 : vector<1x16x32xbf16> to vector<16x32xbf16>
    %cst_64 = arith.constant dense<0.000000e+00> : vector<128x32xf32>
    %71 = tpu.matmul %61, %70, %cst_64 {dimension_numbers = #tpu.dot_dimension_numbers<[1], [0], [0], [1], [0, 0, 1, 1], [], []>} : vector<128x16xbf16>, vector<16x32xbf16>, vector<128x32xf32> -> vector<128x32xf32>
    %c1_65 = arith.constant 1 : index
    %c0_66 = arith.constant 0 : index
    %c0_67 = arith.constant 0 : index
    %72 = vector.load %arg8[%c1_65, %c0_66, %c0_67] : memref<3x128x128xbf16, #tpu.memory_space<vmem>>, vector<1x128x128xbf16>
    %73 = vector.shape_cast %72 : vector<1x128x128xbf16> to vector<128x128xbf16>
    %74 = arith.truncf %71 : vector<128x32xf32> to vector<128x32xbf16>
    %cst_68 = arith.constant dense<0.000000e+00> : vector<128x32xf32>
    %75 = tpu.matmul %73, %74, %cst_68 {dimension_numbers = #tpu.dot_dimension_numbers<[1], [0], [0], [1], [0, 0, 1, 1], [], []>} : vector<128x128xbf16>, vector<128x32xbf16>, vector<128x32xf32> -> vector<128x32xf32>
    %76 = arith.addf %68, %75 : vector<128x32xf32>
    %c2_69 = arith.constant 2 : index
    %c0_70 = arith.constant 0 : index
    %c0_71 = arith.constant 0 : index
    %77 = vector.load %arg9[%c2_69, %c0_70, %c0_71] : memref<3x16x32xbf16, #tpu.memory_space<vmem>>, vector<1x16x32xbf16>
    %78 = vector.shape_cast %77 : vector<1x16x32xbf16> to vector<16x32xbf16>
    %cst_72 = arith.constant dense<0.000000e+00> : vector<128x32xf32>
    %79 = tpu.matmul %61, %78, %cst_72 {dimension_numbers = #tpu.dot_dimension_numbers<[1], [0], [0], [1], [0, 0, 1, 1], [], []>} : vector<128x16xbf16>, vector<16x32xbf16>, vector<128x32xf32> -> vector<128x32xf32>
    %c2_73 = arith.constant 2 : index
    %c0_74 = arith.constant 0 : index
    %c0_75 = arith.constant 0 : index
    %80 = vector.load %arg8[%c2_73, %c0_74, %c0_75] : memref<3x128x128xbf16, #tpu.memory_space<vmem>>, vector<1x128x128xbf16>
    %81 = vector.shape_cast %80 : vector<1x128x128xbf16> to vector<128x128xbf16>
    %82 = arith.truncf %79 : vector<128x32xf32> to vector<128x32xbf16>
    %cst_76 = arith.constant dense<0.000000e+00> : vector<128x32xf32>
    %83 = tpu.matmul %81, %82, %cst_76 {dimension_numbers = #tpu.dot_dimension_numbers<[1], [0], [0], [1], [0, 0, 1, 1], [], []>} : vector<128x128xbf16>, vector<128x32xbf16>, vector<128x32xf32> -> vector<128x32xf32>
    %84 = arith.addf %76, %83 : vector<128x32xf32>
    %c0_77 = arith.constant 0 : index
    %c0_78 = arith.constant 0 : index
    %85 = vector.load %arg10[%c0_77, %c0_78] : memref<128x1xf32, #tpu.memory_space<vmem>>, vector<128x1xf32>
    %86 = vector.broadcast %85 : vector<128x1xf32> to vector<128x32xf32>
    %87 = arith.addf %84, %86 : vector<128x32xf32>
    %cst_79 = arith.constant 0.000000e+00 : f32
    %88 = vector.broadcast %cst_79 : f32 to vector<128x32xf32>
    %89 = arith.maximumf %87, %88 : vector<128x32xf32>
    %90 = arith.truncf %89 : vector<128x32xf32> to vector<128x32xbf16>
    %c0_80 = arith.constant 0 : index
    %c0_81 = arith.constant 0 : index
    %c0_82 = arith.constant 0 : index
    %91 = vector.load %arg12[%c0_80, %c0_81, %c0_82] : memref<3x32x64xbf16, #tpu.memory_space<vmem>>, vector<1x32x64xbf16>
    %92 = vector.shape_cast %91 : vector<1x32x64xbf16> to vector<32x64xbf16>
    %cst_83 = arith.constant dense<0.000000e+00> : vector<128x64xf32>
    %93 = tpu.matmul %90, %92, %cst_83 {dimension_numbers = #tpu.dot_dimension_numbers<[1], [0], [0], [1], [0, 0, 1, 1], [], []>} : vector<128x32xbf16>, vector<32x64xbf16>, vector<128x64xf32> -> vector<128x64xf32>
    %c0_84 = arith.constant 0 : index
    %c0_85 = arith.constant 0 : index
    %c0_86 = arith.constant 0 : index
    %94 = vector.load %arg11[%c0_84, %c0_85, %c0_86] : memref<3x128x128xbf16, #tpu.memory_space<vmem>>, vector<1x128x128xbf16>
    %95 = vector.shape_cast %94 : vector<1x128x128xbf16> to vector<128x128xbf16>
    %96 = arith.truncf %93 : vector<128x64xf32> to vector<128x64xbf16>
    %cst_87 = arith.constant dense<0.000000e+00> : vector<128x64xf32>
    %97 = tpu.matmul %95, %96, %cst_87 {dimension_numbers = #tpu.dot_dimension_numbers<[1], [0], [0], [1], [0, 0, 1, 1], [], []>} : vector<128x128xbf16>, vector<128x64xbf16>, vector<128x64xf32> -> vector<128x64xf32>
    %c1_88 = arith.constant 1 : index
    %c0_89 = arith.constant 0 : index
    %c0_90 = arith.constant 0 : index
    %98 = vector.load %arg12[%c1_88, %c0_89, %c0_90] : memref<3x32x64xbf16, #tpu.memory_space<vmem>>, vector<1x32x64xbf16>
    %99 = vector.shape_cast %98 : vector<1x32x64xbf16> to vector<32x64xbf16>
    %cst_91 = arith.constant dense<0.000000e+00> : vector<128x64xf32>
    %100 = tpu.matmul %90, %99, %cst_91 {dimension_numbers = #tpu.dot_dimension_numbers<[1], [0], [0], [1], [0, 0, 1, 1], [], []>} : vector<128x32xbf16>, vector<32x64xbf16>, vector<128x64xf32> -> vector<128x64xf32>
    %c1_92 = arith.constant 1 : index
    %c0_93 = arith.constant 0 : index
    %c0_94 = arith.constant 0 : index
    %101 = vector.load %arg11[%c1_92, %c0_93, %c0_94] : memref<3x128x128xbf16, #tpu.memory_space<vmem>>, vector<1x128x128xbf16>
    %102 = vector.shape_cast %101 : vector<1x128x128xbf16> to vector<128x128xbf16>
    %103 = arith.truncf %100 : vector<128x64xf32> to vector<128x64xbf16>
    %cst_95 = arith.constant dense<0.000000e+00> : vector<128x64xf32>
    %104 = tpu.matmul %102, %103, %cst_95 {dimension_numbers = #tpu.dot_dimension_numbers<[1], [0], [0], [1], [0, 0, 1, 1], [], []>} : vector<128x128xbf16>, vector<128x64xbf16>, vector<128x64xf32> -> vector<128x64xf32>
    %105 = arith.addf %97, %104 : vector<128x64xf32>
    %c2_96 = arith.constant 2 : index
    %c0_97 = arith.constant 0 : index
    %c0_98 = arith.constant 0 : index
    %106 = vector.load %arg12[%c2_96, %c0_97, %c0_98] : memref<3x32x64xbf16, #tpu.memory_space<vmem>>, vector<1x32x64xbf16>
    %107 = vector.shape_cast %106 : vector<1x32x64xbf16> to vector<32x64xbf16>
    %cst_99 = arith.constant dense<0.000000e+00> : vector<128x64xf32>
    %108 = tpu.matmul %90, %107, %cst_99 {dimension_numbers = #tpu.dot_dimension_numbers<[1], [0], [0], [1], [0, 0, 1, 1], [], []>} : vector<128x32xbf16>, vector<32x64xbf16>, vector<128x64xf32> -> vector<128x64xf32>
    %c2_100 = arith.constant 2 : index
    %c0_101 = arith.constant 0 : index
    %c0_102 = arith.constant 0 : index
    %109 = vector.load %arg11[%c2_100, %c0_101, %c0_102] : memref<3x128x128xbf16, #tpu.memory_space<vmem>>, vector<1x128x128xbf16>
    %110 = vector.shape_cast %109 : vector<1x128x128xbf16> to vector<128x128xbf16>
    %111 = arith.truncf %108 : vector<128x64xf32> to vector<128x64xbf16>
    %cst_103 = arith.constant dense<0.000000e+00> : vector<128x64xf32>
    %112 = tpu.matmul %110, %111, %cst_103 {dimension_numbers = #tpu.dot_dimension_numbers<[1], [0], [0], [1], [0, 0, 1, 1], [], []>} : vector<128x128xbf16>, vector<128x64xbf16>, vector<128x64xf32> -> vector<128x64xf32>
    %113 = arith.addf %105, %112 : vector<128x64xf32>
    %c0_104 = arith.constant 0 : index
    %c0_105 = arith.constant 0 : index
    %114 = vector.load %arg13[%c0_104, %c0_105] : memref<128x1xf32, #tpu.memory_space<vmem>>, vector<128x1xf32>
    %115 = vector.broadcast %114 : vector<128x1xf32> to vector<128x64xf32>
    %116 = arith.addf %113, %115 : vector<128x64xf32>
    %cst_106 = arith.constant 0.000000e+00 : f32
    %117 = vector.broadcast %cst_106 : f32 to vector<128x64xf32>
    %118 = arith.maximumf %116, %117 : vector<128x64xf32>
    %119 = arith.truncf %118 : vector<128x64xf32> to vector<128x64xbf16>
    %c0_107 = arith.constant 0 : index
    %c0_108 = arith.constant 0 : index
    %c0_109 = arith.constant 0 : index
    %120 = vector.load %arg15[%c0_107, %c0_108, %c0_109] : memref<5x64x128xbf16, #tpu.memory_space<vmem>>, vector<1x64x128xbf16>
    %121 = vector.shape_cast %120 : vector<1x64x128xbf16> to vector<64x128xbf16>
    %cst_110 = arith.constant dense<0.000000e+00> : vector<128x128xf32>
    %122 = tpu.matmul %119, %121, %cst_110 {dimension_numbers = #tpu.dot_dimension_numbers<[1], [0], [0], [1], [0, 0, 1, 1], [], []>} : vector<128x64xbf16>, vector<64x128xbf16>, vector<128x128xf32> -> vector<128x128xf32>
    %c0_111 = arith.constant 0 : index
    %c0_112 = arith.constant 0 : index
    %c0_113 = arith.constant 0 : index
    %123 = vector.load %arg14[%c0_111, %c0_112, %c0_113] : memref<5x128x128xbf16, #tpu.memory_space<vmem>>, vector<1x128x128xbf16>
    %124 = vector.shape_cast %123 : vector<1x128x128xbf16> to vector<128x128xbf16>
    %125 = arith.truncf %122 : vector<128x128xf32> to vector<128x128xbf16>
    %cst_114 = arith.constant dense<0.000000e+00> : vector<128x128xf32>
    %126 = tpu.matmul %124, %125, %cst_114 {dimension_numbers = #tpu.dot_dimension_numbers<[1], [0], [0], [1], [0, 0, 1, 1], [], []>} : vector<128x128xbf16>, vector<128x128xbf16>, vector<128x128xf32> -> vector<128x128xf32>
    %c1_115 = arith.constant 1 : index
    %c0_116 = arith.constant 0 : index
    %c0_117 = arith.constant 0 : index
    %127 = vector.load %arg15[%c1_115, %c0_116, %c0_117] : memref<5x64x128xbf16, #tpu.memory_space<vmem>>, vector<1x64x128xbf16>
    %128 = vector.shape_cast %127 : vector<1x64x128xbf16> to vector<64x128xbf16>
    %cst_118 = arith.constant dense<0.000000e+00> : vector<128x128xf32>
    %129 = tpu.matmul %119, %128, %cst_118 {dimension_numbers = #tpu.dot_dimension_numbers<[1], [0], [0], [1], [0, 0, 1, 1], [], []>} : vector<128x64xbf16>, vector<64x128xbf16>, vector<128x128xf32> -> vector<128x128xf32>
    %c1_119 = arith.constant 1 : index
    %c0_120 = arith.constant 0 : index
    %c0_121 = arith.constant 0 : index
    %130 = vector.load %arg14[%c1_119, %c0_120, %c0_121] : memref<5x128x128xbf16, #tpu.memory_space<vmem>>, vector<1x128x128xbf16>
    %131 = vector.shape_cast %130 : vector<1x128x128xbf16> to vector<128x128xbf16>
    %132 = arith.truncf %129 : vector<128x128xf32> to vector<128x128xbf16>
    %cst_122 = arith.constant dense<0.000000e+00> : vector<128x128xf32>
    %133 = tpu.matmul %131, %132, %cst_122 {dimension_numbers = #tpu.dot_dimension_numbers<[1], [0], [0], [1], [0, 0, 1, 1], [], []>} : vector<128x128xbf16>, vector<128x128xbf16>, vector<128x128xf32> -> vector<128x128xf32>
    %134 = arith.addf %126, %133 : vector<128x128xf32>
    %c2_123 = arith.constant 2 : index
    %c0_124 = arith.constant 0 : index
    %c0_125 = arith.constant 0 : index
    %135 = vector.load %arg15[%c2_123, %c0_124, %c0_125] : memref<5x64x128xbf16, #tpu.memory_space<vmem>>, vector<1x64x128xbf16>
    %136 = vector.shape_cast %135 : vector<1x64x128xbf16> to vector<64x128xbf16>
    %cst_126 = arith.constant dense<0.000000e+00> : vector<128x128xf32>
    %137 = tpu.matmul %119, %136, %cst_126 {dimension_numbers = #tpu.dot_dimension_numbers<[1], [0], [0], [1], [0, 0, 1, 1], [], []>} : vector<128x64xbf16>, vector<64x128xbf16>, vector<128x128xf32> -> vector<128x128xf32>
    %c2_127 = arith.constant 2 : index
    %c0_128 = arith.constant 0 : index
    %c0_129 = arith.constant 0 : index
    %138 = vector.load %arg14[%c2_127, %c0_128, %c0_129] : memref<5x128x128xbf16, #tpu.memory_space<vmem>>, vector<1x128x128xbf16>
    %139 = vector.shape_cast %138 : vector<1x128x128xbf16> to vector<128x128xbf16>
    %140 = arith.truncf %137 : vector<128x128xf32> to vector<128x128xbf16>
    %cst_130 = arith.constant dense<0.000000e+00> : vector<128x128xf32>
    %141 = tpu.matmul %139, %140, %cst_130 {dimension_numbers = #tpu.dot_dimension_numbers<[1], [0], [0], [1], [0, 0, 1, 1], [], []>} : vector<128x128xbf16>, vector<128x128xbf16>, vector<128x128xf32> -> vector<128x128xf32>
    %142 = arith.addf %134, %141 : vector<128x128xf32>
    %c3 = arith.constant 3 : index
    %c0_131 = arith.constant 0 : index
    %c0_132 = arith.constant 0 : index
    %143 = vector.load %arg15[%c3, %c0_131, %c0_132] : memref<5x64x128xbf16, #tpu.memory_space<vmem>>, vector<1x64x128xbf16>
    %144 = vector.shape_cast %143 : vector<1x64x128xbf16> to vector<64x128xbf16>
    %cst_133 = arith.constant dense<0.000000e+00> : vector<128x128xf32>
    %145 = tpu.matmul %119, %144, %cst_133 {dimension_numbers = #tpu.dot_dimension_numbers<[1], [0], [0], [1], [0, 0, 1, 1], [], []>} : vector<128x64xbf16>, vector<64x128xbf16>, vector<128x128xf32> -> vector<128x128xf32>
    %c3_134 = arith.constant 3 : index
    %c0_135 = arith.constant 0 : index
    %c0_136 = arith.constant 0 : index
    %146 = vector.load %arg14[%c3_134, %c0_135, %c0_136] : memref<5x128x128xbf16, #tpu.memory_space<vmem>>, vector<1x128x128xbf16>
    %147 = vector.shape_cast %146 : vector<1x128x128xbf16> to vector<128x128xbf16>
    %148 = arith.truncf %145 : vector<128x128xf32> to vector<128x128xbf16>
    %cst_137 = arith.constant dense<0.000000e+00> : vector<128x128xf32>
    %149 = tpu.matmul %147, %148, %cst_137 {dimension_numbers = #tpu.dot_dimension_numbers<[1], [0], [0], [1], [0, 0, 1, 1], [], []>} : vector<128x128xbf16>, vector<128x128xbf16>, vector<128x128xf32> -> vector<128x128xf32>
    %150 = arith.addf %142, %149 : vector<128x128xf32>
    %c4 = arith.constant 4 : index
    %c0_138 = arith.constant 0 : index
    %c0_139 = arith.constant 0 : index
    %151 = vector.load %arg15[%c4, %c0_138, %c0_139] : memref<5x64x128xbf16, #tpu.memory_space<vmem>>, vector<1x64x128xbf16>
    %152 = vector.shape_cast %151 : vector<1x64x128xbf16> to vector<64x128xbf16>
    %cst_140 = arith.constant dense<0.000000e+00> : vector<128x128xf32>
    %153 = tpu.matmul %119, %152, %cst_140 {dimension_numbers = #tpu.dot_dimension_numbers<[1], [0], [0], [1], [0, 0, 1, 1], [], []>} : vector<128x64xbf16>, vector<64x128xbf16>, vector<128x128xf32> -> vector<128x128xf32>
    %c4_141 = arith.constant 4 : index
    %c0_142 = arith.constant 0 : index
    %c0_143 = arith.constant 0 : index
    %154 = vector.load %arg14[%c4_141, %c0_142, %c0_143] : memref<5x128x128xbf16, #tpu.memory_space<vmem>>, vector<1x128x128xbf16>
    %155 = vector.shape_cast %154 : vector<1x128x128xbf16> to vector<128x128xbf16>
    %156 = arith.truncf %153 : vector<128x128xf32> to vector<128x128xbf16>
    %cst_144 = arith.constant dense<0.000000e+00> : vector<128x128xf32>
    %157 = tpu.matmul %155, %156, %cst_144 {dimension_numbers = #tpu.dot_dimension_numbers<[1], [0], [0], [1], [0, 0, 1, 1], [], []>} : vector<128x128xbf16>, vector<128x128xbf16>, vector<128x128xf32> -> vector<128x128xf32>
    %158 = arith.addf %150, %157 : vector<128x128xf32>
    %c0_145 = arith.constant 0 : index
    %c0_146 = arith.constant 0 : index
    %159 = vector.load %arg16[%c0_145, %c0_146] : memref<128x1xf32, #tpu.memory_space<vmem>>, vector<128x1xf32>
    %160 = vector.broadcast %159 : vector<128x1xf32> to vector<128x128xf32>
    %161 = arith.addf %158, %160 : vector<128x128xf32>
    %cst_147 = arith.constant 0.000000e+00 : f32
    %162 = vector.broadcast %cst_147 : f32 to vector<128x128xf32>
    %163 = arith.maximumf %161, %162 : vector<128x128xf32>
    %164 = arith.truncf %163 : vector<128x128xf32> to vector<128x128xbf16>
    %c0_148 = arith.constant 0 : index
    %c0_149 = arith.constant 0 : index
    %c0_150 = arith.constant 0 : index
    %165 = vector.load %arg18[%c0_148, %c0_149, %c0_150] : memref<3x128x32xbf16, #tpu.memory_space<vmem>>, vector<1x128x32xbf16>
    %166 = vector.shape_cast %165 : vector<1x128x32xbf16> to vector<128x32xbf16>
    %cst_151 = arith.constant dense<0.000000e+00> : vector<128x32xf32>
    %167 = tpu.matmul %164, %166, %cst_151 {dimension_numbers = #tpu.dot_dimension_numbers<[1], [0], [0], [1], [0, 0, 1, 1], [], []>} : vector<128x128xbf16>, vector<128x32xbf16>, vector<128x32xf32> -> vector<128x32xf32>
    %c0_152 = arith.constant 0 : index
    %c0_153 = arith.constant 0 : index
    %c0_154 = arith.constant 0 : index
    %168 = vector.load %arg17[%c0_152, %c0_153, %c0_154] : memref<3x64x128xbf16, #tpu.memory_space<vmem>>, vector<1x64x128xbf16>
    %169 = vector.shape_cast %168 : vector<1x64x128xbf16> to vector<64x128xbf16>
    %170 = arith.truncf %167 : vector<128x32xf32> to vector<128x32xbf16>
    %cst_155 = arith.constant dense<0.000000e+00> : vector<64x32xf32>
    %171 = tpu.matmul %169, %170, %cst_155 {dimension_numbers = #tpu.dot_dimension_numbers<[1], [0], [0], [1], [0, 0, 1, 1], [], []>} : vector<64x128xbf16>, vector<128x32xbf16>, vector<64x32xf32> -> vector<64x32xf32>
    %c1_156 = arith.constant 1 : index
    %c0_157 = arith.constant 0 : index
    %c0_158 = arith.constant 0 : index
    %172 = vector.load %arg18[%c1_156, %c0_157, %c0_158] : memref<3x128x32xbf16, #tpu.memory_space<vmem>>, vector<1x128x32xbf16>
    %173 = vector.shape_cast %172 : vector<1x128x32xbf16> to vector<128x32xbf16>
    %cst_159 = arith.constant dense<0.000000e+00> : vector<128x32xf32>
    %174 = tpu.matmul %164, %173, %cst_159 {dimension_numbers = #tpu.dot_dimension_numbers<[1], [0], [0], [1], [0, 0, 1, 1], [], []>} : vector<128x128xbf16>, vector<128x32xbf16>, vector<128x32xf32> -> vector<128x32xf32>
    %c1_160 = arith.constant 1 : index
    %c0_161 = arith.constant 0 : index
    %c0_162 = arith.constant 0 : index
    %175 = vector.load %arg17[%c1_160, %c0_161, %c0_162] : memref<3x64x128xbf16, #tpu.memory_space<vmem>>, vector<1x64x128xbf16>
    %176 = vector.shape_cast %175 : vector<1x64x128xbf16> to vector<64x128xbf16>
    %177 = arith.truncf %174 : vector<128x32xf32> to vector<128x32xbf16>
    %cst_163 = arith.constant dense<0.000000e+00> : vector<64x32xf32>
    %178 = tpu.matmul %176, %177, %cst_163 {dimension_numbers = #tpu.dot_dimension_numbers<[1], [0], [0], [1], [0, 0, 1, 1], [], []>} : vector<64x128xbf16>, vector<128x32xbf16>, vector<64x32xf32> -> vector<64x32xf32>
    %179 = arith.addf %171, %178 : vector<64x32xf32>
    %c2_164 = arith.constant 2 : index
    %c0_165 = arith.constant 0 : index
    %c0_166 = arith.constant 0 : index
    %180 = vector.load %arg18[%c2_164, %c0_165, %c0_166] : memref<3x128x32xbf16, #tpu.memory_space<vmem>>, vector<1x128x32xbf16>
    %181 = vector.shape_cast %180 : vector<1x128x32xbf16> to vector<128x32xbf16>
    %cst_167 = arith.constant dense<0.000000e+00> : vector<128x32xf32>
    %182 = tpu.matmul %164, %181, %cst_167 {dimension_numbers = #tpu.dot_dimension_numbers<[1], [0], [0], [1], [0, 0, 1, 1], [], []>} : vector<128x128xbf16>, vector<128x32xbf16>, vector<128x32xf32> -> vector<128x32xf32>
    %c2_168 = arith.constant 2 : index
    %c0_169 = arith.constant 0 : index
    %c0_170 = arith.constant 0 : index
    %183 = vector.load %arg17[%c2_168, %c0_169, %c0_170] : memref<3x64x128xbf16, #tpu.memory_space<vmem>>, vector<1x64x128xbf16>
    %184 = vector.shape_cast %183 : vector<1x64x128xbf16> to vector<64x128xbf16>
    %185 = arith.truncf %182 : vector<128x32xf32> to vector<128x32xbf16>
    %cst_171 = arith.constant dense<0.000000e+00> : vector<64x32xf32>
    %186 = tpu.matmul %184, %185, %cst_171 {dimension_numbers = #tpu.dot_dimension_numbers<[1], [0], [0], [1], [0, 0, 1, 1], [], []>} : vector<64x128xbf16>, vector<128x32xbf16>, vector<64x32xf32> -> vector<64x32xf32>
    %187 = arith.addf %179, %186 : vector<64x32xf32>
    %c0_172 = arith.constant 0 : index
    %c0_173 = arith.constant 0 : index
    %188 = vector.load %arg19[%c0_172, %c0_173] : memref<64x1xf32, #tpu.memory_space<vmem>>, vector<64x1xf32>
    %189 = vector.broadcast %188 : vector<64x1xf32> to vector<64x32xf32>
    %190 = arith.addf %187, %189 : vector<64x32xf32>
    %c0_174 = arith.constant 0 : index
    %c0_175 = arith.constant 0 : index
    %c0_176 = arith.constant 0 : index
    %191 = vector.load %arg20[%c0_174, %c0_175, %c0_176] : memref<1x64x32xf32, #tpu.memory_space<vmem>>, vector<1x64x32xf32>
    %192 = vector.shape_cast %191 : vector<1x64x32xf32> to vector<64x32xf32>
    %193 = vector.shape_cast %190 : vector<64x32xf32> to vector<1x64x32xf32>
    tpu.vector_store %arg20[%c0_174, %c0_175, %c0_176], %193 {strides = array<i32>} : memref<1x64x32xf32, #tpu.memory_space<vmem>>, vector<1x64x32xf32>,
    return
  }
  func.func @transform_0(%arg0: i32) -> (i32, i32, i32) {
    %c0_i32 = arith.constant 0 : i32
    %c0_i32_0 = arith.constant 0 : i32
    %c0_i32_1 = arith.constant 0 : i32
    return %arg0, %c0_i32, %c0_i32_0 : i32, i32, i32
  }
  func.func @transform_1(%arg0: i32) -> (i32, i32, i32) {
    %c0_i32 = arith.constant 0 : i32
    %c0_i32_0 = arith.constant 0 : i32
    %c0_i32_1 = arith.constant 0 : i32
    %c0_i32_2 = arith.constant 0 : i32
    return %c0_i32, %c0_i32_0, %c0_i32_1 : i32, i32, i32
  }
  func.func @transform_2(%arg0: i32) -> (i32, i32, i32) {
    %c0_i32 = arith.constant 0 : i32
    %c0_i32_0 = arith.constant 0 : i32
    %c0_i32_1 = arith.constant 0 : i32
    %c0_i32_2 = arith.constant 0 : i32
    return %c0_i32, %c0_i32_0, %c0_i32_1 : i32, i32, i32
  }
  func.func @transform_3(%arg0: i32) -> (i32, i32) {
    %c0_i32 = arith.constant 0 : i32
    %c0_i32_0 = arith.constant 0 : i32
    %c0_i32_1 = arith.constant 0 : i32
    return %c0_i32, %c0_i32_0 : i32, i32
  }
  func.func @transform_4(%arg0: i32) -> (i32, i32, i32) {
    %c0_i32 = arith.constant 0 : i32
    %c0_i32_0 = arith.constant 0 : i32
    %c0_i32_1 = arith.constant 0 : i32
    %c0_i32_2 = arith.constant 0 : i32
    return %c0_i32, %c0_i32_0, %c0_i32_1 : i32, i32, i32
  }
  func.func @transform_5(%arg0: i32) -> (i32, i32, i32) {
    %c0_i32 = arith.constant 0 : i32
    %c0_i32_0 = arith.constant 0 : i32
    %c0_i32_1 = arith.constant 0 : i32
    %c0_i32_2 = arith.constant 0 : i32
    return %c0_i32, %c0_i32_0, %c0_i32_1 : i32, i32, i32
  }
  func.func @transform_6(%arg0: i32) -> (i32, i32) {
    %c0_i32 = arith.constant 0 : i32
    %c0_i32_0 = arith.constant 0 : i32
    %c0_i32_1 = arith.constant 0 : i32
    return %c0_i32, %c0_i32_0 : i32, i32
  }
  func.func @transform_7(%arg0: i32) -> (i32, i32, i32) {
    %c0_i32 = arith.constant 0 : i32
    %c0_i32_0 = arith.constant 0 : i32
    %c0_i32_1 = arith.constant 0 : i32
    %c0_i32_2 = arith.constant 0 : i32
    return %c0_i32, %c0_i32_0, %c0_i32_1 : i32, i32, i32
  }
  func.func @transform_8(%arg0: i32) -> (i32, i32, i32) {
    %c0_i32 = arith.constant 0 : i32
    %c0_i32_0 = arith.constant 0 : i32
    %c0_i32_1 = arith.constant 0 : i32
    %c0_i32_2 = arith.constant 0 : i32
    return %c0_i32, %c0_i32_0, %c0_i32_1 : i32, i32, i32
  }
  func.func @transform_9(%arg0: i32) -> (i32, i32) {
    %c0_i32 = arith.constant 0 : i32
    %c0_i32_0 = arith.constant 0 : i32
    %c0_i32_1 = arith.constant 0 : i32
    return %c0_i32, %c0_i32_0 : i32, i32
  }
  func.func @transform_10(%arg0: i32) -> (i32, i32, i32) {
    %c0_i32 = arith.constant 0 : i32
    %c0_i32_0 = arith.constant 0 : i32
    %c0_i32_1 = arith.constant 0 : i32
    %c0_i32_2 = arith.constant 0 : i32
    return %c0_i32, %c0_i32_0, %c0_i32_1 : i32, i32, i32
  }
  func.func @transform_11(%arg0: i32) -> (i32, i32, i32) {
    %c0_i32 = arith.constant 0 : i32
    %c0_i32_0 = arith.constant 0 : i32
    %c0_i32_1 = arith.constant 0 : i32
    %c0_i32_2 = arith.constant 0 : i32
    return %c0_i32, %c0_i32_0, %c0_i32_1 : i32, i32, i32
  }
  func.func @transform_12(%arg0: i32) -> (i32, i32) {
    %c0_i32 = arith.constant 0 : i32
    %c0_i32_0 = arith.constant 0 : i32
    %c0_i32_1 = arith.constant 0 : i32
    return %c0_i32, %c0_i32_0 : i32, i32
  }
  func.func @transform_13(%arg0: i32) -> (i32, i32, i32) {
    %c0_i32 = arith.constant 0 : i32
    %c0_i32_0 = arith.constant 0 : i32
    %c0_i32_1 = arith.constant 0 : i32
    %c0_i32_2 = arith.constant 0 : i32
    return %c0_i32, %c0_i32_0, %c0_i32_1 : i32, i32, i32
  }
  func.func @transform_14(%arg0: i32) -> (i32, i32, i32) {
    %c0_i32 = arith.constant 0 : i32
    %c0_i32_0 = arith.constant 0 : i32
    %c0_i32_1 = arith.constant 0 : i32
    %c0_i32_2 = arith.constant 0 : i32
    return %c0_i32, %c0_i32_0, %c0_i32_1 : i32, i32, i32
  }
  func.func @transform_15(%arg0: i32) -> (i32, i32) {
    %c0_i32 = arith.constant 0 : i32
    %c0_i32_0 = arith.constant 0 : i32
    %c0_i32_1 = arith.constant 0 : i32
    return %c0_i32, %c0_i32_0 : i32, i32
  }
  func.func @transform_16(%arg0: i32) -> (i32, i32, i32) {
    %c0_i32 = arith.constant 0 : i32
    %c0_i32_0 = arith.constant 0 : i32
    %c0_i32_1 = arith.constant 0 : i32
    %c0_i32_2 = arith.constant 0 : i32
    return %c0_i32, %c0_i32_0, %c0_i32_1 : i32, i32, i32
  }
  func.func @transform_17(%arg0: i32) -> (i32, i32, i32) {
    %c0_i32 = arith.constant 0 : i32
    %c0_i32_0 = arith.constant 0 : i32
    %c0_i32_1 = arith.constant 0 : i32
    %c0_i32_2 = arith.constant 0 : i32
    return %c0_i32, %c0_i32_0, %c0_i32_1 : i32, i32, i32
  }
  func.func @transform_18(%arg0: i32) -> (i32, i32) {
    %c0_i32 = arith.constant 0 : i32
    %c0_i32_0 = arith.constant 0 : i32
    %c0_i32_1 = arith.constant 0 : i32
    return %c0_i32, %c0_i32_0 : i32, i32
  }
  func.func @transform_19(%arg0: i32) -> (i32, i32, i32) {
    %c0_i32 = arith.constant 0 : i32
    %c0_i32_0 = arith.constant 0 : i32
    %c0_i32_1 = arith.constant 0 : i32
    return %arg0, %c0_i32, %c0_i32_0 : i32, i32, i32
  }
}

</mosaic_0001>

<bundles_post_ra>
// kernel: forward.3
= control target key start
LH: loop header
LB: loop body
LE: loop exit
PB: predicated region body
PF: predicated region fallthrough
CT: control target
= control target key end

     0   :  { %8 = vsyncpa [#allocation3], 0  ;;  %s602_s12 = smov 0   ;;  %s664_s0 = inlined_call_operand.hbm [shape: f32[16,32], index: 0, kind: input, shape index: {}]   ;;  %s665_s1 = inlined_call_operand.vmem [shape: f32[32,16], index: 1, kind: input, shape index: {}]   ;;  %s666_s2 = inlined_call_operand.vmem [shape: f32[2,3,32,32], index: 2, kind: input, shape index: {}]   ;;  %s667_s3 = inlined_call_operand.vmem [shape: f32[2,3,16,16], index: 3, kind: output, shape index: {}]  }
   0x1 LB: > { %s124_s15 = sshll.u32 %s664_s0, 4  ;;  %s471_s16 = sadd.s32 4294967295, %s577_s12   ;;  %s577_s12 = sphi %s602_s12, %s14_s12   ;;  %s125_s15 = int_to_ptr.hbm [resolvable:$true] %s124_s15 }
   0x2   : > { %p473_p0 = scmp.ge.s32.totalorder %s577_s12, 1  ;;  %p113_p1 = scmp.lt.s32.totalorder %s577_s12, 3 }
   0x3   : > { %p524_p2 = scmp.eq.s32.totalorder %s471_s16, 0  ;;  %s579_s17 = smov [#allocation2]  }
   0x4   : > { %p114_p3 = pnand %p473_p0, %p113_p1  ;;  %s126_s18 = sshll.u32 %s579_s17, 4  ;;  %s127_s18 = int_to_ptr.vmem [resolvable:$true] %s126_s18 }
   0x5   : > { %s580_s19 = smov 128   ;;  %s581_s20 = smov 8  }
   0x6   : > { %p520_p4 = pneg %p114_p3  ;;  %153 = sbr.rel (%p114_p3) target bundleno = 307 (0x133), region = 32 }
   0x8   : > { %p521_p5 = pnand %p524_p2, %p520_p4 }
   0xa   : > { %523 = dma.hbm_to_vmem [thread:$0]  (!%p521_p5), %s125_s15, 256, %s127_s18, [#allocation3], %s580_s19, %s580_s19, %s581_s20  }
   0xb   : > { %572 = dma.done.wait (%p524_p2), [#allocation3], 256  }
   0xc   : > { %574 = vsyncadd (%p524_p2), [#allocation3], 4294967040  ;;  %p178_p6 = scmp.lt.s32.totalorder %s471_s16, 1  ;;  %v227_v4 = vld [vmem:[%s665_s1 + $0x18] sm:$0xff]  ;;  %v189_v5 = vld [vmem:[#allocation2 + $0x8] sm:$0xff]  ;;  %vm194_vm0 = vcmask 261120  }
   0xd   : > { %510 = vmatpush.msra.mxu3 %v227_v4  ;;  %246 = vmatpush.msra.mxu1 %v227_v4  ;;  %v260_v8 = vld [vmem:[#allocation2] sm:$0xff]  ;;  %v226_v9 = vld [vmem:[%s665_s1 + $0x10] sm:$0xff]  ;;  %v225_v12 = vld [vmem:[%s665_s1 + $0x8] sm:$0xff]  ;;  %vm257_vm1 = vcmask 130048  }
   0xe   : > { %s669_s16 = smov (!%p178_p6, %s471_s16), 1  ;;  %v224_v17 = vld [vmem:[%s665_s1] sm:$0xff] }
   0xf   : > { %s514_s21 = smul.u32 96, %s669_s16  ;;  %511 = vmatpush.msra.mxu3 %v226_v9  ;;  %247 = vmatpush.msra.mxu1 %v226_v9 }
  0x10   : > { %s515_s6 = smul.u32 48, %s669_s16 }
  0x11   : > { %s619_s24 = scalar_lea.vmem %s666_s2, %s514_s21  ;;  %512 = vmatpush.msra.mxu3 %v225_v12  ;;  %248 = vmatpush.msra.mxu1 %v225_v12 }
  0x12   : > { %v193_v0 = vld [vmem:[%s619_s24 + $0x18] sm:$0xff]  ;;  %v192_v1 = vld [vmem:[%s619_s24 + $0x10] sm:$0xff]  ;;  %v191_v2 = vld [vmem:[%s619_s24 + $0x8] sm:$0xff]  ;;  %s187_s9 = scalar_lea.vmem %s667_s3, %s515_s6 }
  0x13   : > { %506 = vmatpush.msra.mxu2 %v193_v0  ;;  %213 = vmatpush.msra.mxu0 %v193_v0  ;;  %v190_v3 = vld [vmem:[%s619_s24] sm:$0xff]  ;;  %v487_v6 = vld [vmem:[%s619_s24 + $0x38] sm:$0xff]  ;;  %v486_v10 = vld [vmem:[%s619_s24 + $0x30] sm:$0xff] }
  0x14   : > { %v497_v7 = vld [vmem:[%s619_s24 + $0x58] sm:$0xff]  ;;  %v496_v11 = vld [vmem:[%s619_s24 + $0x50] sm:$0xff]  ;;  %v485_v13 = vld [vmem:[%s619_s24 + $0x28] sm:$0xff]  ;;  %513 = vmatpush.msra.mxu3 %v224_v17  ;;  %249 = vmatpush.msra.mxu1 %v224_v17 }
  0x15   : > { %507 = vmatpush.msra.mxu2 %v192_v1  ;;  %214 = vmatpush.msra.mxu0 %v192_v1  ;;  %v495_v14 = vld [vmem:[%s619_s24 + $0x48] sm:$0xff]  ;;  %v484_v15 = vld [vmem:[%s619_s24 + $0x20] sm:$0xff] }
  0x16   : > { %v494_v16 = vld [vmem:[%s619_s24 + $0x40] sm:$0xff]  ;;  %318 = vmatpush.msrb.mxu3 %v227_v4  ;;  %390 = vmatpush.msrb.mxu1 %v227_v4 }
  0x17   : > { %508 = vmatpush.msra.mxu2 %v191_v2  ;;  %215 = vmatpush.msra.mxu0 %v191_v2 }
  0x18   : > { %319 = vmatpush.msrb.mxu3 %v226_v9  ;;  %391 = vmatpush.msrb.mxu1 %v226_v9 }
  0x19   : > { %509 = vmatpush.msra.mxu2 %v190_v3  ;;  %216 = vmatpush.msra.mxu0 %v190_v3 }
  0x1a   : > { %481 = vmatmul.msk.f32.vlgmr.msra.gmra.mxu2 %vm194_vm0, %v189_v5  ;;  %480 = vmatmul.msk.f32.vlgmr.msra.gmra.mxu0 %vm194_vm0, %v260_v8 }
  0x1b   : > { %285 = vmatpush.msrb.mxu2 %v487_v6  ;;  %357 = vmatpush.msrb.mxu0 %v497_v7 }
  0x1c   : > { %320 = vmatpush.msrb.mxu3 %v225_v12  ;;  %392 = vmatpush.msrb.mxu1 %v225_v12 }
  0x1d   : > { %286 = vmatpush.msrb.mxu2 %v486_v10  ;;  %358 = vmatpush.msrb.mxu0 %v496_v11 }
  0x1e   : > { %321 = vmatpush.msrb.mxu3 %v224_v17  ;;  %393 = vmatpush.msrb.mxu1 %v224_v17 }
  0x1f   : > { %287 = vmatpush.msrb.mxu2 %v485_v13  ;;  %359 = vmatpush.msrb.mxu0 %v495_v14 }
  0x21   : > { %288 = vmatpush.msrb.mxu2 %v484_v15  ;;  %360 = vmatpush.msrb.mxu0 %v494_v16 }
  0x22   : > { %488 = vmatmul.msk.f32.vlgmr.msrb.gmra.mxu2 %vm194_vm0, %v260_v8  ;;  %498 = vmatmul.msk.f32.vlgmr.msrb.gmra.mxu0 %vm194_vm0, %v260_v8 }
  0x2a   : > { %489 = vmatmul.msk.f32.gmra.mxu2 %vm194_vm0, %v189_v5  ;;  %499 = vmatmul.msk.f32.gmra.mxu0 %vm194_vm0, %v189_v5 }
  0x97   : > { %v218_v18 = vpop.f32.mrf.mxu0 }
  0x98   : > { %482 = vmatmul.msk.f32.vlgmr.msra.gmra.mxu1 %vm194_vm0, %v218_v18 }
  0x9d   : > { %v221_v19 = vpop.f32.mrf.mxu2 }
  0x9e   : > { %483 = vmatmul.msk.f32.vlgmr.msra.gmra.mxu3 %vm194_vm0, %v221_v19 }
  0x9f   : > { %v362_v20 = vpop.f32.mrf.mxu0 }
  0xa0   : > { %500 = vmatmul.msk.f32.vlgmr.msrb.gmra.mxu1 %vm194_vm0, %v362_v20 }
  0xa5   : > { %v290_v21 = vpop.f32.mrf.mxu2 }
  0xa6   : > { %490 = vmatmul.msk.f32.vlgmr.msrb.gmra.mxu3 %vm194_vm0, %v290_v21 }
  0xa7   : > { %v365_v22 = vpop.f32.mrf.mxu0 }
  0xa8   : > { %501 = vmatmul.msk.f32.gmra.mxu1 %vm194_vm0, %v365_v22 }
  0xad   : > { %v293_v23 = vpop.f32.mrf.mxu2 }
  0xae   : > { %491 = vmatmul.msk.f32.gmra.mxu3 %vm194_vm0, %v293_v23 }
 0x115   : > { %v251_v24 = vpop.f32.mrf.mxu1 }
 0x116   : > { %258 = vst.msk [vmem:[%s187_s9] sm:$0xff] %vm257_vm1, %v251_v24 }
 0x11d   : > { %v395_v25 = vpop.f32.mrf.mxu1 }
 0x11e   : > { %502 = vst.msk [vmem:[%s187_s9 + $0x20] sm:$0xff] %vm257_vm1, %v395_v25 }
 0x121   : > { %v254_v26 = vpop.f32.mrf.mxu3 }
 0x122   : > { %259 = vst.msk [vmem:[%s187_s9 + $0x8] sm:$0xff] %vm257_vm1, %v254_v26 }
 0x125   : > { %v398_v27 = vpop.f32.mrf.mxu1 }
 0x126   : > { %503 = vst.msk [vmem:[%s187_s9 + $0x28] sm:$0xff] %vm257_vm1, %v398_v27 }
 0x129   : > { %v323_v28 = vpop.f32.mrf.mxu3 }
 0x12a   : > { %492 = vst.msk [vmem:[%s187_s9 + $0x10] sm:$0xff] %vm257_vm1, %v323_v28 }
 0x131   : > { %v326_v29 = vpop.f32.mrf.mxu3 }
 0x132   : > { %493 = vst.msk [vmem:[%s187_s9 + $0x18] sm:$0xff] %vm257_vm1, %v326_v29 }
 0x133 PF: > { %s14_s12 = sadd.s32 1, %s577_s12  }
 0x134   : > { %p11_p7 = scmp.ge.s32.totalorder %s14_s12, 4  }
 0x136   :  { %13 = sbr.rel (!%p11_p7) target bundleno = 1 (0x1), region = 71 }
 0x13b   :  { %425 = vsyncpa [#allocation3], 1 }
 0x13c   :  { %427 = vsyncpa [#allocation3 + $0x1], 1 }

// kernel: forward.4
= control target key start
LH: loop header
LB: loop body
LE: loop exit
PB: predicated region body
PF: predicated region fallthrough
CT: control target
= control target key end

     0   :  { %s5505_s0 = inlined_call_operand.vmem [shape: f32[2,17,48], index: 0, kind: input, shape index: {}]   ;;  %s5506_s1 = inlined_call_operand.vmem [shape: f32[17,64], index: 1, kind: input, shape index: {}]   ;;  %s5507_s2 = inlined_call_operand.vmem [shape: bf16[48,64], index: 2, kind: input, shape index: {}]   ;;  %s5508_s3 = inlined_call_operand.vmem [shape: bf16[2,64,192], index: 3, kind: input, shape index: {}]   ;;  %s5509_s4 = inlined_call_operand.vmem [shape: f32[2,1,192], index: 4, kind: input, shape index: {}]   ;;  %s5510_s5 = inlined_call_operand.vmem [shape: bf16[2,64,64], index: 5, kind: input, shape index: {}]   ;;  %s5511_s6 = inlined_call_operand.vmem [shape: f32[2,1,64], index: 6, kind: input, shape index: {}]   ;;  %s5512_s7 = inlined_call_operand.vmem [shape: f32[2,1,64], index: 7, kind: input, shape index: {}]   ;;  %s5513_s8 = inlined_call_operand.vmem [shape: f32[2,1,64], index: 8, kind: input, shape index: {}]   ;;  %s5514_s9 = inlined_call_operand.vmem [shape: f32[2,1,64], index: 9, kind: input, shape index: {}]   ;;  %s5515_s10 = inlined_call_operand.vmem [shape: f32[2,1,64], index: 10, kind: input, shape index: {}]   ;;  %s5516_s11 = inlined_call_operand.vmem [shape: bf16[2,64,256], index: 11, kind: input, shape index: {}]   ;;  %s5517_s12 = inlined_call_operand.vmem [shape: f32[2,1,256], index: 12, kind: input, shape index: {}]   ;;  %s5518_s13 = inlined_call_operand.vmem [shape: bf16[2,256,64], index: 13, kind: input, shape index: {}]   ;;  %s5519_s14 = inlined_call_operand.vmem [shape: f32[2,1,64], index: 14, kind: input, shape index: {}]   ;;  %s5520_s15 = inlined_call_operand.hbm [shape: f32[1,64], index: 15, kind: input, shape index: {}]   ;;  %s5521_s16 = inlined_call_operand.hbm [shape: f32[1,64], index: 16, kind: input, shape index: {}]   ;;  %s5522_s17 = inlined_call_operand.vmem [shape: bf16[64,48], index: 17, kind: input, shape index: {}]   ;;  %s5523_s18 = inlined_call_operand.hbm [shape: f32[1,48], index: 18, kind: input, shape index: {}]   ;;  %s5524_s19 = inlined_call_operand.vmem [shape: bf16[48,32], index: 19, kind: input, shape index: {}]   ;;  %s5525_s20 = inlined_call_operand.hbm [shape: f32[1,32], index: 20, kind: input, shape index: {}]   ;;  %s5526_s21 = inlined_call_operand.vmem [shape: bf16[2,16,32], index: 21, kind: output, shape index: {}]  }
   0x1   :  { %5546 = sst [smem:[#allocation12_spill]] %s5505_s0 }
   0x2   :  { %5547 = sst [smem:[#allocation13_spill]] %s5506_s1 }
   0x3   :  { %5548 = sst [smem:[#allocation14_spill]] %s5507_s2 }
   0x4   :  { %5549 = sst [smem:[#allocation15_spill]] %s5508_s3 }
   0x5   :  { %5550 = sst [smem:[#allocation16_spill]] %s5509_s4 }
   0x6   :  { %5551 = sst [smem:[#allocation17_spill]] %s5510_s5 }
   0x7   :  { %5552 = sst [smem:[#allocation18_spill]] %s5520_s15 }
   0x8   :  { %5553 = sst [smem:[#allocation19_spill]] %s5521_s16 }
   0x9   :  { %26 = vsyncpa [#allocation3], 0 }
   0xa   :  { %27 = vsyncpa [#allocation5], 0 }
   0xb   :  { %28 = vsyncpa [#allocation8], 0  ;;  %s4449_s2 = smov 0  }
   0xc LB: > { %s5554_s16 = sld [smem:[#allocation19_spill]]  ;;  %s4458_s3 = sadd.s32 4294967295, %s4324_s2   ;;  %s4324_s2 = sphi %s4449_s2, %s34_s2  }
   0xd   : > { %p3377_p0 = scmp.ge.s32.totalorder %s4324_s2, 1  ;;  %p511_p1 = scmp.lt.s32.totalorder %s4324_s2, 3 }
   0xe   : > { %p3959_p2 = scmp.eq.s32.totalorder %s4458_s3, 0  ;;  %s4326_s29 = smov [#allocation4]  }
   0xf   : > { %p4463_p3 = pnand %p3377_p0, %p511_p1  ;;  %s579_s0 = sshll.u32 %s4326_s29, 4  ;;  %s580_s0 = int_to_ptr.vmem [resolvable:$true] %s579_s0 }
  0x10   : > { %s5556_s15 = sld [smem:[#allocation18_spill]]  ;;  %s592_s1 = sshll.u32 %s5523_s18, 4  ;;  %s593_s1 = int_to_ptr.hbm [resolvable:$true] %s592_s1 }
  0x11   : > { %p3946_p4 = pneg %p4463_p3  ;;  %s4327_s25 = smov [#allocation2]  }
  0x12   : > { %s577_s27 = sshll.u32 %s5554_s16, 4  ;;  %s567_s26 = sshll.u32 %s4327_s25, 4  ;;  %s578_s27 = int_to_ptr.hbm [resolvable:$true] %s577_s27  ;;  %s568_s26 = int_to_ptr.vmem [resolvable:$true] %s567_s26 }
  0x13   : > { %p4477_p5 = pnand %p3959_p2, %p3946_p4  ;;  %s4328_s29 = smov [#allocation6]  }
  0x14   : > { %s594_s4 = sshll.u32 %s4328_s29, 4  ;;  %s607_s23 = sshll.u32 %s5525_s20, 4  ;;  %s595_s4 = int_to_ptr.vmem [resolvable:$true] %s594_s4  ;;  %s608_s23 = int_to_ptr.hbm [resolvable:$true] %s607_s23 }
  0x15   : > { %3952 = dma.hbm_to_vmem [thread:$0]  (!%p4477_p5), %s578_s27, 16, %s580_s0, [#allocation5]  }
  0x16   : > { %s565_s5 = sshll.u32 %s5556_s15, 4  ;;  %s4329_s15 = smov [#allocation7]   ;;  %s566_s5 = int_to_ptr.hbm [resolvable:$true] %s565_s5 }
  0x17   : > { %3949 = dma.hbm_to_vmem [thread:$0]  (!%p4477_p5), %s566_s5, 16, %s568_s26, [#allocation3]  }
  0x18   : > { %3955 = dma.hbm_to_vmem [thread:$0]  (!%p4477_p5), %s593_s1, 16, %s595_s4, [#allocation5]  }
  0x19   : > { %s609_s16 = sshll.u32 %s4329_s15, 4  ;;  %630 = sbr.rel (%p4463_p3) target bundleno = 4884 (0x1314), region = 104  ;;  %s610_s16 = int_to_ptr.vmem [resolvable:$true] %s609_s16 }
  0x1a   : > { %3958 = dma.hbm_to_vmem [thread:$0]  (!%p4477_p5), %s608_s23, 16, %s610_s16, [#allocation8]  }
  0x1e   : > { %4311 = dma.done.wait (%p3959_p2), [#allocation3], 16  }
  0x1f   : > { %4313 = vsyncadd (%p3959_p2), [#allocation3], 4294967280 }
  0x20   : > { %4315 = dma.done.wait (%p3959_p2), [#allocation5], 32  }
  0x21   : > { %4317 = vsyncadd (%p3959_p2), [#allocation5], 4294967264 }
  0x22   : > { %4319 = dma.done.wait (%p3959_p2), [#allocation8], 16  }
  0x23   : > { %4321 = vsyncadd (%p3959_p2), [#allocation8], 4294967280  ;;  %p706_p6 = scmp.lt.s32.totalorder %s4458_s3, 1  ;;  %s5558_s28 = sld [smem:[#allocation14_spill]]  ;;  %vm749_vm0 = vcmask 392192   ;;  %vm783_vm1 = vcmask 516096  }
  0x24   : > { %s5559_s1 = sld [smem:[#allocation12_spill]]  ;;  %vm776_vm2 = vcmask 523264   ;;  %v4330_v21 = vmov 64.0   ;;  %s5544_s26 = smov 64   ;;  %vm1045_vm13 = vcmask 1040384   ;;  %vm969_vm14 = vcmask 130048  }
  0x25   : > { %s5574_s3 = smov (!%p706_p6, %s4458_s3), 1  ;;  %s5560_s23 = sld [smem:[#allocation13_spill]]  ;;  %4034 = vrcp.f32 %v4330_v21  ;;  %vm1000_vm15 = vcmask 138240  }
  0x26   : > { %s3929_s15 = smul.u32 24, %s5574_s3  ;;  %s5562_s25 = sld [smem:[#allocation16_spill]] }
  0x27   : > { %s5538_s29 = smov 112   ;;  %s5542_s4 = smov 48  }
  0x28   : > { %s5536_s30 = smov 16   ;;  %s5540_s22 = smov 32  }
  0x29   : > { %v3846_v0 = vld [vmem:[%s5558_s28 + $0x10] sm:$0xff]  ;;  %v3845_v1 = vld [vmem:[%s5558_s28 + $0x8] sm:$0xff]  ;;  %v3844_v2 = vld [vmem:[%s5558_s28] sm:$0xff]  ;;  %s5532_s16 = smov 80   ;;  %s5563_s5 = sld [smem:[#allocation17_spill]] }
  0x2a   : > { %s710_s24 = scalar_lea.vmem %s5559_s1, %s3929_s15  ;;  %761 = vmatpush.bf16.msra.mxu0 %v3846_v0  ;;  %3926 = vmatpush.bf16.msra.mxu1 %v3846_v0  ;;  %s5534_s15 = smov 96  }
  0x2b   : > { %v717_v3 = vld [vmem:[%s710_s24] sm:$0xff]  ;;  %v718_v4 = vld [vmem:[%s710_s24 + $0x8] sm:$0xff]  ;;  %v719_v5 = vld [vmem:[%s710_s24 + $0x10] sm:$0x1]  ;;  %v4035_v22 = vpop.eup %4034  ;;  %s5561_s24 = sld [smem:[#allocation15_spill]]  ;;  %s5567_s27 = smov 112  }
  0x2c   : > { %v726_v6 = vpack.c.bf16 %v718_v4, %v717_v3  ;;  %v727_v7 = vpack.c.bf16 %v719_v5, %v719_v5  ;;  %v728_v8 = vld [vmem:[%s5560_s23] sm:$0xff]  ;;  %v730_v9 = vld [vmem:[%s5560_s23 + $0x10] sm:$0x1]  ;;  %v729_v16 = vld [vmem:[%s5560_s23 + $0x8] sm:$0xff]  ;;  %v788_v23 = vmul.f32 64.0, %v4035_v22  ;;  %vm792_vm3 = vweird.f32 %v4035_v22  ;;  %s5568_s0 = smov 16  }
  0x2d   : > { %s5569_s1 = smov 96  }
  0x2e   : > { %762 = vmatpush.bf16.msra.mxu0 %v3845_v1  ;;  %3927 = vmatpush.bf16.msra.mxu1 %v3845_v1  ;;  %v789_v24 = vsub.f32 1.0, %v788_v23 }
  0x30   : > { %v790_v25 = vmul.f32 %v4035_v22, %v789_v24 }
  0x31   : > { %v3431_v43 = vld [vmem:[%s5561_s24 + $0x30] sm:$0xf]  ;;  %v3854_v44 = vld [vmem:[%s5561_s24 + $0x34] sm:$0xf0]  ;;  %v3853_v45 = vld [vmem:[%s5561_s24 + $0x34] sm:$0xf] }
  0x32   : > { %763 = vmatpush.bf16.msra.mxu0 %v3844_v2  ;;  %3928 = vmatpush.bf16.msra.mxu1 %v3844_v2  ;;  %v791_v26 = vadd.f32 %v4035_v22, %v790_v25  ;;  %v3432_v46 = vor.u32 %v3854_v44, %v3431_v43  ;;  %v3433_v47 = vld [vmem:[%s5561_s24 + $0x38] sm:$0xf0]  ;;  %v3423_v49 = vld [vmem:[%s5561_s24 + $0x20] sm:$0xf]  ;;  %v3852_v50 = vld [vmem:[%s5561_s24 + $0x24] sm:$0xf0] }
  0x33   : > { %v3436_v48 = vor.u32 %v3853_v45, %v3433_v47  ;;  %v3851_v51 = vld [vmem:[%s5561_s24 + $0x24] sm:$0xf]  ;;  %v3424_v52 = vor.u32 %v3852_v50, %v3423_v49  ;;  %v3425_v53 = vld [vmem:[%s5561_s24 + $0x28] sm:$0xf0]  ;;  %v3415_v55 = vld [vmem:[%s5561_s24 + $0x10] sm:$0xf] }
  0x34   : > { %v4546_v27 = vsel %vm792_vm3, %v4035_v22, %v791_v26  ;;  %v3428_v54 = vor.u32 %v3851_v51, %v3425_v53  ;;  %v3850_v56 = vld [vmem:[%s5561_s24 + $0x14] sm:$0xf0]  ;;  %v3849_v57 = vld [vmem:[%s5561_s24 + $0x14] sm:$0xf]  ;;  %v3417_v59 = vld [vmem:[%s5561_s24 + $0x18] sm:$0xf0] }
  0x35   : > { %3403 = vmatmul.msk.bf16.vlgmr.msra.gmra.mxu0 %vm749_vm0, %v726_v6  ;;  %3404 = vmatmul.msk.bf16.vlgmr.msra.gmra.mxu1 %vm749_vm0, %v727_v7  ;;  %v3416_v58 = vor.u32 %v3850_v56, %v3415_v55  ;;  %v3420_v60 = vor.u32 %v3849_v57, %v3417_v59  ;;  %v3407_v63 = vld [vmem:[%s5561_s24] sm:$0xf]  ;;  %v3848_v0 = vld [vmem:[%s5561_s24 + $0x4] sm:$0xf0]  ;;  %v3847_v1 = vld [vmem:[%s5561_s24 + $0x4] sm:$0xf] }
  0x36   : > { %929 = vmatpush.bf16.msrb.mxu1 %v3432_v46  ;;  %947 = vmatpush.bf16.msra.mxu2 %v3436_v48  ;;  %v3408_v2 = vor.u32 %v3848_v0, %v3407_v63  ;;  %v3409_v3 = vld [vmem:[%s5561_s24 + $0x8] sm:$0xf0]  ;;  %vm1007_vm3 = vcmask 131072  }
  0x37   : > { %v3412_v5 = vor.u32 %v3847_v1, %v3409_v3 }
  0x3a   : > { %930 = vmatpush.bf16.msrb.mxu1 %v3424_v52  ;;  %948 = vmatpush.bf16.msra.mxu2 %v3428_v54  ;;  %v873_v52 = vld [vmem:[%s5562_s25] sm:$0x3] }
  0x3b   : > { %v875_v53 = vperm.slane %v873_v52, 0 }
  0x3e   : > { %931 = vmatpush.bf16.msrb.mxu1 %v3416_v58  ;;  %949 = vmatpush.bf16.msra.mxu2 %v3420_v60 }
  0x42   : > { %932 = vmatpush.bf16.msrb.mxu1 %v3408_v2  ;;  %950 = vmatpush.bf16.msra.mxu2 %v3412_v5  ;;  %v4334_v2 = vmov 0  }
  0x43   : > { %v4648_v3 = vsel %vm1045_vm13, 65535, %v4334_v2 }
  0xb2   : > { %v765_v10 = vpop.f32.mrf.mxu0  ;;  %v770_v11 = vpop.f32.mrf.mxu1 }
  0xb3   : > { %v4531_v12 = vadd.f32 %v765_v10, %v728_v8  ;;  %v4533_v13 = vadd.f32 %v770_v11, %v730_v9 }
  0xb5   : > { %v784_v14 = vsel %vm783_vm1, %v4533_v13, 0.0  ;;  %v777_v15 = vsel %vm776_vm2, %v4531_v12, 0.0 }
  0xb6   : > { %785 = vadd.xlane.f32.xlu1 %v784_v14  ;;  %778 = vadd.xlane.f32.xlu0 %v777_v15 }
  0xba   : > { %v767_v17 = vpop.f32.mrf.mxu0  ;;  %v772_v18 = vpop.f32.mrf.mxu1 }
  0xbb   : > { %v4542_v19 = vadd.f32 %v767_v17, %v729_v16 }
  0xbd   : > { %v780_v20 = vsel %vm776_vm2, %v4542_v19, 0.0 }
  0xbe   : > { %781 = vadd.xlane.f32.xlu0 %v780_v20 }
 0x129   : > { %v779_v28 = vpop.xlane.xlu0 %778  ;;  %v786_v33 = vpop.xlane.xlu1 %785 }
 0x12a   : > { %v794_v29 = vmul.f32 %v4546_v27, %v779_v28  ;;  %v796_v36 = vmul.f32 %v4546_v27, %v786_v33 }
 0x12c   : > { %v4550_v30 = vsub.f32 %v4531_v12, %v794_v29  ;;  %v4563_v39 = vsub.f32 %v4533_v13, %v796_v36 }
 0x12e   : > { %v800_v31 = vmul.f32 %v4550_v30, %v4550_v30  ;;  %v802_v41 = vmul.f32 %v4563_v39, %v4563_v39 }
 0x130   : > { %v803_v32 = vsel %vm776_vm2, %v800_v31, 0.0  ;;  %v809_v42 = vsel %vm783_vm1, %v802_v41, 0.0  ;;  %v4018_v31 = vld [vmem:[%s5512_s7] ss:$0 sm:$0xff] }
 0x131   : > { %804 = vadd.xlane.f32.xlu1 %v803_v32  ;;  %v782_v34 = vpop.xlane.xlu0 %781 }
 0x132   : > { %v795_v35 = vmul.f32 %v4546_v27, %v782_v34 }
 0x134   : > { %v4558_v37 = vsub.f32 %v4542_v19, %v795_v35 }
 0x136   : > { %v801_v38 = vmul.f32 %v4558_v37, %v4558_v37 }
 0x138   : > { %v806_v40 = vsel %vm776_vm2, %v801_v38, 0.0 }
 0x139   : > { %807 = vadd.xlane.f32.xlu2 %v806_v40  ;;  %v4019_v40 = vld [vmem:[%s5513_s8] ss:$0 sm:$0xff] }
 0x141   : > { %810 = vadd.xlane.f32.xlu2 %v809_v42 }
 0x1a4   : > { %v805_v61 = vpop.xlane.xlu1 %804 }
 0x1a5   : > { %v812_v62 = vmul.f32 %v805_v61, %v4546_v27 }
 0x1a7   : > { %v815_v4 = vadd.f32 1e-06, %v812_v62  ;;  %v876_v62 = vperm.slane %v873_v52, 1 }
 0x1a9   : > { %4036 = vrsqrt.f32 %v815_v4  ;;  %vm824_vm5 = vweird.f32 %v815_v4 }
 0x1ac   : > { %v808_v6 = vpop.xlane.xlu2 %807 }
 0x1ad   : > { %v813_v7 = vmul.f32 %v808_v6, %v4546_v27 }
 0x1af   : > { %v4037_v8 = vpop.eup %4036  ;;  %v816_v9 = vadd.f32 1e-06, %v813_v7 }
 0x1b0   : > { %v819_v10 = vmul.f32 %v4037_v8, %v815_v4  ;;  %vm825_vm4 = vweird.f32 %v4037_v8 }
 0x1b1   : > { %4038 = vrsqrt.f32 %v816_v9  ;;  %vm826_vm6 = vmor %vm824_vm5, %vm825_vm4  ;;  %vm834_vm8 = vweird.f32 %v816_v9  ;;  %vm1425_vm4 = vcmask 261120  }
 0x1b2   : > { %v820_v11 = vmul.f32 %v4037_v8, %v819_v10 }
 0x1b4   : > { %v821_v14 = vmul.f32 0.5, %v820_v11  ;;  %v811_v15 = vpop.xlane.xlu2 %810 }
 0x1b5   : > { %v814_v16 = vmul.f32 %v811_v15, %v4546_v27 }
 0x1b6   : > { %v822_v17 = vsub.f32 1.5, %v821_v14 }
 0x1b7   : > { %v4039_v18 = vpop.eup %4038  ;;  %v817_v20 = vadd.f32 1e-06, %v814_v16 }
 0x1b8   : > { %v823_v21 = vmul.f32 %v4037_v8, %v822_v17  ;;  %v829_v22 = vmul.f32 %v4039_v18, %v816_v9  ;;  %vm835_vm7 = vweird.f32 %v4039_v18 }
 0x1b9   : > { %4040 = vrsqrt.f32 %v817_v20  ;;  %vm836_vm9 = vmor %vm834_vm8, %vm835_vm7  ;;  %vm844_vm11 = vweird.f32 %v817_v20 }
 0x1ba   : > { %v830_v23 = vmul.f32 %v4039_v18, %v829_v22  ;;  %v827_v24 = vsel %vm826_vm6, %v4037_v8, %v823_v21 }
 0x1bb   : > { %v848_v29 = vmul.f32 %v827_v24, %v4550_v30 }
 0x1bc   : > { %v831_v25 = vmul.f32 0.5, %v830_v23 }
 0x1bd   : > { %v854_v38 = vmul.f32 %v4018_v31, %v848_v29 }
 0x1be   : > { %v832_v26 = vsub.f32 1.5, %v831_v25 }
 0x1bf   : > { %v4041_v28 = vpop.eup %4040  ;;  %v860_v43 = vadd.f32 %v4019_v40, %v854_v38 }
 0x1c0   : > { %v833_v32 = vmul.f32 %v4039_v18, %v832_v26  ;;  %v839_v33 = vmul.f32 %v4041_v28, %v817_v20  ;;  %vm845_vm10 = vweird.f32 %v4041_v28 }
 0x1c1   : > { %vm846_vm12 = vmor %vm844_vm11, %vm845_vm10 }
 0x1c2   : > { %v837_v34 = vsel %vm836_vm9, %v4039_v18, %v833_v32  ;;  %v840_v35 = vmul.f32 %v4041_v28, %v839_v33 }
 0x1c3   : > { %v849_v36 = vmul.f32 %v837_v34, %v4558_v37 }
 0x1c4   : > { %v841_v41 = vmul.f32 0.5, %v840_v35 }
 0x1c5   : > { %v855_v42 = vmul.f32 %v4018_v31, %v849_v36 }
 0x1c6   : > { %v842_v30 = vsub.f32 1.5, %v841_v41 }
 0x1c7   : > { %v861_v44 = vadd.f32 %v4019_v40, %v855_v42 }
 0x1c8   : > { %v843_v45 = vmul.f32 %v4041_v28, %v842_v30 }
 0x1c9   : > { %v871_v46 = vpack.c.bf16 %v861_v44, %v860_v43 }
 0x1ca   : > { %v847_v47 = vsel %vm846_vm12, %v4041_v28, %v843_v45 }
 0x1cb   : > { %3437 = vmatmul.msk.bf16.vlgmr.msrb.gmra.mxu1 %vm776_vm2, %v871_v46  ;;  %3439 = vmatmul.msk.bf16.vlgmr.msra.gmra.mxu2 %vm776_vm2, %v871_v46  ;;  %v850_v37 = vmul.f32 %v847_v47, %v4563_v39 }
 0x1cd   : > { %v856_v48 = vmul.f32 %v4018_v31, %v850_v37 }
 0x1cf   : > { %v862_v49 = vadd.f32 %v4019_v40, %v856_v48 }
 0x1d1   : > { %v872_v50 = vpack.c.bf16 %v862_v49, %v862_v49 }
 0x1db   : > { %3438 = vmatmul.msk.bf16.gmra.mxu1 %vm776_vm2, %v872_v50  ;;  %3440 = vmatmul.msk.bf16.gmra.mxu2 %vm776_vm2, %v872_v50 }
 0x248   : > { %v934_v51 = vpop.f32.mrf.mxu1 }
 0x249   : > { %v935_v56 = vadd.f32 %v934_v51, %v875_v53 }
 0x24e   : > { %v952_v54 = vpop.f32.mrf.mxu2 }
 0x24f   : > { %v953_v7 = vadd.f32 %v952_v54, %v876_v62 }
 0x250   : > { %v936_v55 = vpop.f32.mrf.mxu1 }
 0x251   : > { %v937_v57 = vadd.f32 %v936_v55, %v875_v53 }
 0x253   : > { %v4636_v58 = vpack.c.bf16 %v937_v57, %v935_v56 }
 0x255   : > { %965 = vrot.lane.b32.xlu2 %v4636_v58, %s5544_s26 }
 0x256   : > { %v954_v39 = vpop.f32.mrf.mxu2 }
 0x257   : > { %v955_v5 = vadd.f32 %v954_v39, %v876_v62 }
 0x258   : > { %v939_v59 = vpop.f32.mrf.mxu1 }
 0x259   : > { %v940_v60 = vadd.f32 %v939_v59, %v875_v53  ;;  %v4660_v9 = vpack.c.bf16 %v955_v5, %v953_v7 }
 0x25b   : > { %v4640_v61 = vpack.c.bf16 %v940_v60, %v940_v60 }
 0x25d   : > { %1069 = vrot.lane.b32.xlu2 %v4636_v58, %s5538_s29  ;;  %1075 = vrot.lane.b32.xlu1 %v4640_v61, %s5542_s4 }
 0x25e   : > { %967 = vrot.lane.b32.xlu0 %v4640_v61, %s5544_s26  ;;  %v957_v63 = vpop.f32.mrf.mxu2 }
 0x25f   : > { %v958_v0 = vadd.f32 %v957_v63, %v876_v62 }
 0x260   : > { %v941_v1 = vpop.f32.mrf.mxu1 }
 0x261   : > { %v4650_v4 = vpack.c.bf16 %v958_v0, %v958_v0 }
 0x263   : > { %v1049_v6 = vand.u32 %v4648_v3, %v4650_v4 }
 0x265   : > { %1057 = vmatpush.bf16.msrb.mxu0 %v1049_v6  ;;  %1287 = vrot.lane.b32.xlu2 %v4640_v61, %s5536_s30 }
 0x266   : > { %1182 = vrot.lane.b32.xlu1 %v4640_v61, %s5540_s22  ;;  %1073 = vrot.lane.b32.xlu0 %v4636_v58, %s5542_s4  ;;  %v959_v8 = vpop.f32.mrf.mxu2 }
 0x269   : > { %1058 = vmatpush.bf16.msrb.mxu0 %v4660_v9 }
 0x26d   : > { %1176 = vrot.lane.b32.xlu2 %v4636_v58, %s5534_s15 }
 0x26e   : > { %1180 = vrot.lane.b32.xlu1 %v4636_v58, %s5540_s22  ;;  %1071 = vrot.lane.b32.xlu0 %v4640_v61, %s5538_s29 }
 0x275   : > { %1283 = vrot.lane.b32.xlu2 %v4640_v61, %s5532_s16 }
 0x276   : > { %1281 = vrot.lane.b32.xlu1 %v4636_v58, %s5532_s16  ;;  %1285 = vrot.lane.b32.xlu0 %v4636_v58, %s5536_s30 }
 0x27e   : > { %1178 = vrot.lane.b32.xlu0 %v4640_v61, %s5534_s15 }
 0x2af   : > { %v966_v10 = vpop.permute.xlu2 %965 }
 0x2b0   : > { %v977_v23 = vsel %vm969_vm14, %v966_v10, 0 }
 0x2b7   : > { %v1070_v11 = vpop.permute.xlu2 %1069 }
 0x2bf   : > { %v1288_v18 = vpop.permute.xlu2 %1287 }
 0x2c0   : > { %v1299_v25 = vsel %vm969_vm14, %v1288_v18, 0 }
 0x2c7   : > { %v1177_v33 = vpop.permute.xlu2 %1176 }
 0x2cf   : > { %v1076_v14 = vpop.permute.xlu1 %1075  ;;  %v1284_v35 = vpop.permute.xlu2 %1283 }
 0x2d0   : > { %v1087_v15 = vsel %vm969_vm14, %v1076_v14, 0  ;;  %v968_v16 = vpop.permute.xlu0 %967 }
 0x2d1   : > { %v980_v17 = vsel %vm969_vm14, %v968_v16, 0  ;;  %1095 = vmatpush.bf16.xpose.msra.mxu1 %v1087_v15 }
 0x2d2   : > { %988 = vmatpush.bf16.xpose.msra.mxu3 %v980_v17 }
 0x2d8   : > { %v1183_v20 = vpop.permute.xlu1 %1182  ;;  %v1074_v21 = vpop.permute.xlu0 %1073 }
 0x2d9   : > { %v1084_v22 = vsel %vm969_vm14, %v1074_v21, 0  ;;  %v1194_v24 = vsel %vm969_vm14, %v1183_v20, 0 }
 0x2da   : > { %989 = vmatpush.bf16.xpose.msra.mxu3 %v977_v23  ;;  %1096 = vmatpush.bf16.xpose.msra.mxu1 %v1084_v22 }
 0x2e0   : > { %v1181_v26 = vpop.permute.xlu1 %1180  ;;  %v1072_v28 = vpop.permute.xlu0 %1071 }
 0x2e1   : > { %3441 = vmatmul.msk.bf16.vlgmr.msra.gmra.mxu3 %vm969_vm14, %v4636_v58  ;;  %3445 = vmatmul.msk.bf16.vlgmr.msra.gmra.mxu1 %vm969_vm14, %v1070_v11  ;;  %v1191_v29 = vsel %vm969_vm14, %v1181_v26, 0 }
 0x2e2   : > { %1202 = vmatpush.bf16.xpose.msrb.mxu3 %v1194_v24  ;;  %1307 = vmatpush.bf16.xpose.msrb.mxu1 %v1299_v25 }
 0x2e8   : > { %v1286_v31 = vpop.permute.xlu0 %1285  ;;  %v1282_v34 = vpop.permute.xlu1 %1281 }
 0x2e9   : > { %v1296_v32 = vsel %vm969_vm14, %v1286_v31, 0 }
 0x2ea   : > { %1203 = vmatpush.bf16.xpose.msrb.mxu3 %v1191_v29  ;;  %1308 = vmatpush.bf16.xpose.msrb.mxu1 %v1296_v32 }
 0x2f0   : > { %v1179_v36 = vpop.permute.xlu0 %1178 }
 0x2f1   : > { %3442 = vmatmul.msk.bf16.gmra.mxu3 %vm969_vm14, %v4640_v61  ;;  %3446 = vmatmul.msk.bf16.gmra.mxu1 %vm969_vm14, %v1072_v28 }
 0x301   : > { %3449 = vmatmul.msk.bf16.vlgmr.msrb.gmra.mxu3 %vm969_vm14, %v1177_v33  ;;  %3453 = vmatmul.msk.bf16.vlgmr.msrb.gmra.mxu1 %vm969_vm14, %v1282_v34 }
 0x311   : > { %3450 = vmatmul.msk.bf16.gmra.mxu3 %vm969_vm14, %v1179_v36  ;;  %3454 = vmatmul.msk.bf16.gmra.mxu1 %vm969_vm14, %v1284_v35 }
 0x35e   : > { %v1098_v38 = vpop.f32.mrf.mxu1 }
 0x35f   : > { %v1107_v40 = vsel %vm1000_vm15, %v1098_v38, -inf }
 0x360   : > { %1108 = vmax.xlane.f32.xlu1 %v1107_v40 }
 0x364   : > { %v991_v41 = vpop.f32.mrf.mxu3 }
 0x365   : > { %v1001_v42 = vsel %vm1000_vm15, %v991_v41, -inf }
 0x366   : > { %1002 = vmax.xlane.f32.xlu2 %v1001_v42  ;;  %v1100_v30 = vpop.f32.mrf.mxu1 }
 0x367   : > { %v1110_v43 = vsel %vm1000_vm15, %v1100_v30, -inf }
 0x368   : > { %1111 = vmax.xlane.f32.xlu0 %v1110_v43 }
 0x36c   : > { %v993_v44 = vpop.f32.mrf.mxu3 }
 0x36d   : > { %v1004_v45 = vsel %vm1000_vm15, %v993_v44, -inf }
 0x36e   : > { %1005 = vmax.xlane.f32.xlu1 %v1004_v45  ;;  %v4699_v46 = vpop.f32.mrf.mxu1 }
 0x36f   : > { %v1113_v58 = vsel %vm1007_vm3, %v4699_v46, -inf }
 0x374   : > { %v4701_v47 = vpop.f32.mrf.mxu3 }
 0x375   : > { %v1008_v37 = vsel %vm1007_vm3, %v4701_v47, -inf }
 0x376   : > { %1009 = vmax.xlane.f32.xlu2 %v1008_v37  ;;  %v1105_v48 = vpop.f32.mrf.mxu1 }
 0x37c   : > { %v998_v49 = vpop.f32.mrf.mxu3  ;;  %1144 = vrot.lane.b32.xlu0 %v4660_v9, %s5538_s29 }
 0x37e   : > { %v4707_v50 = vpop.f32.mrf.mxu1 }
 0x37f   : > { %v1319_v59 = vsel %vm1000_vm15, %v4707_v50, -inf }
 0x384   : > { %v4709_v51 = vpop.f32.mrf.mxu3 }
 0x385   : > { %v1214_v60 = vsel %vm1000_vm15, %v4709_v51, -inf }
 0x386   : > { %v4711_v52 = vpop.f32.mrf.mxu1 }
 0x387   : > { %1146 = vrot.lane.b32.xlu1 %v4650_v4, %s5538_s29  ;;  %v1322_v39 = vsel %vm1000_vm15, %v4711_v52, -inf  ;;  %s5570_s29 = smov 80  }
 0x38c   : > { %v4715_v53 = vpop.f32.mrf.mxu3 }
 0x38d   : > { %v1217_v61 = vsel %vm1000_vm15, %v4715_v53, -inf }
 0x38e   : > { %1356 = vrot.lane.b32.xlu2 %v4650_v4, %s5532_s16  ;;  %v4719_v54 = vpop.f32.mrf.mxu1 }
 0x38f   : > { %v1325_v63 = vsel %vm1007_vm3, %v4719_v54, -inf }
 0x394   : > { %v4721_v55 = vpop.f32.mrf.mxu3 }
 0x395   : > { %v1220_v62 = vsel %vm1007_vm3, %v4721_v55, -inf }
 0x396   : > { %v1317_v56 = vpop.f32.mrf.mxu1 }
 0x39c   : > { %v1212_v57 = vpop.f32.mrf.mxu3 }
 0x3a6   : > { %1114 = vmax.xlane.f32.xlu0 %v1113_v58 }
 0x3ae   : > { %1323 = vmax.xlane.f32.xlu0 %v1322_v39 }
 0x3b1   : > { %1320 = vmax.xlane.f32.xlu1 %v1319_v59 }
 0x3b7   : > { %1215 = vmax.xlane.f32.xlu2 %v1214_v60 }
 0x3b9   : > { %1218 = vmax.xlane.f32.xlu1 %v1217_v61 }
 0x3bf   : > { %1221 = vmax.xlane.f32.xlu2 %v1220_v62 }
 0x3c1   : > { %1326 = vmax.xlane.f32.xlu1 %v1325_v63 }
 0x3d3   : > { %v1109_v0 = vpop.xlane.xlu1 %1108 }
 0x3d4   : > { %v1116_v1 = vsub.f32 %v1098_v38, %v1109_v0 }
 0x3d6   : > { %v1119_v2 = vmul.f32 1.442695, %v1116_v1 }
 0x3d8   : > { %4042 = vpow2.f32 %v1119_v2 }
 0x3d9   : > { %v1003_v5 = vpop.xlane.xlu2 %1002 }
 0x3da   : > { %v1011_v6 = vsub.f32 %v991_v41, %v1003_v5 }
 0x3db   : > { %v1112_v7 = vpop.xlane.xlu0 %1111 }
 0x3dc   : > { %v1014_v8 = vmul.f32 1.442695, %v1011_v6  ;;  %v1117_v10 = vsub.f32 %v1100_v30, %v1112_v7 }
 0x3de   : > { %v4737_v11 = vpop.eup %4042  ;;  %4044 = vpow2.f32 %v1014_v8  ;;  %v1121_v14 = vmul.f32 1.442695, %v1117_v10 }
 0x3df   : > { %v1125_v15 = vsel %vm1000_vm15, %v4737_v11, 0.0 }
 0x3e0   : > { %4046 = vpow2.f32 %v1121_v14  ;;  %1126 = vadd.xlane.f32.xlu0 %v1125_v15 }
 0x3e1   : > { %v1006_v16 = vpop.xlane.xlu1 %1005 }
 0x3e2   : > { %v1012_v17 = vsub.f32 %v993_v44, %v1006_v16 }
 0x3e4   : > { %v4741_v18 = vpop.eup %4044  ;;  %v1016_v20 = vmul.f32 1.442695, %v1012_v17 }
 0x3e5   : > { %v1020_v23 = vsel %vm1000_vm15, %v4741_v18, 0.0 }
 0x3e6   : > { %v4743_v21 = vpop.eup %4046  ;;  %4048 = vpow2.f32 %v1016_v20 }
 0x3e7   : > { %v1128_v22 = vsel %vm1000_vm15, %v4743_v21, 0.0 }
 0x3e8   : > { %1129 = vadd.xlane.f32.xlu2 %v1128_v22  ;;  %1021 = vadd.xlane.f32.xlu0 %v1020_v23 }
 0x3e9   : > { %v1010_v26 = vpop.xlane.xlu2 %1009 }
 0x3ea   : > { %v1013_v36 = vsub.f32 %v4701_v47, %v1010_v26 }
 0x3ec   : > { %v4749_v24 = vpop.eup %4048  ;;  %v1018_v40 = vmul.f32 1.442695, %v1013_v36 }
 0x3ed   : > { %v1023_v25 = vsel %vm1000_vm15, %v4749_v24, 0.0 }
 0x3ee   : > { %v1145_v32 = vpop.permute.xlu0 %1144 }
 0x3f0   : > { %1024 = vadd.xlane.f32.xlu2 %v1023_v25 }
 0x3f1   : > { %v1357_v31 = vpop.permute.xlu2 %1356 }
 0x3f2   : > { %v1366_v33 = vand.u32 %v1357_v31, %v4648_v3 }
 0x3f9   : > { %v1147_v28 = vpop.permute.xlu1 %1146 }
 0x3fa   : > { %v1156_v29 = vand.u32 %v1147_v28, %v4648_v3 }
 0x3fc   : > { %1164 = vmatpush.bf16.msrb.mxu2 %v1156_v29 }
 0x400   : > { %1165 = vmatpush.bf16.msrb.mxu2 %v1145_v32 }
 0x404   : > { %1374 = vmatpush.bf16.msra.mxu2 %v1366_v33 }
 0x419   : > { %v1115_v34 = vpop.xlane.xlu0 %1114 }
 0x41a   : > { %v1118_v35 = vsub.f32 %v4699_v46, %v1115_v34 }
 0x41c   : > { %v1123_v38 = vmul.f32 1.442695, %v1118_v35 }
 0x41e   : > { %4050 = vpow2.f32 %v1123_v38 }
 0x41f   : > { %4052 = vpow2.f32 %v1018_v40 }
 0x421   : > { %v1324_v41 = vpop.xlane.xlu0 %1323 }
 0x422   : > { %v1329_v42 = vsub.f32 %v4711_v52, %v1324_v41 }
 0x424   : > { %v4758_v30 = vpop.eup %4050  ;;  %v1333_v43 = vmul.f32 1.442695, %v1329_v42  ;;  %v1321_v44 = vpop.xlane.xlu1 %1320 }
 0x425   : > { %v1328_v45 = vsub.f32 %v4707_v50, %v1321_v44  ;;  %v1131_v37 = vsel %vm1007_vm3, %v4758_v30, 0.0  ;;  %v4763_v47 = vpop.eup %4052 }
 0x426   : > { %4054 = vpow2.f32 %v1333_v43  ;;  %1132 = vadd.xlane.f32.xlu2 %v1131_v37  ;;  %v1026_v39 = vsel %vm1007_vm3, %v4763_v47, 0.0 }
 0x427   : > { %v1331_v46 = vmul.f32 1.442695, %v1328_v45 }
 0x429   : > { %4056 = vpow2.f32 %v1331_v46 }
 0x42a   : > { %v1216_v48 = vpop.xlane.xlu2 %1215 }
 0x42b   : > { %v1223_v49 = vsub.f32 %v4709_v51, %v1216_v48 }
 0x42c   : > { %v4766_v56 = vpop.eup %4054  ;;  %v1219_v52 = vpop.xlane.xlu1 %1218 }
 0x42d   : > { %v1226_v57 = vmul.f32 1.442695, %v1223_v49  ;;  %v1224_v58 = vsub.f32 %v4715_v53, %v1219_v52  ;;  %v1340_v50 = vsel %vm1000_vm15, %v4766_v56, 0.0 }
 0x42e   : > { %1341 = vadd.xlane.f32.xlu0 %v1340_v50  ;;  %1027 = vadd.xlane.f32.xlu2 %v1026_v39 }
 0x42f   : > { %4058 = vpow2.f32 %v1226_v57  ;;  %v1228_v59 = vmul.f32 1.442695, %v1224_v58  ;;  %v4773_v60 = vpop.eup %4056 }
 0x430   : > { %v1337_v61 = vsel %vm1000_vm15, %v4773_v60, 0.0 }
 0x431   : > { %4060 = vpow2.f32 %v1228_v59 }
 0x432   : > { %v1222_v0 = vpop.xlane.xlu2 %1221 }
 0x433   : > { %v1225_v7 = vsub.f32 %v4721_v55, %v1222_v0 }
 0x434   : > { %v1327_v15 = vpop.xlane.xlu1 %1326 }
 0x435   : > { %v4775_v51 = vpop.eup %4058  ;;  %v1230_v16 = vmul.f32 1.442695, %v1225_v7  ;;  %v1330_v20 = vsub.f32 %v4719_v54, %v1327_v15 }
 0x436   : > { %1338 = vadd.xlane.f32.xlu2 %v1337_v61  ;;  %v1232_v53 = vsel %vm1000_vm15, %v4775_v51, 0.0 }
 0x437   : > { %1233 = vadd.xlane.f32.xlu1 %v1232_v53  ;;  %v4781_v62 = vpop.eup %4060  ;;  %v1335_v25 = vmul.f32 1.442695, %v1330_v20 }
 0x438   : > { %v1235_v63 = vsel %vm1000_vm15, %v4781_v62, 0.0 }
 0x43e   : > { %1236 = vadd.xlane.f32.xlu2 %v1235_v63 }
 0x442   : > { %1251 = vrot.lane.b32.xlu0 %v4650_v4, %s5534_s15 }
 0x44a   : > { %1249 = vrot.lane.b32.xlu0 %v4660_v9, %s5534_s15  ;;  %s5565_s15 = smov 48  }
 0x450   : > { %1354 = vrot.lane.b32.xlu1 %v4660_v9, %s5532_s16  ;;  %s5566_s16 = smov 32  }
 0x453   : > { %v1127_v1 = vpop.xlane.xlu0 %1126 }
 0x454   : > { %4062 = vrcp.f32 %v1127_v1 }
 0x45a   : > { %v4063_v6 = vpop.eup %4062 }
 0x45b   : > { %v1130_v2 = vpop.xlane.xlu2 %1129  ;;  %v1022_v5 = vpop.xlane.xlu0 %1021  ;;  %v1137_v4 = vmul.f32 %v4063_v6, %v4737_v11 }
 0x45c   : > { %4064 = vrcp.f32 %v1130_v2 }
 0x45d   : > { %4066 = vrcp.f32 %v1022_v5 }
 0x462   : > { %v4065_v8 = vpop.eup %4064 }
 0x463   : > { %v1025_v10 = vpop.xlane.xlu2 %1024  ;;  %v1138_v14 = vmul.f32 %v4065_v8, %v4743_v21  ;;  %v4067_v17 = vpop.eup %4066 }
 0x464   : > { %4068 = vrcp.f32 %v1025_v10  ;;  %v1032_v55 = vmul.f32 %v4067_v17, %v4741_v18 }
 0x465   : > { %v1140_v9 = vpack.c.bf16 %v1138_v14, %v1137_v4  ;;  %4070 = vpow2.f32 %v1230_v16 }
 0x466   : > { %4072 = vpow2.f32 %v1335_v25  ;;  %v3858_v25 = vld [vmem:[%s5563_s5 + $0x18] sm:$0xff] }
 0x467   : > { %3447 = vmatmul.msk.bf16.vlgmr.msrb.gmra.mxu2 %vm1000_vm15, %v1140_v9  ;;  %1476 = vmatpush.bf16.msra.mxu3 %v3858_v25  ;;  %v3493_v25 = vld [vmem:[%s5516_s11 + $0x20] sm:$0xf] }
 0x46a   : > { %v4069_v22 = vpop.eup %4068 }
 0x46b   : > { %v1033_v23 = vmul.f32 %v4069_v22, %v4749_v24  ;;  %v4071_v11 = vpop.eup %4070 }
 0x46c   : > { %v1238_v21 = vsel %vm1007_vm3, %v4071_v11, 0.0  ;;  %v4073_v28 = vpop.eup %4072 }
 0x46d   : > { %v1035_v26 = vpack.c.bf16 %v1033_v23, %v1032_v55  ;;  %v1343_v54 = vsel %vm1007_vm3, %v4073_v28, 0.0 }
 0x46f   : > { %3443 = vmatmul.msk.bf16.vlgmr.msrb.gmra.mxu0 %vm1000_vm15, %v1035_v26  ;;  %v3857_v26 = vld [vmem:[%s5563_s5 + $0x10] sm:$0xff] }
 0x470   : > { %1477 = vmatpush.bf16.msra.mxu3 %v3857_v26  ;;  %v3864_v26 = vld [vmem:[%s5516_s11 + $0x24] sm:$0xf0] }
 0x474   : > { %1239 = vadd.xlane.f32.xlu0 %v1238_v21  ;;  %v3855_v21 = vld [vmem:[%s5563_s5] sm:$0xff] }
 0x47a   : > { %1344 = vadd.xlane.f32.xlu1 %v1343_v54 }
 0x499   : > { %v1133_v29 = vpop.xlane.xlu2 %1132 }
 0x49a   : > { %4074 = vrcp.f32 %v1133_v29 }
 0x4a0   : > { %v4075_v31 = vpop.eup %4074 }
 0x4a1   : > { %v1028_v32 = vpop.xlane.xlu2 %1027  ;;  %v1139_v18 = vmul.f32 %v4075_v31, %v4758_v30  ;;  %v1342_v36 = vpop.xlane.xlu0 %1341 }
 0x4a2   : > { %4076 = vrcp.f32 %v1028_v32 }
 0x4a3   : > { %v1141_v24 = vpack.c.bf16 %v1139_v18, %v1139_v18 }
 0x4a5   : > { %3448 = vmatmul.msk.bf16.gmra.mxu2 %vm1000_vm15, %v1141_v24 }
 0x4a8   : > { %v4077_v33 = vpop.eup %4076 }
 0x4a9   : > { %v1339_v34 = vpop.xlane.xlu2 %1338  ;;  %v1034_v35 = vmul.f32 %v4077_v33, %v4763_v47 }
 0x4aa   : > { %v1234_v40 = vpop.xlane.xlu1 %1233 }
 0x4ab   : > { %v1036_v38 = vpack.c.bf16 %v1034_v35, %v1034_v35 }
 0x4ad   : > { %3444 = vmatmul.msk.bf16.gmra.mxu0 %vm1000_vm15, %v1036_v38 }
 0x4b1   : > { %v1237_v41 = vpop.xlane.xlu2 %1236 }
 0x4b2   : > { %4078 = vrcp.f32 %v1237_v41 }
 0x4b3   : > { %4080 = vrcp.f32 %v1234_v40 }
 0x4b4   : > { %v1252_v42 = vpop.permute.xlu0 %1251  ;;  %4082 = vrcp.f32 %v1339_v34 }
 0x4b5   : > { %v1261_v43 = vand.u32 %v1252_v42, %v4648_v3  ;;  %4084 = vrcp.f32 %v1342_v36 }
 0x4b7   : > { %1269 = vmatpush.bf16.msra.mxu0 %v1261_v43 }
 0x4b8   : > { %v4079_v30 = vpop.eup %4078 }
 0x4b9   : > { %v4081_v44 = vpop.eup %4080  ;;  %v1245_v45 = vmul.f32 %v4079_v30, %v4781_v62 }
 0x4ba   : > { %v1244_v37 = vmul.f32 %v4081_v44, %v4775_v51  ;;  %v4083_v47 = vpop.eup %4082 }
 0x4bb   : > { %v4085_v49 = vpop.eup %4084  ;;  %v1349_v52 = vmul.f32 %v4083_v47, %v4773_v60 }
 0x4bc   : > { %v1250_v46 = vpop.permute.xlu0 %1249  ;;  %v1247_v48 = vpack.c.bf16 %v1245_v45, %v1244_v37  ;;  %v1350_v57 = vmul.f32 %v4085_v49, %v4766_v56  ;;  %v4020_v49 = vld [vmem:[%s5511_s6] ss:$0 sm:$0xff] }
 0x4bd   : > { %1270 = vmatpush.bf16.msra.mxu0 %v1250_v46 }
 0x4be   : > { %v1352_v50 = vpack.c.bf16 %v1350_v57, %v1349_v52 }
 0x4c0   : > { %3451 = vmatmul.msk.bf16.vlgmr.msra.gmra.mxu0 %vm1000_vm15, %v1247_v48 }
 0x4c2   : > { %v1355_v58 = vpop.permute.xlu1 %1354 }
 0x4c3   : > { %1375 = vmatpush.bf16.msra.mxu2 %v1355_v58 }
 0x4c6   : > { %3455 = vmatmul.msk.bf16.vlgmr.msra.gmra.mxu2 %vm1000_vm15, %v1352_v50 }
 0x4e7   : > { %v1240_v39 = vpop.xlane.xlu0 %1239 }
 0x4e8   : > { %4086 = vrcp.f32 %v1240_v39 }
 0x4ea   : > { %v1167_v59 = vpop.f32.mrf.mxu2 }
 0x4ec   : > { %v1060_v2 = vpop.f32.mrf.mxu0 }
 0x4ed   : > { %v1345_v51 = vpop.xlane.xlu1 %1344 }
 0x4ee   : > { %v4087_v61 = vpop.eup %4086  ;;  %4088 = vrcp.f32 %v1345_v51 }
 0x4ef   : > { %v1246_v53 = vmul.f32 %v4087_v61, %v4071_v11  ;;  %v3856_v11 = vld [vmem:[%s5563_s5 + $0x8] sm:$0xff] }
 0x4f0   : > { %1478 = vmatpush.bf16.msra.mxu3 %v3856_v11  ;;  %v3863_v11 = vld [vmem:[%s5516_s11 + $0x24] sm:$0xf] }
 0x4f1   : > { %v1248_v62 = vpack.c.bf16 %v1246_v53, %v1246_v53 }
 0x4f2   : > { %v1169_v63 = vpop.f32.mrf.mxu2 }
 0x4f3   : > { %3452 = vmatmul.msk.bf16.gmra.mxu0 %vm1000_vm15, %v1248_v62  ;;  %v3988_v0 = vpack.i.bf16 %v1169_v63, %v1167_v59 }
 0x4f4   : > { %v4089_v60 = vpop.eup %4088  ;;  %v1062_v5 = vpop.f32.mrf.mxu0  ;;  %1479 = vmatpush.bf16.msra.mxu3 %v3855_v21  ;;  %v3494_v21 = vor.u32 %v3864_v26, %v3493_v25 }
 0x4f5   : > { %v1351_v1 = vmul.f32 %v4089_v60, %v4073_v28  ;;  %3989 = vrot.lane.b32.xlu2 %v3988_v0, %s5536_s30 }
 0x4f7   : > { %v1353_v56 = vpack.c.bf16 %v1351_v1, %v1351_v1 }
 0x4f9   : > { %3456 = vmatmul.msk.bf16.gmra.mxu2 %vm1000_vm15, %v1353_v56 }
 0x528   : > { %v1172_v6 = vpop.f32.mrf.mxu2 }
 0x529   : > { %1393 = vrot.lane.b32.xlu0 %v1172_v6, %s5536_s30 }
 0x52a   : > { %v1065_v7 = vpop.f32.mrf.mxu0 }
 0x530   : > { %v1174_v8 = vpop.f32.mrf.mxu2 }
 0x532   : > { %v1067_v10 = vpop.f32.mrf.mxu0 }
 0x53d   : > { %v1272_v4 = vpop.f32.mrf.mxu0 }
 0x545   : > { %v1274_v14 = vpop.f32.mrf.mxu0 }
 0x546   : > { %v3993_v15 = vpack.i.bf16 %v1274_v14, %v1272_v4 }
 0x548   : > { %3994 = vrot.lane.b32.xlu2 %v3993_v15, %s5540_s22 }
 0x549   : > { %v1377_v16 = vpop.f32.mrf.mxu2 }
 0x54f   : > { %v3990_v28 = vpop.permute.xlu2 %3989 }
 0x550   : > { %v3992_v29 = vunpack.i.h.bf16 %v3990_v28  ;;  %v3991_v31 = vunpack.i.l.bf16 %v3990_v28  ;;  %v3495_v28 = vld [vmem:[%s5516_s11 + $0x28] sm:$0xf0] }
 0x551   : > { %v1379_v9 = vpop.f32.mrf.mxu2 }
 0x552   : > { %v3998_v17 = vpack.i.bf16 %v1379_v9, %v1377_v16  ;;  %v1423_v33 = vsel %vm969_vm14, %v1062_v5, %v3992_v29  ;;  %v1422_v34 = vsel %vm969_vm14, %v1060_v2, %v3991_v31  ;;  %v3501_v9 = vld [vmem:[%s5516_s11 + $0x30] sm:$0xf]  ;;  %v3862_v31 = vld [vmem:[%s5516_s11 + $0x14] sm:$0xf0] }
 0x553   : > { %v3485_v29 = vld [vmem:[%s5516_s11 + $0x10] sm:$0xf] }
 0x554   : > { %3999 = vrot.lane.b32.xlu1 %v3998_v17, %s5542_s4  ;;  %v3866_v17 = vld [vmem:[%s5516_s11 + $0x34] sm:$0xf0] }
 0x570   : > { %v1277_v20 = vpop.f32.mrf.mxu0 }
 0x571   : > { %1405 = vrot.lane.b32.xlu2 %v1277_v20, %s5540_s22  ;;  %v3865_v20 = vld [vmem:[%s5516_s11 + $0x34] sm:$0xf]  ;;  %s5564_s22 = smov 64  }
 0x578   : > { %v1279_v22 = vpop.f32.mrf.mxu0 }
 0x579   : > { %v3502_v22 = vor.u32 %v3866_v17, %v3501_v9 }
 0x57b   : > { %1646 = vmatpush.bf16.msrb.mxu0 %v3502_v22 }
 0x57c   : > { %v1382_v55 = vpop.f32.mrf.mxu2 }
 0x57d   : > { %1417 = vrot.lane.b32.xlu2 %v1382_v55, %s5542_s4  ;;  %v3503_v55 = vld [vmem:[%s5516_s11 + $0x38] sm:$0xf0] }
 0x57f   : > { %1647 = vmatpush.bf16.msrb.mxu0 %v3494_v21  ;;  %v3874_v21 = vld [vmem:[%s5518_s13 + $0x38] sm:$0xff] }
 0x580   : > { %1864 = vmatpush.bf16.msrb.mxu2 %v3874_v21 }
 0x584   : > { %v1384_v23 = vpop.f32.mrf.mxu2 }
 0x585   : > { %v3506_v23 = vor.u32 %v3865_v20, %v3503_v55 }
 0x587   : > { %1664 = vmatpush.bf16.msra.mxu1 %v3506_v23 }
 0x59b   : > { %v1394_v44 = vpop.permute.xlu0 %1393 }
 0x59c   : > { %v1424_v45 = vsel %vm969_vm14, %v1065_v7, %v1394_v44 }
 0x5a2   : > { %v3995_v54 = vpop.permute.xlu2 %3994 }
 0x5a3   : > { %v3997_v32 = vunpack.i.h.bf16 %v3995_v54  ;;  %v3996_v18 = vunpack.i.l.bf16 %v3995_v54  ;;  %v3498_v54 = vor.u32 %v3863_v11, %v3495_v28  ;;  %v3882_v28 = vld [vmem:[%s5518_s13 + $0x78] sm:$0xff] }
 0x5a4   : > { %1882 = vmatpush.bf16.msrb.mxu3 %v3882_v28 }
 0x5a5   : > { %v1426_v38 = vsel %vm1425_vm4, %v1422_v34, %v3996_v18  ;;  %v1427_v40 = vsel %vm1425_vm4, %v1423_v33, %v3997_v32  ;;  %1665 = vmatpush.bf16.msra.mxu1 %v3498_v54  ;;  %v3861_v32 = vld [vmem:[%s5516_s11 + $0x14] sm:$0xf]  ;;  %v3486_v18 = vor.u32 %v3862_v31, %v3485_v29  ;;  %v3872_v29 = vld [vmem:[%s5518_s13 + $0x28] sm:$0xff] }
 0x5a6   : > { %v3881_v54 = vld [vmem:[%s5518_s13 + $0x70] sm:$0xff]  ;;  %v3880_v31 = vld [vmem:[%s5518_s13 + $0x68] sm:$0xff] }
 0x5a7   : > { %1648 = vmatpush.bf16.msrb.mxu0 %v3486_v18  ;;  %v3879_v18 = vld [vmem:[%s5518_s13 + $0x60] sm:$0xff] }
 0x5a8   : > { %1883 = vmatpush.bf16.msrb.mxu3 %v3881_v54 }
 0x5ac   : > { %1884 = vmatpush.bf16.msrb.mxu3 %v3880_v31 }
 0x5b0   : > { %1885 = vmatpush.bf16.msrb.mxu3 %v3879_v18 }
 0x5c6   : > { %v4000_v24 = vpop.permute.xlu1 %3999 }
 0x5c7   : > { %v4002_v35 = vunpack.i.h.bf16 %v4000_v24  ;;  %v4001_v36 = vunpack.i.l.bf16 %v4000_v24  ;;  %v3487_v24 = vld [vmem:[%s5516_s11 + $0x18] sm:$0xf0] }
 0x5c8   : > { %v3490_v34 = vor.u32 %v3861_v32, %v3487_v24  ;;  %v3871_v32 = vld [vmem:[%s5518_s13 + $0x20] sm:$0xff]  ;;  %v3870_v24 = vld [vmem:[%s5518_s13 + $0x18] sm:$0xff] }
 0x5c9   : > { %v1429_v41 = vsel %vm749_vm0, %v1426_v38, %v4001_v36  ;;  %v1430_v42 = vsel %vm749_vm0, %v1427_v40, %v4002_v35  ;;  %v3477_v36 = vld [vmem:[%s5516_s11] sm:$0xf]  ;;  %v3860_v38 = vld [vmem:[%s5516_s11 + $0x4] sm:$0xf0]  ;;  %v3859_v40 = vld [vmem:[%s5516_s11 + $0x4] sm:$0xf] }
 0x5ca   : > { %v1440_v43 = vpack.c.bf16 %v1430_v42, %v1429_v41  ;;  %1666 = vmatpush.bf16.msra.mxu1 %v3490_v34  ;;  %v3478_v42 = vor.u32 %v3860_v38, %v3477_v36  ;;  %v3869_v34 = vld [vmem:[%s5518_s13 + $0x10] sm:$0xff]  ;;  %v1590_v36 = vld [vmem:[%s5517_s12] sm:$0x3]  ;;  %v3868_v38 = vld [vmem:[%s5518_s13 + $0x8] sm:$0xff] }
 0x5cb   : > { %v1406_v30 = vpop.permute.xlu2 %1405 }
 0x5cc   : > { %3473 = vmatmul.msk.bf16.vlgmr.msra.gmra.mxu3 %vm776_vm2, %v1440_v43  ;;  %v1428_v37 = vsel %vm1425_vm4, %v1424_v45, %v1406_v30  ;;  %v3479_v43 = vld [vmem:[%s5516_s11 + $0x8] sm:$0xf0]  ;;  %1649 = vmatpush.bf16.msrb.mxu0 %v3478_v42  ;;  %v1593_v42 = vperm.slane %v1590_v36, 1 }
 0x5cd   : > { %v3482_v30 = vor.u32 %v3859_v40, %v3479_v43  ;;  %v3876_v40 = vld [vmem:[%s5518_s13 + $0x48] sm:$0xff] }
 0x5cf   : > { %1667 = vmatpush.bf16.msra.mxu1 %v3482_v30 }
 0x5d7   : > { %v1418_v46 = vpop.permute.xlu2 %1417 }
 0x5d8   : > { %v1431_v47 = vsel %vm749_vm0, %v1428_v37, %v1418_v46 }
 0x5d9   : > { %v1441_v48 = vpack.c.bf16 %v1431_v47, %v1431_v47 }
 0x5dc   : > { %3474 = vmatmul.msk.bf16.gmra.mxu3 %vm776_vm2, %v1441_v48 }
 0x64f   : > { %v1481_v52 = vpop.f32.mrf.mxu3 }
 0x650   : > { %v1490_v57 = vadd.f32 %v1481_v52, %v4531_v12 }
 0x652   : > { %v4847_v58 = vadd.f32 %v4020_v49, %v1490_v57 }
 0x654   : > { %v1502_v50 = vsel %vm776_vm2, %v4847_v58, 0.0 }
 0x655   : > { %1503 = vadd.xlane.f32.xlu2 %v1502_v50 }
 0x657   : > { %v1483_v39 = vpop.f32.mrf.mxu3 }
 0x658   : > { %v1491_v59 = vadd.f32 %v1483_v39, %v4542_v19 }
 0x65a   : > { %v4852_v51 = vadd.f32 %v4020_v49, %v1491_v59 }
 0x65c   : > { %v1505_v61 = vsel %vm776_vm2, %v4852_v51, 0.0 }
 0x65d   : > { %1506 = vadd.xlane.f32.xlu0 %v1505_v61 }
 0x65f   : > { %v1486_v53 = vpop.f32.mrf.mxu3 }
 0x660   : > { %v1492_v62 = vadd.f32 %v1486_v53, %v4533_v13 }
 0x662   : > { %v4857_v63 = vadd.f32 %v4020_v49, %v1492_v62 }
 0x664   : > { %v1508_v12 = vsel %vm783_vm1, %v4857_v63, 0.0 }
 0x665   : > { %1509 = vadd.xlane.f32.xlu1 %v1508_v12 }
 0x667   : > { %v1488_v60 = vpop.f32.mrf.mxu3 }
 0x6c8   : > { %v1504_v0 = vpop.xlane.xlu2 %1503 }
 0x6c9   : > { %v1511_v1 = vmul.f32 %v1504_v0, %v4546_v27 }
 0x6cb   : > { %v4863_v19 = vsub.f32 %v4847_v58, %v1511_v1 }
 0x6cd   : > { %v1517_v56 = vmul.f32 %v4863_v19, %v4863_v19 }
 0x6cf   : > { %v1520_v2 = vsel %vm776_vm2, %v1517_v56, 0.0  ;;  %v4021_v56 = vld [vmem:[%s5514_s9] ss:$0 sm:$0xff] }
 0x6d0   : > { %1521 = vadd.xlane.f32.xlu2 %v1520_v2  ;;  %v1507_v13 = vpop.xlane.xlu0 %1506 }
 0x6d1   : > { %v1512_v5 = vmul.f32 %v1507_v13, %v4546_v27 }
 0x6d3   : > { %v4870_v6 = vsub.f32 %v4852_v51, %v1512_v5 }
 0x6d5   : > { %v1518_v7 = vmul.f32 %v4870_v6, %v4870_v6 }
 0x6d7   : > { %v1523_v8 = vsel %vm776_vm2, %v1518_v7, 0.0 }
 0x6d8   : > { %1524 = vadd.xlane.f32.xlu0 %v1523_v8  ;;  %v1510_v10 = vpop.xlane.xlu1 %1509 }
 0x6d9   : > { %v1513_v4 = vmul.f32 %v1510_v10, %v4546_v27  ;;  %v4022_v10 = vld [vmem:[%s5515_s10] ss:$0 sm:$0xff] }
 0x6db   : > { %v4877_v14 = vsub.f32 %v4857_v63, %v1513_v4 }
 0x6dd   : > { %v1519_v15 = vmul.f32 %v4877_v14, %v4877_v14 }
 0x6df   : > { %v1526_v16 = vsel %vm783_vm1, %v1519_v15, 0.0 }
 0x6e0   : > { %1527 = vadd.xlane.f32.xlu2 %v1526_v16 }
 0x743   : > { %v1522_v33 = vpop.xlane.xlu2 %1521 }
 0x744   : > { %v1529_v35 = vmul.f32 %v1522_v33, %v4546_v27  ;;  %v3878_v33 = vld [vmem:[%s5518_s13 + $0x58] sm:$0xff] }
 0x745   : > { %1886 = vmatpush.bf16.msrb.mxu3 %v3878_v33 }
 0x746   : > { %v1532_v41 = vadd.f32 1e-06, %v1529_v35  ;;  %v3877_v35 = vld [vmem:[%s5518_s13 + $0x50] sm:$0xff] }
 0x748   : > { %4090 = vrsqrt.f32 %v1532_v41  ;;  %vm1541_vm6 = vweird.f32 %v1532_v41 }
 0x749   : > { %1887 = vmatpush.bf16.msrb.mxu3 %v3877_v35 }
 0x74b   : > { %v1525_v44 = vpop.xlane.xlu0 %1524 }
 0x74c   : > { %v1530_v45 = vmul.f32 %v1525_v44, %v4546_v27  ;;  %v3867_v44 = vld [vmem:[%s5518_s13] sm:$0xff] }
 0x74d   : > { %1888 = vmatpush.bf16.msrb.mxu3 %v3876_v40 }
 0x74e   : > { %v4091_v37 = vpop.eup %4090  ;;  %v1533_v46 = vadd.f32 1e-06, %v1530_v45  ;;  %v3875_v45 = vld [vmem:[%s5518_s13 + $0x40] sm:$0xff] }
 0x74f   : > { %v1536_v47 = vmul.f32 %v4091_v37, %v1532_v41  ;;  %vm1542_vm5 = vweird.f32 %v4091_v37  ;;  %v1592_v41 = vperm.slane %v1590_v36, 0 }
 0x750   : > { %4092 = vrsqrt.f32 %v1533_v46  ;;  %vm1543_vm7 = vmor %vm1541_vm6, %vm1542_vm5  ;;  %vm1551_vm9 = vweird.f32 %v1533_v46 }
 0x751   : > { %v1537_v48 = vmul.f32 %v4091_v37, %v1536_v47  ;;  %1889 = vmatpush.bf16.msrb.mxu3 %v3875_v45 }
 0x753   : > { %v1538_v49 = vmul.f32 0.5, %v1537_v48  ;;  %v1528_v52 = vpop.xlane.xlu2 %1527 }
 0x754   : > { %v1531_v57 = vmul.f32 %v1528_v52, %v4546_v27 }
 0x755   : > { %v1539_v50 = vsub.f32 1.5, %v1538_v49 }
 0x756   : > { %v4093_v39 = vpop.eup %4092  ;;  %v1534_v59 = vadd.f32 1e-06, %v1531_v57 }
 0x757   : > { %v1540_v61 = vmul.f32 %v4091_v37, %v1539_v50  ;;  %v1546_v53 = vmul.f32 %v4093_v39, %v1533_v46  ;;  %vm1552_vm8 = vweird.f32 %v4093_v39 }
 0x758   : > { %4094 = vrsqrt.f32 %v1534_v59  ;;  %vm1553_vm10 = vmor %vm1551_vm9, %vm1552_vm8  ;;  %vm1561_vm12 = vweird.f32 %v1534_v59 }
 0x759   : > { %v1547_v62 = vmul.f32 %v4093_v39, %v1546_v53  ;;  %v1544_v12 = vsel %vm1543_vm7, %v4091_v37, %v1540_v61 }
 0x75a   : > { %v1565_v2 = vmul.f32 %v1544_v12, %v4863_v19 }
 0x75b   : > { %v1548_v60 = vmul.f32 0.5, %v1547_v62 }
 0x75c   : > { %v1571_v4 = vmul.f32 %v4021_v56, %v1565_v2 }
 0x75d   : > { %v1549_v0 = vsub.f32 1.5, %v1548_v60 }
 0x75e   : > { %v4095_v1 = vpop.eup %4094  ;;  %v1577_v20 = vadd.f32 %v4022_v10, %v1571_v4 }
 0x75f   : > { %v1550_v13 = vmul.f32 %v4093_v39, %v1549_v0  ;;  %v1556_v5 = vmul.f32 %v4095_v1, %v1534_v59  ;;  %vm1562_vm11 = vweird.f32 %v4095_v1 }
 0x760   : > { %vm1563_vm13 = vmor %vm1561_vm12, %vm1562_vm11 }
 0x761   : > { %v1554_v7 = vsel %vm1553_vm10, %v4093_v39, %v1550_v13  ;;  %v1557_v8 = vmul.f32 %v4095_v1, %v1556_v5 }
 0x762   : > { %v1566_v15 = vmul.f32 %v1554_v7, %v4870_v6 }
 0x763   : > { %v1558_v16 = vmul.f32 0.5, %v1557_v8 }
 0x764   : > { %v1572_v9 = vmul.f32 %v4021_v56, %v1566_v15 }
 0x765   : > { %v1559_v17 = vsub.f32 1.5, %v1558_v16 }
 0x766   : > { %v1578_v22 = vadd.f32 %v4022_v10, %v1572_v9 }
 0x767   : > { %v1560_v19 = vmul.f32 %v4095_v1, %v1559_v17 }
 0x768   : > { %v1588_v55 = vpack.c.bf16 %v1578_v22, %v1577_v20 }
 0x769   : > { %v1564_v23 = vsel %vm1563_vm13, %v4095_v1, %v1560_v19 }
 0x76a   : > { %3507 = vmatmul.msk.bf16.vlgmr.msrb.gmra.mxu0 %vm776_vm2, %v1588_v55  ;;  %3509 = vmatmul.msk.bf16.vlgmr.msra.gmra.mxu1 %vm776_vm2, %v1588_v55  ;;  %v1567_v25 = vmul.f32 %v1564_v23, %v4877_v14  ;;  %v3873_v14 = vld [vmem:[%s5518_s13 + $0x30] sm:$0xff] }
 0x76b   : > { %1865 = vmatpush.bf16.msrb.mxu2 %v3873_v14 }
 0x76c   : > { %v1573_v26 = vmul.f32 %v4021_v56, %v1567_v25 }
 0x76e   : > { %v1579_v11 = vadd.f32 %v4022_v10, %v1573_v26 }
 0x76f   : > { %1866 = vmatpush.bf16.msrb.mxu2 %v3872_v29 }
 0x770   : > { %v1589_v6 = vpack.c.bf16 %v1579_v11, %v1579_v11 }
 0x773   : > { %1867 = vmatpush.bf16.msrb.mxu2 %v3871_v32 }
 0x777   : > { %1868 = vmatpush.bf16.msrb.mxu2 %v3870_v24 }
 0x77a   : > { %3508 = vmatmul.msk.bf16.gmra.mxu0 %vm776_vm2, %v1589_v6  ;;  %3510 = vmatmul.msk.bf16.gmra.mxu1 %vm776_vm2, %v1589_v6 }
 0x77b   : > { %1869 = vmatpush.bf16.msrb.mxu2 %v3869_v34 }
 0x77f   : > { %1870 = vmatpush.bf16.msrb.mxu2 %v3868_v38 }
 0x783   : > { %1871 = vmatpush.bf16.msrb.mxu2 %v3867_v44 }
 0x7e7   : > { %v1651_v43 = vpop.f32.mrf.mxu0  ;;  %v1669_v30 = vpop.f32.mrf.mxu1 }
 0x7e8   : > { %v1652_v37 = vadd.f32 %v1651_v43, %v1592_v41  ;;  %v4997_v46 = vadd.f32 %v1669_v30, %v1593_v42 }
 0x7ea   : > { %v1678_v47 = vmul.f32 %v1652_v37, %v1652_v37  ;;  %v1679_v48 = vmul.f32 %v4997_v46, %v4997_v46 }
 0x7ec   : > { %v1684_v49 = vmul.f32 %v1678_v47, %v1652_v37  ;;  %v1685_v52 = vmul.f32 %v1679_v48, %v4997_v46 }
 0x7ee   : > { %v1690_v57 = vmul.f32 0.044715, %v1684_v49  ;;  %v1691_v50 = vmul.f32 0.044715, %v1685_v52 }
 0x7ef   : > { %v1653_v39 = vpop.f32.mrf.mxu0  ;;  %v1671_v59 = vpop.f32.mrf.mxu1 }
 0x7f0   : > { %v1696_v61 = vadd.f32 %v1690_v57, %v1652_v37  ;;  %v1697_v53 = vadd.f32 %v1691_v50, %v4997_v46  ;;  %v1654_v62 = vadd.f32 %v1653_v39, %v1592_v41  ;;  %v1672_v12 = vadd.f32 %v1671_v59, %v1593_v42 }
 0x7f2   : > { %v1702_v60 = vmul.f32 0.7978846, %v1696_v61  ;;  %v1680_v0 = vmul.f32 %v1654_v62, %v1654_v62  ;;  %v1681_v1 = vmul.f32 %v1672_v12, %v1672_v12  ;;  %v1703_v56 = vmul.f32 0.7978846, %v1697_v53 }
 0x7f4   : > { %v1686_v2 = vmul.f32 %v1680_v0, %v1654_v62  ;;  %v1687_v13 = vmul.f32 %v1681_v1, %v1672_v12  ;;  %4096 = vtanh.f32 %v1702_v60 }
 0x7f5   : > { %4098 = vtanh.f32 %v1703_v56 }
 0x7f6   : > { %v1692_v5 = vmul.f32 0.044715, %v1686_v2  ;;  %v1693_v7 = vmul.f32 0.044715, %v1687_v13 }
 0x7f7   : > { %v1656_v8 = vpop.f32.mrf.mxu0  ;;  %v1674_v10 = vpop.f32.mrf.mxu1 }
 0x7f8   : > { %v1698_v4 = vadd.f32 %v1692_v5, %v1654_v62  ;;  %v1699_v15 = vadd.f32 %v1693_v7, %v1672_v12  ;;  %v1657_v16 = vadd.f32 %v1656_v8, %v1592_v41  ;;  %v1675_v9 = vadd.f32 %v1674_v10, %v1593_v42 }
 0x7fa   : > { %v1704_v17 = vmul.f32 0.7978846, %v1698_v4  ;;  %v1705_v20 = vmul.f32 0.7978846, %v1699_v15  ;;  %v1682_v22 = vmul.f32 %v1657_v16, %v1657_v16  ;;  %v1683_v19 = vmul.f32 %v1675_v9, %v1675_v9  ;;  %v4097_v55 = vpop.eup %4096 }
 0x7fb   : > { %v4099_v26 = vpop.eup %4098  ;;  %v1714_v21 = vadd.f32 1.0, %v4097_v55 }
 0x7fc   : > { %4100 = vtanh.f32 %v1704_v17  ;;  %v1688_v23 = vmul.f32 %v1682_v22, %v1657_v16  ;;  %v1689_v25 = vmul.f32 %v1683_v19, %v1675_v9  ;;  %v1715_v54 = vadd.f32 1.0, %v4099_v26 }
 0x7fd   : > { %4102 = vtanh.f32 %v1705_v20  ;;  %v1720_v34 = vmul.f32 0.5, %v1714_v21 }
 0x7fe   : > { %v1694_v11 = vmul.f32 0.044715, %v1688_v23  ;;  %v1695_v6 = vmul.f32 0.044715, %v1689_v25  ;;  %v1721_v36 = vmul.f32 0.5, %v1715_v54 }
 0x7ff   : > { %v1658_v28 = vpop.f32.mrf.mxu0  ;;  %v1676_v14 = vpop.f32.mrf.mxu1  ;;  %v1726_v42 = vmul.f32 %v1720_v34, %v1652_v37  ;;  %v3614_v34 = vld [vmem:[%s5561_s24 + $0x78] sm:$0xf0] }
 0x800   : > { %v1700_v29 = vadd.f32 %v1694_v11, %v1657_v16  ;;  %v1701_v31 = vadd.f32 %v1695_v6, %v1675_v9  ;;  %v1727_v30 = vmul.f32 %v1721_v36, %v4997_v46  ;;  %v3604_v36 = vld [vmem:[%s5561_s24 + $0x60] sm:$0xf] }
 0x802   : > { %v4101_v32 = vpop.eup %4100  ;;  %v1706_v18 = vmul.f32 0.7978846, %v1700_v29  ;;  %v1707_v24 = vmul.f32 0.7978846, %v1701_v31 }
 0x803   : > { %v4103_v33 = vpop.eup %4102  ;;  %v1716_v35 = vadd.f32 1.0, %v4101_v32  ;;  %v3612_v32 = vld [vmem:[%s5561_s24 + $0x70] sm:$0xf] }
 0x804   : > { %v1717_v38 = vadd.f32 1.0, %v4103_v33  ;;  %4104 = vtanh.f32 %v1706_v18  ;;  %v3890_v18 = vld [vmem:[%s5561_s24 + $0x74] sm:$0xf0] }
 0x805   : > { %v1722_v40 = vmul.f32 0.5, %v1716_v35  ;;  %4106 = vtanh.f32 %v1707_v24  ;;  %v3889_v24 = vld [vmem:[%s5561_s24 + $0x74] sm:$0xf]  ;;  %v3613_v33 = vor.u32 %v3890_v18, %v3612_v32 }
 0x806   : > { %v1723_v41 = vmul.f32 0.5, %v1717_v38  ;;  %v3617_v35 = vor.u32 %v3889_v24, %v3614_v34  ;;  %v3888_v38 = vld [vmem:[%s5561_s24 + $0x64] sm:$0xf0] }
 0x807   : > { %v1728_v43 = vmul.f32 %v1722_v40, %v1654_v62  ;;  %2060 = vmatpush.bf16.msra.mxu0 %v3613_v33  ;;  %v3887_v40 = vld [vmem:[%s5561_s24 + $0x64] sm:$0xf] }
 0x808   : > { %v1729_v44 = vmul.f32 %v1723_v41, %v1672_v12  ;;  %v4023_v12 = vld [vmem:[%s5519_s14] ss:$0 sm:$0xff]  ;;  %2078 = vmatpush.bf16.msrb.mxu1 %v3617_v35  ;;  %v3605_v41 = vor.u32 %v3888_v38, %v3604_v36 }
 0x809   : > { %v1764_v45 = vpack.c.bf16 %v1728_v43, %v1726_v42  ;;  %v3606_v42 = vld [vmem:[%s5561_s24 + $0x68] sm:$0xf0] }
 0x80a   : > { %v4105_v47 = vpop.eup %4104  ;;  %v1765_v48 = vpack.c.bf16 %v1729_v44, %v1727_v30  ;;  %v3609_v43 = vor.u32 %v3887_v40, %v3606_v42  ;;  %v3596_v30 = vld [vmem:[%s5561_s24 + $0x50] sm:$0xf]  ;;  %v3886_v44 = vld [vmem:[%s5561_s24 + $0x54] sm:$0xf0] }
 0x80b   : > { %v4107_v49 = vpop.eup %4106  ;;  %1872 = vmatmul.bf16.vlgmr.msrb.gmra.mxu2 %v1764_v45  ;;  %v1718_v52 = vadd.f32 1.0, %v4105_v47  ;;  %2061 = vmatpush.bf16.msra.mxu0 %v3605_v41  ;;  %v3885_v45 = vld [vmem:[%s5561_s24 + $0x54] sm:$0xf]  ;;  %v3597_v47 = vor.u32 %v3886_v44, %v3596_v30 }
 0x80c   : > { %1890 = vmatmul.bf16.vlgmr.msrb.gmra.mxu3 %v1765_v48  ;;  %v1719_v57 = vadd.f32 1.0, %v4107_v49  ;;  %2079 = vmatpush.bf16.msrb.mxu1 %v3609_v43  ;;  %v3598_v48 = vld [vmem:[%s5561_s24 + $0x58] sm:$0xf0]  ;;  %v3585_v43 = vld [vmem:[%s5562_s25 + $0x2] sm:$0x3] }
 0x80d   : > { %v1724_v50 = vmul.f32 0.5, %v1718_v52  ;;  %v3601_v49 = vor.u32 %v3885_v45, %v3598_v48  ;;  %v2006_v30 = vperm.slane %v3585_v43, 0 }
 0x80e   : > { %v1725_v39 = vmul.f32 0.5, %v1719_v57 }
 0x80f   : > { %v1730_v59 = vmul.f32 %v1724_v50, %v1657_v16  ;;  %2062 = vmatpush.bf16.msra.mxu0 %v3597_v47  ;;  %v3588_v50 = vld [vmem:[%s5561_s24 + $0x40] sm:$0xf] }
 0x810   : > { %v1731_v61 = vmul.f32 %v1725_v39, %v1675_v9  ;;  %2080 = vmatpush.bf16.msrb.mxu1 %v3601_v49  ;;  %v3884_v39 = vld [vmem:[%s5561_s24 + $0x44] sm:$0xf0] }
 0x811   : > { %v1766_v53 = vpack.c.bf16 %v1730_v59, %v1730_v59  ;;  %v3883_v59 = vld [vmem:[%s5561_s24 + $0x44] sm:$0xf] }
 0x812   : > { %v1767_v60 = vpack.c.bf16 %v1731_v61, %v1731_v61  ;;  %v3589_v61 = vor.u32 %v3884_v39, %v3588_v50 }
 0x814   : > { %2063 = vmatpush.bf16.msra.mxu0 %v3589_v61 }
 0x81b   : > { %1877 = vmatmul.bf16.gmra.mxu2 %v1766_v53  ;;  %v3590_v53 = vld [vmem:[%s5561_s24 + $0x48] sm:$0xf0] }
 0x81c   : > { %1895 = vmatmul.bf16.gmra.mxu3 %v1767_v60 }
 0x88e   : > { %v1873_v37 = vpop.f32.mrf.mxu2 }
 0x88f   : > { %v1891_v62 = vpop.f32.mrf.mxu3 }
 0x890   : > { %v1892_v46 = vadd.f32 %v1891_v62, %v1873_v37  ;;  %v3593_v37 = vor.u32 %v3883_v59, %v3590_v53 }
 0x892   : > { %v1900_v0 = vadd.f32 %v1892_v46, %v4847_v58  ;;  %2081 = vmatpush.bf16.msrb.mxu1 %v3593_v37 }
 0x894   : > { %v5008_v1 = vadd.f32 %v4023_v12, %v1900_v0 }
 0x896   : > { %v1875_v56 = vpop.f32.mrf.mxu2  ;;  %v1914_v2 = vsel %vm776_vm2, %v5008_v1, 0.0 }
 0x897   : > { %v1893_v13 = vpop.f32.mrf.mxu3  ;;  %1915 = vadd.xlane.f32.xlu1 %v1914_v2 }
 0x898   : > { %v1894_v5 = vadd.f32 %v1893_v13, %v1875_v56 }
 0x89a   : > { %v1901_v7 = vadd.f32 %v1894_v5, %v4852_v51 }
 0x89c   : > { %v5013_v8 = vadd.f32 %v4023_v12, %v1901_v7 }
 0x89e   : > { %v1878_v10 = vpop.f32.mrf.mxu2  ;;  %v1917_v4 = vsel %vm776_vm2, %v5013_v8, 0.0 }
 0x89f   : > { %v1896_v15 = vpop.f32.mrf.mxu3  ;;  %1918 = vadd.xlane.f32.xlu0 %v1917_v4 }
 0x8a0   : > { %v1897_v58 = vadd.f32 %v1896_v15, %v1878_v10 }
 0x8a2   : > { %v1902_v16 = vadd.f32 %v1897_v58, %v4857_v63 }
 0x8a4   : > { %v5018_v9 = vadd.f32 %v4023_v12, %v1902_v16 }
 0x8a6   : > { %v1880_v17 = vpop.f32.mrf.mxu2  ;;  %v1920_v20 = vsel %vm783_vm1, %v5018_v9, 0.0 }
 0x8a7   : > { %v1898_v22 = vpop.f32.mrf.mxu3  ;;  %1921 = vadd.xlane.f32.xlu2 %v1920_v20 }
 0x90a   : > { %v1916_v51 = vpop.xlane.xlu1 %1915 }
 0x90b   : > { %v1923_v19 = vmul.f32 %v1916_v51, %v4546_v27 }
 0x90d   : > { %v5024_v55 = vsub.f32 %v5008_v1, %v1923_v19 }
 0x90f   : > { %v1929_v23 = vmul.f32 %v5024_v55, %v5024_v55 }
 0x911   : > { %v1932_v25 = vsel %vm776_vm2, %v1929_v23, 0.0  ;;  %v4024_v23 = vld [vmem:[%s5512_s7 + $0x1] ss:$0 sm:$0xff] }
 0x912   : > { %v1919_v63 = vpop.xlane.xlu0 %1918  ;;  %1933 = vadd.xlane.f32.xlu1 %v1932_v25 }
 0x913   : > { %v1924_v26 = vmul.f32 %v1919_v63, %v4546_v27 }
 0x915   : > { %v5031_v11 = vsub.f32 %v5013_v8, %v1924_v26 }
 0x917   : > { %v1930_v6 = vmul.f32 %v5031_v11, %v5031_v11 }
 0x919   : > { %v1935_v21 = vsel %vm776_vm2, %v1930_v6, 0.0 }
 0x91a   : > { %v1922_v28 = vpop.xlane.xlu2 %1921  ;;  %1936 = vadd.xlane.f32.xlu0 %v1935_v21 }
 0x91b   : > { %v1925_v14 = vmul.f32 %v1922_v28, %v4546_v27  ;;  %v4025_v28 = vld [vmem:[%s5513_s8 + $0x1] ss:$0 sm:$0xff] }
 0x91d   : > { %v5038_v54 = vsub.f32 %v5018_v9, %v1925_v14 }
 0x91f   : > { %v1931_v29 = vmul.f32 %v5038_v54, %v5038_v54 }
 0x921   : > { %v1938_v31 = vsel %vm783_vm1, %v1931_v29, 0.0 }
 0x922   : > { %1939 = vadd.xlane.f32.xlu2 %v1938_v31 }
 0x985   : > { %v1934_v52 = vpop.xlane.xlu1 %1933 }
 0x986   : > { %v1941_v57 = vmul.f32 %v1934_v52, %v4546_v27 }
 0x988   : > { %v1944_v60 = vadd.f32 1e-06, %v1941_v57 }
 0x98a   : > { %4108 = vrsqrt.f32 %v1944_v60  ;;  %vm1953_vm6 = vweird.f32 %v1944_v60 }
 0x98d   : > { %v1937_v62 = vpop.xlane.xlu0 %1936 }
 0x98e   : > { %v1942_v46 = vmul.f32 %v1937_v62, %v4546_v27 }
 0x990   : > { %v4109_v12 = vpop.eup %4108  ;;  %v1945_v0 = vadd.f32 1e-06, %v1942_v46 }
 0x991   : > { %v1948_v56 = vmul.f32 %v4109_v12, %v1944_v60  ;;  %vm1954_vm5 = vweird.f32 %v4109_v12 }
 0x992   : > { %4110 = vrsqrt.f32 %v1945_v0  ;;  %vm1955_vm7 = vmor %vm1953_vm6, %vm1954_vm5  ;;  %vm1963_vm9 = vweird.f32 %v1945_v0 }
 0x993   : > { %v1949_v2 = vmul.f32 %v4109_v12, %v1948_v56 }
 0x995   : > { %v1950_v13 = vmul.f32 0.5, %v1949_v2  ;;  %v1940_v5 = vpop.xlane.xlu2 %1939 }
 0x996   : > { %v1943_v7 = vmul.f32 %v1940_v5, %v4546_v27 }
 0x997   : > { %v1951_v10 = vsub.f32 1.5, %v1950_v13 }
 0x998   : > { %v4111_v4 = vpop.eup %4110  ;;  %v1946_v15 = vadd.f32 1e-06, %v1943_v7 }
 0x999   : > { %v1952_v58 = vmul.f32 %v4109_v12, %v1951_v10  ;;  %v1958_v16 = vmul.f32 %v4111_v4, %v1945_v0  ;;  %vm1964_vm8 = vweird.f32 %v4111_v4 }
 0x99a   : > { %4112 = vrsqrt.f32 %v1946_v15  ;;  %vm1965_vm10 = vmor %vm1963_vm9, %vm1964_vm8  ;;  %vm1973_vm12 = vweird.f32 %v1946_v15 }
 0x99b   : > { %v1959_v17 = vmul.f32 %v4111_v4, %v1958_v16  ;;  %v1956_v20 = vsel %vm1955_vm7, %v4109_v12, %v1952_v58 }
 0x99c   : > { %v1977_v25 = vmul.f32 %v1956_v20, %v5024_v55 }
 0x99d   : > { %v1960_v22 = vmul.f32 0.5, %v1959_v17 }
 0x99e   : > { %v1983_v14 = vmul.f32 %v4024_v23, %v1977_v25 }
 0x99f   : > { %v1961_v51 = vsub.f32 1.5, %v1960_v22 }
 0x9a0   : > { %v4113_v19 = vpop.eup %4112  ;;  %v1989_v24 = vadd.f32 %v4025_v28, %v1983_v14 }
 0x9a1   : > { %v1962_v63 = vmul.f32 %v4111_v4, %v1961_v51  ;;  %v1968_v26 = vmul.f32 %v4113_v19, %v1946_v15  ;;  %vm1974_vm11 = vweird.f32 %v4113_v19 }
 0x9a2   : > { %vm1975_vm13 = vmor %vm1973_vm12, %vm1974_vm11 }
 0x9a3   : > { %v1966_v6 = vsel %vm1965_vm10, %v4111_v4, %v1962_v63  ;;  %v1969_v21 = vmul.f32 %v4113_v19, %v1968_v26 }
 0x9a4   : > { %v1978_v29 = vmul.f32 %v1966_v6, %v5031_v11 }
 0x9a5   : > { %v1970_v31 = vmul.f32 0.5, %v1969_v21 }
 0x9a6   : > { %v1984_v32 = vmul.f32 %v4024_v23, %v1978_v29 }
 0x9a7   : > { %v1971_v18 = vsub.f32 1.5, %v1970_v31 }
 0x9a8   : > { %v1990_v33 = vadd.f32 %v4025_v28, %v1984_v32 }
 0x9a9   : > { %v1972_v55 = vmul.f32 %v4113_v19, %v1971_v18 }
 0x9aa   : > { %v2001_v34 = vpack.c.bf16 %v1990_v33, %v1989_v24 }
 0x9ab   : > { %v1976_v35 = vsel %vm1975_vm13, %v4113_v19, %v1972_v55 }
 0x9ac   : > { %3618 = vmatmul.msk.bf16.vlgmr.msra.gmra.mxu0 %vm776_vm2, %v2001_v34  ;;  %3620 = vmatmul.msk.bf16.vlgmr.msrb.gmra.mxu1 %vm776_vm2, %v2001_v34  ;;  %v1979_v36 = vmul.f32 %v1976_v35, %v5038_v54  ;;  %v2007_v54 = vperm.slane %v3585_v43, 1 }
 0x9ae   : > { %v1985_v38 = vmul.f32 %v4024_v23, %v1979_v36 }
 0x9b0   : > { %v1991_v40 = vadd.f32 %v4025_v28, %v1985_v38 }
 0x9b2   : > { %v2002_v11 = vpack.c.bf16 %v1991_v40, %v1991_v40 }
 0x9bc   : > { %3619 = vmatmul.msk.bf16.gmra.mxu0 %vm776_vm2, %v2002_v11  ;;  %3621 = vmatmul.msk.bf16.gmra.mxu1 %vm776_vm2, %v2002_v11 }
 0xa29   : > { %v2065_v41 = vpop.f32.mrf.mxu0  ;;  %v2083_v42 = vpop.f32.mrf.mxu1 }
 0xa2a   : > { %v2066_v47 = vadd.f32 %v2065_v41, %v2006_v30  ;;  %v2084_v37 = vadd.f32 %v2083_v42, %v2007_v54 }
 0xa31   : > { %v2067_v44 = vpop.f32.mrf.mxu0  ;;  %v2085_v45 = vpop.f32.mrf.mxu1 }
 0xa32   : > { %v2068_v48 = vadd.f32 %v2067_v44, %v2006_v30  ;;  %v2086_v53 = vadd.f32 %v2085_v45, %v2007_v54 }
 0xa34   : > { %v2092_v49 = vpack.c.bf16 %v2068_v48, %v2066_v47  ;;  %v5118_v12 = vpack.c.bf16 %v2086_v53, %v2084_v37 }
 0xa36   : > { %2096 = vrot.lane.b32.xlu0 %v2092_v49, %s5564_s22 }
 0xa39   : > { %v2070_v52 = vpop.f32.mrf.mxu0  ;;  %v2088_v57 = vpop.f32.mrf.mxu1 }
 0xa3a   : > { %v2071_v50 = vadd.f32 %v2070_v52, %v2006_v30  ;;  %v2089_v39 = vadd.f32 %v2088_v57, %v2007_v54 }
 0xa3c   : > { %v2093_v59 = vpack.c.bf16 %v2071_v50, %v2071_v50  ;;  %v5111_v61 = vpack.c.bf16 %v2089_v39, %v2089_v39 }
 0xa3e   : > { %2200 = vrot.lane.b32.xlu2 %v2093_v59, %s5565_s15  ;;  %2098 = vrot.lane.b32.xlu1 %v2093_v59, %s5564_s22  ;;  %v2174_v60 = vand.u32 %v5111_v61, %v4648_v3 }
 0xa3f   : > { %2198 = vrot.lane.b32.xlu0 %v2092_v49, %s5565_s15 }
 0xa40   : > { %2182 = vmatpush.bf16.msra.mxu3 %v2174_v60 }
 0xa41   : > { %v2072_v62 = vpop.f32.mrf.mxu0  ;;  %v2090_v46 = vpop.f32.mrf.mxu1 }
 0xa44   : > { %2183 = vmatpush.bf16.msra.mxu3 %v5118_v12 }
 0xa46   : > { %2307 = vrot.lane.b32.xlu2 %v2093_v59, %s5566_s16  ;;  %2194 = vrot.lane.b32.xlu1 %v2092_v49, %s5567_s27 }
 0xa47   : > { %2305 = vrot.lane.b32.xlu0 %v2092_v49, %s5566_s16 }
 0xa4e   : > { %2412 = vrot.lane.b32.xlu2 %v2093_v59, %s5568_s0  ;;  %2196 = vrot.lane.b32.xlu1 %v2093_v59, %s5567_s27 }
 0xa4f   : > { %2301 = vrot.lane.b32.xlu0 %v2092_v49, %s5569_s1 }
 0xa56   : > { %2406 = vrot.lane.b32.xlu2 %v2092_v49, %s5570_s29  ;;  %2410 = vrot.lane.b32.xlu1 %v2092_v49, %s5568_s0 }
 0xa57   : > { %2303 = vrot.lane.b32.xlu0 %v2093_v59, %s5569_s1 }
 0xa5e   : > { %2408 = vrot.lane.b32.xlu1 %v2093_v59, %s5570_s29 }
 0xa98   : > { %v2201_v0 = vpop.permute.xlu2 %2200 }
 0xa99   : > { %v2212_v56 = vsel %vm969_vm14, %v2201_v0, 0 }
 0xa9a   : > { %2220 = vmatpush.bf16.xpose.msrb.mxu0 %v2212_v56 }
 0xaa0   : > { %v2308_v2 = vpop.permute.xlu2 %2307 }
 0xaa1   : > { %v2319_v20 = vsel %vm969_vm14, %v2308_v2, 0 }
 0xaa8   : > { %v2097_v13 = vpop.permute.xlu0 %2096  ;;  %v2413_v5 = vpop.permute.xlu2 %2412 }
 0xaa9   : > { %v2424_v58 = vsel %vm969_vm14, %v2413_v5, 0  ;;  %v2107_v17 = vsel %vm969_vm14, %v2097_v13, 0 }
 0xab0   : > { %v2099_v7 = vpop.permute.xlu1 %2098  ;;  %v2407_v63 = vpop.permute.xlu2 %2406 }
 0xab1   : > { %v2110_v10 = vsel %vm969_vm14, %v2099_v7, 0  ;;  %v2199_v4 = vpop.permute.xlu0 %2198 }
 0xab2   : > { %v2209_v15 = vsel %vm969_vm14, %v2199_v4, 0  ;;  %2118 = vmatpush.bf16.xpose.msra.mxu2 %v2110_v10 }
 0xab3   : > { %2221 = vmatpush.bf16.xpose.msrb.mxu0 %v2209_v15 }
 0xab8   : > { %v2195_v16 = vpop.permute.xlu1 %2194 }
 0xab9   : > { %v2306_v22 = vpop.permute.xlu0 %2305 }
 0xaba   : > { %3626 = vmatmul.msk.bf16.vlgmr.msrb.gmra.mxu0 %vm969_vm14, %v2195_v16  ;;  %2119 = vmatpush.bf16.xpose.msra.mxu2 %v2107_v17  ;;  %v2316_v19 = vsel %vm969_vm14, %v2306_v22, 0 }
 0xabb   : > { %2432 = vmatpush.bf16.xpose.msra.mxu0 %v2424_v58 }
 0xac0   : > { %v2197_v51 = vpop.permute.xlu1 %2196 }
 0xac1   : > { %3622 = vmatmul.msk.bf16.vlgmr.msra.gmra.mxu2 %vm969_vm14, %v2092_v49  ;;  %v2302_v26 = vpop.permute.xlu0 %2301 }
 0xac2   : > { %2327 = vmatpush.bf16.xpose.msrb.mxu2 %v2319_v20 }
 0xac8   : > { %v2411_v23 = vpop.permute.xlu1 %2410 }
 0xac9   : > { %v2421_v25 = vsel %vm969_vm14, %v2411_v23, 0  ;;  %v2304_v21 = vpop.permute.xlu0 %2303 }
 0xaca   : > { %2328 = vmatpush.bf16.xpose.msrb.mxu2 %v2316_v19  ;;  %3627 = vmatmul.msk.bf16.gmra.mxu0 %vm969_vm14, %v2197_v51 }
 0xacb   : > { %2433 = vmatpush.bf16.xpose.msra.mxu0 %v2421_v25 }
 0xad0   : > { %v2409_v6 = vpop.permute.xlu1 %2408 }
 0xad1   : > { %3623 = vmatmul.msk.bf16.gmra.mxu2 %vm969_vm14, %v2093_v59 }
 0xada   : > { %3634 = vmatmul.msk.bf16.vlgmr.msra.gmra.mxu0 %vm969_vm14, %v2407_v63 }
 0xae1   : > { %3630 = vmatmul.msk.bf16.vlgmr.msrb.gmra.mxu2 %vm969_vm14, %v2302_v26 }
 0xaea   : > { %3635 = vmatmul.msk.bf16.gmra.mxu0 %vm969_vm14, %v2409_v6 }
 0xaf1   : > { %3631 = vmatmul.msk.bf16.gmra.mxu2 %vm969_vm14, %v2304_v21 }
 0xb37   : > { %v2223_v28 = vpop.f32.mrf.mxu0 }
 0xb38   : > { %v2232_v14 = vsel %vm1000_vm15, %v2223_v28, -inf }
 0xb39   : > { %2233 = vmax.xlane.f32.xlu1 %v2232_v14 }
 0xb3f   : > { %v2225_v29 = vpop.f32.mrf.mxu0 }
 0xb40   : > { %v2235_v34 = vsel %vm1000_vm15, %v2225_v29, -inf }
 0xb44   : > { %v2121_v31 = vpop.f32.mrf.mxu2 }
 0xb45   : > { %v2130_v32 = vsel %vm1000_vm15, %v2121_v31, -inf }
 0xb46   : > { %2131 = vmax.xlane.f32.xlu2 %v2130_v32 }
 0xb47   : > { %v2228_v18 = vpop.f32.mrf.mxu0 }
 0xb48   : > { %v2238_v24 = vsel %vm1007_vm3, %v2228_v18, -inf }
 0xb49   : > { %2239 = vmax.xlane.f32.xlu1 %v2238_v24 }
 0xb4c   : > { %v2123_v33 = vpop.f32.mrf.mxu2 }
 0xb4d   : > { %v2133_v55 = vsel %vm1000_vm15, %v2123_v33, -inf }
 0xb4e   : > { %2134 = vmax.xlane.f32.xlu0 %v2133_v55  ;;  %2236 = vmax.xlane.f32.xlu2 %v2235_v34 }
 0xb4f   : > { %v2230_v35 = vpop.f32.mrf.mxu0 }
 0xb54   : > { %v5152_v36 = vpop.f32.mrf.mxu2 }
 0xb55   : > { %v2136_v52 = vsel %vm1007_vm3, %v5152_v36, -inf }
 0xb57   : > { %v5154_v38 = vpop.f32.mrf.mxu0 }
 0xb58   : > { %v2444_v54 = vsel %vm1000_vm15, %v5154_v38, -inf }
 0xb5c   : > { %v2128_v40 = vpop.f32.mrf.mxu2 }
 0xb5f   : > { %v5156_v11 = vpop.f32.mrf.mxu0 }
 0xb60   : > { %v2447_v44 = vsel %vm1000_vm15, %v5156_v11, -inf }
 0xb62   : > { %2271 = vrot.lane.b32.xlu1 %v5111_v61, %s5567_s27  ;;  %2269 = vrot.lane.b32.xlu0 %v5118_v12, %s5567_s27 }
 0xb64   : > { %v5162_v41 = vpop.f32.mrf.mxu2 }
 0xb65   : > { %v2339_v42 = vsel %vm1000_vm15, %v5162_v41, -inf }
 0xb66   : > { %2340 = vmax.xlane.f32.xlu2 %v2339_v42 }
 0xb67   : > { %v5166_v43 = vpop.f32.mrf.mxu0 }
 0xb6c   : > { %v5168_v30 = vpop.f32.mrf.mxu2 }
 0xb6d   : > { %v2342_v57 = vsel %vm1000_vm15, %v5168_v30, -inf }
 0xb6e   : > { %2448 = vmax.xlane.f32.xlu2 %v2447_v44 }
 0xb6f   : > { %v2442_v45 = vpop.f32.mrf.mxu0 }
 0xb74   : > { %v5172_v47 = vpop.f32.mrf.mxu2 }
 0xb75   : > { %v2345_v48 = vsel %vm1007_vm3, %v5172_v47, -inf }
 0xb76   : > { %2346 = vmax.xlane.f32.xlu2 %v2345_v48 }
 0xb7c   : > { %v2337_v49 = vpop.f32.mrf.mxu2 }
 0xb8c   : > { %2445 = vmax.xlane.f32.xlu1 %v2444_v54  ;;  %2137 = vmax.xlane.f32.xlu0 %v2136_v52 }
 0xb94   : > { %2343 = vmax.xlane.f32.xlu0 %v2342_v57 }
 0xba8   : > { %2376 = vrot.lane.b32.xlu0 %v5111_v61, %s5569_s1 }
 0xbac   : > { %v2234_v50 = vpop.xlane.xlu1 %2233 }
 0xbad   : > { %v2241_v39 = vsub.f32 %v2223_v28, %v2234_v50 }
 0xbaf   : > { %v2244_v59 = vmul.f32 1.442695, %v2241_v39 }
 0xbb1   : > { %4114 = vpow2.f32 %v2244_v59 }
 0xbb7   : > { %v5184_v53 = vpop.eup %4114 }
 0xbb8   : > { %v2250_v60 = vsel %vm1000_vm15, %v5184_v53, 0.0 }
 0xbb9   : > { %2251 = vadd.xlane.f32.xlu2 %v2250_v60  ;;  %v2132_v37 = vpop.xlane.xlu2 %2131 }
 0xbba   : > { %v2139_v56 = vsub.f32 %v2121_v31, %v2132_v37 }
 0xbbc   : > { %v2240_v62 = vpop.xlane.xlu1 %2239  ;;  %v2142_v5 = vmul.f32 1.442695, %v2139_v56 }
 0xbbd   : > { %v2243_v46 = vsub.f32 %v2228_v18, %v2240_v62 }
 0xbbf   : > { %v2248_v0 = vmul.f32 1.442695, %v2243_v46 }
 0xbc1   : > { %4116 = vpow2.f32 %v2248_v0  ;;  %v2135_v2 = vpop.xlane.xlu0 %2134  ;;  %v2237_v10 = vpop.xlane.xlu2 %2236 }
 0xbc2   : > { %v2140_v13 = vsub.f32 %v2123_v33, %v2135_v2  ;;  %v2242_v15 = vsub.f32 %v2225_v29, %v2237_v10 }
 0xbc4   : > { %v2144_v7 = vmul.f32 1.442695, %v2140_v13  ;;  %v2246_v16 = vmul.f32 1.442695, %v2242_v15 }
 0xbc6   : > { %4118 = vpow2.f32 %v2144_v7 }
 0xbc7   : > { %v5188_v4 = vpop.eup %4116  ;;  %4120 = vpow2.f32 %v2142_v5 }
 0xbc8   : > { %v2256_v58 = vsel %vm1007_vm3, %v5188_v4, 0.0  ;;  %4122 = vpow2.f32 %v2246_v16 }
 0xbc9   : > { %2257 = vadd.xlane.f32.xlu2 %v2256_v58 }
 0xbcc   : > { %v5192_v17 = vpop.eup %4118 }
 0xbcd   : > { %v5194_v20 = vpop.eup %4120  ;;  %v2151_v22 = vsel %vm1000_vm15, %v5192_v17, 0.0 }
 0xbce   : > { %2152 = vadd.xlane.f32.xlu1 %v2151_v22  ;;  %v2148_v51 = vsel %vm1000_vm15, %v5194_v20, 0.0  ;;  %v5201_v25 = vpop.eup %4122 }
 0xbcf   : > { %v2253_v63 = vsel %vm1000_vm15, %v5201_v25, 0.0 }
 0xbd2   : > { %2149 = vadd.xlane.f32.xlu0 %v2148_v51 }
 0xbd4   : > { %v2272_v19 = vpop.permute.xlu1 %2271  ;;  %v2270_v26 = vpop.permute.xlu0 %2269 }
 0xbd5   : > { %v2281_v23 = vand.u32 %v2272_v19, %v4648_v3 }
 0xbd7   : > { %2289 = vmatpush.bf16.msra.mxu1 %v2281_v23 }
 0xbda   : > { %2254 = vadd.xlane.f32.xlu0 %v2253_v63 }
 0xbdb   : > { %2290 = vmatpush.bf16.msra.mxu1 %v2270_v26 }
 0xbff   : > { %v2446_v6 = vpop.xlane.xlu1 %2445  ;;  %v2138_v21 = vpop.xlane.xlu0 %2137 }
 0xc00   : > { %v2453_v28 = vsub.f32 %v5154_v38, %v2446_v6  ;;  %v2141_v14 = vsub.f32 %v5152_v36, %v2138_v21 }
 0xc02   : > { %v2456_v29 = vmul.f32 1.442695, %v2453_v28  ;;  %v2146_v31 = vmul.f32 1.442695, %v2141_v14 }
 0xc04   : > { %4124 = vpow2.f32 %v2456_v29 }
 0xc05   : > { %4126 = vpow2.f32 %v2146_v31 }
 0xc07   : > { %v2344_v32 = vpop.xlane.xlu0 %2343 }
 0xc08   : > { %v2349_v18 = vsub.f32 %v5168_v30, %v2344_v32  ;;  %v2341_v30 = vpop.xlane.xlu2 %2340 }
 0xc09   : > { %v2348_v45 = vsub.f32 %v5162_v41, %v2341_v30 }
 0xc0a   : > { %v5208_v24 = vpop.eup %4124  ;;  %v2353_v33 = vmul.f32 1.442695, %v2349_v18 }
 0xc0b   : > { %v5210_v55 = vpop.eup %4126  ;;  %v2462_v34 = vsel %vm1000_vm15, %v5208_v24, 0.0  ;;  %v2351_v48 = vmul.f32 1.442695, %v2348_v45 }
 0xc0c   : > { %4128 = vpow2.f32 %v2353_v33  ;;  %2463 = vadd.xlane.f32.xlu0 %v2462_v34  ;;  %v2154_v35 = vsel %vm1007_vm3, %v5210_v55, 0.0 }
 0xc0d   : > { %2155 = vadd.xlane.f32.xlu2 %v2154_v35  ;;  %4130 = vpow2.f32 %v2351_v48 }
 0xc10   : > { %v2449_v44 = vpop.xlane.xlu2 %2448 }
 0xc11   : > { %v2454_v52 = vsub.f32 %v5156_v11, %v2449_v44 }
 0xc12   : > { %v5216_v36 = vpop.eup %4128 }
 0xc13   : > { %v2360_v38 = vsel %vm1000_vm15, %v5216_v36, 0.0  ;;  %v2458_v39 = vmul.f32 1.442695, %v2454_v52 }
 0xc14   : > { %2361 = vadd.xlane.f32.xlu1 %v2360_v38 }
 0xc18   : > { %v2347_v49 = vpop.xlane.xlu2 %2346 }
 0xc19   : > { %v2350_v57 = vsub.f32 %v5172_v47, %v2347_v49 }
 0xc1a   : > { %v2377_v40 = vpop.permute.xlu0 %2376 }
 0xc1b   : > { %v2386_v42 = vand.u32 %v2377_v40, %v4648_v3  ;;  %v2355_v59 = vmul.f32 1.442695, %v2350_v57 }
 0xc1d   : > { %2394 = vmatpush.bf16.msrb.mxu3 %v2386_v42 }
 0xc20   : > { %2479 = vrot.lane.b32.xlu0 %v5118_v12, %s5570_s29 }
 0xc25   : > { %2374 = vrot.lane.b32.xlu2 %v5118_v12, %s5569_s1  ;;  %v4131_v12 = vpop.eup %4130  ;;  %s3843_s1 = sshll.u32 %s5574_s3, 3 }
 0xc26   : > { %v2357_v11 = vsel %vm1000_vm15, %v4131_v12, 0.0  ;;  %s715_s30 = scalar_lea.vmem %s5526_s21, %s3843_s1 }
 0xc2c   : > { %v2252_v60 = vpop.xlane.xlu2 %2251 }
 0xc2d   : > { %2481 = vrot.lane.b32.xlu1 %v5111_v61, %s5570_s29 }
 0xc3c   : > { %v2258_v58 = vpop.xlane.xlu2 %2257 }
 0xc41   : > { %v2153_v54 = vpop.xlane.xlu1 %2152 }
 0xc42   : > { %4132 = vrcp.f32 %v2153_v54 }
 0xc45   : > { %v2150_v50 = vpop.xlane.xlu0 %2149 }
 0xc46   : > { %4134 = vrcp.f32 %v2150_v50 }
 0xc47   : > { %4136 = vpow2.f32 %v2458_v39 }
 0xc48   : > { %v4133_v37 = vpop.eup %4132  ;;  %4138 = vrcp.f32 %v2252_v60 }
 0xc49   : > { %4140 = vpow2.f32 %v2355_v59  ;;  %v2161_v41 = vmul.f32 %v4133_v37, %v5192_v17  ;;  %v2450_v17 = vsel %vm1007_vm3, %v5166_v43, -inf }
 0xc4c   : > { %v4135_v61 = vpop.eup %4134 }
 0xc4d   : > { %v2160_v62 = vmul.f32 %v4135_v61, %v5194_v20  ;;  %v2255_v46 = vpop.xlane.xlu0 %2254  ;;  %v4137_v0 = vpop.eup %4136 }
 0xc4e   : > { %2358 = vadd.xlane.f32.xlu2 %v2357_v11  ;;  %4142 = vrcp.f32 %v2255_v46  ;;  %v4139_v56 = vpop.eup %4138  ;;  %v2465_v10 = vsel %vm1000_vm15, %v4137_v0, 0.0 }
 0xc4f   : > { %v2163_v47 = vpack.c.bf16 %v2161_v41, %v2160_v62  ;;  %v4141_v2 = vpop.eup %4140  ;;  %v2262_v5 = vmul.f32 %v4139_v56, %v5184_v53  ;;  %4144 = vrcp.f32 %v2258_v58  ;;  %v3892_v58 = vld [vmem:[%s5563_s5 + $0x28] sm:$0xff] }
 0xc50   : > { %v2363_v15 = vsel %vm1007_vm3, %v4141_v2, 0.0 }
 0xc51   : > { %3624 = vmatmul.msk.bf16.vlgmr.msra.gmra.mxu3 %vm1000_vm15, %v2163_v47 }
 0xc54   : > { %v4143_v13 = vpop.eup %4142 }
 0xc55   : > { %v2263_v7 = vmul.f32 %v4143_v13, %v5201_v25  ;;  %v4145_v20 = vpop.eup %4144 }
 0xc56   : > { %2466 = vadd.xlane.f32.xlu2 %v2465_v10  ;;  %v2264_v53 = vmul.f32 %v4145_v20, %v5188_v4  ;;  %v3894_v10 = vld [vmem:[%s5563_s5 + $0x38] sm:$0xff] }
 0xc57   : > { %v2265_v16 = vpack.c.bf16 %v2263_v7, %v2262_v5  ;;  %2364 = vadd.xlane.f32.xlu1 %v2363_v15  ;;  %2601 = vmatpush.bf16.msra.mxu2 %v3894_v10  ;;  %v3893_v15 = vld [vmem:[%s5563_s5 + $0x30] sm:$0xff] }
 0xc58   : > { %v2266_v22 = vpack.c.bf16 %v2264_v53, %v2264_v53 }
 0xc59   : > { %3628 = vmatmul.msk.bf16.vlgmr.msra.gmra.mxu1 %vm1000_vm15, %v2265_v16  ;;  %v3891_v16 = vld [vmem:[%s5563_s5 + $0x20] sm:$0xff] }
 0xc5b   : > { %2602 = vmatpush.bf16.msra.mxu2 %v3893_v15  ;;  %v3694_v15 = vld [vmem:[%s5516_s11 + $0x60] sm:$0xf] }
 0xc5e   : > { %2451 = vmax.xlane.f32.xlu2 %v2450_v17 }
 0xc5f   : > { %2603 = vmatpush.bf16.msra.mxu2 %v3892_v58  ;;  %v3900_v58 = vld [vmem:[%s5516_s11 + $0x64] sm:$0xf0] }
 0xc63   : > { %2604 = vmatpush.bf16.msra.mxu2 %v3891_v16  ;;  %v3899_v16 = vld [vmem:[%s5516_s11 + $0x64] sm:$0xf] }
 0xc69   : > { %3629 = vmatmul.msk.bf16.gmra.mxu1 %vm1000_vm15, %v2266_v22 }
 0xc7f   : > { %v2464_v6 = vpop.xlane.xlu0 %2463 }
 0xc80   : > { %v2156_v51 = vpop.xlane.xlu2 %2155 }
 0xc81   : > { %4146 = vrcp.f32 %v2156_v51 }
 0xc87   : > { %v4147_v19 = vpop.eup %4146  ;;  %v2362_v26 = vpop.xlane.xlu1 %2361 }
 0xc88   : > { %v2375_v23 = vpop.permute.xlu2 %2374  ;;  %v2162_v25 = vmul.f32 %v4147_v19, %v5210_v55  ;;  %4148 = vrcp.f32 %v2362_v26 }
 0xc89   : > { %2395 = vmatpush.bf16.msrb.mxu3 %v2375_v23 }
 0xc8a   : > { %v2164_v63 = vpack.c.bf16 %v2162_v25, %v2162_v25 }
 0xc8c   : > { %3625 = vmatmul.msk.bf16.gmra.mxu3 %vm1000_vm15, %v2164_v63 }
 0xc8e   : > { %v4149_v29 = vpop.eup %4148 }
 0xc8f   : > { %v2370_v32 = vmul.f32 %v4149_v29, %v5216_v36 }
 0xc92   : > { %v2480_v4 = vpop.permute.xlu0 %2479 }
 0xc9f   : > { %v2482_v21 = vpop.permute.xlu1 %2481 }
 0xca0   : > { %v2491_v28 = vand.u32 %v2482_v21, %v4648_v3 }
 0xca2   : > { %2499 = vmatpush.bf16.msrb.mxu1 %v2491_v28 }
 0xca6   : > { %2500 = vmatpush.bf16.msrb.mxu1 %v2480_v4 }
 0xcc1   : > { %v2359_v14 = vpop.xlane.xlu2 %2358 }
 0xcc2   : > { %4150 = vrcp.f32 %v2359_v14 }
 0xcc3   : > { %4152 = vrcp.f32 %v2464_v6 }
 0xcc8   : > { %v4151_v31 = vpop.eup %4150 }
 0xcc9   : > { %v2369_v18 = vmul.f32 %v4151_v31, %v4131_v12  ;;  %v2467_v33 = vpop.xlane.xlu2 %2466  ;;  %v4153_v35 = vpop.eup %4152 }
 0xcca   : > { %4154 = vrcp.f32 %v2467_v33  ;;  %v2365_v34 = vpop.xlane.xlu1 %2364  ;;  %v2474_v38 = vmul.f32 %v4153_v35, %v5208_v24 }
 0xccb   : > { %v2372_v55 = vpack.c.bf16 %v2370_v32, %v2369_v18  ;;  %4156 = vrcp.f32 %v2365_v34 }
 0xccd   : > { %3632 = vmatmul.msk.bf16.vlgmr.msrb.gmra.mxu3 %vm1000_vm15, %v2372_v55 }
 0xcd0   : > { %v4155_v3 = vpop.eup %4154 }
 0xcd1   : > { %v2475_v40 = vmul.f32 %v4155_v3, %v4137_v0  ;;  %v2452_v42 = vpop.xlane.xlu2 %2451  ;;  %v4157_v45 = vpop.eup %4156 }
 0xcd2   : > { %v2455_v30 = vsub.f32 %v5166_v43, %v2452_v42  ;;  %v2371_v49 = vmul.f32 %v4157_v45, %v4141_v2 }
 0xcd3   : > { %v2477_v44 = vpack.c.bf16 %v2475_v40, %v2474_v38  ;;  %v4026_v40 = vld [vmem:[%s5511_s6 + $0x1] ss:$0 sm:$0xff] }
 0xcd4   : > { %v2460_v48 = vmul.f32 1.442695, %v2455_v30  ;;  %v2373_v54 = vpack.c.bf16 %v2371_v49, %v2371_v49  ;;  %v2185_v12 = vpop.f32.mrf.mxu3 }
 0xcd5   : > { %3636 = vmatmul.msk.bf16.vlgmr.msrb.gmra.mxu1 %vm1000_vm15, %v2477_v44 }
 0xcd6   : > { %4158 = vpow2.f32 %v2460_v48  ;;  %v2292_v36 = vpop.f32.mrf.mxu1 }
 0xcdc   : > { %v4159_v52 = vpop.eup %4158  ;;  %v2187_v59 = vpop.f32.mrf.mxu3 }
 0xcdd   : > { %3633 = vmatmul.msk.bf16.gmra.mxu3 %vm1000_vm15, %v2373_v54  ;;  %v2468_v57 = vsel %vm1007_vm3, %v4159_v52, 0.0 }
 0xcde   : > { %2469 = vadd.xlane.f32.xlu0 %v2468_v57  ;;  %v2294_v24 = vpop.f32.mrf.mxu1 }
 0xcdf   : > { %v4003_v50 = vpack.i.bf16 %v2294_v24, %v2292_v36 }
 0xce1   : > { %4004 = vrot.lane.b32.xlu2 %v4003_v50, %s5568_s0 }
 0xce6   : > { %v2297_v43 = vpop.f32.mrf.mxu1 }
 0xcee   : > { %v2299_v39 = vpop.f32.mrf.mxu1 }
 0xcf2   : > { %2518 = vrot.lane.b32.xlu0 %v2297_v43, %s5568_s0 }
 0xd0f   : > { %v2190_v60 = vpop.f32.mrf.mxu3 }
 0xd17   : > { %v2192_v37 = vpop.f32.mrf.mxu3 }
 0xd3b   : > { %v4005_v17 = vpop.permute.xlu2 %4004 }
 0xd3c   : > { %v4007_v20 = vunpack.i.h.bf16 %v4005_v17  ;;  %v4006_v53 = vunpack.i.l.bf16 %v4005_v17  ;;  %v3695_v17 = vor.u32 %v3900_v58, %v3694_v15 }
 0xd3e   : > { %v2548_v25 = vsel %vm969_vm14, %v2187_v59, %v4007_v20  ;;  %v2547_v63 = vsel %vm969_vm14, %v2185_v12, %v4006_v53  ;;  %v3696_v20 = vld [vmem:[%s5516_s11 + $0x68] sm:$0xf0] }
 0xd3f   : > { %v3699_v53 = vor.u32 %v3899_v16, %v3696_v20  ;;  %v3918_v16 = vld [vmem:[%s5518_s13 + $0xf8] sm:$0xff]  ;;  %v3916_v20 = vld [vmem:[%s5518_s13 + $0xe8] sm:$0xff] }
 0xd40   : > { %3013 = vmatpush.bf16.msrb.mxu2 %v3918_v16 }
 0xd50   : > { %v2397_v61 = vpop.f32.mrf.mxu3 }
 0xd51   : > { %v2470_v41 = vpop.xlane.xlu0 %2469 }
 0xd52   : > { %4160 = vrcp.f32 %v2470_v41  ;;  %v2502_v62 = vpop.f32.mrf.mxu1 }
 0xd58   : > { %v4161_v11 = vpop.eup %4160  ;;  %v2399_v46 = vpop.f32.mrf.mxu3 }
 0xd59   : > { %v2476_v47 = vmul.f32 %v4161_v11, %v4159_v52  ;;  %v4008_v0 = vpack.i.bf16 %v2399_v46, %v2397_v61 }
 0xd5a   : > { %v2504_v56 = vpop.f32.mrf.mxu1 }
 0xd5b   : > { %v4013_v2 = vpack.i.bf16 %v2504_v56, %v2502_v62  ;;  %4009 = vrot.lane.b32.xlu1 %v4008_v0, %s5566_s16  ;;  %v2478_v13 = vpack.c.bf16 %v2476_v47, %v2476_v47  ;;  %v3702_v56 = vld [vmem:[%s5516_s11 + $0x70] sm:$0xf] }
 0xd5d   : > { %4014 = vrot.lane.b32.xlu2 %v4013_v2, %s5565_s15  ;;  %3637 = vmatmul.msk.bf16.gmra.mxu1 %vm1000_vm15, %v2478_v13  ;;  %v3902_v2 = vld [vmem:[%s5516_s11 + $0x74] sm:$0xf0]  ;;  %v3901_v13 = vld [vmem:[%s5516_s11 + $0x74] sm:$0xf] }
 0xd60   : > { %v2402_v5 = vpop.f32.mrf.mxu3 }
 0xd64   : > { %v2519_v33 = vpop.permute.xlu0 %2518 }
 0xd65   : > { %2530 = vrot.lane.b32.xlu2 %v2402_v5, %s5566_s16  ;;  %v2549_v55 = vsel %vm969_vm14, %v2190_v60, %v2519_v33  ;;  %v3703_v5 = vor.u32 %v3902_v2, %v3702_v56 }
 0xd67   : > { %2776 = vmatpush.bf16.msra.mxu3 %v3703_v5 }
 0xd68   : > { %v2404_v7 = vpop.f32.mrf.mxu3 }
 0xd69   : > { %v3704_v7 = vld [vmem:[%s5516_s11 + $0x78] sm:$0xf0] }
 0xd6a   : > { %v3707_v10 = vor.u32 %v3901_v13, %v3704_v7 }
 0xd6b   : > { %2777 = vmatpush.bf16.msra.mxu3 %v3695_v17  ;;  %v3917_v17 = vld [vmem:[%s5518_s13 + $0xf0] sm:$0xff] }
 0xd6c   : > { %2794 = vmatpush.bf16.msrb.mxu0 %v3707_v10  ;;  %3014 = vmatpush.bf16.msrb.mxu2 %v3917_v17 }
 0xd70   : > { %2795 = vmatpush.bf16.msrb.mxu0 %v3699_v53  ;;  %3015 = vmatpush.bf16.msrb.mxu2 %v3916_v20  ;;  %v3909_v53 = vld [vmem:[%s5518_s13 + $0xb0] sm:$0xff] }
 0xdb7   : > { %v4015_v22 = vpop.permute.xlu2 %4014 }
 0xdb8   : > { %v4017_v26 = vunpack.i.h.bf16 %v4015_v22  ;;  %v4016_v6 = vunpack.i.l.bf16 %v4015_v22  ;;  %v3686_v22 = vld [vmem:[%s5516_s11 + $0x50] sm:$0xf] }
 0xdbf   : > { %v2531_v18 = vpop.permute.xlu2 %2530 }
 0xdc0   : > { %v2552_v34 = vsel %vm1425_vm4, %v2549_v55, %v2531_v18 }
 0xdcd   : > { %v4010_v51 = vpop.permute.xlu1 %4009 }
 0xdce   : > { %v4012_v19 = vunpack.i.h.bf16 %v4010_v51  ;;  %v4011_v23 = vunpack.i.l.bf16 %v4010_v51  ;;  %v3898_v51 = vld [vmem:[%s5516_s11 + $0x54] sm:$0xf0] }
 0xdd0   : > { %v2550_v21 = vsel %vm1425_vm4, %v2547_v63, %v4011_v23  ;;  %v2551_v28 = vsel %vm1425_vm4, %v2548_v25, %v4012_v19  ;;  %v3897_v19 = vld [vmem:[%s5516_s11 + $0x54] sm:$0xf]  ;;  %v3687_v23 = vor.u32 %v3898_v51, %v3686_v22  ;;  %v3688_v25 = vld [vmem:[%s5516_s11 + $0x58] sm:$0xf0]  ;;  %v3915_v22 = vld [vmem:[%s5518_s13 + $0xe0] sm:$0xff] }
 0xdd1   : > { %v2553_v4 = vsel %vm749_vm0, %v2550_v21, %v4016_v6  ;;  %v2554_v14 = vsel %vm749_vm0, %v2551_v28, %v4017_v26  ;;  %v3691_v63 = vor.u32 %v3897_v19, %v3688_v25  ;;  %v3678_v21 = vld [vmem:[%s5516_s11 + $0x40] sm:$0xf]  ;;  %v3896_v28 = vld [vmem:[%s5516_s11 + $0x44] sm:$0xf0]  ;;  %3016 = vmatpush.bf16.msrb.mxu2 %v3915_v22  ;;  %v3914_v19 = vld [vmem:[%s5518_s13 + $0xd8] sm:$0xff] }
 0xdd2   : > { %v2565_v29 = vpack.c.bf16 %v2554_v14, %v2553_v4  ;;  %2778 = vmatpush.bf16.msra.mxu3 %v3687_v23  ;;  %v3895_v4 = vld [vmem:[%s5516_s11 + $0x44] sm:$0xf]  ;;  %v3679_v14 = vor.u32 %v3896_v28, %v3678_v21  ;;  %v3908_v51 = vld [vmem:[%s5518_s13 + $0xa8] sm:$0xff]  ;;  %v3913_v25 = vld [vmem:[%s5518_s13 + $0xd0] sm:$0xff] }
 0xdd3   : > { %2796 = vmatpush.bf16.msrb.mxu0 %v3691_v63  ;;  %v3907_v23 = vld [vmem:[%s5518_s13 + $0xa0] sm:$0xff]  ;;  %v3906_v63 = vld [vmem:[%s5518_s13 + $0x98] sm:$0xff]  ;;  %v3905_v28 = vld [vmem:[%s5518_s13 + $0x90] sm:$0xff] }
 0xdd4   : > { %3662 = vmatmul.msk.bf16.vlgmr.msra.gmra.mxu2 %vm776_vm2, %v2565_v29  ;;  %v3680_v29 = vld [vmem:[%s5516_s11 + $0x48] sm:$0xf0] }
 0xdd5   : > { %3017 = vmatpush.bf16.msrb.mxu2 %v3914_v19 }
 0xdd6   : > { %2779 = vmatpush.bf16.msra.mxu3 %v3679_v14 }
 0xdd9   : > { %3018 = vmatpush.bf16.msrb.mxu2 %v3913_v25 }
 0xdda   : > { %v2507_v31 = vpop.f32.mrf.mxu1 }
 0xddb   : > { %2542 = vrot.lane.b32.xlu2 %v2507_v31, %s5565_s15 }
 0xde2   : > { %v2509_v32 = vpop.f32.mrf.mxu1 }
 0xde3   : > { %v3683_v32 = vor.u32 %v3895_v4, %v3680_v29  ;;  %v3911_v4 = vld [vmem:[%s5518_s13 + $0xc0] sm:$0xff] }
 0xde5   : > { %2797 = vmatpush.bf16.msrb.mxu0 %v3683_v32 }
 0xe35   : > { %v2543_v35 = vpop.permute.xlu2 %2542 }
 0xe36   : > { %v2555_v3 = vsel %vm749_vm0, %v2552_v34, %v2543_v35 }
 0xe37   : > { %v2566_v38 = vpack.c.bf16 %v2555_v3, %v2555_v3 }
 0xe39   : > { %3663 = vmatmul.msk.bf16.gmra.mxu2 %vm776_vm2, %v2566_v38 }
 0xe57   : > { %v2606_v42 = vpop.f32.mrf.mxu2 }
 0xe58   : > { %v2615_v30 = vadd.f32 %v2606_v42, %v5008_v1 }
 0xe5a   : > { %v5287_v44 = vadd.f32 %v4026_v40, %v2615_v30 }
 0xe5c   : > { %v2630_v45 = vsel %vm776_vm2, %v5287_v44, 0.0 }
 0xe5d   : > { %2631 = vadd.xlane.f32.xlu2 %v2630_v45 }
 0xe5f   : > { %v2608_v48 = vpop.f32.mrf.mxu2 }
 0xe60   : > { %v2616_v36 = vadd.f32 %v2608_v48, %v5013_v8 }
 0xe62   : > { %v5292_v49 = vadd.f32 %v4026_v40, %v2616_v36 }
 0xe64   : > { %v2633_v54 = vsel %vm776_vm2, %v5292_v49, 0.0 }
 0xe65   : > { %2634 = vadd.xlane.f32.xlu0 %v2633_v54 }
 0xebc   : > { %v2611_v52 = vpop.f32.mrf.mxu2 }
 0xebd   : > { %v2617_v57 = vadd.f32 %v2611_v52, %v5018_v9 }
 0xebf   : > { %v5297_v24 = vadd.f32 %v4026_v40, %v2617_v57  ;;  %v4027_v57 = vld [vmem:[%s5514_s9 + $0x1] ss:$0 sm:$0xff] }
 0xec1   : > { %v2636_v1 = vsel %vm783_vm1, %v5297_v24, 0.0 }
 0xec2   : > { %2637 = vadd.xlane.f32.xlu1 %v2636_v1 }
 0xec4   : > { %v2613_v50 = vpop.f32.mrf.mxu2 }
 0xed0   : > { %v2632_v43 = vpop.xlane.xlu2 %2631 }
 0xed1   : > { %v2639_v39 = vmul.f32 %v2632_v43, %v4546_v27 }
 0xed3   : > { %v5303_v8 = vsub.f32 %v5287_v44, %v2639_v39  ;;  %v4028_v39 = vld [vmem:[%s5515_s10 + $0x1] ss:$0 sm:$0xff] }
 0xed5   : > { %v2645_v12 = vmul.f32 %v5303_v8, %v5303_v8 }
 0xed7   : > { %v2648_v59 = vsel %vm776_vm2, %v2645_v12, 0.0 }
 0xed8   : > { %2649 = vadd.xlane.f32.xlu2 %v2648_v59  ;;  %v2635_v9 = vpop.xlane.xlu0 %2634 }
 0xed9   : > { %v2640_v60 = vmul.f32 %v2635_v9, %v4546_v27 }
 0xedb   : > { %v5310_v37 = vsub.f32 %v5292_v49, %v2640_v60 }
 0xedd   : > { %v2646_v61 = vmul.f32 %v5310_v37, %v5310_v37 }
 0xedf   : > { %v2651_v41 = vsel %vm776_vm2, %v2646_v61, 0.0 }
 0xee0   : > { %2652 = vadd.xlane.f32.xlu0 %v2651_v41 }
 0xf35   : > { %v2638_v62 = vpop.xlane.xlu1 %2637 }
 0xf36   : > { %v2641_v11 = vmul.f32 %v2638_v62, %v4546_v27 }
 0xf38   : > { %v5317_v46 = vsub.f32 %v5297_v24, %v2641_v11 }
 0xf3a   : > { %v2647_v47 = vmul.f32 %v5317_v46, %v5317_v46 }
 0xf3c   : > { %v2654_v0 = vsel %vm783_vm1, %v2647_v47, 0.0 }
 0xf3d   : > { %2655 = vadd.xlane.f32.xlu1 %v2654_v0 }
 0xf4b   : > { %v2650_v26 = vpop.xlane.xlu2 %2649 }
 0xf4c   : > { %v2657_v6 = vmul.f32 %v2650_v26, %v4546_v27  ;;  %v3675_v26 = vld [vmem:[%s5517_s12 + $0x2] sm:$0x3] }
 0xf4d   : > { %v5425_v21 = vperm.slane %v3675_v26, 1 }
 0xf4e   : > { %v2660_v31 = vadd.f32 1e-06, %v2657_v6  ;;  %v3912_v6 = vld [vmem:[%s5518_s13 + $0xc8] sm:$0xff] }
 0xf4f   : > { %3019 = vmatpush.bf16.msrb.mxu2 %v3912_v6 }
 0xf50   : > { %4162 = vrsqrt.f32 %v2660_v31  ;;  %vm2669_vm15 = vweird.f32 %v2660_v31 }
 0xf53   : > { %v2653_v18 = vpop.xlane.xlu0 %2652  ;;  %3020 = vmatpush.bf16.msrb.mxu2 %v3911_v4 }
 0xf54   : > { %v2658_v33 = vmul.f32 %v2653_v18, %v4546_v27  ;;  %v2722_v18 = vperm.slane %v3675_v26, 0 }
 0xf56   : > { %v4163_v55 = vpop.eup %4162  ;;  %v2661_v34 = vadd.f32 1e-06, %v2658_v33 }
 0xf57   : > { %v2664_v35 = vmul.f32 %v4163_v55, %v2660_v31  ;;  %vm2670_vm14 = vweird.f32 %v4163_v55  ;;  %v3904_v31 = vld [vmem:[%s5518_s13 + $0x88] sm:$0xff] }
 0xf58   : > { %4164 = vrsqrt.f32 %v2661_v34  ;;  %vm2671_vm3 = vmor %vm2669_vm15, %vm2670_vm14  ;;  %vm2679_vm5 = vweird.f32 %v2661_v34 }
 0xf59   : > { %v2665_v3 = vmul.f32 %v4163_v55, %v2664_v35 }
 0xf5b   : > { %v2666_v38 = vmul.f32 0.5, %v2665_v3 }
 0xf5d   : > { %v2667_v40 = vsub.f32 1.5, %v2666_v38 }
 0xf5e   : > { %v4165_v42 = vpop.eup %4164 }
 0xf5f   : > { %v2668_v30 = vmul.f32 %v4163_v55, %v2667_v40  ;;  %v2674_v45 = vmul.f32 %v4165_v42, %v2661_v34  ;;  %vm2680_vm4 = vweird.f32 %v4165_v42 }
 0xf60   : > { %vm2681_vm6 = vmor %vm2679_vm5, %vm2680_vm4  ;;  %vm3248_vm5 = vsmask.f32 7440 }
 0xf61   : > { %v2675_v48 = vmul.f32 %v4165_v42, %v2674_v45  ;;  %v2672_v36 = vsel %vm2671_vm3, %v4163_v55, %v2668_v30  ;;  %v3903_v55 = vld [vmem:[%s5518_s13 + $0x80] sm:$0xff] }
 0xf62   : > { %v2693_v1 = vmul.f32 %v2672_v36, %v5303_v8 }
 0xf63   : > { %v2676_v54 = vmul.f32 0.5, %v2675_v48 }
 0xf64   : > { %v2699_v12 = vmul.f32 %v4027_v57, %v2693_v1 }
 0xf65   : > { %v2677_v52 = vsub.f32 1.5, %v2676_v54 }
 0xf66   : > { %v2705_v60 = vadd.f32 %v4028_v39, %v2699_v12 }
 0xf67   : > { %v2678_v50 = vmul.f32 %v4165_v42, %v2677_v52 }
 0xf69   : > { %v2682_v43 = vsel %vm2681_vm6, %v4165_v42, %v2678_v50  ;;  %vm3276_vm6 = vcmask 257024  }
 0xf6a   : > { %v2694_v59 = vmul.f32 %v2682_v43, %v5310_v37 }
 0xf6c   : > { %v2700_v9 = vmul.f32 %v4027_v57, %v2694_v59 }
 0xf6e   : > { %v2706_v61 = vadd.f32 %v4028_v39, %v2700_v9 }
 0xf70   : > { %v2717_v41 = vpack.c.bf16 %v2706_v61, %v2705_v60 }
 0xf72   : > { %3708 = vmatmul.msk.bf16.vlgmr.msra.gmra.mxu3 %vm776_vm2, %v2717_v41  ;;  %3710 = vmatmul.msk.bf16.vlgmr.msrb.gmra.mxu0 %vm776_vm2, %v2717_v41 }
 0xfb0   : > { %v2656_v8 = vpop.xlane.xlu1 %2655 }
 0xfb1   : > { %v2659_v62 = vmul.f32 %v2656_v8, %v4546_v27 }
 0xfb3   : > { %v2662_v11 = vadd.f32 1e-06, %v2659_v62 }
 0xfb5   : > { %4166 = vrsqrt.f32 %v2662_v11  ;;  %vm2689_vm8 = vweird.f32 %v2662_v11 }
 0xfbb   : > { %v4167_v47 = vpop.eup %4166 }
 0xfbc   : > { %v2684_v0 = vmul.f32 %v4167_v47, %v2662_v11  ;;  %vm2690_vm7 = vweird.f32 %v4167_v47 }
 0xfbd   : > { %vm2691_vm9 = vmor %vm2689_vm8, %vm2690_vm7 }
 0xfbe   : > { %v2685_v56 = vmul.f32 %v4167_v47, %v2684_v0 }
 0xfc0   : > { %v2686_v2 = vmul.f32 0.5, %v2685_v56 }
 0xfc2   : > { %v2687_v13 = vsub.f32 1.5, %v2686_v2 }
 0xfc4   : > { %v2688_v37 = vmul.f32 %v4167_v47, %v2687_v13 }
 0xfc6   : > { %v2692_v5 = vsel %vm2691_vm9, %v4167_v47, %v2688_v37 }
 0xfc7   : > { %v2695_v7 = vmul.f32 %v2692_v5, %v5317_v46  ;;  %v3910_v46 = vld [vmem:[%s5518_s13 + $0xb8] sm:$0xff] }
 0xfc8   : > { %2995 = vmatpush.bf16.msra.mxu1 %v3910_v46 }
 0xfc9   : > { %v2701_v10 = vmul.f32 %v4027_v57, %v2695_v7 }
 0xfcb   : > { %v2707_v15 = vadd.f32 %v4028_v39, %v2701_v10 }
 0xfcc   : > { %2996 = vmatpush.bf16.msra.mxu1 %v3909_v53 }
 0xfcd   : > { %v2718_v58 = vpack.c.bf16 %v2707_v15, %v2707_v15 }
 0xfcf   : > { %3709 = vmatmul.msk.bf16.gmra.mxu3 %vm776_vm2, %v2718_v58  ;;  %3711 = vmatmul.msk.bf16.gmra.mxu0 %vm776_vm2, %v2718_v58 }
 0xfd0   : > { %2997 = vmatpush.bf16.msra.mxu1 %v3908_v51 }
 0xfd4   : > { %2998 = vmatpush.bf16.msra.mxu1 %v3907_v23 }
 0xfd8   : > { %2999 = vmatpush.bf16.msra.mxu1 %v3906_v63 }
 0xfdc   : > { %3000 = vmatpush.bf16.msra.mxu1 %v3905_v28 }
 0xfe0   : > { %3001 = vmatpush.bf16.msra.mxu1 %v3904_v31 }
 0xfe4   : > { %3002 = vmatpush.bf16.msra.mxu1 %v3903_v55 }
 0xfef   : > { %v2799_v14 = vpop.f32.mrf.mxu0 }
 0xff0   : > { %v2800_v29 = vadd.f32 %v2799_v14, %v5425_v21 }
 0xff2   : > { %v2809_v32 = vmul.f32 %v2800_v29, %v2800_v29 }
 0xff4   : > { %v2815_v33 = vmul.f32 %v2809_v32, %v2800_v29 }
 0xff5   : > { %v2781_v34 = vpop.f32.mrf.mxu3 }
 0xff6   : > { %v2821_v35 = vmul.f32 0.044715, %v2815_v33  ;;  %v2782_v3 = vadd.f32 %v2781_v34, %v2722_v18 }
 0xff7   : > { %v2801_v38 = vpop.f32.mrf.mxu0 }
 0xff8   : > { %v2827_v40 = vadd.f32 %v2821_v35, %v2800_v29  ;;  %v2808_v42 = vmul.f32 %v2782_v3, %v2782_v3  ;;  %v2802_v30 = vadd.f32 %v2801_v38, %v5425_v21 }
 0xffa   : > { %v2833_v45 = vmul.f32 0.7978846, %v2827_v40  ;;  %v2814_v48 = vmul.f32 %v2808_v42, %v2782_v3  ;;  %v2811_v36 = vmul.f32 %v2802_v30, %v2802_v30 }
 0xffc   : > { %v2820_v54 = vmul.f32 0.044715, %v2814_v48  ;;  %v2817_v52 = vmul.f32 %v2811_v36, %v2802_v30  ;;  %4168 = vtanh.f32 %v2833_v45 }
 0xffd   : > { %v2783_v57 = vpop.f32.mrf.mxu3 }
 0xffe   : > { %v2826_v1 = vadd.f32 %v2820_v54, %v2782_v3  ;;  %v2823_v50 = vmul.f32 0.044715, %v2817_v52  ;;  %v2784_v43 = vadd.f32 %v2783_v57, %v2722_v18  ;;  %v4029_v52 = vld [vmem:[%s5519_s14 + $0x1] ss:$0 sm:$0xff] }
0x1000   : > { %v2832_v39 = vmul.f32 0.7978846, %v2826_v1  ;;  %v2829_v12 = vadd.f32 %v2823_v50, %v2802_v30  ;;  %v2810_v59 = vmul.f32 %v2784_v43, %v2784_v43 }
0x1002   : > { %v2835_v9 = vmul.f32 0.7978846, %v2829_v12  ;;  %v2816_v60 = vmul.f32 %v2810_v59, %v2784_v43  ;;  %4170 = vtanh.f32 %v2832_v39  ;;  %v4169_v61 = vpop.eup %4168 }
0x1003   : > { %v2845_v62 = vadd.f32 1.0, %v4169_v61 }
0x1004   : > { %4172 = vtanh.f32 %v2835_v9  ;;  %v2822_v41 = vmul.f32 0.044715, %v2816_v60 }
0x1005   : > { %v2851_v56 = vmul.f32 0.5, %v2845_v62 }
0x1006   : > { %v2828_v8 = vadd.f32 %v2822_v41, %v2784_v43 }
0x1007   : > { %v2857_v5 = vmul.f32 %v2851_v56, %v2800_v29 }
0x1008   : > { %v2834_v11 = vmul.f32 0.7978846, %v2828_v8  ;;  %v4171_v47 = vpop.eup %4170 }
0x1009   : > { %v2844_v13 = vadd.f32 1.0, %v4171_v47 }
0x100a   : > { %v4173_v0 = vpop.eup %4172  ;;  %4174 = vtanh.f32 %v2834_v11 }
0x100b   : > { %v2847_v2 = vadd.f32 1.0, %v4173_v0  ;;  %v2850_v15 = vmul.f32 0.5, %v2844_v13 }
0x100d   : > { %v2853_v37 = vmul.f32 0.5, %v2847_v2  ;;  %v2856_v46 = vmul.f32 %v2850_v15, %v2782_v3 }
0x100f   : > { %v2859_v7 = vmul.f32 %v2853_v37, %v2802_v30 }
0x1010   : > { %v4175_v10 = vpop.eup %4174 }
0x1011   : > { %v2896_v58 = vpack.c.bf16 %v2859_v7, %v2857_v5  ;;  %v2846_v16 = vadd.f32 1.0, %v4175_v10 }
0x1013   : > { %v2852_v17 = vmul.f32 0.5, %v2846_v16  ;;  %3021 = vmatmul.bf16.vlgmr.msrb.gmra.mxu2 %v2896_v58 }
0x1015   : > { %v2858_v20 = vmul.f32 %v2852_v17, %v2784_v43 }
0x1017   : > { %v2895_v53 = vpack.c.bf16 %v2858_v20, %v2856_v46 }
0x1019   : > { %3003 = vmatmul.bf16.vlgmr.msra.gmra.mxu1 %v2895_v53  ;;  %v3922_v53 = vld [vmem:[%s5522_s17 + $0x18] sm:$0xff] }
0x101a   : > { %3170 = vmatpush.bf16.msrb.mxu3 %v3922_v53 }
0x104c   : > { %v2804_v22 = vpop.f32.mrf.mxu0 }
0x104d   : > { %v2805_v51 = vadd.f32 %v2804_v22, %v5425_v21  ;;  %v3921_v22 = vld [vmem:[%s5522_s17 + $0x10] sm:$0xff] }
0x104e   : > { %3171 = vmatpush.bf16.msrb.mxu3 %v3921_v22 }
0x104f   : > { %v2813_v19 = vmul.f32 %v2805_v51, %v2805_v51 }
0x1051   : > { %v2819_v23 = vmul.f32 %v2813_v19, %v2805_v51 }
0x1052   : > { %v2786_v25 = vpop.f32.mrf.mxu3 }
0x1053   : > { %v2825_v63 = vmul.f32 0.044715, %v2819_v23  ;;  %v2787_v26 = vadd.f32 %v2786_v25, %v2722_v18  ;;  %v3919_v25 = vld [vmem:[%s5522_s17] sm:$0xff] }
0x1054   : > { %v2806_v6 = vpop.f32.mrf.mxu0 }
0x1055   : > { %v2831_v28 = vadd.f32 %v2825_v63, %v2805_v51  ;;  %v2812_v4 = vmul.f32 %v2787_v26, %v2787_v26 }
0x1057   : > { %v2837_v14 = vmul.f32 0.7978846, %v2831_v28  ;;  %v2818_v29 = vmul.f32 %v2812_v4, %v2787_v26 }
0x1059   : > { %v2824_v31 = vmul.f32 0.044715, %v2818_v29  ;;  %4176 = vtanh.f32 %v2837_v14 }
0x105a   : > { %v2788_v32 = vpop.f32.mrf.mxu3 }
0x105b   : > { %v2830_v33 = vadd.f32 %v2824_v31, %v2787_v26 }
0x105d   : > { %v2836_v55 = vmul.f32 0.7978846, %v2830_v33 }
0x105f   : > { %v4177_v34 = vpop.eup %4176  ;;  %4178 = vtanh.f32 %v2836_v55 }
0x1060   : > { %v2849_v35 = vadd.f32 1.0, %v4177_v34 }
0x1062   : > { %v2855_v3 = vmul.f32 0.5, %v2849_v35 }
0x1064   : > { %v2861_v21 = vmul.f32 %v2855_v3, %v2805_v51  ;;  %v3920_v51 = vld [vmem:[%s5522_s17 + $0x8] sm:$0xff] }
0x1065   : > { %v4179_v38 = vpop.eup %4178  ;;  %3172 = vmatpush.bf16.msrb.mxu3 %v3920_v51 }
0x1066   : > { %v2898_v40 = vpack.c.bf16 %v2861_v21, %v2861_v21  ;;  %v2848_v42 = vadd.f32 1.0, %v4179_v38 }
0x1068   : > { %3026 = vmatmul.bf16.gmra.mxu2 %v2898_v40  ;;  %v2854_v18 = vmul.f32 0.5, %v2848_v42  ;;  %v4030_v40 = vld [vmem:[#allocation2] ss:$0 sm:$0xff] }
0x1069   : > { %3173 = vmatpush.bf16.msrb.mxu3 %v3919_v25 }
0x106a   : > { %v2860_v30 = vmul.f32 %v2854_v18, %v2787_v26 }
0x106c   : > { %v2897_v45 = vpack.c.bf16 %v2860_v30, %v2860_v30 }
0x106e   : > { %3008 = vmatmul.bf16.gmra.mxu1 %v2897_v45  ;;  %v4031_v45 = vld [vmem:[#allocation4] ss:$0 sm:$0xff] }
0x1096   : > { %v3004_v48 = vpop.f32.mrf.mxu1  ;;  %v3022_v36 = vpop.f32.mrf.mxu2 }
0x1097   : > { %v3023_v54 = vadd.f32 %v3022_v36, %v3004_v48 }
0x1099   : > { %v3031_v57 = vadd.f32 %v3023_v54, %v5287_v44 }
0x109b   : > { %v3039_v1 = vadd.f32 %v4029_v52, %v3031_v57 }
0x109d   : > { %v3044_v50 = vsel %vm776_vm2, %v3039_v1, 0.0 }
0x109e   : > { %v3024_v43 = vpop.f32.mrf.mxu2  ;;  %3045 = vadd.xlane.f32.xlu2 %v3044_v50  ;;  %v3006_v39 = vpop.f32.mrf.mxu1 }
0x109f   : > { %v3025_v12 = vadd.f32 %v3024_v43, %v3006_v39 }
0x10a1   : > { %v3032_v59 = vadd.f32 %v3025_v12, %v5292_v49 }
0x10a3   : > { %v3040_v9 = vadd.f32 %v4029_v52, %v3032_v59 }
0x10a5   : > { %v3047_v60 = vsel %vm776_vm2, %v3040_v9, 0.0 }
0x10a6   : > { %3048 = vadd.xlane.f32.xlu0 %v3047_v60 }
0x10eb   : > { %v3009_v61 = vpop.f32.mrf.mxu1  ;;  %v3027_v41 = vpop.f32.mrf.mxu2 }
0x10ec   : > { %v3028_v8 = vadd.f32 %v3027_v41, %v3009_v61 }
0x10ee   : > { %v3033_v62 = vadd.f32 %v3028_v8, %v5297_v24 }
0x10f0   : > { %v3041_v11 = vadd.f32 %v4029_v52, %v3033_v62 }
0x10f2   : > { %v3050_v44 = vsel %vm783_vm1, %v3041_v11, 0.0 }
0x10f3   : > { %v3029_v47 = vpop.f32.mrf.mxu2  ;;  %3051 = vadd.xlane.f32.xlu1 %v3050_v44  ;;  %v3011_v0 = vpop.f32.mrf.mxu1 }
0x10f4   : > { %v3924_v0 = vld [vmem:[%s5524_s19 + $0x8] sm:$0xff] }
0x1111   : > { %v3046_v56 = vpop.xlane.xlu2 %3045 }
0x1112   : > { %v3053_v2 = vmul.f32 %v3046_v56, %v4546_v27  ;;  %v3923_v56 = vld [vmem:[%s5524_s19] sm:$0xff] }
0x1114   : > { %v3056_v13 = vsub.f32 %v3039_v1, %v3053_v2 }
0x1116   : > { %v3059_v49 = vmul.f32 %v3056_v13, %v3056_v13 }
0x1118   : > { %v3062_v37 = vsel %vm776_vm2, %v3059_v49, 0.0 }
0x1119   : > { %3063 = vadd.xlane.f32.xlu2 %v3062_v37  ;;  %v3049_v5 = vpop.xlane.xlu0 %3048 }
0x111a   : > { %v3054_v7 = vmul.f32 %v3049_v5, %v4546_v27 }
0x111c   : > { %v3057_v10 = vsub.f32 %v3040_v9, %v3054_v7 }
0x111e   : > { %v3060_v15 = vmul.f32 %v3057_v10, %v3057_v10 }
0x1120   : > { %v3065_v24 = vsel %vm776_vm2, %v3060_v15, 0.0 }
0x1121   : > { %3066 = vadd.xlane.f32.xlu0 %v3065_v24 }
0x1166   : > { %v3052_v58 = vpop.xlane.xlu1 %3051 }
0x1167   : > { %v3055_v16 = vmul.f32 %v3052_v58, %v4546_v27 }
0x1169   : > { %v5456_v17 = vsub.f32 %v3041_v11, %v3055_v16 }
0x116b   : > { %v3061_v46 = vmul.f32 %v5456_v17, %v5456_v17 }
0x116d   : > { %v3068_v20 = vsel %vm783_vm1, %v3061_v46, 0.0 }
0x116e   : > { %3069 = vadd.xlane.f32.xlu1 %v3068_v20  ;;  %v4033_v20 = vld [vmem:[#allocation7] ss:$0 sm:$0xff] }
0x118c   : > { %v3064_v19 = vpop.xlane.xlu2 %3063 }
0x118d   : > { %v3071_v23 = vmul.f32 %v3064_v19, %v4546_v27 }
0x118f   : > { %v3074_v63 = vadd.f32 1e-06, %v3071_v23 }
0x1191   : > { %4180 = vrsqrt.f32 %v3074_v63  ;;  %vm3083_vm10 = vweird.f32 %v3074_v63 }
0x1194   : > { %v3067_v26 = vpop.xlane.xlu0 %3066 }
0x1195   : > { %v3072_v6 = vmul.f32 %v3067_v26, %v4546_v27 }
0x1197   : > { %v4181_v28 = vpop.eup %4180  ;;  %v3075_v4 = vadd.f32 1e-06, %v3072_v6 }
0x1198   : > { %v3078_v14 = vmul.f32 %v4181_v28, %v3074_v63  ;;  %vm3084_vm1 = vweird.f32 %v4181_v28 }
0x1199   : > { %4182 = vrsqrt.f32 %v3075_v4  ;;  %vm3085_vm11 = vmor %vm3083_vm10, %vm3084_vm1  ;;  %vm3093_vm13 = vweird.f32 %v3075_v4 }
0x119a   : > { %v3079_v29 = vmul.f32 %v4181_v28, %v3078_v14 }
0x119c   : > { %v3080_v31 = vmul.f32 0.5, %v3079_v29 }
0x119e   : > { %v3081_v32 = vsub.f32 1.5, %v3080_v31 }
0x119f   : > { %v4183_v33 = vpop.eup %4182 }
0x11a0   : > { %v3082_v55 = vmul.f32 %v4181_v28, %v3081_v32  ;;  %v3088_v34 = vmul.f32 %v4183_v33, %v3075_v4  ;;  %vm3094_vm12 = vweird.f32 %v4183_v33 }
0x11a1   : > { %vm3095_vm14 = vmor %vm3093_vm13, %vm3094_vm12 }
0x11a2   : > { %v3089_v35 = vmul.f32 %v4183_v33, %v3088_v34  ;;  %v3086_v3 = vsel %vm3085_vm11, %v4181_v28, %v3082_v55 }
0x11a3   : > { %v3107_v42 = vmul.f32 %v3086_v3, %v3056_v13  ;;  %v4032_v13 = vld [vmem:[#allocation6] ss:$0 sm:$0xff] }
0x11a4   : > { %v3090_v21 = vmul.f32 0.5, %v3089_v35 }
0x11a5   : > { %v3113_v48 = vmul.f32 %v4030_v40, %v3107_v42 }
0x11a6   : > { %v3091_v38 = vsub.f32 1.5, %v3090_v21 }
0x11a7   : > { %v3119_v52 = vadd.f32 %v4031_v45, %v3113_v48 }
0x11a8   : > { %v3092_v18 = vmul.f32 %v4183_v33, %v3091_v38 }
0x11aa   : > { %v3096_v30 = vsel %vm3095_vm14, %v4183_v33, %v3092_v18 }
0x11ab   : > { %v3108_v36 = vmul.f32 %v3096_v30, %v3057_v10 }
0x11ad   : > { %v3114_v54 = vmul.f32 %v4030_v40, %v3108_v36 }
0x11af   : > { %v3120_v57 = vadd.f32 %v4031_v45, %v3114_v54 }
0x11b1   : > { %v3130_v1 = vpack.c.bf16 %v3120_v57, %v3119_v52 }
0x11b3   : > { %3825 = vmatmul.msk.bf16.vlgmr.msrb.gmra.mxu3 %vm776_vm2, %v3130_v1 }
0x11e1   : > { %v3070_v50 = vpop.xlane.xlu1 %3069 }
0x11e2   : > { %v3073_v43 = vmul.f32 %v3070_v50, %v4546_v27  ;;  %v3925_v27 = vld [vmem:[%s5524_s19 + $0x10] sm:$0xff] }
0x11e3   : > { %3228 = vmatpush.bf16.msra.mxu0 %v3925_v27 }
0x11e4   : > { %v3076_v39 = vadd.f32 1e-06, %v3073_v43 }
0x11e6   : > { %4184 = vrsqrt.f32 %v3076_v39  ;;  %vm3103_vm3 = vweird.f32 %v3076_v39 }
0x11e7   : > { %3229 = vmatpush.bf16.msra.mxu0 %v3924_v0 }
0x11eb   : > { %3230 = vmatpush.bf16.msra.mxu0 %v3923_v56 }
0x11ec   : > { %v4185_v12 = vpop.eup %4184 }
0x11ed   : > { %v3098_v59 = vmul.f32 %v4185_v12, %v3076_v39  ;;  %vm3104_vm15 = vweird.f32 %v4185_v12 }
0x11ee   : > { %vm3105_vm4 = vmor %vm3103_vm3, %vm3104_vm15 }
0x11ef   : > { %v3099_v9 = vmul.f32 %v4185_v12, %v3098_v59 }
0x11f1   : > { %v3100_v60 = vmul.f32 0.5, %v3099_v9 }
0x11f3   : > { %v3101_v61 = vsub.f32 1.5, %v3100_v60 }
0x11f5   : > { %v3102_v41 = vmul.f32 %v4185_v12, %v3101_v61 }
0x11f7   : > { %v3106_v8 = vsel %vm3105_vm4, %v4185_v12, %v3102_v41 }
0x11f8   : > { %v3109_v62 = vmul.f32 %v3106_v8, %v5456_v17 }
0x11fa   : > { %v3115_v11 = vmul.f32 %v4030_v40, %v3109_v62 }
0x11fc   : > { %v3121_v44 = vadd.f32 %v4031_v45, %v3115_v11 }
0x11fe   : > { %v3131_v47 = vpack.c.bf16 %v3121_v44, %v3121_v44 }
0x1200   : > { %3826 = vmatmul.msk.bf16.gmra.mxu3 %vm776_vm2, %v3131_v47  ;;  %vm3247_vm2 = vsmask.f32 3328 }
0x1236   : > { %v3175_v2 = vpop.f32.mrf.mxu3 }
0x1237   : > { %v3176_v49 = vadd.f32 %v4032_v13, %v3175_v2 }
0x1239   : > { %v3184_v7 = vmax.f32 %v3176_v49, 0.0 }
0x123e   : > { %v3177_v37 = vpop.f32.mrf.mxu3 }
0x123f   : > { %v3178_v5 = vadd.f32 %v4032_v13, %v3177_v37 }
0x1241   : > { %v3185_v10 = vmax.f32 %v3178_v5, 0.0 }
0x1243   : > { %v3193_v15 = vpack.c.bf16 %v3185_v10, %v3184_v7 }
0x1245   : > { %3839 = vmatmul.msk.bf16.vlgmr.msra.gmra.mxu0 %vm749_vm0, %v3193_v15 }
0x1283   : > { %v3180_v24 = vpop.f32.mrf.mxu3 }
0x1284   : > { %v3181_v58 = vadd.f32 %v4032_v13, %v3180_v24 }
0x1286   : > { %v3186_v16 = vmax.f32 %v3181_v58, 0.0 }
0x1288   : > { %v3194_v17 = vpack.c.bf16 %v3186_v16, %v3186_v16 }
0x128a   : > { %3840 = vmatmul.msk.bf16.gmra.mxu0 %vm749_vm0, %v3194_v17  ;;  %vm5491_vm0 = vmor %vm3247_vm2, %vm3248_vm5 }
0x128b   : > { %v3182_v46 = vpop.f32.mrf.mxu3 }
0x12c2   : > { %v3232_v53 = vpop.f32.mrf.mxu0 }
0x12c3   : > { %v3233_v22 = vadd.f32 %v4033_v20, %v3232_v53 }
0x12c5   : > { %v3241_v51 = vmax.f32 %v3233_v22, 0.0 }
0x12c7   : > { %v3244_v19 = vpack.c.bf16 %v3241_v51, %v3241_v51 }
0x12c9   : > { %v3251_v23 = vshrl.u32 %v3244_v19, 16  ;;  %v3254_v25 = vshll.u32 %v3244_v19, 16 }
0x12ca   : > { %v3234_v63 = vpop.f32.mrf.mxu0 }
0x12cb   : > { %v3253_v26 = vrot.slane %v3251_v23, 4  ;;  %v3256_v6 = vrot.slane %v3254_v25, 5  ;;  %v3235_v28 = vadd.f32 %v4033_v20, %v3234_v63 }
0x12cd   : > { %v3242_v4 = vmax.f32 %v3235_v28, 0.0  ;;  %v3257_v14 = vor.u32 %v3256_v6, %v3253_v26 }
0x12cf   : > { %v3245_v29 = vpack.c.bf16 %v3242_v4, %v3242_v4  ;;  %v3258_v33 = vrot.slane %v3257_v14, 4 }
0x12d1   : > { %v3260_v31 = vshll.u32 %v3245_v29, 16  ;;  %v3264_v35 = vshrl.u32 %v3245_v29, 16 }
0x12d3   : > { %v3262_v55 = vrot.slane %v3260_v31, 5  ;;  %v3266_v21 = vrot.slane %v3264_v35, 4 }
0x12d5   : > { %v3263_v34 = vsel %vm5491_vm0, %v3258_v33, %v3262_v55  ;;  %v3267_v42 = vor.u32 %v3266_v21, %v3262_v55 }
0x12d6   : > { %3277 = vst.msk [vmem:[%s715_s30] sm:$0xf] %vm3276_vm6, %v3263_v34 }
0x12d7   : > { %v3268_v48 = vrot.slane %v3267_v42, 4 }
0x1307   : > { %v3237_v3 = vpop.f32.mrf.mxu0 }
0x1308   : > { %v3238_v38 = vadd.f32 %v4033_v20, %v3237_v3 }
0x130a   : > { %v3243_v40 = vmax.f32 %v3238_v38, 0.0 }
0x130c   : > { %v3246_v18 = vpack.c.bf16 %v3243_v40, %v3243_v40 }
0x130e   : > { %v3270_v30 = vshll.u32 %v3246_v18, 16 }
0x130f   : > { %v3239_v45 = vpop.f32.mrf.mxu0 }
0x1310   : > { %v3272_v36 = vrot.slane %v3270_v30, 5 }
0x1312   : > { %v3273_v54 = vsel %vm5491_vm0, %v3268_v48, %v3272_v36 }
0x1313   : > { %3278 = vst.msk [vmem:[%s715_s30 + $0x4] sm:$0xf] %vm3276_vm6, %v3273_v54 }
0x1314 PF: > { %s34_s2 = sadd.s32 1, %s4324_s2  }
0x1315   : > { %p31_p7 = scmp.ge.s32.totalorder %s34_s2, 4  }
0x1317   :  { %33 = sbr.rel (!%p31_p7) target bundleno = 12 (0xc), region = 163 }
0x131c   :  { %3300 = vsyncpa [#allocation3], 1 }
0x131d   :  { %3302 = vsyncpa [#allocation3 + $0x1], 1 }
0x131e   :  { %3303 = vsyncpa [#allocation5], 1 }
0x131f   :  { %3304 = vsyncpa [#allocation8], 1 }

// kernel: forward.5
= control target key start
LH: loop header
LB: loop body
LE: loop exit
PB: predicated region body
PF: predicated region fallthrough
CT: control target
= control target key end

     0   :  { %s9009_s0 = inlined_call_operand.vmem [shape: bf16[2,128,4], index: 0, kind: input, shape index: {}]   ;;  %s9010_s1 = inlined_call_operand.vmem [shape: bf16[3,128,128], index: 1, kind: input, shape index: {}]   ;;  %s9011_s2 = inlined_call_operand.hbm [shape: bf16[3,4,8], index: 2, kind: input, shape index: {}]   ;;  %s9012_s3 = inlined_call_operand.vmem [shape: f32[128,1], index: 3, kind: input, shape index: {}]   ;;  %s9013_s4 = inlined_call_operand.vmem [shape: bf16[3,128,128], index: 4, kind: input, shape index: {}]   ;;  %s9014_s5 = inlined_call_operand.hbm [shape: bf16[3,8,16], index: 5, kind: input, shape index: {}]   ;;  %s9015_s6 = inlined_call_operand.vmem [shape: f32[128,1], index: 6, kind: input, shape index: {}]   ;;  %s9016_s7 = inlined_call_operand.vmem [shape: bf16[3,128,128], index: 7, kind: input, shape index: {}]   ;;  %s9017_s8 = inlined_call_operand.vmem [shape: bf16[3,16,32], index: 8, kind: input, shape index: {}]   ;;  %s9018_s9 = inlined_call_operand.vmem [shape: f32[128,1], index: 9, kind: input, shape index: {}]   ;;  %s9019_s10 = inlined_call_operand.vmem [shape: bf16[3,128,128], index: 10, kind: input, shape index: {}]   ;;  %s9020_s11 = inlined_call_operand.vmem [shape: bf16[3,32,64], index: 11, kind: input, shape index: {}]   ;;  %s9021_s12 = inlined_call_operand.vmem [shape: f32[128,1], index: 12, kind: input, shape index: {}]   ;;  %s9022_s13 = inlined_call_operand.vmem [shape: bf16[5,128,128], index: 13, kind: input, shape index: {}]   ;;  %s9023_s14 = inlined_call_operand.vmem [shape: bf16[5,64,128], index: 14, kind: input, shape index: {}]   ;;  %s9024_s15 = inlined_call_operand.vmem [shape: f32[128,1], index: 15, kind: input, shape index: {}]   ;;  %s9025_s16 = inlined_call_operand.vmem [shape: bf16[3,64,128], index: 16, kind: input, shape index: {}]   ;;  %s9026_s17 = inlined_call_operand.vmem [shape: bf16[3,128,32], index: 17, kind: input, shape index: {}]   ;;  %s9027_s18 = inlined_call_operand.vmem [shape: f32[64,1], index: 18, kind: input, shape index: {}]   ;;  %s9028_s19 = inlined_call_operand.hbm [shape: f32[2,64,32], index: 19, kind: output, shape index: {}]  }
   0x1   :  { %9039 = sst [smem:[#allocation18_spill]] %s9009_s0 }
   0x2   :  { %9040 = sst [smem:[#allocation19_spill]] %s9010_s1 }
   0x3   :  { %9041 = sst [smem:[#allocation20_spill]] %s9011_s2 }
   0x4   :  { %9042 = sst [smem:[#allocation21_spill]] %s9012_s3 }
   0x5   :  { %9043 = sst [smem:[#allocation22_spill]] %s9013_s4 }
   0x6   :  { %9044 = sst [smem:[#allocation23_spill]] %s9014_s5 }
   0x7   :  { %9045 = sst [smem:[#allocation24_spill]] %s9015_s6 }
   0x8   :  { %9046 = sst [smem:[#allocation25_spill]] %s9016_s7 }
   0x9   :  { %24 = vsyncpa [#allocation3], 0 }
   0xa   :  { %25 = vsyncpa [#allocation6], 0 }
   0xb   :  { %26 = vsyncpa [#allocation4], 0 }
   0xc   :  { %28 = vsyncpa [#allocation4 + $0x1], 0  ;;  %s7306_s0 = smov 0   ;;  %s7308_s30 = smov 0  }
   0xd   :  { %s7310_s20 = smov 0   ;;  %s7312_s21 = smov 0  }
   0xe LB: > { %9047 = sst [smem:[#allocation11_spill]] %s7183_s0  ;;  %s7327_s1 = sadd.s32 4294967295, %s7195_s21   ;;  %s7195_s21 = sphi %s7312_s21, %s9069_s21   ;;  %s7191_s20 = sphi %s7310_s20, %s9071_s20   ;;  %s7187_s30 = sphi %s7308_s30, %s9073_s30   ;;  %s7183_s0 = sphi %s7306_s0, %s9072_s0  }
   0xf   : > { %9048 = sst [smem:[#allocation12_spill]] %s7191_s20  ;;  %s5503_s22 = sadd.s32 4294967294, %s7195_s21  }
  0x10   : > { %9049 = sst [smem:[#allocation13_spill]] %s7195_s21  ;;  %s7331_s2 = sadd.s32 1, %s7195_s21  }
  0x11   : > { %9050 = sst [smem:[#allocation14_spill]] %s7331_s2  ;;  %s445_s23 = sadd.s32 1, %s7191_s20 }
  0x12   : > { %s442_s24 = ssub.s32 %s7195_s21, %s7331_s2  ;;  %p455_p0 = scmp.ne.s32.totalorder %s7191_s20, %s7187_s30 }
  0x13   : > { %p443_p1 = scmp.eq.s32.totalorder %s442_s24, 0  ;;  %p456_p2 = scmp.eq.s32.totalorder %s7327_s1, 1 }
  0x14   : > { %p461_p3 = scmp.ne.s32.totalorder %s7187_s30, %s7183_s0  ;;  %p462_p4 = scmp.eq.s32.totalorder %s5503_s22, 1 }
  0x15   : > { %s7342_s25 = scalar_select %p443_p1, %s7191_s20, %s445_s23  }
  0x16   : > { %p7344_p5 = por %p456_p2, %p455_p0  ;;  %p7348_p6 = por %p462_p4, %p461_p3 }
  0x17   : > { %9051 = sst [smem:[#allocation15_spill]] %s7342_s25  ;;  %p5504_p7 = scmp.ge.s32.totalorder %s7195_s21, 1 }
  0x18   : > { %s9052_s3 = scalar_select %p7344_p5, 1, 0 }
  0x19   : > { %s9054_s26 = scalar_select %p7348_p6, 1, 0 }
  0x1a   : > { %9053 = sst [smem:[#allocation16_spill]] %s9052_s3  ;;  %p469_p8 = scmp.lt.s32.totalorder %s7195_s21, 3 }
  0x1b   : > { %9055 = sst [smem:[#allocation17_spill]] %s9054_s26  ;;  %p7016_p9 = scmp.eq.s32.totalorder %s7327_s1, 0 }
  0x1c   : > { %p7355_p10 = pnand %p5504_p7, %p469_p8  ;;  %s9057_s22 = sld [smem:[#allocation20_spill]] }
  0x1d   : > { %s7197_s24 = smov [#allocation2]   ;;  %s9058_s5 = sld [smem:[#allocation23_spill]] }
  0x1e   : > { %p7005_p11 = pneg %p7355_p10  ;;  %s485_s25 = sshll.u32 %s7197_s24, 4  ;;  %s486_s25 = int_to_ptr.vmem [resolvable:$true] %s485_s25 }
  0x1f   : > { %s7198_s0 = smov 32   ;;  %s7199_s21 = smov 2  }
  0x20   : > { %p7006_p12 = pnand %p7016_p9, %p7005_p11  ;;  %s7200_s3 = smov [#allocation5]  }
  0x21   : > { %s505_s28 = sshll.u32 %s7200_s3, 4  ;;  %s7201_s29 = smov 64   ;;  %s506_s28 = int_to_ptr.vmem [resolvable:$true] %s505_s28 }
  0x22   : > { %s483_s23 = sshll.u32 %s9057_s22, 4  ;;  %s7202_s22 = smov 4   ;;  %s484_s23 = int_to_ptr.hbm [resolvable:$true] %s483_s23 }
  0x23   : > { %s503_s26 = sshll.u32 %s9058_s5, 4  ;;  %568 = sbr.rel (%p7355_p10) target bundleno = 3937 (0xf61), region = 96  ;;  %s504_s26 = int_to_ptr.hbm [resolvable:$true] %s503_s26 }
  0x24   : > { %7008 = dma.hbm_to_vmem [thread:$0]  (!%p7006_p12), %s484_s23, 96, %s486_s25, [#allocation3], %s7198_s0, %s7198_s0, %s7199_s21  }
  0x25   : > { %7011 = dma.hbm_to_vmem [thread:$0]  (!%p7006_p12), %s504_s26, 192, %s506_s28, [#allocation6], %s7201_s29, %s7201_s29, %s7202_s22  }
  0x28   : > { %7170 = dma.done.wait (%p7016_p9), [#allocation3], 96  }
  0x29   : > { %7172 = vsyncadd (%p7016_p9), [#allocation3], 4294967200 }
  0x2a   : > { %7174 = dma.done.wait (%p7016_p9), [#allocation6], 192  }
  0x2b   : > { %7176 = vsyncadd (%p7016_p9), [#allocation6], 4294967104  ;;  %p630_p13 = scmp.lt.s32.totalorder %s7327_s1, 1  ;;  %vm718_vm0 = vcmask 1041408   ;;  %s9059_s25 = sld [smem:[#allocation18_spill]]  ;;  %vm693_vm1 = vcmask 31744  }
  0x2c   : > { %v652_v0 = vld [vmem:[#allocation2] sm:$0x3]  ;;  %v796_v1 = vld [vmem:[#allocation2 + $0x2] sm:$0x3]  ;;  %s9060_s23 = sld [smem:[#allocation19_spill]]  ;;  %vm1422_vm2 = vcmask 1043456  }
  0x2d   : > { %s631_s0 = scalar_select %p630_p13, %s7327_s1, 1  ;;  %v720_v2 = vsel %vm718_vm0, %v652_v0, 0  ;;  %v798_v4 = vsel %vm718_vm0, %v796_v1, 0  ;;  %v1069_v0 = vld [vmem:[#allocation2 + $0x4] sm:$0x3]  ;;  %vm1397_vm3 = vcmask 64512  }
  0x2e   : > { %6986 = vmatpush.bf16.msra.mxu1 %v720_v2  ;;  %729 = vmatpush.bf16.msra.mxu0 %v720_v2  ;;  %v1071_v1 = vsel %vm718_vm0, %v1069_v0, 0  ;;  %s9061_s24 = sld [smem:[#allocation21_spill]]  ;;  %v2682_v0 = vld [vmem:[%s9018_s9 + $0x18] sm:$0xff]  ;;  %vm2108_vm4 = vcmask 130048   ;;  %vm2831_vm5 = vcmask 261120   ;;  %vm3586_vm6 = vcmask 523264  }
  0x2f   : > { %s6775_s20 = sshll.u32 %s631_s0, 6  ;;  %s9062_s6 = sld [smem:[#allocation24_spill]] }
  0x30   : > { %s9063_s4 = sld [smem:[#allocation22_spill]]  ;;  %s627_s0 = sand.u32 1, %s7187_s30  }
  0x31   : > { %s634_s3 = scalar_lea.vmem %s9059_s25, %s6775_s20  ;;  %s9064_s7 = sld [smem:[#allocation25_spill]] }
  0x32   : > { %v7385_v3 = vld [vmem:[%s634_s3 + $0x38] sm:$0xff]  ;;  %807 = vmatpush.bf16.msrb.mxu1 %v798_v4  ;;  %v7388_v5 = vld [vmem:[%s634_s3] sm:$0xff]  ;;  %v7394_v6 = vld [vmem:[%s634_s3 + $0x8] sm:$0xff]  ;;  %s5511_s20 = sshll.u32 %s627_s0, 6  ;;  %s6985_s2 = sshll.u32 %s7327_s1, 6 }
  0x33   : > { %5553 = vmatmul.msk.bf16.vlgmr.msra.gmra.mxu1 %vm693_vm1, %v7385_v3  ;;  %5546 = vmatmul.msk.bf16.vlgmr.msra.gmra.mxu0 %vm693_vm1, %v7388_v5  ;;  %v7400_v7 = vld [vmem:[%s634_s3 + $0x10] sm:$0xff]  ;;  %v7406_v8 = vld [vmem:[%s634_s3 + $0x18] sm:$0xff]  ;;  %v7412_v9 = vld [vmem:[%s634_s3 + $0x20] sm:$0xff]  ;;  %s8957_s21 = scalar_lea.vmem [#allocation7], %s5511_s20  ;;  %s5415_s26 = scalar_lea.hbm %s9028_s19, %s6985_s2 }
  0x34   : > { %v7418_v10 = vld [vmem:[%s634_s3 + $0x28] sm:$0xff]  ;;  %v7424_v11 = vld [vmem:[%s634_s3 + $0x30] sm:$0xff]  ;;  %v6784_v51 = vld [vmem:[%s9060_s23] sm:$0xff]  ;;  %s5416_s28 = sshll.u32 %s8957_s21, 4  ;;  %s5418_s29 = sshll.u32 %s5415_s26, 4  ;;  %s5417_s28 = int_to_ptr.vmem [resolvable:$true] %s5416_s28  ;;  %s5419_s29 = int_to_ptr.hbm [resolvable:$true] %s5418_s29 }
  0x35   : > { %v6785_v56 = vld [vmem:[%s9060_s23 + $0x8] sm:$0xff]  ;;  %v6786_v61 = vld [vmem:[%s9060_s23 + $0x10] sm:$0xff]  ;;  %v6792_v63 = vld [vmem:[%s9060_s23 + $0x40] sm:$0xff]  ;;  %s5404_s1 = scalar_lea.sflag [#allocation4], %s627_s0  ;;  %s7139_s22 = sshra.s32 %s5419_s29, 4  ;;  %s7140_s22 = int_to_ptr.hbm [resolvable:$true] %s7139_s22 }
  0x36   : > { %v6793_v2 = vld [vmem:[%s9060_s23 + $0x48] sm:$0xff]  ;;  %v6794_v4 = vld [vmem:[%s9060_s23 + $0x50] sm:$0xff]  ;;  %s7141_s20 = scalar_lea.hbm %s7140_s22, 64  ;;  %s7145_s3 = scalar_lea.hbm %s9028_s19, 128 }
  0x37   : > { %p7142_p0 = scmp.ne.s32.totalorder %s7140_s22, %s7141_s20  ;;  %p7146_p3 = scmp.lt.s32.totalorder %s7140_s22, %s9028_s19 }
  0x38   : > { %p7147_p4 = scmp.lt.s32.totalorder %s7145_s3, %s7141_s20 }
  0x39   : > { %p7143_p1 = pnand %p7142_p0, %p7344_p5 }
  0x3a   : > { %p7148_p7 = por %p7147_p4, %p7146_p3 }
  0x3b   : > { %p7144_p2 = pneg %p7143_p1 }
  0x3d   : > { %p7149_p8 = pnand %p7148_p7, %p7144_p2 }
  0x43   : > { %5554 = vmatmul.msk.bf16.vlgmr.msrb.gmra.mxu1 %vm693_vm1, %v7388_v5  ;;  %5547 = vmatmul.msk.bf16.gmra.mxu0 %vm693_vm1, %v7394_v6 }
  0x53   : > { %5555 = vmatmul.msk.bf16.gmra.mxu1 %vm693_vm1, %v7394_v6  ;;  %5548 = vmatmul.msk.bf16.gmra.mxu0 %vm693_vm1, %v7400_v7 }
  0x63   : > { %5556 = vmatmul.msk.bf16.gmra.mxu1 %vm693_vm1, %v7400_v7  ;;  %5549 = vmatmul.msk.bf16.gmra.mxu0 %vm693_vm1, %v7406_v8 }
  0x73   : > { %5557 = vmatmul.msk.bf16.gmra.mxu1 %vm693_vm1, %v7406_v8  ;;  %5550 = vmatmul.msk.bf16.gmra.mxu0 %vm693_vm1, %v7412_v9 }
  0x83   : > { %5558 = vmatmul.msk.bf16.gmra.mxu1 %vm693_vm1, %v7412_v9  ;;  %5551 = vmatmul.msk.bf16.gmra.mxu0 %vm693_vm1, %v7418_v10 }
  0x93   : > { %5559 = vmatmul.msk.bf16.gmra.mxu1 %vm693_vm1, %v7418_v10  ;;  %5552 = vmatmul.msk.bf16.gmra.mxu0 %vm693_vm1, %v7424_v11 }
  0xa3   : > { %5560 = vmatmul.msk.bf16.gmra.mxu1 %vm693_vm1, %v7424_v11 }
  0xb0   : > { %v766_v12 = vpop.f32.mrf.mxu1  ;;  %v731_v13 = vpop.f32.mrf.mxu0 }
  0xb3   : > { %5561 = vmatmul.msk.bf16.gmra.mxu1 %vm693_vm1, %v7385_v3 }
  0xb8   : > { %v768_v14 = vpop.f32.mrf.mxu1  ;;  %v733_v15 = vpop.f32.mrf.mxu0 }
  0xb9   : > { %v794_v16 = vpack.c.bf16 %v768_v14, %v766_v12  ;;  %v787_v49 = vpack.c.bf16 %v733_v15, %v731_v13  ;;  %v1260_v12 = vld [vmem:[%s9061_s24] sm:$0xff]  ;;  %v7203_v13 = vmov 0   ;;  %v1261_v14 = vld [vmem:[%s9061_s24 + $0x8] sm:$0xff]  ;;  %v1263_v15 = vld [vmem:[%s9061_s24 + $0x18] sm:$0xff] }
  0xba   : > { %7062 = vset.pattern.permute.xlu0 %v7203_v13  ;;  %7063 = vset.pattern.permute.xlu1 %v7203_v13 }
  0xbb   : > { %1019 = vmatpush.bf16.msra.mxu3 %v794_v16  ;;  %1278 = vperm.xlu0 %7062, %v1260_v12   ;;  %v1272_v16 = vld [vmem:[%s9061_s24 + $0x60] sm:$0xff]  ;;  %v2685_v12 = vld [vmem:[%s9018_s9 + $0x30] sm:$0xff] }
  0xbc   : > { %7064 = vset.pattern.permute.xlu2 %v7203_v13  ;;  %v3422_v13 = vld [vmem:[%s9021_s12 + $0x20] sm:$0xff] }
  0xc0   : > { %v7434_v17 = vpop.f32.mrf.mxu1  ;;  %v736_v18 = vpop.f32.mrf.mxu0 }
  0xc3   : > { %1283 = vperm.xlu0 %7062, %v1261_v14   ;;  %v3430_v14 = vld [vmem:[%s9021_s12 + $0x60] sm:$0xff] }
  0xc8   : > { %v7436_v19 = vpop.f32.mrf.mxu1  ;;  %v738_v20 = vpop.f32.mrf.mxu0 }
  0xc9   : > { %v788_v48 = vpack.c.bf16 %v738_v20, %v736_v18  ;;  %v866_v62 = vpack.c.bf16 %v7436_v19, %v7434_v17  ;;  %v1275_v17 = vld [vmem:[%s9061_s24 + $0x78] sm:$0xff]  ;;  %v1270_v18 = vld [vmem:[%s9061_s24 + $0x50] sm:$0xff]  ;;  %v1273_v20 = vld [vmem:[%s9061_s24 + $0x68] sm:$0xff] }
  0xca   : > { %v1966_v19 = vld [vmem:[%s9062_s6 + $0x10] sm:$0xff] }
  0xd0   : > { %v814_v21 = vpop.f32.mrf.mxu1  ;;  %v741_v22 = vpop.f32.mrf.mxu0 }
  0xd8   : > { %v816_v23 = vpop.f32.mrf.mxu1  ;;  %v743_v24 = vpop.f32.mrf.mxu0 }
  0xd9   : > { %v789_v46 = vpack.c.bf16 %v743_v24, %v741_v22  ;;  %v867_v60 = vpack.c.bf16 %v816_v23, %v814_v21  ;;  %v1969_v21 = vld [vmem:[%s9062_s6 + $0x28] sm:$0xff]  ;;  %v1264_v23 = vld [vmem:[%s9061_s24 + $0x20] sm:$0xff] }
  0xda   : > { %v1972_v24 = vld [vmem:[%s9062_s6 + $0x40] sm:$0xff]  ;;  %1298 = vperm.xlu2 %7064, %v1264_v23   ;;  %v4650_v23 = vld [vmem:[%s9024_s15 + $0x28] sm:$0xff] }
  0xe0   : > { %v819_v25 = vpop.f32.mrf.mxu1  ;;  %v746_v26 = vpop.f32.mrf.mxu0 }
  0xe8   : > { %v821_v27 = vpop.f32.mrf.mxu1  ;;  %v748_v28 = vpop.f32.mrf.mxu0 }
  0xe9   : > { %v790_v45 = vpack.c.bf16 %v748_v28, %v746_v26  ;;  %v868_v59 = vpack.c.bf16 %v821_v27, %v819_v25  ;;  %v1265_v26 = vld [vmem:[%s9061_s24 + $0x28] sm:$0xff]  ;;  %v1967_v27 = vld [vmem:[%s9062_s6 + $0x18] sm:$0xff] }
  0xea   : > { %v1975_v28 = vld [vmem:[%s9062_s6 + $0x58] sm:$0xff]  ;;  %1303 = vperm.xlu2 %7064, %v1265_v26   ;;  %v4645_v26 = vld [vmem:[%s9024_s15] sm:$0xff] }
  0xf0   : > { %v824_v29 = vpop.f32.mrf.mxu1  ;;  %v751_v30 = vpop.f32.mrf.mxu0 }
  0xf8   : > { %v826_v31 = vpop.f32.mrf.mxu1  ;;  %v753_v32 = vpop.f32.mrf.mxu0 }
  0xf9   : > { %v791_v43 = vpack.c.bf16 %v753_v32, %v751_v30  ;;  %v869_v58 = vpack.c.bf16 %v826_v31, %v824_v29  ;;  %v1268_v30 = vld [vmem:[%s9061_s24 + $0x40] sm:$0xff]  ;;  %v1970_v31 = vld [vmem:[%s9062_s6 + $0x30] sm:$0xff] }
  0xfa   : > { %v1978_v32 = vld [vmem:[%s9062_s6 + $0x70] sm:$0xff]  ;;  %1318 = vperm.xlu2 %7064, %v1268_v30   ;;  %v3423_v30 = vld [vmem:[%s9021_s12 + $0x28] sm:$0xff] }
 0x100   : > { %v829_v33 = vpop.f32.mrf.mxu1  ;;  %v756_v34 = vpop.f32.mrf.mxu0 }
 0x108   : > { %v831_v35 = vpop.f32.mrf.mxu1  ;;  %v758_v36 = vpop.f32.mrf.mxu0 }
 0x109   : > { %v792_v42 = vpack.c.bf16 %v758_v36, %v756_v34  ;;  %v870_v57 = vpack.c.bf16 %v831_v35, %v829_v33  ;;  %v1271_v33 = vld [vmem:[%s9061_s24 + $0x58] sm:$0xff]  ;;  %v1973_v34 = vld [vmem:[%s9062_s6 + $0x48] sm:$0xff] }
 0x10a   : > { %v2680_v35 = vld [vmem:[%s9018_s9 + $0x8] sm:$0xff]  ;;  %1333 = vperm.xlu2 %7064, %v1271_v33  }
 0x110   : > { %v834_v37 = vpop.f32.mrf.mxu1  ;;  %v761_v38 = vpop.f32.mrf.mxu0 }
 0x118   : > { %v836_v39 = vpop.f32.mrf.mxu1  ;;  %v763_v40 = vpop.f32.mrf.mxu0 }
 0x119   : > { %v793_v41 = vpack.c.bf16 %v763_v40, %v761_v38  ;;  %v871_v55 = vpack.c.bf16 %v836_v39, %v834_v37  ;;  %v1274_v37 = vld [vmem:[%s9061_s24 + $0x70] sm:$0xff]  ;;  %v1976_v38 = vld [vmem:[%s9062_s6 + $0x60] sm:$0xff]  ;;  %v1965_v40 = vld [vmem:[%s9062_s6 + $0x8] sm:$0xff] }
 0x11a   : > { %v2683_v39 = vld [vmem:[%s9018_s9 + $0x20] sm:$0xff]  ;;  %1348 = vperm.xlu2 %7064, %v1274_v37   ;;  %v4659_v37 = vld [vmem:[%s9024_s15 + $0x70] sm:$0xff] }
 0x11b   : > { %1020 = vmatpush.bf16.msra.mxu3 %v793_v41  ;;  %v1979_v41 = vld [vmem:[%s9062_s6 + $0x78] sm:$0xff] }
 0x11f   : > { %1021 = vmatpush.bf16.msra.mxu3 %v792_v42  ;;  %v2686_v42 = vld [vmem:[%s9018_s9 + $0x38] sm:$0xff] }
 0x120   : > { %v839_v44 = vpop.f32.mrf.mxu1 }
 0x122   : > { %1987 = vperm.xlu2 %7064, %v1965_v40   ;;  %v4654_v40 = vld [vmem:[%s9024_s15 + $0x48] sm:$0xff] }
 0x123   : > { %1022 = vmatpush.bf16.msra.mxu3 %v791_v43 }
 0x127   : > { %1023 = vmatpush.bf16.msra.mxu3 %v790_v45  ;;  %v2681_v45 = vld [vmem:[%s9018_s9 + $0x10] sm:$0xff] }
 0x128   : > { %v841_v47 = vpop.f32.mrf.mxu1 }
 0x129   : > { %v872_v54 = vpack.c.bf16 %v841_v47, %v839_v44  ;;  %v1968_v44 = vld [vmem:[%s9062_s6 + $0x20] sm:$0xff] }
 0x12a   : > { %2002 = vperm.xlu2 %7064, %v1968_v44  }
 0x12b   : > { %1024 = vmatpush.bf16.msra.mxu3 %v789_v46  ;;  %v2689_v46 = vld [vmem:[%s9018_s9 + $0x50] sm:$0xff] }
 0x12f   : > { %1025 = vmatpush.bf16.msra.mxu3 %v788_v48  ;;  %v1971_v48 = vld [vmem:[%s9062_s6 + $0x38] sm:$0xff] }
 0x130   : > { %v844_v50 = vpop.f32.mrf.mxu1 }
 0x132   : > { %2017 = vperm.xlu2 %7064, %v1971_v48   ;;  %v5343_v48 = vld [vmem:[%s9027_s18 + $0x20] sm:$0xff] }
 0x133   : > { %1026 = vmatpush.bf16.msra.mxu3 %v787_v49  ;;  %v2684_v49 = vld [vmem:[%s9018_s9 + $0x28] sm:$0xff] }
 0x136   : > { %1027 = vmatmul.bf16.vlgmr.msra.gmra.mxu3 %v6784_v51 }
 0x138   : > { %v846_v52 = vpop.f32.mrf.mxu1 }
 0x139   : > { %v873_v53 = vpack.c.bf16 %v846_v52, %v844_v50  ;;  %v2692_v50 = vld [vmem:[%s9018_s9 + $0x68] sm:$0xff]  ;;  %v1974_v52 = vld [vmem:[%s9062_s6 + $0x50] sm:$0xff] }
 0x13a   : > { %2032 = vperm.xlu2 %7064, %v1974_v52   ;;  %v4646_v52 = vld [vmem:[%s9024_s15 + $0x8] sm:$0xff] }
 0x13b   : > { %922 = vmatpush.bf16.msrb.mxu0 %v873_v53  ;;  %6987 = vmatpush.bf16.msra.mxu2 %v873_v53  ;;  %v2687_v53 = vld [vmem:[%s9018_s9 + $0x40] sm:$0xff] }
 0x13f   : > { %923 = vmatpush.bf16.msrb.mxu0 %v872_v54  ;;  %6988 = vmatpush.bf16.msra.mxu2 %v872_v54  ;;  %v3418_v54 = vld [vmem:[%s9021_s12] sm:$0xff] }
 0x143   : > { %924 = vmatpush.bf16.msrb.mxu0 %v871_v55  ;;  %6989 = vmatpush.bf16.msra.mxu2 %v871_v55 }
 0x146   : > { %1032 = vmatmul.bf16.gmra.mxu3 %v6785_v56  ;;  %v1977_v56 = vld [vmem:[%s9062_s6 + $0x68] sm:$0xff] }
 0x147   : > { %925 = vmatpush.bf16.msrb.mxu0 %v870_v57  ;;  %6990 = vmatpush.bf16.msra.mxu2 %v870_v57  ;;  %v2690_v57 = vld [vmem:[%s9018_s9 + $0x58] sm:$0xff] }
 0x148   : > { %2047 = vperm.xlu2 %7064, %v1977_v56  }
 0x14b   : > { %926 = vmatpush.bf16.msrb.mxu0 %v869_v58  ;;  %6991 = vmatpush.bf16.msra.mxu2 %v869_v58  ;;  %v3421_v58 = vld [vmem:[%s9021_s12 + $0x18] sm:$0xff] }
 0x14f   : > { %927 = vmatpush.bf16.msrb.mxu0 %v868_v59  ;;  %6992 = vmatpush.bf16.msra.mxu2 %v868_v59 }
 0x153   : > { %928 = vmatpush.bf16.msrb.mxu0 %v867_v60  ;;  %6993 = vmatpush.bf16.msra.mxu2 %v867_v60  ;;  %v2679_v60 = vld [vmem:[%s9018_s9] sm:$0xff] }
 0x154   : > { %2697 = vperm.xlu2 %7064, %v2679_v60   ;;  %v5341_v60 = vld [vmem:[%s9027_s18 + $0x10] sm:$0xff] }
 0x156   : > { %1037 = vmatmul.bf16.gmra.mxu3 %v6786_v61  ;;  %v2693_v61 = vld [vmem:[%s9018_s9 + $0x70] sm:$0xff] }
 0x157   : > { %929 = vmatpush.bf16.msrb.mxu0 %v866_v62  ;;  %6994 = vmatpush.bf16.msra.mxu2 %v866_v62  ;;  %v3424_v62 = vld [vmem:[%s9021_s12 + $0x30] sm:$0xff] }
 0x15a   : > { %930 = vmatmul.bf16.vlgmr.msrb.gmra.mxu0 %v6792_v63 }
 0x15b   : > { %1080 = vmatpush.bf16.msra.mxu0 %v1071_v1  ;;  %v3419_v1 = vld [vmem:[%s9021_s12 + $0x8] sm:$0xff] }
 0x15c   : > { %2712 = vperm.xlu2 %7064, %v2682_v0  }
 0x164   : > { %2727 = vperm.xlu2 %7064, %v2685_v12   ;;  %v5339_v12 = vld [vmem:[%s9027_s18] sm:$0xff] }
 0x16a   : > { %935 = vmatmul.bf16.gmra.mxu0 %v6793_v2  ;;  %v3427_v2 = vld [vmem:[%s9021_s12 + $0x48] sm:$0xff] }
 0x17a   : > { %940 = vmatmul.bf16.gmra.mxu0 %v6794_v4 }
 0x18a   : > { %5642 = vmatmul.msk.bf16.vlgmr.msra.gmra.mxu0 %vm693_vm1, %v7388_v5  ;;  %v1266_v5 = vld [vmem:[%s9061_s24 + $0x30] sm:$0xff] }
 0x18b   : > { %1308 = vperm.xlu0 %7062, %v1266_v5  }
 0x19a   : > { %5643 = vmatmul.msk.bf16.gmra.mxu0 %vm693_vm1, %v7394_v6  ;;  %v1262_v6 = vld [vmem:[%s9061_s24 + $0x10] sm:$0xff] }
 0x19b   : > { %1288 = vperm.xlu1 %7063, %v1262_v6   ;;  %v2688_v6 = vld [vmem:[%s9018_s9 + $0x48] sm:$0xff] }
 0x19c   : > { %2742 = vperm.xlu2 %7064, %v2688_v6   ;;  %v6802_v6 = vld [vmem:[%s9060_s23 + $0x90] sm:$0xff] }
 0x1a3   : > { %1293 = vperm.xlu1 %7063, %v1263_v15   ;;  %v3433_v15 = vld [vmem:[%s9021_s12 + $0x78] sm:$0xff] }
 0x1aa   : > { %5644 = vmatmul.msk.bf16.gmra.mxu0 %vm693_vm1, %v7400_v7  ;;  %v1269_v7 = vld [vmem:[%s9061_s24 + $0x48] sm:$0xff] }
 0x1ab   : > { %1323 = vperm.xlu0 %7062, %v1269_v7   ;;  %v3425_v7 = vld [vmem:[%s9021_s12 + $0x38] sm:$0xff] }
 0x1b3   : > { %1338 = vperm.xlu0 %7062, %v1272_v16  }
 0x1ba   : > { %5645 = vmatmul.msk.bf16.gmra.mxu0 %vm693_vm1, %v7406_v8  ;;  %v1267_v8 = vld [vmem:[%s9061_s24 + $0x38] sm:$0xff] }
 0x1bb   : > { %1313 = vperm.xlu1 %7063, %v1267_v8   ;;  %1353 = vperm.xlu0 %7062, %v1275_v17   ;;  %v2691_v8 = vld [vmem:[%s9018_s9 + $0x60] sm:$0xff]  ;;  %v3428_v17 = vld [vmem:[%s9021_s12 + $0x50] sm:$0xff] }
 0x1bc   : > { %2757 = vperm.xlu2 %7064, %v2691_v8   ;;  %v6803_v8 = vld [vmem:[%s9060_s23 + $0x98] sm:$0xff] }
 0x1c3   : > { %1328 = vperm.xlu1 %7063, %v1270_v18   ;;  %1992 = vperm.xlu0 %7062, %v1966_v19   ;;  %v4647_v18 = vld [vmem:[%s9024_s15 + $0x10] sm:$0xff] }
 0x1ca   : > { %5646 = vmatmul.msk.bf16.gmra.mxu0 %vm693_vm1, %v7412_v9 }
 0x1cb   : > { %1343 = vperm.xlu1 %7063, %v1273_v20   ;;  %2007 = vperm.xlu0 %7062, %v1969_v21   ;;  %v2694_v20 = vld [vmem:[%s9018_s9 + $0x78] sm:$0xff]  ;;  %v3431_v21 = vld [vmem:[%s9021_s12 + $0x68] sm:$0xff] }
 0x1cc   : > { %2772 = vperm.xlu2 %7064, %v2694_v20   ;;  %v6805_v20 = vld [vmem:[%s9060_s23 + $0xa8] sm:$0xff] }
 0x1d3   : > { %2022 = vperm.xlu0 %7062, %v1972_v24   ;;  %v3420_v24 = vld [vmem:[%s9021_s12 + $0x10] sm:$0xff] }
 0x1d4   : > { %3446 = vperm.xlu2 %7064, %v3420_v24   ;;  %v1396_v24 = vld [vmem:[#allocation5] sm:$0xf] }
 0x1d7   : > { %v7502_v9 = vpop.f32.mrf.mxu0 }
 0x1da   : > { %5647 = vmatmul.msk.bf16.gmra.mxu0 %vm693_vm1, %v7418_v10  ;;  %v1964_v10 = vld [vmem:[%s9062_s6] sm:$0xff] }
 0x1db   : > { %1982 = vperm.xlu1 %7063, %v1964_v10   ;;  %2037 = vperm.xlu0 %7062, %v1975_v28  }
 0x1dc   : > { %3461 = vperm.xlu2 %7064, %v3423_v30   ;;  %v6807_v30 = vld [vmem:[%s9060_s23 + $0xb8] sm:$0xff] }
 0x1df   : > { %v7512_v22 = vpop.f32.mrf.mxu0 }
 0x1e3   : > { %1997 = vperm.xlu1 %7063, %v1967_v27   ;;  %2052 = vperm.xlu0 %7062, %v1978_v32   ;;  %v4653_v27 = vld [vmem:[%s9024_s15 + $0x40] sm:$0xff]  ;;  %v4656_v32 = vld [vmem:[%s9024_s15 + $0x58] sm:$0xff] }
 0x1e7   : > { %v7523_v25 = vpop.f32.mrf.mxu0 }
 0x1ea   : > { %5648 = vmatmul.msk.bf16.gmra.mxu0 %vm693_vm1, %v7424_v11 }
 0x1eb   : > { %2012 = vperm.xlu1 %7063, %v1970_v31   ;;  %2702 = vperm.xlu0 %7062, %v2680_v35   ;;  %v4648_v31 = vld [vmem:[%s9024_s15 + $0x18] sm:$0xff]  ;;  %v4651_v35 = vld [vmem:[%s9024_s15 + $0x30] sm:$0xff] }
 0x1ef   : > { %v7536_v29 = vpop.f32.mrf.mxu0 }
 0x1f3   : > { %2027 = vperm.xlu1 %7063, %v1973_v34   ;;  %2717 = vperm.xlu0 %7062, %v2683_v39   ;;  %v3426_v34 = vld [vmem:[%s9021_s12 + $0x40] sm:$0xff]  ;;  %v3429_v39 = vld [vmem:[%s9021_s12 + $0x58] sm:$0xff] }
 0x1f4   : > { %3476 = vperm.xlu2 %7064, %v3426_v34  }
 0x1f7   : > { %v7547_v11 = vpop.f32.mrf.mxu0 }
 0x1fa   : > { %5649 = vmatmul.msk.bf16.gmra.mxu0 %vm693_vm1, %v7385_v3 }
 0x1fb   : > { %2042 = vperm.xlu1 %7063, %v1976_v38   ;;  %2732 = vperm.xlu0 %7062, %v2686_v42  }
 0x1fc   : > { %3491 = vperm.xlu2 %7064, %v3429_v39  }
 0x1ff   : > { %v7560_v36 = vpop.f32.mrf.mxu0 }
 0x203   : > { %2057 = vperm.xlu1 %7063, %v1979_v41   ;;  %2747 = vperm.xlu0 %7062, %v2689_v46   ;;  %v5340_v41 = vld [vmem:[%s9027_s18 + $0x8] sm:$0xff]  ;;  %v4657_v46 = vld [vmem:[%s9024_s15 + $0x60] sm:$0xff] }
 0x207   : > { %v7571_v3 = vpop.f32.mrf.mxu0 }
 0x20b   : > { %2707 = vperm.xlu1 %7063, %v2681_v45   ;;  %2762 = vperm.xlu0 %7062, %v2692_v50   ;;  %v3432_v45 = vld [vmem:[%s9021_s12 + $0x70] sm:$0xff] }
 0x20c   : > { %3506 = vperm.xlu2 %7064, %v3432_v45  }
 0x20f   : > { %v7582_v43 = vpop.f32.mrf.mxu0 }
 0x213   : > { %2722 = vperm.xlu1 %7063, %v2684_v49   ;;  %3436 = vperm.xlu0 %7062, %v3418_v54   ;;  %v5346_v54 = vld [vmem:[%s9027_s18 + $0x38] sm:$0xff] }
 0x214   : > { %4668 = vperm.xlu2 %7064, %v4646_v52  }
 0x217   : > { %v7593_v47 = vpop.f32.mrf.mxu0 }
 0x21b   : > { %2737 = vperm.xlu1 %7063, %v2687_v53   ;;  %3451 = vperm.xlu0 %7062, %v3421_v58   ;;  %v4660_v53 = vld [vmem:[%s9024_s15 + $0x78] sm:$0xff]  ;;  %v4649_v58 = vld [vmem:[%s9024_s15 + $0x20] sm:$0xff] }
 0x21c   : > { %4683 = vperm.xlu2 %7064, %v4649_v58  }
 0x21f   : > { %v7604_v51 = vpop.f32.mrf.mxu0 }
 0x220   : > { %v1140_v0 = vpack.c.bf16 %v7604_v51, %v7593_v47  ;;  %v4655_v47 = vld [vmem:[%s9024_s15 + $0x50] sm:$0xff]  ;;  %v6796_v51 = vld [vmem:[%s9060_s23 + $0x60] sm:$0xff] }
 0x223   : > { %2752 = vperm.xlu1 %7063, %v2690_v57   ;;  %3466 = vperm.xlu0 %7062, %v3424_v62   ;;  %v6787_v62 = vld [vmem:[%s9060_s23 + $0x18] sm:$0xff] }
 0x224   : > { %1042 = vmatmul.bf16.gmra.mxu3 %v6787_v62 }
 0x227   : > { %v7615_v55 = vpop.f32.mrf.mxu0 }
 0x22b   : > { %2767 = vperm.xlu1 %7063, %v2693_v61   ;;  %3481 = vperm.xlu0 %7062, %v3427_v2   ;;  %v6795_v61 = vld [vmem:[%s9060_s23 + $0x58] sm:$0xff]  ;;  %v5344_v2 = vld [vmem:[%s9027_s18 + $0x28] sm:$0xff] }
 0x22c   : > { %945 = vmatmul.bf16.vlgmr.msra.gmra.mxu2 %v6795_v61 }
 0x22f   : > { %v7626_v59 = vpop.f32.mrf.mxu0 }
 0x233   : > { %3441 = vperm.xlu1 %7063, %v3419_v1   ;;  %3496 = vperm.xlu0 %7062, %v3430_v14   ;;  %v4652_v1 = vld [vmem:[%s9024_s15 + $0x38] sm:$0xff]  ;;  %v6789_v14 = vld [vmem:[%s9060_s23 + $0x28] sm:$0xff] }
 0x234   : > { %4698 = vperm.xlu2 %7064, %v4652_v1  }
 0x237   : > { %v7637_v63 = vpop.f32.mrf.mxu0 }
 0x23b   : > { %3456 = vperm.xlu1 %7063, %v3422_v13   ;;  %3511 = vperm.xlu0 %7062, %v3433_v15   ;;  %v6797_v13 = vld [vmem:[%s9060_s23 + $0x68] sm:$0xff]  ;;  %v6798_v15 = vld [vmem:[%s9060_s23 + $0x70] sm:$0xff] }
 0x23c   : > { %4713 = vperm.xlu2 %7064, %v4655_v47   ;;  %950 = vmatmul.bf16.gmra.mxu2 %v6796_v51 }
 0x23f   : > { %v7648_v4 = vpop.f32.mrf.mxu0 }
 0x240   : > { %v1142_v57 = vpack.c.bf16 %v7648_v4, %v7637_v63  ;;  %v1141_v63 = vpack.c.bf16 %v7626_v59, %v7615_v55  ;;  %v1139_v55 = vpack.c.bf16 %v7582_v43, %v7571_v3  ;;  %v6800_v59 = vld [vmem:[%s9060_s23 + $0x80] sm:$0xff]  ;;  %v4658_v3 = vld [vmem:[%s9024_s15 + $0x68] sm:$0xff] }
 0x241   : > { %v6788_v4 = vld [vmem:[%s9060_s23 + $0x20] sm:$0xff]  ;;  %v6801_v43 = vld [vmem:[%s9060_s23 + $0x88] sm:$0xff] }
 0x242   : > { %1047 = vmatmul.bf16.gmra.mxu3 %v6788_v4 }
 0x243   : > { %3471 = vperm.xlu1 %7063, %v3425_v7   ;;  %4673 = vperm.xlu0 %7062, %v4647_v18   ;;  %v5345_v7 = vld [vmem:[%s9027_s18 + $0x30] sm:$0xff]  ;;  %v6791_v18 = vld [vmem:[%s9060_s23 + $0x38] sm:$0xff] }
 0x244   : > { %4728 = vperm.xlu2 %7064, %v4658_v3  }
 0x247   : > { %v7659_v5 = vpop.f32.mrf.mxu0 }
 0x24b   : > { %3486 = vperm.xlu1 %7063, %v3428_v17   ;;  %4688 = vperm.xlu0 %7062, %v4650_v23   ;;  %v6799_v17 = vld [vmem:[%s9060_s23 + $0x78] sm:$0xff]  ;;  %v1028_v23 = vpop.f32.mrf.mxu3 }
 0x24c   : > { %5349 = vperm.xlu2 %7064, %v5339_v12   ;;  %955 = vmatmul.bf16.gmra.mxu2 %v6797_v13 }
 0x24f   : > { %v1104_v16 = vpop.f32.mrf.mxu0 }
 0x250   : > { %v1143_v56 = vpack.c.bf16 %v1104_v16, %v7659_v5  ;;  %v5342_v5 = vld [vmem:[%s9027_s18 + $0x18] sm:$0xff]  ;;  %v6790_v16 = vld [vmem:[%s9060_s23 + $0x30] sm:$0xff] }
 0x252   : > { %1052 = vmatmul.bf16.gmra.mxu3 %v6789_v14 }
 0x253   : > { %3501 = vperm.xlu1 %7063, %v3431_v21   ;;  %4703 = vperm.xlu0 %7062, %v4653_v27   ;;  %v6806_v21 = vld [vmem:[%s9060_s23 + $0xb0] sm:$0xff]  ;;  %v1424_v27 = vsel %vm1422_vm2, %v1396_v24, 0 }
 0x254   : > { %5364 = vperm.xlu2 %7064, %v5342_v5   ;;  %1433 = vmatpush.bf16.msrb.mxu2 %v1424_v27 }
 0x257   : > { %v1107_v19 = vpop.f32.mrf.mxu0 }
 0x25b   : > { %4663 = vperm.xlu1 %7063, %v4645_v26   ;;  %4718 = vperm.xlu0 %7062, %v4656_v32   ;;  %v1500_v26 = vld [vmem:[#allocation5 + $0x4] sm:$0xf] }
 0x25c   : > { %5379 = vperm.xlu2 %7064, %v5345_v7   ;;  %960 = vmatmul.bf16.gmra.mxu2 %v6798_v15 }
 0x25f   : > { %v1109_v10 = vpop.f32.mrf.mxu0 }
 0x260   : > { %v1144_v50 = vpack.c.bf16 %v1109_v10, %v1107_v19  ;;  %v6804_v19 = vld [vmem:[%s9060_s23 + $0xa0] sm:$0xff]  ;;  %v1030_v10 = vpop.f32.mrf.mxu3 }
 0x262   : > { %1057 = vmatmul.bf16.gmra.mxu3 %v6790_v16 }
 0x263   : > { %4678 = vperm.xlu1 %7063, %v4648_v31   ;;  %4733 = vperm.xlu0 %7062, %v4659_v37  }
 0x267   : > { %v1112_v28 = vpop.f32.mrf.mxu0 }
 0x268   : > { %v1033_v31 = vpop.f32.mrf.mxu3 }
 0x26b   : > { %4693 = vperm.xlu1 %7063, %v4651_v35   ;;  %5354 = vperm.xlu0 %7062, %v5340_v41   ;;  %v1029_v35 = vadd.f32 %v1028_v23, %v7502_v9 }
 0x26c   : > { %965 = vmatmul.bf16.gmra.mxu2 %v6799_v17 }
 0x26f   : > { %v1114_v33 = vpop.f32.mrf.mxu0 }
 0x270   : > { %v1145_v49 = vpack.c.bf16 %v1114_v33, %v1112_v28  ;;  %v1502_v28 = vsel %vm1422_vm2, %v1500_v26, 0  ;;  %v1035_v32 = vpop.f32.mrf.mxu3  ;;  %v1279_v33 = vpop.permute.xlu0 %1278 }
 0x271   : > { %1511 = vmatpush.bf16.msrb.mxu3 %v1502_v28 }
 0x272   : > { %1062 = vmatmul.bf16.gmra.mxu3 %v6791_v18 }
 0x273   : > { %4708 = vperm.xlu1 %7063, %v4654_v40   ;;  %5369 = vperm.xlu0 %7062, %v5343_v48  }
 0x277   : > { %v1117_v38 = vpop.f32.mrf.mxu0 }
 0x278   : > { %v1038_v39 = vpop.f32.mrf.mxu3 }
 0x27b   : > { %4723 = vperm.xlu1 %7063, %v4657_v46   ;;  %5384 = vperm.xlu0 %7062, %v5346_v54   ;;  %v1036_v54 = vadd.f32 %v1035_v32, %v7536_v29 }
 0x27f   : > { %v1119_v42 = vpop.f32.mrf.mxu0 }
 0x280   : > { %v1146_v44 = vpack.c.bf16 %v1119_v42, %v1117_v38  ;;  %v1031_v38 = vadd.f32 %v1030_v10, %v7512_v22  ;;  %v1040_v9 = vpop.f32.mrf.mxu3  ;;  %v1034_v22 = vadd.f32 %v1033_v31, %v7523_v25  ;;  %v1039_v25 = vadd.f32 %v1038_v39, %v7547_v11 }
 0x281   : > { %v1041_v4 = vadd.f32 %v1040_v9, %v7560_v36 }
 0x282   : > { %1195 = vmatpush.bf16.msra.mxu1 %v1146_v44  ;;  %v1284_v44 = vpop.permute.xlu0 %1283 }
 0x283   : > { %4738 = vperm.xlu1 %7063, %v4660_v53  }
 0x286   : > { %1196 = vmatpush.bf16.msra.mxu1 %v1145_v49 }
 0x28a   : > { %1197 = vmatpush.bf16.msra.mxu1 %v1144_v50  ;;  %v1289_v50 = vpop.permute.xlu1 %1288  ;;  %v1309_v36 = vpop.permute.xlu0 %1308 }
 0x28b   : > { %5359 = vperm.xlu1 %7063, %v5341_v60  }
 0x28e   : > { %1198 = vmatpush.bf16.msra.mxu1 %v1143_v56 }
 0x292   : > { %1199 = vmatpush.bf16.msra.mxu1 %v1142_v57  ;;  %v1294_v61 = vpop.permute.xlu1 %1293 }
 0x293   : > { %5374 = vperm.xlu1 %7063, %v5344_v2  }
 0x296   : > { %1200 = vmatpush.bf16.msra.mxu1 %v1141_v63 }
 0x29a   : > { %1201 = vmatpush.bf16.msra.mxu1 %v1140_v0  ;;  %v1314_v24 = vpop.permute.xlu1 %1313 }
 0x29e   : > { %1202 = vmatpush.bf16.msra.mxu1 %v1139_v55  ;;  %v1299_v55 = vpop.permute.xlu2 %1298 }
 0x2a1   : > { %1203 = vmatmul.bf16.vlgmr.msra.gmra.mxu1 %v6800_v59 }
 0x2a6   : > { %v1304_v13 = vpop.permute.xlu2 %1303 }
 0x2a7   : > { %v1043_v62 = vpop.f32.mrf.mxu3 }
 0x2af   : > { %v946_v60 = vpop.f32.mrf.mxu2  ;;  %v1045_v47 = vpop.f32.mrf.mxu3 }
 0x2b0   : > { %v1044_v17 = vadd.f32 %v1043_v62, %v946_v60 }
 0x2b1   : > { %1208 = vmatmul.bf16.gmra.mxu1 %v6801_v43 }
 0x2b7   : > { %v948_v29 = vpop.f32.mrf.mxu2 }
 0x2b8   : > { %v1046_v18 = vadd.f32 %v1045_v47, %v948_v29 }
 0x2bf   : > { %v951_v7 = vpop.f32.mrf.mxu2 }
 0x2c1   : > { %1213 = vmatmul.bf16.gmra.mxu1 %v6802_v6 }
 0x2c5   : > { %v1048_v15 = vpop.f32.mrf.mxu3 }
 0x2c6   : > { %v1049_v32 = vadd.f32 %v1048_v15, %v951_v7 }
 0x2d1   : > { %1218 = vmatmul.bf16.gmra.mxu1 %v6803_v8 }
 0x2e1   : > { %1223 = vmatmul.bf16.gmra.mxu1 %v6804_v19  ;;  %v953_v19 = vpop.f32.mrf.mxu2 }
 0x2f1   : > { %1228 = vmatmul.bf16.gmra.mxu1 %v6805_v20 }
 0x301   : > { %1233 = vmatmul.bf16.gmra.mxu1 %v6806_v21  ;;  %v1050_v21 = vpop.f32.mrf.mxu3 }
 0x311   : > { %1238 = vmatmul.bf16.gmra.mxu1 %v6807_v30 }
 0x31e   : > { %v1204_v34 = vpop.f32.mrf.mxu1 }
 0x31f   : > { %v1244_v37 = vadd.f32 %v1204_v34, %v1029_v35  ;;  %v1053_v34 = vpop.f32.mrf.mxu3 }
 0x321   : > { %v1356_v41 = vadd.f32 %v1279_v33, %v1244_v37  ;;  %v956_v33 = vpop.f32.mrf.mxu2  ;;  %v1051_v37 = vadd.f32 %v1050_v21, %v953_v19 }
 0x323   : > { %v1372_v46 = vmax.f32 %v1356_v41, 0.0 }
 0x326   : > { %v1206_v40 = vpop.f32.mrf.mxu1 }
 0x327   : > { %v1245_v42 = vadd.f32 %v1206_v40, %v1031_v38  ;;  %v1319_v38 = vpop.permute.xlu2 %1318 }
 0x329   : > { %v1357_v45 = vadd.f32 %v1284_v44, %v1245_v42  ;;  %v1324_v42 = vpop.permute.xlu0 %1323 }
 0x32b   : > { %v1373_v48 = vmax.f32 %v1357_v45, 0.0  ;;  %v958_v45 = vpop.f32.mrf.mxu2 }
 0x32d   : > { %v7836_v49 = vpack.c.bf16 %v1373_v48, %v1372_v46  ;;  %v1055_v46 = vpop.f32.mrf.mxu3 }
 0x32e   : > { %v1209_v52 = vpop.f32.mrf.mxu1  ;;  %v1056_v60 = vadd.f32 %v1055_v46, %v958_v45 }
 0x32f   : > { %5698 = vmatmul.msk.bf16.vlgmr.msrb.gmra.mxu2 %vm1397_vm3, %v7836_v49  ;;  %5706 = vmatmul.msk.bf16.vlgmr.msrb.gmra.mxu3 %vm1397_vm3, %v7836_v49  ;;  %v1246_v53 = vadd.f32 %v1209_v52, %v1034_v22  ;;  %v1054_v22 = vadd.f32 %v1053_v34, %v956_v33 }
 0x331   : > { %v1358_v57 = vadd.f32 %v1289_v50, %v1246_v53 }
 0x333   : > { %v1374_v0 = vmax.f32 %v1358_v57, 0.0 }
 0x335   : > { %v1058_v57 = vpop.f32.mrf.mxu3 }
 0x336   : > { %v1211_v56 = vpop.f32.mrf.mxu1 }
 0x337   : > { %v1247_v58 = vadd.f32 %v1211_v56, %v1036_v54  ;;  %v961_v54 = vpop.f32.mrf.mxu2  ;;  %v1773_v56 = vld [vmem:[#allocation5 + $0x8] sm:$0xf] }
 0x339   : > { %v1359_v63 = vadd.f32 %v1294_v61, %v1247_v58  ;;  %v1775_v58 = vsel %vm1422_vm2, %v1773_v56, 0  ;;  %v1329_v61 = vpop.permute.xlu1 %1328 }
 0x33a   : > { %1784 = vmatpush.bf16.msra.mxu2 %v1775_v58 }
 0x33b   : > { %v1375_v1 = vmax.f32 %v1359_v63, 0.0 }
 0x33d   : > { %v7844_v2 = vpack.c.bf16 %v1375_v1, %v1374_v0  ;;  %v1334_v1 = vpop.permute.xlu2 %1333 }
 0x33e   : > { %v1214_v59 = vpop.f32.mrf.mxu1 }
 0x33f   : > { %5699 = vmatmul.msk.bf16.gmra.mxu2 %vm1397_vm3, %v7844_v2  ;;  %5707 = vmatmul.msk.bf16.gmra.mxu3 %vm1397_vm3, %v7844_v2  ;;  %v1248_v51 = vadd.f32 %v1214_v59, %v1039_v25  ;;  %v963_v29 = vpop.f32.mrf.mxu2 }
 0x341   : > { %v1360_v43 = vadd.f32 %v1299_v55, %v1248_v51  ;;  %v1060_v51 = vpop.f32.mrf.mxu3 }
 0x343   : > { %v1376_v5 = vmax.f32 %v1360_v43, 0.0 }
 0x346   : > { %v1216_v3 = vpop.f32.mrf.mxu1 }
 0x347   : > { %v1249_v12 = vadd.f32 %v1216_v3, %v1041_v4  ;;  %v1059_v3 = vadd.f32 %v1058_v57, %v961_v54  ;;  %v966_v15 = vpop.f32.mrf.mxu2 }
 0x349   : > { %v1361_v14 = vadd.f32 %v1304_v13, %v1249_v12  ;;  %v1061_v12 = vadd.f32 %v1060_v51, %v963_v29  ;;  %v1339_v13 = vpop.permute.xlu0 %1338 }
 0x34b   : > { %v1377_v6 = vmax.f32 %v1361_v14, 0.0 }
 0x34d   : > { %v7852_v16 = vpack.c.bf16 %v1377_v6, %v1376_v5  ;;  %v1344_v5 = vpop.permute.xlu1 %1343 }
 0x34e   : > { %v1219_v8 = vpop.f32.mrf.mxu1 }
 0x34f   : > { %5700 = vmatmul.msk.bf16.gmra.mxu2 %vm1397_vm3, %v7852_v16  ;;  %5708 = vmatmul.msk.bf16.gmra.mxu3 %vm1397_vm3, %v7852_v16  ;;  %v1250_v11 = vadd.f32 %v1219_v8, %v1044_v17  ;;  %v1063_v8 = vpop.f32.mrf.mxu3  ;;  %v968_v21 = vpop.f32.mrf.mxu2 }
 0x351   : > { %v1362_v23 = vadd.f32 %v1309_v36, %v1250_v11 }
 0x353   : > { %v1378_v27 = vmax.f32 %v1362_v23, 0.0 }
 0x356   : > { %v1221_v20 = vpop.f32.mrf.mxu1 }
 0x357   : > { %v1251_v10 = vadd.f32 %v1221_v20, %v1046_v18  ;;  %v1064_v20 = vadd.f32 %v1063_v8, %v966_v15  ;;  %v1065_v23 = vpop.f32.mrf.mxu3 }
 0x359   : > { %v1363_v26 = vadd.f32 %v1314_v24, %v1251_v10  ;;  %v1066_v24 = vadd.f32 %v1065_v23, %v968_v21 }
 0x35b   : > { %v1379_v28 = vmax.f32 %v1363_v26, 0.0  ;;  %v1349_v26 = vpop.permute.xlu2 %1348 }
 0x35d   : > { %v7858_v30 = vpack.c.bf16 %v1379_v28, %v1378_v27 }
 0x35e   : > { %v1224_v31 = vpop.f32.mrf.mxu1 }
 0x35f   : > { %5701 = vmatmul.msk.bf16.gmra.mxu2 %vm1397_vm3, %v7858_v30  ;;  %5709 = vmatmul.msk.bf16.gmra.mxu3 %vm1397_vm3, %v7858_v30  ;;  %v1252_v35 = vadd.f32 %v1224_v31, %v1049_v32  ;;  %v1354_v32 = vpop.permute.xlu0 %1353 }
 0x361   : > { %v1364_v40 = vadd.f32 %v1319_v38, %v1252_v35 }
 0x363   : > { %v1380_v48 = vmax.f32 %v1364_v40, 0.0 }
 0x366   : > { %v1226_v39 = vpop.f32.mrf.mxu1 }
 0x367   : > { %v1253_v41 = vadd.f32 %v1226_v39, %v1051_v37 }
 0x369   : > { %v1365_v44 = vadd.f32 %v1324_v42, %v1253_v41 }
 0x36b   : > { %v1381_v50 = vmax.f32 %v1365_v44, 0.0 }
 0x36d   : > { %v7864_v52 = vpack.c.bf16 %v1381_v50, %v1380_v48 }
 0x36e   : > { %v1229_v9 = vpop.f32.mrf.mxu1 }
 0x36f   : > { %5702 = vmatmul.msk.bf16.gmra.mxu2 %vm1397_vm3, %v7864_v52  ;;  %5710 = vmatmul.msk.bf16.gmra.mxu3 %vm1397_vm3, %v7864_v52  ;;  %v1254_v53 = vadd.f32 %v1229_v9, %v1054_v22 }
 0x371   : > { %v1366_v63 = vadd.f32 %v1329_v61, %v1254_v53 }
 0x373   : > { %v1382_v59 = vmax.f32 %v1366_v63, 0.0 }
 0x376   : > { %v1231_v62 = vpop.f32.mrf.mxu1 }
 0x377   : > { %v1255_v0 = vadd.f32 %v1231_v62, %v1056_v60 }
 0x379   : > { %v1367_v55 = vadd.f32 %v1334_v1, %v1255_v0 }
 0x37b   : > { %v1383_v25 = vmax.f32 %v1367_v55, 0.0 }
 0x37d   : > { %v7871_v47 = vpack.c.bf16 %v1383_v25, %v1382_v59 }
 0x37e   : > { %v1234_v4 = vpop.f32.mrf.mxu1 }
 0x37f   : > { %5703 = vmatmul.msk.bf16.gmra.mxu2 %vm1397_vm3, %v7871_v47  ;;  %5711 = vmatmul.msk.bf16.gmra.mxu3 %vm1397_vm3, %v7871_v47  ;;  %v1256_v43 = vadd.f32 %v1234_v4, %v1059_v3 }
 0x381   : > { %v1368_v6 = vadd.f32 %v1339_v13, %v1256_v43 }
 0x383   : > { %v1384_v11 = vmax.f32 %v1368_v6, 0.0 }
 0x386   : > { %v1236_v14 = vpop.f32.mrf.mxu1 }
 0x387   : > { %v1257_v7 = vadd.f32 %v1236_v14, %v1061_v12 }
 0x389   : > { %v1369_v17 = vadd.f32 %v1344_v5, %v1257_v7 }
 0x38b   : > { %v1385_v36 = vmax.f32 %v1369_v17, 0.0 }
 0x38d   : > { %v1394_v18 = vpack.c.bf16 %v1385_v36, %v1384_v11 }
 0x38e   : > { %v1239_v19 = vpop.f32.mrf.mxu1 }
 0x38f   : > { %5704 = vmatmul.msk.bf16.gmra.mxu2 %vm1397_vm3, %v1394_v18  ;;  %5712 = vmatmul.msk.bf16.gmra.mxu3 %vm1397_vm3, %v1394_v18  ;;  %v1258_v10 = vadd.f32 %v1239_v19, %v1064_v20 }
 0x391   : > { %v1370_v28 = vadd.f32 %v1349_v26, %v1258_v10 }
 0x393   : > { %v1386_v34 = vmax.f32 %v1370_v28, 0.0 }
 0x396   : > { %v1241_v27 = vpop.f32.mrf.mxu1 }
 0x397   : > { %v1259_v31 = vadd.f32 %v1241_v27, %v1066_v24 }
 0x399   : > { %v1371_v33 = vadd.f32 %v1354_v32, %v1259_v31 }
 0x39b   : > { %v1387_v35 = vmax.f32 %v1371_v33, 0.0 }
 0x39d   : > { %v1395_v37 = vpack.c.bf16 %v1387_v35, %v1386_v34 }
 0x39f   : > { %5705 = vmatmul.msk.bf16.gmra.mxu2 %vm1397_vm3, %v1395_v37  ;;  %5713 = vmatmul.msk.bf16.gmra.mxu3 %vm1397_vm3, %v1395_v37 }
 0x3af   : > { %5794 = vmatmul.msk.bf16.vlgmr.msra.gmra.mxu2 %vm1397_vm3, %v7836_v49 }
 0x3b2   : > { %v7883_v38 = vpop.f32.mrf.mxu2  ;;  %v7885_v39 = vpop.f32.mrf.mxu3 }
 0x3ba   : > { %v7887_v40 = vpop.f32.mrf.mxu2  ;;  %v7889_v41 = vpop.f32.mrf.mxu3 }
 0x3bb   : > { %v1491_v42 = vpack.c.bf16 %v7887_v40, %v7883_v38  ;;  %v1570_v20 = vpack.c.bf16 %v7889_v41, %v7885_v39  ;;  %v6808_v38 = vld [vmem:[%s9063_s4] sm:$0xff] }
 0x3bf   : > { %5795 = vmatmul.msk.bf16.gmra.mxu2 %vm1397_vm3, %v7844_v2 }
 0x3c2   : > { %v7895_v44 = vpop.f32.mrf.mxu2  ;;  %v1518_v45 = vpop.f32.mrf.mxu3 }
 0x3ca   : > { %v1442_v46 = vpop.f32.mrf.mxu2  ;;  %v1520_v48 = vpop.f32.mrf.mxu3 }
 0x3cb   : > { %v1492_v49 = vpack.c.bf16 %v1442_v46, %v7895_v44  ;;  %v1571_v19 = vpack.c.bf16 %v1520_v48, %v1518_v45  ;;  %v6817_v44 = vld [vmem:[%s9063_s4 + $0x48] sm:$0xff] }
 0x3cc   : > { %v6809_v45 = vld [vmem:[%s9063_s4 + $0x8] sm:$0xff] }
 0x3cf   : > { %5796 = vmatmul.msk.bf16.gmra.mxu2 %vm1397_vm3, %v7852_v16 }
 0x3d2   : > { %v1445_v50 = vpop.f32.mrf.mxu2  ;;  %v1523_v9 = vpop.f32.mrf.mxu3 }
 0x3da   : > { %v1447_v22 = vpop.f32.mrf.mxu2  ;;  %v1525_v53 = vpop.f32.mrf.mxu3 }
 0x3db   : > { %v1493_v54 = vpack.c.bf16 %v1447_v22, %v1445_v50  ;;  %v1572_v36 = vpack.c.bf16 %v1525_v53, %v1523_v9  ;;  %v6818_v9 = vld [vmem:[%s9063_s4 + $0x50] sm:$0xff] }
 0x3dc   : > { %v6810_v22 = vld [vmem:[%s9063_s4 + $0x10] sm:$0xff] }
 0x3df   : > { %5797 = vmatmul.msk.bf16.gmra.mxu2 %vm1397_vm3, %v7858_v30 }
 0x3e2   : > { %v1450_v56 = vpop.f32.mrf.mxu2  ;;  %v1528_v2 = vpop.f32.mrf.mxu3 }
 0x3ea   : > { %v1452_v57 = vpop.f32.mrf.mxu2  ;;  %v1530_v58 = vpop.f32.mrf.mxu3 }
 0x3eb   : > { %v1494_v60 = vpack.c.bf16 %v1452_v57, %v1450_v56  ;;  %v1573_v11 = vpack.c.bf16 %v1530_v58, %v1528_v2  ;;  %v6819_v56 = vld [vmem:[%s9063_s4 + $0x58] sm:$0xff]  ;;  %v6825_v57 = vld [vmem:[%s9063_s4 + $0x88] sm:$0xff]  ;;  %v6820_v58 = vld [vmem:[%s9063_s4 + $0x60] sm:$0xff] }
 0x3ec   : > { %v6811_v2 = vld [vmem:[%s9063_s4 + $0x18] sm:$0xff] }
 0x3ef   : > { %5798 = vmatmul.msk.bf16.gmra.mxu2 %vm1397_vm3, %v7864_v52 }
 0x3f2   : > { %v1455_v61 = vpop.f32.mrf.mxu2  ;;  %v1533_v62 = vpop.f32.mrf.mxu3 }
 0x3fa   : > { %v1457_v63 = vpop.f32.mrf.mxu2  ;;  %v1535_v16 = vpop.f32.mrf.mxu3 }
 0x3fb   : > { %v1495_v15 = vpack.c.bf16 %v1457_v63, %v1455_v61  ;;  %v1574_v8 = vpack.c.bf16 %v1535_v16, %v1533_v62  ;;  %v6826_v61 = vld [vmem:[%s9063_s4 + $0x90] sm:$0xff]  ;;  %v6821_v62 = vld [vmem:[%s9063_s4 + $0x68] sm:$0xff]  ;;  %v6827_v16 = vld [vmem:[%s9063_s4 + $0x98] sm:$0xff] }
 0x3fc   : > { %v6813_v63 = vld [vmem:[%s9063_s4 + $0x28] sm:$0xff] }
 0x3ff   : > { %5799 = vmatmul.msk.bf16.gmra.mxu2 %vm1397_vm3, %v7871_v47 }
 0x402   : > { %v1460_v0 = vpop.f32.mrf.mxu2  ;;  %v1538_v1 = vpop.f32.mrf.mxu3 }
 0x40a   : > { %v1462_v55 = vpop.f32.mrf.mxu2  ;;  %v1540_v59 = vpop.f32.mrf.mxu3 }
 0x40b   : > { %v1496_v6 = vpack.c.bf16 %v1462_v55, %v1460_v0  ;;  %v1575_v7 = vpack.c.bf16 %v1540_v59, %v1538_v1  ;;  %v6822_v0 = vld [vmem:[%s9063_s4 + $0x70] sm:$0xff]  ;;  %v6828_v55 = vld [vmem:[%s9063_s4 + $0xa0] sm:$0xff]  ;;  %v6823_v59 = vld [vmem:[%s9063_s4 + $0x78] sm:$0xff] }
 0x40c   : > { %v6814_v1 = vld [vmem:[%s9063_s4 + $0x30] sm:$0xff] }
 0x40f   : > { %5800 = vmatmul.msk.bf16.gmra.mxu2 %vm1397_vm3, %v1394_v18 }
 0x412   : > { %v1465_v30 = vpop.f32.mrf.mxu2  ;;  %v1543_v25 = vpop.f32.mrf.mxu3 }
 0x41a   : > { %v1467_v29 = vpop.f32.mrf.mxu2  ;;  %v1545_v51 = vpop.f32.mrf.mxu3 }
 0x41b   : > { %v1497_v47 = vpack.c.bf16 %v1467_v29, %v1465_v30  ;;  %v1576_v14 = vpack.c.bf16 %v1545_v51, %v1543_v25  ;;  %v6815_v30 = vld [vmem:[%s9063_s4 + $0x38] sm:$0xff]  ;;  %v6829_v25 = vld [vmem:[%s9063_s4 + $0xa8] sm:$0xff]  ;;  %v6832_v29 = vld [vmem:[%s9017_s8] sm:$0xff] }
 0x41c   : > { %v6830_v51 = vld [vmem:[%s9063_s4 + $0xb0] sm:$0xff] }
 0x41f   : > { %5801 = vmatmul.msk.bf16.gmra.mxu2 %vm1397_vm3, %v1395_v37  ;;  %v6816_v37 = vld [vmem:[%s9063_s4 + $0x40] sm:$0xff] }
 0x422   : > { %v1470_v52 = vpop.f32.mrf.mxu2  ;;  %v1548_v4 = vpop.f32.mrf.mxu3 }
 0x42a   : > { %v1472_v3 = vpop.f32.mrf.mxu2  ;;  %v1550_v43 = vpop.f32.mrf.mxu3 }
 0x42b   : > { %v1498_v12 = vpack.c.bf16 %v1472_v3, %v1470_v52  ;;  %v1577_v13 = vpack.c.bf16 %v1550_v43, %v1548_v4 }
 0x42d   : > { %1626 = vmatpush.bf16.msrb.mxu0 %v1577_v13  ;;  %1723 = vmatpush.bf16.msrb.mxu1 %v1498_v12  ;;  %v6831_v12 = vld [vmem:[%s9063_s4 + $0xb8] sm:$0xff]  ;;  %v6841_v13 = vld [vmem:[%s9017_s8 + $0x8] sm:$0xff] }
 0x431   : > { %1627 = vmatpush.bf16.msrb.mxu0 %v1576_v14  ;;  %1724 = vmatpush.bf16.msrb.mxu1 %v1497_v47 }
 0x432   : > { %v7908_v5 = vpop.f32.mrf.mxu2 }
 0x435   : > { %1628 = vmatpush.bf16.msrb.mxu0 %v1575_v7  ;;  %1725 = vmatpush.bf16.msrb.mxu1 %v1496_v6 }
 0x439   : > { %1629 = vmatpush.bf16.msrb.mxu0 %v1574_v8  ;;  %1726 = vmatpush.bf16.msrb.mxu1 %v1495_v15 }
 0x43a   : > { %v1788_v17 = vpop.f32.mrf.mxu2 }
 0x43b   : > { %v1843_v53 = vpack.c.bf16 %v1788_v17, %v7908_v5 }
 0x43d   : > { %1630 = vmatpush.bf16.msrb.mxu0 %v1573_v11  ;;  %1727 = vmatpush.bf16.msrb.mxu1 %v1494_v60  ;;  %v6812_v60 = vld [vmem:[%s9063_s4 + $0x20] sm:$0xff] }
 0x441   : > { %1631 = vmatpush.bf16.msrb.mxu0 %v1572_v36  ;;  %1728 = vmatpush.bf16.msrb.mxu1 %v1493_v54  ;;  %v6824_v54 = vld [vmem:[%s9063_s4 + $0x80] sm:$0xff] }
 0x442   : > { %v1791_v18 = vpop.f32.mrf.mxu2 }
 0x445   : > { %1632 = vmatpush.bf16.msrb.mxu0 %v1571_v19  ;;  %1729 = vmatpush.bf16.msrb.mxu1 %v1492_v49 }
 0x449   : > { %1633 = vmatpush.bf16.msrb.mxu0 %v1570_v20  ;;  %1730 = vmatpush.bf16.msrb.mxu1 %v1491_v42 }
 0x44a   : > { %v1793_v21 = vpop.f32.mrf.mxu2 }
 0x44b   : > { %v1844_v50 = vpack.c.bf16 %v1793_v21, %v1791_v18  ;;  %v1983_v18 = vpop.permute.xlu1 %1982 }
 0x44c   : > { %1634 = vmatmul.bf16.vlgmr.msrb.gmra.mxu0 %v6816_v37  ;;  %1731 = vmatmul.bf16.vlgmr.msrb.gmra.mxu1 %v6808_v38  ;;  %v1993_v37 = vpop.permute.xlu0 %1992 }
 0x44d   : > { %2140 = vmatpush.bf16.msra.mxu0 %v6832_v29  ;;  %2222 = vmatpush.bf16.msra.mxu1 %v6841_v13 }
 0x452   : > { %v1796_v23 = vpop.f32.mrf.mxu2 }
 0x45a   : > { %v1798_v10 = vpop.f32.mrf.mxu2 }
 0x45b   : > { %v1845_v49 = vpack.c.bf16 %v1798_v10, %v1796_v23  ;;  %v1988_v23 = vpop.permute.xlu2 %1987 }
 0x45c   : > { %1639 = vmatmul.bf16.gmra.mxu0 %v6817_v44  ;;  %1736 = vmatmul.bf16.gmra.mxu1 %v6809_v45 }
 0x462   : > { %v1801_v24 = vpop.f32.mrf.mxu2 }
 0x46a   : > { %v1803_v26 = vpop.f32.mrf.mxu2 }
 0x46b   : > { %v1846_v48 = vpack.c.bf16 %v1803_v26, %v1801_v24 }
 0x46c   : > { %1644 = vmatmul.bf16.gmra.mxu0 %v6818_v9  ;;  %1741 = vmatmul.bf16.gmra.mxu1 %v6810_v22 }
 0x472   : > { %v1806_v27 = vpop.f32.mrf.mxu2 }
 0x47a   : > { %v1808_v28 = vpop.f32.mrf.mxu2 }
 0x47b   : > { %v1847_v46 = vpack.c.bf16 %v1808_v28, %v1806_v27 }
 0x47c   : > { %1649 = vmatmul.bf16.gmra.mxu0 %v6819_v56  ;;  %1746 = vmatmul.bf16.gmra.mxu1 %v6811_v2  ;;  %v2003_v2 = vpop.permute.xlu2 %2002 }
 0x482   : > { %v1811_v31 = vpop.f32.mrf.mxu2 }
 0x484   : > { %v2018_v13 = vpop.permute.xlu2 %2017 }
 0x48a   : > { %v1813_v32 = vpop.f32.mrf.mxu2 }
 0x48b   : > { %v1848_v42 = vpack.c.bf16 %v1813_v32, %v1811_v31 }
 0x48c   : > { %1654 = vmatmul.bf16.gmra.mxu0 %v6820_v58  ;;  %1751 = vmatmul.bf16.gmra.mxu1 %v6812_v60 }
 0x492   : > { %v1816_v33 = vpop.f32.mrf.mxu2 }
 0x49a   : > { %v1818_v34 = vpop.f32.mrf.mxu2 }
 0x49b   : > { %v1849_v41 = vpack.c.bf16 %v1818_v34, %v1816_v33 }
 0x49c   : > { %1659 = vmatmul.bf16.gmra.mxu0 %v6821_v62  ;;  %1756 = vmatmul.bf16.gmra.mxu1 %v6813_v63 }
 0x4a2   : > { %v1821_v35 = vpop.f32.mrf.mxu2 }
 0x4aa   : > { %v1823_v39 = vpop.f32.mrf.mxu2 }
 0x4ab   : > { %v1850_v40 = vpack.c.bf16 %v1823_v39, %v1821_v35 }
 0x4ac   : > { %1664 = vmatmul.bf16.gmra.mxu0 %v6822_v0  ;;  %1761 = vmatmul.bf16.gmra.mxu1 %v6814_v1 }
 0x4ad   : > { %1899 = vmatpush.bf16.msra.mxu3 %v1850_v40 }
 0x4b1   : > { %1900 = vmatpush.bf16.msra.mxu3 %v1849_v41 }
 0x4b5   : > { %1901 = vmatpush.bf16.msra.mxu3 %v1848_v42  ;;  %v1998_v42 = vpop.permute.xlu1 %1997 }
 0x4b9   : > { %1902 = vmatpush.bf16.msra.mxu3 %v1847_v46 }
 0x4bc   : > { %1669 = vmatmul.bf16.gmra.mxu0 %v6823_v59  ;;  %1766 = vmatmul.bf16.gmra.mxu1 %v6815_v30 }
 0x4bd   : > { %1903 = vmatpush.bf16.msra.mxu3 %v1846_v48  ;;  %v2013_v29 = vpop.permute.xlu1 %2012 }
 0x4c1   : > { %1904 = vmatpush.bf16.msra.mxu3 %v1845_v49 }
 0x4c5   : > { %1905 = vmatpush.bf16.msra.mxu3 %v1844_v50 }
 0x4c9   : > { %1906 = vmatpush.bf16.msra.mxu3 %v1843_v53  ;;  %v1635_v52 = vpop.f32.mrf.mxu0  ;;  %v1732_v4 = vpop.f32.mrf.mxu1 }
 0x4ca   : > { %v1733_v15 = vadd.f32 %v1732_v4, %v1635_v52 }
 0x4cc   : > { %1907 = vmatmul.bf16.vlgmr.msra.gmra.mxu3 %v6824_v54 }
 0x4d1   : > { %v1637_v3 = vpop.f32.mrf.mxu0  ;;  %v1734_v43 = vpop.f32.mrf.mxu1 }
 0x4d2   : > { %v1735_v36 = vadd.f32 %v1734_v43, %v1637_v3 }
 0x4d9   : > { %v1640_v47 = vpop.f32.mrf.mxu0  ;;  %v1737_v14 = vpop.f32.mrf.mxu1 }
 0x4da   : > { %v1738_v33 = vadd.f32 %v1737_v14, %v1640_v47 }
 0x4dc   : > { %1912 = vmatmul.bf16.gmra.mxu3 %v6825_v57 }
 0x4e1   : > { %v1642_v5 = vpop.f32.mrf.mxu0  ;;  %v1739_v6 = vpop.f32.mrf.mxu1 }
 0x4e2   : > { %v1740_v35 = vadd.f32 %v1739_v6, %v1642_v5 }
 0x4e9   : > { %v1645_v17 = vpop.f32.mrf.mxu0  ;;  %v1742_v11 = vpop.f32.mrf.mxu1 }
 0x4ea   : > { %v1743_v9 = vadd.f32 %v1742_v11, %v1645_v17 }
 0x4ec   : > { %1917 = vmatmul.bf16.gmra.mxu3 %v6826_v61  ;;  %v2008_v61 = vpop.permute.xlu0 %2007 }
 0x4f1   : > { %v1647_v28 = vpop.f32.mrf.mxu0  ;;  %v1744_v32 = vpop.f32.mrf.mxu1 }
 0x4f2   : > { %v1745_v56 = vadd.f32 %v1744_v32, %v1647_v28 }
 0x4f9   : > { %v1650_v41 = vpop.f32.mrf.mxu0  ;;  %v1747_v44 = vpop.f32.mrf.mxu1 }
 0x4fa   : > { %v1748_v30 = vadd.f32 %v1747_v44, %v1650_v41  ;;  %v2033_v41 = vpop.permute.xlu2 %2032 }
 0x4fc   : > { %1922 = vmatmul.bf16.gmra.mxu3 %v6827_v16 }
 0x501   : > { %v1652_v22 = vpop.f32.mrf.mxu0  ;;  %v1749_v53 = vpop.f32.mrf.mxu1 }
 0x509   : > { %v1655_v0 = vpop.f32.mrf.mxu0  ;;  %v1752_v1 = vpop.f32.mrf.mxu1 }
 0x50c   : > { %1927 = vmatmul.bf16.gmra.mxu3 %v6828_v55 }
 0x511   : > { %v1657_v52 = vpop.f32.mrf.mxu0  ;;  %v1754_v3 = vpop.f32.mrf.mxu1 }
 0x519   : > { %v1757_v17 = vpop.f32.mrf.mxu1 }
 0x51c   : > { %1932 = vmatmul.bf16.gmra.mxu3 %v6829_v25 }
 0x52c   : > { %1937 = vmatmul.bf16.gmra.mxu3 %v6830_v51  ;;  %v1750_v51 = vadd.f32 %v1749_v53, %v1652_v22 }
 0x53c   : > { %1942 = vmatmul.bf16.gmra.mxu3 %v6831_v12 }
 0x54f   : > { %v1908_v7 = vpop.f32.mrf.mxu3 }
 0x550   : > { %v1948_v8 = vadd.f32 %v1908_v7, %v1733_v15  ;;  %v1753_v15 = vadd.f32 %v1752_v1, %v1655_v0 }
 0x552   : > { %v2060_v20 = vadd.f32 %v1983_v18, %v1948_v8  ;;  %v1660_v8 = vpop.f32.mrf.mxu0  ;;  %v2023_v18 = vpop.permute.xlu0 %2022 }
 0x554   : > { %v2076_v24 = vmax.f32 %v2060_v20, 0.0 }
 0x557   : > { %v1910_v19 = vpop.f32.mrf.mxu3 }
 0x558   : > { %v1949_v21 = vadd.f32 %v1910_v19, %v1735_v36  ;;  %v1755_v36 = vadd.f32 %v1754_v3, %v1657_v52 }
 0x55a   : > { %v2061_v10 = vadd.f32 %v1988_v23, %v1949_v21  ;;  %v2028_v23 = vpop.permute.xlu1 %2027 }
 0x55c   : > { %v2077_v26 = vmax.f32 %v2061_v10, 0.0 }
 0x55e   : > { %v7994_v27 = vpack.c.bf16 %v2077_v26, %v2076_v24  ;;  %v1662_v24 = vpop.f32.mrf.mxu0  ;;  %v1759_v26 = vpop.f32.mrf.mxu1 }
 0x55f   : > { %v1913_v31 = vpop.f32.mrf.mxu3 }
 0x560   : > { %5854 = vmatmul.msk.bf16.vlgmr.msra.gmra.mxu0 %vm2108_vm4, %v7994_v27  ;;  %5868 = vmatmul.msk.bf16.vlgmr.msra.gmra.mxu1 %vm2108_vm4, %v7994_v27  ;;  %v1950_v34 = vadd.f32 %v1913_v31, %v1738_v33 }
 0x562   : > { %v2062_v39 = vadd.f32 %v1993_v37, %v1950_v34  ;;  %v1758_v34 = vadd.f32 %v1757_v17, %v1660_v8 }
 0x564   : > { %v2078_v46 = vmax.f32 %v2062_v39, 0.0 }
 0x566   : > { %v1665_v37 = vpop.f32.mrf.mxu0  ;;  %v1762_v39 = vpop.f32.mrf.mxu1 }
 0x567   : > { %v1915_v38 = vpop.f32.mrf.mxu3 }
 0x568   : > { %v1951_v40 = vadd.f32 %v1915_v38, %v1740_v35  ;;  %v6850_v38 = vld [vmem:[%s9017_s8 + $0x10] sm:$0xff] }
 0x569   : > { %2499 = vmatpush.bf16.msrb.mxu0 %v6850_v38 }
 0x56a   : > { %v2063_v45 = vadd.f32 %v1998_v42, %v1951_v40  ;;  %v1760_v40 = vadd.f32 %v1759_v26, %v1662_v24 }
 0x56c   : > { %v2079_v48 = vmax.f32 %v2063_v45, 0.0 }
 0x56e   : > { %v8000_v49 = vpack.c.bf16 %v2079_v48, %v2078_v46  ;;  %v2038_v46 = vpop.permute.xlu0 %2037  ;;  %v1667_v53 = vpop.f32.mrf.mxu0 }
 0x56f   : > { %v1918_v50 = vpop.f32.mrf.mxu3 }
 0x570   : > { %5855 = vmatmul.msk.bf16.gmra.mxu0 %vm2108_vm4, %v8000_v49  ;;  %5869 = vmatmul.msk.bf16.gmra.mxu1 %vm2108_vm4, %v8000_v49  ;;  %v1952_v54 = vadd.f32 %v1918_v50, %v1743_v9 }
 0x572   : > { %v2064_v58 = vadd.f32 %v2003_v2, %v1952_v54  ;;  %v1764_v54 = vpop.f32.mrf.mxu1  ;;  %v1763_v2 = vadd.f32 %v1762_v39, %v1665_v37 }
 0x574   : > { %v2080_v63 = vmax.f32 %v2064_v58, 0.0  ;;  %v1765_v58 = vadd.f32 %v1764_v54, %v1667_v53 }
 0x576   : > { %v1670_v0 = vpop.f32.mrf.mxu0 }
 0x577   : > { %v1920_v57 = vpop.f32.mrf.mxu3 }
 0x578   : > { %v1953_v60 = vadd.f32 %v1920_v57, %v1745_v56 }
 0x57a   : > { %v2065_v62 = vadd.f32 %v2008_v61, %v1953_v60  ;;  %v2043_v60 = vpop.permute.xlu1 %2042  ;;  %v1767_v1 = vpop.f32.mrf.mxu1 }
 0x57b   : > { %v1768_v52 = vadd.f32 %v1767_v1, %v1670_v0 }
 0x57c   : > { %v2081_v16 = vmax.f32 %v2065_v62, 0.0  ;;  %v2048_v62 = vpop.permute.xlu2 %2047 }
 0x57e   : > { %v8006_v55 = vpack.c.bf16 %v2081_v16, %v2080_v63 }
 0x57f   : > { %v1923_v59 = vpop.f32.mrf.mxu3 }
 0x580   : > { %5856 = vmatmul.msk.bf16.gmra.mxu0 %vm2108_vm4, %v8006_v55  ;;  %5870 = vmatmul.msk.bf16.gmra.mxu1 %vm2108_vm4, %v8006_v55  ;;  %v1954_v25 = vadd.f32 %v1923_v59, %v1748_v30 }
 0x582   : > { %v2066_v43 = vadd.f32 %v2013_v29, %v1954_v25  ;;  %v1769_v3 = vpop.f32.mrf.mxu1 }
 0x584   : > { %v2082_v14 = vmax.f32 %v2066_v43, 0.0 }
 0x587   : > { %v1925_v4 = vpop.f32.mrf.mxu3 }
 0x588   : > { %v1955_v12 = vadd.f32 %v1925_v4, %v1750_v51  ;;  %v1672_v4 = vpop.f32.mrf.mxu0 }
 0x58a   : > { %v2067_v47 = vadd.f32 %v2018_v13, %v1955_v12  ;;  %v1770_v12 = vadd.f32 %v1769_v3, %v1672_v4  ;;  %v2053_v13 = vpop.permute.xlu0 %2052 }
 0x58c   : > { %v2083_v5 = vmax.f32 %v2067_v47, 0.0 }
 0x58e   : > { %v8012_v6 = vpack.c.bf16 %v2083_v5, %v2082_v14 }
 0x58f   : > { %v1928_v7 = vpop.f32.mrf.mxu3 }
 0x590   : > { %5857 = vmatmul.msk.bf16.gmra.mxu0 %vm2108_vm4, %v8012_v6  ;;  %5871 = vmatmul.msk.bf16.gmra.mxu1 %vm2108_vm4, %v8012_v6  ;;  %v1956_v11 = vadd.f32 %v1928_v7, %v1753_v15  ;;  %v2058_v7 = vpop.permute.xlu1 %2057 }
 0x592   : > { %v2068_v20 = vadd.f32 %v2023_v18, %v1956_v11 }
 0x594   : > { %v2084_v28 = vmax.f32 %v2068_v20, 0.0 }
 0x597   : > { %v1930_v19 = vpop.f32.mrf.mxu3 }
 0x598   : > { %v1957_v21 = vadd.f32 %v1930_v19, %v1755_v36 }
 0x59a   : > { %v2069_v10 = vadd.f32 %v2028_v23, %v1957_v21 }
 0x59c   : > { %v2085_v31 = vmax.f32 %v2069_v10, 0.0 }
 0x59e   : > { %v8018_v32 = vpack.c.bf16 %v2085_v31, %v2084_v28 }
 0x59f   : > { %v1933_v33 = vpop.f32.mrf.mxu3 }
 0x5a0   : > { %5858 = vmatmul.msk.bf16.gmra.mxu0 %vm2108_vm4, %v8018_v32  ;;  %5872 = vmatmul.msk.bf16.gmra.mxu1 %vm2108_vm4, %v8018_v32  ;;  %v1958_v35 = vadd.f32 %v1933_v33, %v1758_v34 }
 0x5a2   : > { %v2070_v44 = vadd.f32 %v2033_v41, %v1958_v35 }
 0x5a4   : > { %v2086_v50 = vmax.f32 %v2070_v44, 0.0 }
 0x5a7   : > { %v1935_v42 = vpop.f32.mrf.mxu3 }
 0x5a8   : > { %v1959_v45 = vadd.f32 %v1935_v42, %v1760_v40 }
 0x5aa   : > { %v2071_v48 = vadd.f32 %v2038_v46, %v1959_v45 }
 0x5ac   : > { %v2087_v9 = vmax.f32 %v2071_v48, 0.0 }
 0x5ae   : > { %v8027_v22 = vpack.c.bf16 %v2087_v9, %v2086_v50 }
 0x5af   : > { %v1938_v56 = vpop.f32.mrf.mxu3 }
 0x5b0   : > { %5859 = vmatmul.msk.bf16.gmra.mxu0 %vm2108_vm4, %v8027_v22  ;;  %5873 = vmatmul.msk.bf16.gmra.mxu1 %vm2108_vm4, %v8027_v22  ;;  %v1960_v57 = vadd.f32 %v1938_v56, %v1763_v2 }
 0x5b2   : > { %v2072_v63 = vadd.f32 %v2043_v60, %v1960_v57 }
 0x5b4   : > { %v2088_v30 = vmax.f32 %v2072_v63, 0.0 }
 0x5b7   : > { %v1940_v61 = vpop.f32.mrf.mxu3 }
 0x5b8   : > { %v1961_v16 = vadd.f32 %v1940_v61, %v1765_v58 }
 0x5ba   : > { %v2073_v59 = vadd.f32 %v2048_v62, %v1961_v16 }
 0x5bc   : > { %v2089_v25 = vmax.f32 %v2073_v59, 0.0 }
 0x5be   : > { %v2098_v29 = vpack.c.bf16 %v2089_v25, %v2088_v30 }
 0x5bf   : > { %v1943_v51 = vpop.f32.mrf.mxu3 }
 0x5c0   : > { %5860 = vmatmul.msk.bf16.gmra.mxu0 %vm2108_vm4, %v2098_v29  ;;  %5874 = vmatmul.msk.bf16.gmra.mxu1 %vm2108_vm4, %v2098_v29  ;;  %v1962_v43 = vadd.f32 %v1943_v51, %v1768_v52 }
 0x5c2   : > { %v2074_v14 = vadd.f32 %v2053_v13, %v1962_v43 }
 0x5c4   : > { %v2090_v8 = vmax.f32 %v2074_v14, 0.0 }
 0x5c7   : > { %v1945_v47 = vpop.f32.mrf.mxu3 }
 0x5c8   : > { %v1963_v5 = vadd.f32 %v1945_v47, %v1770_v12 }
 0x5ca   : > { %v2075_v15 = vadd.f32 %v2058_v7, %v1963_v5 }
 0x5cc   : > { %v2091_v17 = vmax.f32 %v2075_v15, 0.0 }
 0x5ce   : > { %v2099_v11 = vpack.c.bf16 %v2091_v17, %v2090_v8  ;;  %v6842_v8 = vld [vmem:[%s9064_s7 + $0x40] sm:$0xff] }
 0x5cf   : > { %v6833_v17 = vld [vmem:[%s9064_s7] sm:$0xff] }
 0x5d0   : > { %5861 = vmatmul.msk.bf16.gmra.mxu0 %vm2108_vm4, %v2099_v11  ;;  %5875 = vmatmul.msk.bf16.gmra.mxu1 %vm2108_vm4, %v2099_v11 }
 0x5dd   : > { %v8037_v36 = vpop.f32.mrf.mxu0  ;;  %v8039_v18 = vpop.f32.mrf.mxu1 }
 0x5e0   : > { %5962 = vmatmul.msk.bf16.vlgmr.msrb.gmra.mxu0 %vm2108_vm4, %v7994_v27 }
 0x5e5   : > { %v8043_v19 = vpop.f32.mrf.mxu0  ;;  %v8045_v20 = vpop.f32.mrf.mxu1 }
 0x5e6   : > { %v2198_v21 = vpack.c.bf16 %v8043_v19, %v8037_v36  ;;  %v2281_v52 = vpack.c.bf16 %v8045_v20, %v8039_v18  ;;  %v6843_v18 = vld [vmem:[%s9064_s7 + $0x48] sm:$0xff] }
 0x5e7   : > { %v6834_v19 = vld [vmem:[%s9064_s7 + $0x8] sm:$0xff] }
 0x5ed   : > { %v8049_v23 = vpop.f32.mrf.mxu0  ;;  %v8051_v10 = vpop.f32.mrf.mxu1 }
 0x5f0   : > { %5963 = vmatmul.msk.bf16.gmra.mxu0 %vm2108_vm4, %v8000_v49 }
 0x5f5   : > { %v2149_v24 = vpop.f32.mrf.mxu0  ;;  %v2231_v26 = vpop.f32.mrf.mxu1 }
 0x5f6   : > { %v2199_v28 = vpack.c.bf16 %v2149_v24, %v8049_v23  ;;  %v2282_v51 = vpack.c.bf16 %v2231_v26, %v8051_v10  ;;  %v6844_v26 = vld [vmem:[%s9064_s7 + $0x50] sm:$0xff] }
 0x5fd   : > { %v2152_v31 = vpop.f32.mrf.mxu0  ;;  %v2234_v27 = vpop.f32.mrf.mxu1 }
 0x600   : > { %5964 = vmatmul.msk.bf16.gmra.mxu0 %vm2108_vm4, %v8006_v55 }
 0x605   : > { %v2154_v33 = vpop.f32.mrf.mxu0  ;;  %v2236_v34 = vpop.f32.mrf.mxu1 }
 0x606   : > { %v2200_v35 = vpack.c.bf16 %v2154_v33, %v2152_v31  ;;  %v2283_v25 = vpack.c.bf16 %v2236_v34, %v2234_v27 }
 0x60d   : > { %v2157_v37 = vpop.f32.mrf.mxu0  ;;  %v2239_v38 = vpop.f32.mrf.mxu1 }
 0x610   : > { %5965 = vmatmul.msk.bf16.gmra.mxu0 %vm2108_vm4, %v8012_v6 }
 0x615   : > { %v2159_v39 = vpop.f32.mrf.mxu0  ;;  %v2241_v40 = vpop.f32.mrf.mxu1 }
 0x616   : > { %v2201_v49 = vpack.c.bf16 %v2159_v39, %v2157_v37  ;;  %v2284_v30 = vpack.c.bf16 %v2241_v40, %v2239_v38  ;;  %v6836_v37 = vld [vmem:[%s9064_s7 + $0x18] sm:$0xff]  ;;  %v6851_v38 = vld [vmem:[%s9064_s7 + $0x80] sm:$0xff] }
 0x617   : > { %v6846_v39 = vld [vmem:[%s9064_s7 + $0x60] sm:$0xff] }
 0x618   : > { %v6837_v40 = vld [vmem:[%s9064_s7 + $0x20] sm:$0xff] }
 0x61d   : > { %v2162_v41 = vpop.f32.mrf.mxu0  ;;  %v2244_v42 = vpop.f32.mrf.mxu1 }
 0x620   : > { %5966 = vmatmul.msk.bf16.gmra.mxu0 %vm2108_vm4, %v8018_v32 }
 0x625   : > { %v2164_v44 = vpop.f32.mrf.mxu0  ;;  %v2246_v45 = vpop.f32.mrf.mxu1 }
 0x626   : > { %v2202_v0 = vpack.c.bf16 %v2164_v44, %v2162_v41  ;;  %v2285_v1 = vpack.c.bf16 %v2246_v45, %v2244_v42  ;;  %v6847_v41 = vld [vmem:[%s9064_s7 + $0x68] sm:$0xff]  ;;  %v6853_v44 = vld [vmem:[%s9064_s7 + $0x90] sm:$0xff] }
 0x627   : > { %v6838_v42 = vld [vmem:[%s9064_s7 + $0x28] sm:$0xff]  ;;  %v6848_v45 = vld [vmem:[%s9064_s7 + $0x70] sm:$0xff] }
 0x62d   : > { %v2167_v46 = vpop.f32.mrf.mxu0  ;;  %v2249_v55 = vpop.f32.mrf.mxu1 }
 0x630   : > { %5967 = vmatmul.msk.bf16.gmra.mxu0 %vm2108_vm4, %v8027_v22 }
 0x635   : > { %v2169_v48 = vpop.f32.mrf.mxu0  ;;  %v2251_v50 = vpop.f32.mrf.mxu1 }
 0x636   : > { %v2203_v63 = vpack.c.bf16 %v2169_v48, %v2167_v46  ;;  %v2286_v16 = vpack.c.bf16 %v2251_v50, %v2249_v55  ;;  %v6839_v46 = vld [vmem:[%s9064_s7 + $0x30] sm:$0xff]  ;;  %v6854_v55 = vld [vmem:[%s9064_s7 + $0x98] sm:$0xff] }
 0x637   : > { %v6849_v48 = vld [vmem:[%s9064_s7 + $0x78] sm:$0xff] }
 0x638   : > { %v6840_v50 = vld [vmem:[%s9064_s7 + $0x38] sm:$0xff] }
 0x63d   : > { %v2172_v9 = vpop.f32.mrf.mxu0  ;;  %v2254_v53 = vpop.f32.mrf.mxu1 }
 0x640   : > { %5968 = vmatmul.msk.bf16.gmra.mxu0 %vm2108_vm4, %v2098_v29 }
 0x645   : > { %v2174_v6 = vpop.f32.mrf.mxu0  ;;  %v2256_v54 = vpop.f32.mrf.mxu1 }
 0x646   : > { %v2204_v61 = vpack.c.bf16 %v2174_v6, %v2172_v9  ;;  %v2287_v22 = vpack.c.bf16 %v2256_v54, %v2254_v53  ;;  %v6855_v9 = vld [vmem:[%s9064_s7 + $0xa0] sm:$0xff]  ;;  %v6860_v53 = vld [vmem:[%s9020_s11 + $0x8] sm:$0xff] }
 0x647   : > { %v6856_v6 = vld [vmem:[%s9064_s7 + $0xa8] sm:$0xff] }
 0x64d   : > { %v2177_v56 = vpop.f32.mrf.mxu0  ;;  %v2259_v2 = vpop.f32.mrf.mxu1 }
 0x650   : > { %5969 = vmatmul.msk.bf16.gmra.mxu0 %vm2108_vm4, %v2099_v11 }
 0x655   : > { %v2179_v32 = vpop.f32.mrf.mxu0  ;;  %v2261_v57 = vpop.f32.mrf.mxu1 }
 0x656   : > { %v2205_v58 = vpack.c.bf16 %v2179_v32, %v2177_v56  ;;  %v2288_v60 = vpack.c.bf16 %v2261_v57, %v2259_v2  ;;  %v6857_v2 = vld [vmem:[%s9064_s7 + $0xb0] sm:$0xff] }
 0x658   : > { %2337 = vmatpush.bf16.msrb.mxu2 %v2288_v60  ;;  %2434 = vmatpush.bf16.msrb.mxu3 %v2205_v58  ;;  %v6870_v58 = vld [vmem:[%s9020_s11 + $0x18] sm:$0xff]  ;;  %v6859_v60 = vld [vmem:[%s9020_s11] sm:$0xff] }
 0x65c   : > { %2338 = vmatpush.bf16.msrb.mxu2 %v2287_v22  ;;  %2435 = vmatpush.bf16.msrb.mxu3 %v2204_v61  ;;  %v6869_v61 = vld [vmem:[%s9020_s11 + $0x10] sm:$0xff]  ;;  %v6858_v22 = vld [vmem:[%s9064_s7 + $0xb8] sm:$0xff] }
 0x65d   : > { %v8066_v62 = vpop.f32.mrf.mxu0 }
 0x660   : > { %2339 = vmatpush.bf16.msrb.mxu2 %v2286_v16  ;;  %2436 = vmatpush.bf16.msrb.mxu3 %v2203_v63 }
 0x664   : > { %2340 = vmatpush.bf16.msrb.mxu2 %v2285_v1  ;;  %2437 = vmatpush.bf16.msrb.mxu3 %v2202_v0 }
 0x665   : > { %v2503_v59 = vpop.f32.mrf.mxu0 }
 0x666   : > { %v2558_v34 = vpack.c.bf16 %v2503_v59, %v8066_v62 }
 0x668   : > { %2341 = vmatpush.bf16.msrb.mxu2 %v2284_v30  ;;  %2438 = vmatpush.bf16.msrb.mxu3 %v2201_v49  ;;  %v6852_v49 = vld [vmem:[%s9064_s7 + $0x88] sm:$0xff] }
 0x66c   : > { %2342 = vmatpush.bf16.msrb.mxu2 %v2283_v25  ;;  %2439 = vmatpush.bf16.msrb.mxu3 %v2200_v35  ;;  %v6845_v35 = vld [vmem:[%s9064_s7 + $0x58] sm:$0xff] }
 0x66d   : > { %v2506_v29 = vpop.f32.mrf.mxu0 }
 0x670   : > { %2343 = vmatpush.bf16.msrb.mxu2 %v2282_v51  ;;  %2440 = vmatpush.bf16.msrb.mxu3 %v2199_v28  ;;  %v6835_v28 = vld [vmem:[%s9064_s7 + $0x10] sm:$0xff] }
 0x674   : > { %2344 = vmatpush.bf16.msrb.mxu2 %v2281_v52  ;;  %2441 = vmatpush.bf16.msrb.mxu3 %v2198_v21  ;;  %v2698_v52 = vpop.permute.xlu2 %2697 }
 0x675   : > { %v2508_v4 = vpop.f32.mrf.mxu0 }
 0x676   : > { %v2559_v33 = vpack.c.bf16 %v2508_v4, %v2506_v29 }
 0x677   : > { %2345 = vmatmul.bf16.vlgmr.msrb.gmra.mxu2 %v6842_v8  ;;  %2442 = vmatmul.bf16.vlgmr.msrb.gmra.mxu3 %v6833_v17 }
 0x678   : > { %2862 = vmatpush.bf16.msra.mxu2 %v6860_v53  ;;  %2952 = vmatpush.bf16.msra.mxu3 %v6870_v58 }
 0x67c   : > { %2863 = vmatpush.bf16.msra.mxu2 %v6859_v60  ;;  %2953 = vmatpush.bf16.msra.mxu3 %v6869_v61 }
 0x67d   : > { %v2511_v3 = vpop.f32.mrf.mxu0 }
 0x685   : > { %v2513_v43 = vpop.f32.mrf.mxu0 }
 0x686   : > { %v2560_v27 = vpack.c.bf16 %v2513_v43, %v2511_v3 }
 0x687   : > { %2350 = vmatmul.bf16.gmra.mxu2 %v6843_v18  ;;  %2447 = vmatmul.bf16.gmra.mxu3 %v6834_v19  ;;  %v2708_v18 = vpop.permute.xlu1 %2707 }
 0x68d   : > { %v2516_v12 = vpop.f32.mrf.mxu0 }
 0x695   : > { %v2518_v13 = vpop.f32.mrf.mxu0 }
 0x696   : > { %v2561_v31 = vpack.c.bf16 %v2518_v13, %v2516_v12  ;;  %v2703_v12 = vpop.permute.xlu0 %2702 }
 0x697   : > { %2355 = vmatmul.bf16.gmra.mxu2 %v6844_v26  ;;  %2452 = vmatmul.bf16.gmra.mxu3 %v6835_v28 }
 0x69d   : > { %v2521_v47 = vpop.f32.mrf.mxu0 }
 0x6a5   : > { %v2523_v14 = vpop.f32.mrf.mxu0 }
 0x6a6   : > { %v2562_v24 = vpack.c.bf16 %v2523_v14, %v2521_v47 }
 0x6a7   : > { %2360 = vmatmul.bf16.gmra.mxu2 %v6845_v35  ;;  %2457 = vmatmul.bf16.gmra.mxu3 %v6836_v37 }
 0x6ad   : > { %v2526_v5 = vpop.f32.mrf.mxu0 }
 0x6b5   : > { %v2528_v7 = vpop.f32.mrf.mxu0 }
 0x6b6   : > { %v2563_v10 = vpack.c.bf16 %v2528_v7, %v2526_v5 }
 0x6b7   : > { %2365 = vmatmul.bf16.gmra.mxu2 %v6846_v39  ;;  %2462 = vmatmul.bf16.gmra.mxu3 %v6837_v40  ;;  %v2718_v40 = vpop.permute.xlu0 %2717 }
 0x6bd   : > { %v2531_v15 = vpop.f32.mrf.mxu0 }
 0x6c5   : > { %v2533_v11 = vpop.f32.mrf.mxu0 }
 0x6c6   : > { %v2564_v23 = vpack.c.bf16 %v2533_v11, %v2531_v15 }
 0x6c7   : > { %2370 = vmatmul.bf16.gmra.mxu2 %v6847_v41  ;;  %2467 = vmatmul.bf16.gmra.mxu3 %v6838_v42 }
 0x6cd   : > { %v2536_v36 = vpop.f32.mrf.mxu0 }
 0x6d5   : > { %v2538_v20 = vpop.f32.mrf.mxu0 }
 0x6d6   : > { %v2565_v21 = vpack.c.bf16 %v2538_v20, %v2536_v36 }
 0x6d7   : > { %2375 = vmatmul.bf16.gmra.mxu2 %v6848_v45  ;;  %2472 = vmatmul.bf16.gmra.mxu3 %v6839_v46 }
 0x6d8   : > { %2614 = vmatpush.bf16.msrb.mxu1 %v2565_v21 }
 0x6dc   : > { %2615 = vmatpush.bf16.msrb.mxu1 %v2564_v23 }
 0x6e0   : > { %2616 = vmatpush.bf16.msrb.mxu1 %v2563_v10  ;;  %v2713_v10 = vpop.permute.xlu2 %2712 }
 0x6e4   : > { %2617 = vmatpush.bf16.msrb.mxu1 %v2562_v24 }
 0x6e7   : > { %2380 = vmatmul.bf16.gmra.mxu2 %v6849_v48  ;;  %2477 = vmatmul.bf16.gmra.mxu3 %v6840_v50 }
 0x6e8   : > { %2618 = vmatpush.bf16.msrb.mxu1 %v2561_v31 }
 0x6ec   : > { %2619 = vmatpush.bf16.msrb.mxu1 %v2560_v27 }
 0x6f0   : > { %2620 = vmatpush.bf16.msrb.mxu1 %v2559_v33 }
 0x6f4   : > { %2621 = vmatpush.bf16.msrb.mxu1 %v2558_v34 }
 0x6f7   : > { %2622 = vmatmul.bf16.vlgmr.msrb.gmra.mxu1 %v6851_v38 }
 0x6fa   : > { %v2346_v54 = vpop.f32.mrf.mxu2  ;;  %v2443_v56 = vpop.f32.mrf.mxu3 }
 0x6fb   : > { %v2444_v59 = vadd.f32 %v2443_v56, %v2346_v54  ;;  %v2728_v56 = vpop.permute.xlu2 %2727 }
 0x702   : > { %v2348_v32 = vpop.f32.mrf.mxu2  ;;  %v2445_v57 = vpop.f32.mrf.mxu3 }
 0x703   : > { %v2446_v51 = vadd.f32 %v2445_v57, %v2348_v32 }
 0x707   : > { %2627 = vmatmul.bf16.gmra.mxu1 %v6852_v49 }
 0x70a   : > { %v2351_v62 = vpop.f32.mrf.mxu2  ;;  %v2448_v63 = vpop.f32.mrf.mxu3 }
 0x70b   : > { %v2449_v17 = vadd.f32 %v2448_v63, %v2351_v62 }
 0x712   : > { %v2353_v16 = vpop.f32.mrf.mxu2  ;;  %v2450_v0 = vpop.f32.mrf.mxu3 }
 0x713   : > { %v2451_v36 = vadd.f32 %v2450_v0, %v2353_v16 }
 0x717   : > { %2632 = vmatmul.bf16.gmra.mxu1 %v6853_v44  ;;  %v2723_v44 = vpop.permute.xlu1 %2722 }
 0x71a   : > { %v2356_v25 = vpop.f32.mrf.mxu2  ;;  %v2453_v29 = vpop.f32.mrf.mxu3 }
 0x71b   : > { %v2454_v34 = vadd.f32 %v2453_v29, %v2356_v25 }
 0x722   : > { %v2358_v7 = vpop.f32.mrf.mxu2  ;;  %v2455_v8 = vpop.f32.mrf.mxu3 }
 0x723   : > { %v2456_v39 = vadd.f32 %v2455_v8, %v2358_v7 }
 0x727   : > { %2637 = vmatmul.bf16.gmra.mxu1 %v6854_v55 }
 0x72a   : > { %v2361_v23 = vpop.f32.mrf.mxu2  ;;  %v2458_v24 = vpop.f32.mrf.mxu3 }
 0x732   : > { %v2363_v35 = vpop.f32.mrf.mxu2  ;;  %v2460_v37 = vpop.f32.mrf.mxu3 }
 0x737   : > { %2642 = vmatmul.bf16.gmra.mxu1 %v6855_v9 }
 0x73a   : > { %v2366_v48 = vpop.f32.mrf.mxu2  ;;  %v2463_v50 = vpop.f32.mrf.mxu3 }
 0x742   : > { %v2368_v32 = vpop.f32.mrf.mxu2  ;;  %v2465_v58 = vpop.f32.mrf.mxu3 }
 0x747   : > { %2647 = vmatmul.bf16.gmra.mxu1 %v6856_v6  ;;  %v2459_v6 = vadd.f32 %v2458_v24, %v2361_v23 }
 0x74a   : > { %v2468_v25 = vpop.f32.mrf.mxu3 }
 0x757   : > { %2652 = vmatmul.bf16.gmra.mxu1 %v6857_v2  ;;  %v2461_v2 = vadd.f32 %v2460_v37, %v2363_v35 }
 0x767   : > { %2657 = vmatmul.bf16.gmra.mxu1 %v6858_v22  ;;  %v2733_v22 = vpop.permute.xlu0 %2732 }
 0x76f   : > { %v2748_v23 = vpop.permute.xlu0 %2747 }
 0x774   : > { %v2623_v1 = vpop.f32.mrf.mxu1 }
 0x775   : > { %v2663_v30 = vadd.f32 %v2623_v1, %v2444_v59  ;;  %v2464_v59 = vadd.f32 %v2463_v50, %v2366_v48 }
 0x777   : > { %v2775_v3 = vadd.f32 %v2698_v52, %v2663_v30  ;;  %v2371_v30 = vpop.f32.mrf.mxu2  ;;  %v2738_v52 = vpop.permute.xlu1 %2737 }
 0x779   : > { %v2791_v47 = vmax.f32 %v2775_v3, 0.0 }
 0x77c   : > { %v2625_v4 = vpop.f32.mrf.mxu1 }
 0x77d   : > { %v2664_v43 = vadd.f32 %v2625_v4, %v2446_v51  ;;  %v2466_v51 = vadd.f32 %v2465_v58, %v2368_v32 }
 0x77f   : > { %v2776_v13 = vadd.f32 %v2703_v12, %v2664_v43  ;;  %v2743_v12 = vpop.permute.xlu2 %2742 }
 0x781   : > { %v2792_v14 = vmax.f32 %v2776_v13, 0.0 }
 0x783   : > { %v8159_v5 = vpack.c.bf16 %v2792_v14, %v2791_v47  ;;  %v2373_v47 = vpop.f32.mrf.mxu2  ;;  %v2470_v14 = vpop.f32.mrf.mxu3 }
 0x784   : > { %v2628_v15 = vpop.f32.mrf.mxu1 }
 0x785   : > { %6026 = vmatmul.msk.bf16.vlgmr.msra.gmra.mxu2 %vm2831_vm5, %v8159_v5  ;;  %6046 = vmatmul.msk.bf16.vlgmr.msra.gmra.mxu3 %vm2831_vm5, %v8159_v5  ;;  %v2665_v11 = vadd.f32 %v2628_v15, %v2449_v17 }
 0x787   : > { %v2777_v20 = vadd.f32 %v2708_v18, %v2665_v11  ;;  %v2469_v11 = vadd.f32 %v2468_v25, %v2371_v30 }
 0x789   : > { %v2793_v28 = vmax.f32 %v2777_v20, 0.0 }
 0x78b   : > { %v2376_v18 = vpop.f32.mrf.mxu2  ;;  %v2473_v20 = vpop.f32.mrf.mxu3 }
 0x78c   : > { %v2630_v19 = vpop.f32.mrf.mxu1 }
 0x78d   : > { %v2666_v21 = vadd.f32 %v2630_v19, %v2451_v36  ;;  %v6880_v19 = vld [vmem:[%s9020_s11 + $0x28] sm:$0xff] }
 0x78e   : > { %3237 = vmatpush.bf16.msrb.mxu2 %v6880_v19 }
 0x78f   : > { %v2778_v26 = vadd.f32 %v2713_v10, %v2666_v21  ;;  %v2471_v21 = vadd.f32 %v2470_v14, %v2373_v47 }
 0x791   : > { %v2794_v31 = vmax.f32 %v2778_v26, 0.0 }
 0x793   : > { %v8165_v27 = vpack.c.bf16 %v2794_v31, %v2793_v28  ;;  %v2753_v28 = vpop.permute.xlu1 %2752  ;;  %v2378_v37 = vpop.f32.mrf.mxu2 }
 0x794   : > { %v2633_v33 = vpop.f32.mrf.mxu1 }
 0x795   : > { %6027 = vmatmul.msk.bf16.gmra.mxu2 %vm2831_vm5, %v8165_v27  ;;  %6047 = vmatmul.msk.bf16.gmra.mxu3 %vm2831_vm5, %v8165_v27  ;;  %v2667_v38 = vadd.f32 %v2633_v33, %v2454_v34 }
 0x797   : > { %v2779_v41 = vadd.f32 %v2718_v40, %v2667_v38  ;;  %v2475_v38 = vpop.f32.mrf.mxu3  ;;  %v2474_v40 = vadd.f32 %v2473_v20, %v2376_v18 }
 0x799   : > { %v2795_v46 = vmax.f32 %v2779_v41, 0.0 }
 0x79b   : > { %v2381_v50 = vpop.f32.mrf.mxu2 }
 0x79c   : > { %v2635_v49 = vpop.f32.mrf.mxu1 }
 0x79d   : > { %v2668_v42 = vadd.f32 %v2635_v49, %v2456_v39  ;;  %v6879_v49 = vld [vmem:[%s9020_s11 + $0x20] sm:$0xff] }
 0x79e   : > { %3238 = vmatpush.bf16.msrb.mxu2 %v6879_v49 }
 0x79f   : > { %v2780_v45 = vadd.f32 %v2723_v44, %v2668_v42  ;;  %v2476_v42 = vadd.f32 %v2475_v38, %v2378_v37  ;;  %v2758_v44 = vpop.permute.xlu2 %2757 }
 0x7a1   : > { %v2796_v55 = vmax.f32 %v2780_v45, 0.0 }
 0x7a3   : > { %v8171_v9 = vpack.c.bf16 %v2796_v55, %v2795_v46  ;;  %v2763_v46 = vpop.permute.xlu0 %2762  ;;  %v2383_v58 = vpop.f32.mrf.mxu2 }
 0x7a4   : > { %v2638_v53 = vpop.f32.mrf.mxu1 }
 0x7a5   : > { %6028 = vmatmul.msk.bf16.gmra.mxu2 %vm2831_vm5, %v8171_v9  ;;  %6048 = vmatmul.msk.bf16.gmra.mxu3 %vm2831_vm5, %v8171_v9  ;;  %v2669_v54 = vadd.f32 %v2638_v53, %v2459_v6  ;;  %v2478_v53 = vpop.f32.mrf.mxu3 }
 0x7a7   : > { %v2781_v60 = vadd.f32 %v2728_v56, %v2669_v54 }
 0x7a9   : > { %v2797_v63 = vmax.f32 %v2781_v60, 0.0 }
 0x7ac   : > { %v2640_v57 = vpop.f32.mrf.mxu1 }
 0x7ad   : > { %v2670_v61 = vadd.f32 %v2640_v57, %v2461_v2  ;;  %v2479_v57 = vadd.f32 %v2478_v53, %v2381_v50  ;;  %v2480_v60 = vpop.f32.mrf.mxu3 }
 0x7af   : > { %v2782_v62 = vadd.f32 %v2733_v22, %v2670_v61  ;;  %v2481_v22 = vadd.f32 %v2480_v60, %v2383_v58 }
 0x7b1   : > { %v2798_v16 = vmax.f32 %v2782_v62, 0.0  ;;  %v2768_v62 = vpop.permute.xlu1 %2767 }
 0x7b3   : > { %v8177_v0 = vpack.c.bf16 %v2798_v16, %v2797_v63 }
 0x7b4   : > { %v2643_v1 = vpop.f32.mrf.mxu1 }
 0x7b5   : > { %6029 = vmatmul.msk.bf16.gmra.mxu2 %vm2831_vm5, %v8177_v0  ;;  %6049 = vmatmul.msk.bf16.gmra.mxu3 %vm2831_vm5, %v8177_v0  ;;  %v2671_v29 = vadd.f32 %v2643_v1, %v2464_v59  ;;  %v2773_v59 = vpop.permute.xlu2 %2772 }
 0x7b7   : > { %v2783_v3 = vadd.f32 %v2738_v52, %v2671_v29 }
 0x7b9   : > { %v2799_v7 = vmax.f32 %v2783_v3, 0.0 }
 0x7bc   : > { %v2645_v4 = vpop.f32.mrf.mxu1 }
 0x7bd   : > { %v2672_v43 = vadd.f32 %v2645_v4, %v2466_v51 }
 0x7bf   : > { %v2784_v13 = vadd.f32 %v2743_v12, %v2672_v43 }
 0x7c1   : > { %v2800_v15 = vmax.f32 %v2784_v13, 0.0 }
 0x7c3   : > { %v8183_v8 = vpack.c.bf16 %v2800_v15, %v2799_v7 }
 0x7c4   : > { %v2648_v17 = vpop.f32.mrf.mxu1 }
 0x7c5   : > { %6030 = vmatmul.msk.bf16.gmra.mxu2 %vm2831_vm5, %v8183_v8  ;;  %6050 = vmatmul.msk.bf16.gmra.mxu3 %vm2831_vm5, %v8183_v8  ;;  %v2673_v36 = vadd.f32 %v2648_v17, %v2469_v11 }
 0x7c7   : > { %v2785_v24 = vadd.f32 %v2748_v23, %v2673_v36 }
 0x7c9   : > { %v2801_v33 = vmax.f32 %v2785_v24, 0.0 }
 0x7cc   : > { %v2650_v10 = vpop.f32.mrf.mxu1 }
 0x7cd   : > { %v2674_v26 = vadd.f32 %v2650_v10, %v2471_v21 }
 0x7cf   : > { %v2786_v31 = vadd.f32 %v2753_v28, %v2674_v26 }
 0x7d1   : > { %v2802_v34 = vmax.f32 %v2786_v31, 0.0 }
 0x7d3   : > { %v8192_v35 = vpack.c.bf16 %v2802_v34, %v2801_v33 }
 0x7d4   : > { %v2653_v39 = vpop.f32.mrf.mxu1 }
 0x7d5   : > { %6031 = vmatmul.msk.bf16.gmra.mxu2 %vm2831_vm5, %v8192_v35  ;;  %6051 = vmatmul.msk.bf16.gmra.mxu3 %vm2831_vm5, %v8192_v35  ;;  %v2675_v41 = vadd.f32 %v2653_v39, %v2474_v40 }
 0x7d7   : > { %v2787_v55 = vadd.f32 %v2758_v44, %v2675_v41 }
 0x7d9   : > { %v2803_v54 = vmax.f32 %v2787_v55, 0.0 }
 0x7dc   : > { %v2655_v45 = vpop.f32.mrf.mxu1 }
 0x7dd   : > { %v2676_v48 = vadd.f32 %v2655_v45, %v2476_v42 }
 0x7df   : > { %v2788_v6 = vadd.f32 %v2763_v46, %v2676_v48 }
 0x7e1   : > { %v2804_v56 = vmax.f32 %v2788_v6, 0.0 }
 0x7e3   : > { %v2813_v2 = vpack.c.bf16 %v2804_v56, %v2803_v54 }
 0x7e4   : > { %v2658_v32 = vpop.f32.mrf.mxu1 }
 0x7e5   : > { %6032 = vmatmul.msk.bf16.gmra.mxu2 %vm2831_vm5, %v2813_v2  ;;  %6052 = vmatmul.msk.bf16.gmra.mxu3 %vm2831_vm5, %v2813_v2  ;;  %v2677_v61 = vadd.f32 %v2658_v32, %v2479_v57 }
 0x7e7   : > { %v2789_v16 = vadd.f32 %v2768_v62, %v2677_v61 }
 0x7e9   : > { %v2805_v25 = vmax.f32 %v2789_v16, 0.0 }
 0x7ec   : > { %v2660_v63 = vpop.f32.mrf.mxu1 }
 0x7ed   : > { %v2678_v1 = vadd.f32 %v2660_v63, %v2481_v22 }
 0x7ef   : > { %v2790_v30 = vadd.f32 %v2773_v59, %v2678_v1 }
 0x7f1   : > { %v2806_v29 = vmax.f32 %v2790_v30, 0.0 }
 0x7f3   : > { %v2814_v51 = vpack.c.bf16 %v2806_v29, %v2805_v25 }
 0x7f5   : > { %6033 = vmatmul.msk.bf16.gmra.mxu2 %vm2831_vm5, %v2814_v51  ;;  %6053 = vmatmul.msk.bf16.gmra.mxu3 %vm2831_vm5, %v2814_v51 }
 0x805   : > { %6146 = vmatmul.msk.bf16.vlgmr.msrb.gmra.mxu2 %vm2831_vm5, %v8159_v5 }
 0x808   : > { %v8207_v52 = vpop.f32.mrf.mxu2  ;;  %v8209_v4 = vpop.f32.mrf.mxu3 }
 0x810   : > { %v8211_v3 = vpop.f32.mrf.mxu2  ;;  %v8213_v43 = vpop.f32.mrf.mxu3 }
 0x811   : > { %v2921_v12 = vpack.c.bf16 %v8211_v3, %v8207_v52  ;;  %v3012_v57 = vpack.c.bf16 %v8213_v43, %v8209_v4  ;;  %v6861_v52 = vld [vmem:[%s9019_s10] sm:$0xff] }
 0x815   : > { %6147 = vmatmul.msk.bf16.gmra.mxu2 %vm2831_vm5, %v8165_v27 }
 0x818   : > { %v8219_v13 = vpop.f32.mrf.mxu2  ;;  %v2960_v47 = vpop.f32.mrf.mxu3 }
 0x820   : > { %v2872_v14 = vpop.f32.mrf.mxu2  ;;  %v2962_v7 = vpop.f32.mrf.mxu3 }
 0x821   : > { %v2922_v5 = vpack.c.bf16 %v2872_v14, %v8219_v13  ;;  %v3013_v32 = vpack.c.bf16 %v2962_v7, %v2960_v47  ;;  %v6872_v13 = vld [vmem:[%s9019_s10 + $0x48] sm:$0xff] }
 0x822   : > { %v6862_v47 = vld [vmem:[%s9019_s10 + $0x8] sm:$0xff] }
 0x825   : > { %6148 = vmatmul.msk.bf16.gmra.mxu2 %vm2831_vm5, %v8171_v9 }
 0x828   : > { %v2875_v15 = vpop.f32.mrf.mxu2  ;;  %v2965_v17 = vpop.f32.mrf.mxu3 }
 0x830   : > { %v2877_v11 = vpop.f32.mrf.mxu2  ;;  %v2967_v36 = vpop.f32.mrf.mxu3 }
 0x831   : > { %v2923_v18 = vpack.c.bf16 %v2877_v11, %v2875_v15  ;;  %v3014_v56 = vpack.c.bf16 %v2967_v36, %v2965_v17  ;;  %v6873_v17 = vld [vmem:[%s9019_s10 + $0x50] sm:$0xff] }
 0x832   : > { %v6863_v11 = vld [vmem:[%s9019_s10 + $0x10] sm:$0xff] }
 0x835   : > { %6149 = vmatmul.msk.bf16.gmra.mxu2 %vm2831_vm5, %v8177_v0 }
 0x838   : > { %v2880_v19 = vpop.f32.mrf.mxu2  ;;  %v2970_v27 = vpop.f32.mrf.mxu3 }
 0x840   : > { %v2882_v20 = vpop.f32.mrf.mxu2  ;;  %v2972_v21 = vpop.f32.mrf.mxu3 }
 0x841   : > { %v2924_v23 = vpack.c.bf16 %v2882_v20, %v2880_v19  ;;  %v3015_v54 = vpack.c.bf16 %v2972_v21, %v2970_v27  ;;  %v6874_v19 = vld [vmem:[%s9019_s10 + $0x58] sm:$0xff]  ;;  %v6882_v20 = vld [vmem:[%s9019_s10 + $0x88] sm:$0xff]  ;;  %v6875_v21 = vld [vmem:[%s9019_s10 + $0x60] sm:$0xff] }
 0x842   : > { %v6864_v27 = vld [vmem:[%s9019_s10 + $0x18] sm:$0xff] }
 0x845   : > { %6150 = vmatmul.msk.bf16.gmra.mxu2 %vm2831_vm5, %v8183_v8 }
 0x848   : > { %v2885_v10 = vpop.f32.mrf.mxu2  ;;  %v2975_v24 = vpop.f32.mrf.mxu3 }
 0x850   : > { %v2887_v26 = vpop.f32.mrf.mxu2  ;;  %v2977_v9 = vpop.f32.mrf.mxu3 }
 0x851   : > { %v2925_v50 = vpack.c.bf16 %v2887_v26, %v2885_v10  ;;  %v3016_v53 = vpack.c.bf16 %v2977_v9, %v2975_v24  ;;  %v6883_v10 = vld [vmem:[%s9019_s10 + $0x90] sm:$0xff]  ;;  %v6876_v24 = vld [vmem:[%s9019_s10 + $0x68] sm:$0xff]  ;;  %v6884_v9 = vld [vmem:[%s9019_s10 + $0x98] sm:$0xff] }
 0x852   : > { %v6866_v26 = vld [vmem:[%s9019_s10 + $0x28] sm:$0xff] }
 0x855   : > { %6151 = vmatmul.msk.bf16.gmra.mxu2 %vm2831_vm5, %v8192_v35 }
 0x858   : > { %v2890_v28 = vpop.f32.mrf.mxu2  ;;  %v2980_v31 = vpop.f32.mrf.mxu3 }
 0x860   : > { %v2892_v33 = vpop.f32.mrf.mxu2  ;;  %v2982_v34 = vpop.f32.mrf.mxu3 }
 0x861   : > { %v2926_v55 = vpack.c.bf16 %v2892_v33, %v2890_v28  ;;  %v3017_v48 = vpack.c.bf16 %v2982_v34, %v2980_v31  ;;  %v6877_v28 = vld [vmem:[%s9019_s10 + $0x70] sm:$0xff]  ;;  %v6885_v33 = vld [vmem:[%s9019_s10 + $0xa0] sm:$0xff]  ;;  %v6878_v34 = vld [vmem:[%s9019_s10 + $0x78] sm:$0xff] }
 0x862   : > { %v6867_v31 = vld [vmem:[%s9019_s10 + $0x30] sm:$0xff] }
 0x865   : > { %6152 = vmatmul.msk.bf16.gmra.mxu2 %vm2831_vm5, %v2813_v2 }
 0x868   : > { %v2895_v0 = vpop.f32.mrf.mxu2  ;;  %v2985_v37 = vpop.f32.mrf.mxu3 }
 0x870   : > { %v2897_v38 = vpop.f32.mrf.mxu2  ;;  %v2987_v39 = vpop.f32.mrf.mxu3 }
 0x871   : > { %v2927_v35 = vpack.c.bf16 %v2897_v38, %v2895_v0  ;;  %v3018_v45 = vpack.c.bf16 %v2987_v39, %v2985_v37  ;;  %v6868_v0 = vld [vmem:[%s9019_s10 + $0x38] sm:$0xff]  ;;  %v6886_v37 = vld [vmem:[%s9019_s10 + $0xa8] sm:$0xff]  ;;  %v6887_v39 = vld [vmem:[%s9019_s10 + $0xb0] sm:$0xff] }
 0x872   : > { %v6904_v38 = vld [vmem:[%s9023_s14 + $0x38] sm:$0xff] }
 0x875   : > { %6153 = vmatmul.msk.bf16.gmra.mxu2 %vm2831_vm5, %v2814_v51  ;;  %v6871_v51 = vld [vmem:[%s9019_s10 + $0x40] sm:$0xff] }
 0x878   : > { %v2900_v8 = vpop.f32.mrf.mxu2  ;;  %v2990_v40 = vpop.f32.mrf.mxu3 }
 0x880   : > { %v2902_v49 = vpop.f32.mrf.mxu2  ;;  %v2992_v41 = vpop.f32.mrf.mxu3 }
 0x881   : > { %v2928_v42 = vpack.c.bf16 %v2902_v49, %v2900_v8  ;;  %v3019_v44 = vpack.c.bf16 %v2992_v41, %v2990_v40  ;;  %v6892_v49 = vld [vmem:[%s9023_s14 + $0x18] sm:$0xff]  ;;  %v6891_v41 = vld [vmem:[%s9023_s14 + $0x10] sm:$0xff] }
 0x883   : > { %3068 = vmatpush.bf16.msra.mxu0 %v3019_v44  ;;  %3165 = vmatpush.bf16.msra.mxu1 %v2928_v42  ;;  %v6903_v42 = vld [vmem:[%s9023_s14 + $0x30] sm:$0xff] }
 0x887   : > { %3069 = vmatpush.bf16.msra.mxu0 %v3018_v45  ;;  %3166 = vmatpush.bf16.msra.mxu1 %v2927_v35  ;;  %v6890_v45 = vld [vmem:[%s9023_s14 + $0x8] sm:$0xff] }
 0x888   : > { %v8232_v46 = vpop.f32.mrf.mxu2 }
 0x88b   : > { %3070 = vmatpush.bf16.msra.mxu0 %v3017_v48  ;;  %3167 = vmatpush.bf16.msra.mxu1 %v2926_v55  ;;  %v6888_v55 = vld [vmem:[%s9019_s10 + $0xb8] sm:$0xff]  ;;  %v6889_v48 = vld [vmem:[%s9023_s14] sm:$0xff] }
 0x88f   : > { %3071 = vmatpush.bf16.msra.mxu0 %v3016_v53  ;;  %3168 = vmatpush.bf16.msra.mxu1 %v2925_v50  ;;  %v6901_v50 = vld [vmem:[%s9023_s14 + $0x20] sm:$0xff] }
 0x890   : > { %v3242_v6 = vpop.f32.mrf.mxu2 }
 0x891   : > { %v3297_v36 = vpack.c.bf16 %v3242_v6, %v8232_v46  ;;  %v6902_v46 = vld [vmem:[%s9023_s14 + $0x28] sm:$0xff] }
 0x893   : > { %3072 = vmatpush.bf16.msra.mxu0 %v3015_v54  ;;  %3169 = vmatpush.bf16.msra.mxu1 %v2924_v23  ;;  %v6865_v23 = vld [vmem:[%s9019_s10 + $0x20] sm:$0xff] }
 0x897   : > { %3073 = vmatpush.bf16.msra.mxu0 %v3014_v56  ;;  %3170 = vmatpush.bf16.msra.mxu1 %v2923_v18  ;;  %v6881_v18 = vld [vmem:[%s9019_s10 + $0x80] sm:$0xff] }
 0x898   : > { %v3245_v2 = vpop.f32.mrf.mxu2 }
 0x89b   : > { %3074 = vmatpush.bf16.msra.mxu0 %v3013_v32  ;;  %3171 = vmatpush.bf16.msra.mxu1 %v2922_v5 }
 0x89f   : > { %3075 = vmatpush.bf16.msra.mxu0 %v3012_v57  ;;  %3172 = vmatpush.bf16.msra.mxu1 %v2921_v12 }
 0x8a0   : > { %v3247_v58 = vpop.f32.mrf.mxu2 }
 0x8a1   : > { %v3298_v15 = vpack.c.bf16 %v3247_v58, %v3245_v2 }
 0x8a2   : > { %3076 = vmatmul.bf16.vlgmr.msra.gmra.mxu0 %v6871_v51  ;;  %3173 = vmatmul.bf16.vlgmr.msra.gmra.mxu1 %v6861_v52 }
 0x8a3   : > { %3721 = vmatpush.bf16.msrb.mxu1 %v6904_v38  ;;  %3615 = vmatpush.bf16.msrb.mxu0 %v6892_v49 }
 0x8a7   : > { %3616 = vmatpush.bf16.msrb.mxu0 %v6891_v41  ;;  %3722 = vmatpush.bf16.msrb.mxu1 %v6903_v42 }
 0x8a8   : > { %v3250_v60 = vpop.f32.mrf.mxu2 }
 0x8ab   : > { %3617 = vmatpush.bf16.msrb.mxu0 %v6890_v45  ;;  %3723 = vmatpush.bf16.msrb.mxu1 %v6902_v46 }
 0x8af   : > { %3618 = vmatpush.bf16.msrb.mxu0 %v6889_v48  ;;  %3724 = vmatpush.bf16.msrb.mxu1 %v6901_v50 }
 0x8b0   : > { %v3252_v61 = vpop.f32.mrf.mxu2 }
 0x8b1   : > { %v3299_v5 = vpack.c.bf16 %v3252_v61, %v3250_v60 }
 0x8b2   : > { %3081 = vmatmul.bf16.gmra.mxu0 %v6872_v13  ;;  %3178 = vmatmul.bf16.gmra.mxu1 %v6862_v47  ;;  %v3447_v13 = vpop.permute.xlu2 %3446 }
 0x8b8   : > { %v3255_v22 = vpop.f32.mrf.mxu2 }
 0x8c0   : > { %v3257_v62 = vpop.f32.mrf.mxu2 }
 0x8c1   : > { %v3300_v7 = vpack.c.bf16 %v3257_v62, %v3255_v22  ;;  %v3437_v22 = vpop.permute.xlu0 %3436 }
 0x8c2   : > { %3086 = vmatmul.bf16.gmra.mxu0 %v6873_v17  ;;  %3183 = vmatmul.bf16.gmra.mxu1 %v6863_v11 }
 0x8c8   : > { %v3260_v63 = vpop.f32.mrf.mxu2 }
 0x8d0   : > { %v3262_v16 = vpop.f32.mrf.mxu2 }
 0x8d1   : > { %v3301_v14 = vpack.c.bf16 %v3262_v16, %v3260_v63 }
 0x8d2   : > { %3091 = vmatmul.bf16.gmra.mxu0 %v6874_v19  ;;  %3188 = vmatmul.bf16.gmra.mxu1 %v6864_v27 }
 0x8d8   : > { %v3265_v1 = vpop.f32.mrf.mxu2 }
 0x8e0   : > { %v3267_v59 = vpop.f32.mrf.mxu2 }
 0x8e1   : > { %v3302_v12 = vpack.c.bf16 %v3267_v59, %v3265_v1  ;;  %v3442_v1 = vpop.permute.xlu1 %3441 }
 0x8e2   : > { %3096 = vmatmul.bf16.gmra.mxu0 %v6875_v21  ;;  %3193 = vmatmul.bf16.gmra.mxu1 %v6865_v23 }
 0x8e8   : > { %v3270_v30 = vpop.f32.mrf.mxu2 }
 0x8f0   : > { %v3272_v25 = vpop.f32.mrf.mxu2 }
 0x8f1   : > { %v3303_v43 = vpack.c.bf16 %v3272_v25, %v3270_v30 }
 0x8f2   : > { %3101 = vmatmul.bf16.gmra.mxu0 %v6876_v24  ;;  %3198 = vmatmul.bf16.gmra.mxu1 %v6866_v26  ;;  %v3457_v26 = vpop.permute.xlu1 %3456 }
 0x8f8   : > { %v3275_v29 = vpop.f32.mrf.mxu2 }
 0x8fa   : > { %v3472_v50 = vpop.permute.xlu1 %3471 }
 0x900   : > { %v3277_v4 = vpop.f32.mrf.mxu2 }
 0x901   : > { %v3304_v3 = vpack.c.bf16 %v3277_v4, %v3275_v29 }
 0x902   : > { %3106 = vmatmul.bf16.gmra.mxu0 %v6877_v28  ;;  %3203 = vmatmul.bf16.gmra.mxu1 %v6867_v31 }
 0x903   : > { %3353 = vmatpush.bf16.msrb.mxu3 %v3304_v3 }
 0x907   : > { %3354 = vmatpush.bf16.msrb.mxu3 %v3303_v43 }
 0x90b   : > { %3355 = vmatpush.bf16.msrb.mxu3 %v3302_v12 }
 0x90f   : > { %3356 = vmatpush.bf16.msrb.mxu3 %v3301_v14 }
 0x912   : > { %3111 = vmatmul.bf16.gmra.mxu0 %v6878_v34  ;;  %3208 = vmatmul.bf16.gmra.mxu1 %v6868_v0 }
 0x913   : > { %3357 = vmatpush.bf16.msrb.mxu3 %v3300_v7 }
 0x917   : > { %3358 = vmatpush.bf16.msrb.mxu3 %v3299_v5 }
 0x91b   : > { %3359 = vmatpush.bf16.msrb.mxu3 %v3298_v15  ;;  %v3452_v15 = vpop.permute.xlu0 %3451 }
 0x91f   : > { %3360 = vmatpush.bf16.msrb.mxu3 %v3297_v36  ;;  %v3077_v8 = vpop.f32.mrf.mxu0  ;;  %v3174_v40 = vpop.f32.mrf.mxu1 }
 0x920   : > { %v3175_v32 = vadd.f32 %v3174_v40, %v3077_v8 }
 0x922   : > { %3361 = vmatmul.bf16.vlgmr.msrb.gmra.mxu3 %v6881_v18 }
 0x923   : > { %v3467_v42 = vpop.permute.xlu0 %3466 }
 0x927   : > { %v3079_v44 = vpop.f32.mrf.mxu0  ;;  %v3176_v35 = vpop.f32.mrf.mxu1 }
 0x928   : > { %v3177_v61 = vadd.f32 %v3176_v35, %v3079_v44 }
 0x92f   : > { %v3082_v53 = vpop.f32.mrf.mxu0  ;;  %v3179_v6 = vpop.f32.mrf.mxu1 }
 0x930   : > { %v3180_v3 = vadd.f32 %v3179_v6, %v3082_v53 }
 0x932   : > { %3366 = vmatmul.bf16.gmra.mxu3 %v6882_v20 }
 0x937   : > { %v3084_v54 = vpop.f32.mrf.mxu0  ;;  %v3181_v56 = vpop.f32.mrf.mxu1 }
 0x938   : > { %v3182_v12 = vadd.f32 %v3181_v56, %v3084_v54 }
 0x93f   : > { %v3087_v58 = vpop.f32.mrf.mxu0  ;;  %v3184_v60 = vpop.f32.mrf.mxu1 }
 0x940   : > { %v3185_v20 = vadd.f32 %v3184_v60, %v3087_v58 }
 0x942   : > { %3371 = vmatmul.bf16.gmra.mxu3 %v6883_v10 }
 0x947   : > { %v3089_v51 = vpop.f32.mrf.mxu0  ;;  %v3186_v4 = vpop.f32.mrf.mxu1 }
 0x948   : > { %v3187_v24 = vadd.f32 %v3186_v4, %v3089_v51 }
 0x94f   : > { %v3092_v5 = vpop.f32.mrf.mxu0  ;;  %v3189_v17 = vpop.f32.mrf.mxu1 }
 0x950   : > { %v3190_v49 = vadd.f32 %v3189_v17, %v3092_v5 }
 0x952   : > { %3376 = vmatmul.bf16.gmra.mxu3 %v6884_v9 }
 0x957   : > { %v3094_v21 = vpop.f32.mrf.mxu0  ;;  %v3191_v23 = vpop.f32.mrf.mxu1 }
 0x958   : > { %v3192_v44 = vadd.f32 %v3191_v23, %v3094_v21 }
 0x95f   : > { %v3097_v38 = vpop.f32.mrf.mxu0 }
 0x962   : > { %3381 = vmatmul.bf16.gmra.mxu3 %v6885_v33  ;;  %v3462_v33 = vpop.permute.xlu2 %3461 }
 0x967   : > { %v3099_v35 = vpop.f32.mrf.mxu0 }
 0x972   : > { %3386 = vmatmul.bf16.gmra.mxu3 %v6886_v37 }
 0x982   : > { %3391 = vmatmul.bf16.gmra.mxu3 %v6887_v39  ;;  %v3194_v39 = vpop.f32.mrf.mxu1 }
 0x98a   : > { %v3196_v46 = vpop.f32.mrf.mxu1 }
 0x992   : > { %3396 = vmatmul.bf16.gmra.mxu3 %v6888_v55  ;;  %v3199_v58 = vpop.f32.mrf.mxu1 }
 0x9a5   : > { %v3362_v2 = vpop.f32.mrf.mxu3 }
 0x9a6   : > { %v3402_v57 = vadd.f32 %v3362_v2, %v3175_v32  ;;  %v3195_v32 = vadd.f32 %v3194_v39, %v3097_v38 }
 0x9a8   : > { %v3514_v63 = vadd.f32 %v3437_v22, %v3402_v57  ;;  %v3102_v57 = vpop.f32.mrf.mxu0  ;;  %v3477_v22 = vpop.permute.xlu2 %3476 }
 0x9aa   : > { %v3530_v30 = vmax.f32 %v3514_v63, 0.0 }
 0x9ad   : > { %v3364_v62 = vpop.f32.mrf.mxu3 }
 0x9ae   : > { %v3403_v16 = vadd.f32 %v3364_v62, %v3177_v61  ;;  %v3197_v61 = vadd.f32 %v3196_v46, %v3099_v35 }
 0x9b0   : > { %v3515_v59 = vadd.f32 %v3442_v1, %v3403_v16  ;;  %v3482_v1 = vpop.permute.xlu0 %3481 }
 0x9b2   : > { %v3531_v25 = vmax.f32 %v3515_v59, 0.0 }
 0x9b4   : > { %v8336_v29 = vpack.c.bf16 %v3531_v25, %v3530_v30  ;;  %v3104_v30 = vpop.f32.mrf.mxu0  ;;  %v3201_v25 = vpop.f32.mrf.mxu1 }
 0x9b5   : > { %v3367_v52 = vpop.f32.mrf.mxu3 }
 0x9b6   : > { %6218 = vmatmul.msk.bf16.vlgmr.msrb.gmra.mxu0 %vm3586_vm6, %v8336_v29  ;;  %6250 = vmatmul.msk.bf16.vlgmr.msrb.gmra.mxu1 %vm3586_vm6, %v8336_v29  ;;  %v3404_v43 = vadd.f32 %v3367_v52, %v3180_v3 }
 0x9b8   : > { %v3516_v14 = vadd.f32 %v3447_v13, %v3404_v43  ;;  %v3200_v43 = vadd.f32 %v3199_v58, %v3102_v57 }
 0x9ba   : > { %v3532_v36 = vmax.f32 %v3516_v14, 0.0  ;;  %v3202_v14 = vadd.f32 %v3201_v25, %v3104_v30 }
 0x9bc   : > { %v3107_v13 = vpop.f32.mrf.mxu0 }
 0x9bd   : > { %v3369_v47 = vpop.f32.mrf.mxu3 }
 0x9be   : > { %v3405_v7 = vadd.f32 %v3369_v47, %v3182_v12  ;;  %v3204_v47 = vpop.f32.mrf.mxu1 }
 0x9c0   : > { %v3517_v11 = vadd.f32 %v3452_v15, %v3405_v7  ;;  %v3487_v7 = vpop.permute.xlu1 %3486 }
 0x9c2   : > { %v3533_v18 = vmax.f32 %v3517_v11, 0.0  ;;  %v3492_v11 = vpop.permute.xlu2 %3491 }
 0x9c4   : > { %v8342_v19 = vpack.c.bf16 %v3533_v18, %v3532_v36  ;;  %v3109_v21 = vpop.f32.mrf.mxu0 }
 0x9c5   : > { %v3372_v27 = vpop.f32.mrf.mxu3 }
 0x9c6   : > { %6219 = vmatmul.msk.bf16.gmra.mxu0 %vm3586_vm6, %v8342_v19  ;;  %6251 = vmatmul.msk.bf16.gmra.mxu1 %vm3586_vm6, %v8342_v19  ;;  %v3406_v10 = vadd.f32 %v3372_v27, %v3185_v20  ;;  %v3206_v23 = vpop.f32.mrf.mxu1 }
 0x9c8   : > { %v3518_v28 = vadd.f32 %v3457_v26, %v3406_v10  ;;  %v3205_v26 = vadd.f32 %v3204_v47, %v3107_v13 }
 0x9ca   : > { %v3534_v0 = vmax.f32 %v3518_v28, 0.0 }
 0x9cd   : > { %v3374_v9 = vpop.f32.mrf.mxu3 }
 0x9ce   : > { %v3407_v31 = vadd.f32 %v3374_v9, %v3187_v24  ;;  %v6916_v24 = vld [vmem:[%s9023_s14 + $0x58] sm:$0xff]  ;;  %v6915_v9 = vld [vmem:[%s9023_s14 + $0x50] sm:$0xff] }
 0x9cf   : > { %4022 = vmatpush.bf16.msra.mxu0 %v6916_v24 }
 0x9d0   : > { %v3519_v34 = vadd.f32 %v3462_v33, %v3407_v31  ;;  %v6914_v31 = vld [vmem:[%s9023_s14 + $0x48] sm:$0xff]  ;;  %v3207_v33 = vadd.f32 %v3206_v23, %v3109_v21 }
 0x9d2   : > { %v3535_v37 = vmax.f32 %v3519_v34, 0.0  ;;  %v3497_v34 = vpop.permute.xlu0 %3496 }
 0x9d3   : > { %4023 = vmatpush.bf16.msra.mxu0 %v6915_v9  ;;  %v6939_v9 = vld [vmem:[%s9023_s14 + $0x90] sm:$0xff] }
 0x9d4   : > { %v8348_v8 = vpack.c.bf16 %v3535_v37, %v3534_v0  ;;  %v3502_v37 = vpop.permute.xlu1 %3501 }
 0x9d5   : > { %v3377_v40 = vpop.f32.mrf.mxu3 }
 0x9d6   : > { %6220 = vmatmul.msk.bf16.gmra.mxu0 %vm3586_vm6, %v8348_v8  ;;  %6252 = vmatmul.msk.bf16.gmra.mxu1 %vm3586_vm6, %v8348_v8  ;;  %v3408_v41 = vadd.f32 %v3377_v40, %v3190_v49  ;;  %v3112_v40 = vpop.f32.mrf.mxu0  ;;  %v3209_v49 = vpop.f32.mrf.mxu1 }
 0x9d7   : > { %4024 = vmatpush.bf16.msra.mxu0 %v6914_v31 }
 0x9d8   : > { %v3520_v55 = vadd.f32 %v3467_v42, %v3408_v41  ;;  %v6913_v42 = vld [vmem:[%s9023_s14 + $0x40] sm:$0xff] }
 0x9da   : > { %v3536_v6 = vmax.f32 %v3520_v55, 0.0  ;;  %v3210_v55 = vadd.f32 %v3209_v49, %v3112_v40  ;;  %v3512_v58 = vpop.permute.xlu0 %3511 }
 0x9db   : > { %4025 = vmatpush.bf16.msra.mxu0 %v6913_v42 }
 0x9dd   : > { %v3379_v45 = vpop.f32.mrf.mxu3 }
 0x9de   : > { %v3409_v48 = vadd.f32 %v3379_v45, %v3192_v44 }
 0x9e0   : > { %v3521_v53 = vadd.f32 %v3472_v50, %v3409_v48  ;;  %v3114_v48 = vpop.f32.mrf.mxu0  ;;  %v3211_v50 = vpop.f32.mrf.mxu1 }
 0x9e2   : > { %v3537_v54 = vmax.f32 %v3521_v53, 0.0 }
 0x9e4   : > { %v8354_v56 = vpack.c.bf16 %v3537_v54, %v3536_v6  ;;  %v3212_v6 = vadd.f32 %v3211_v50, %v3114_v48  ;;  %v3507_v54 = vpop.permute.xlu2 %3506 }
 0x9e5   : > { %v3382_v2 = vpop.f32.mrf.mxu3 }
 0x9e6   : > { %6221 = vmatmul.msk.bf16.gmra.mxu0 %vm3586_vm6, %v8354_v56  ;;  %6253 = vmatmul.msk.bf16.gmra.mxu1 %vm3586_vm6, %v8354_v56  ;;  %v3410_v60 = vadd.f32 %v3382_v2, %v3195_v32 }
 0x9e8   : > { %v3522_v63 = vadd.f32 %v3477_v22, %v3410_v60 }
 0x9ea   : > { %v3538_v51 = vmax.f32 %v3522_v63, 0.0 }
 0x9ed   : > { %v3384_v62 = vpop.f32.mrf.mxu3 }
 0x9ee   : > { %v3411_v16 = vadd.f32 %v3384_v62, %v3197_v61 }
 0x9f0   : > { %v3523_v59 = vadd.f32 %v3482_v1, %v3411_v16 }
 0x9f2   : > { %v3539_v52 = vmax.f32 %v3523_v59, 0.0 }
 0x9f4   : > { %v8360_v4 = vpack.c.bf16 %v3539_v52, %v3538_v51 }
 0x9f5   : > { %v3387_v3 = vpop.f32.mrf.mxu3 }
 0x9f6   : > { %6222 = vmatmul.msk.bf16.gmra.mxu0 %vm3586_vm6, %v8360_v4  ;;  %6254 = vmatmul.msk.bf16.gmra.mxu1 %vm3586_vm6, %v8360_v4  ;;  %v3412_v12 = vadd.f32 %v3387_v3, %v3200_v43 }
 0x9f8   : > { %v3524_v15 = vadd.f32 %v3487_v7, %v3412_v12 }
 0x9fa   : > { %v3540_v18 = vmax.f32 %v3524_v15, 0.0 }
 0x9fd   : > { %v3389_v5 = vpop.f32.mrf.mxu3 }
 0x9fe   : > { %v3413_v17 = vadd.f32 %v3389_v5, %v3202_v14 }
 0xa00   : > { %v3525_v36 = vadd.f32 %v3492_v11, %v3413_v17 }
 0xa02   : > { %v3541_v27 = vmax.f32 %v3525_v36, 0.0 }
 0xa04   : > { %v8366_v20 = vpack.c.bf16 %v3541_v27, %v3540_v18 }
 0xa05   : > { %v3392_v10 = vpop.f32.mrf.mxu3 }
 0xa06   : > { %6223 = vmatmul.msk.bf16.gmra.mxu0 %vm3586_vm6, %v8366_v20  ;;  %6255 = vmatmul.msk.bf16.gmra.mxu1 %vm3586_vm6, %v8366_v20  ;;  %v3414_v28 = vadd.f32 %v3392_v10, %v3205_v26  ;;  %v6940_v26 = vld [vmem:[%s9023_s14 + $0x98] sm:$0xff] }
 0xa07   : > { %4462 = vmatpush.bf16.msrb.mxu0 %v6940_v26 }
 0xa08   : > { %v3526_v38 = vadd.f32 %v3497_v34, %v3414_v28  ;;  %v6937_v34 = vld [vmem:[%s9023_s14 + $0x80] sm:$0xff] }
 0xa0a   : > { %v3542_v44 = vmax.f32 %v3526_v38, 0.0 }
 0xa0b   : > { %4463 = vmatpush.bf16.msrb.mxu0 %v6939_v9  ;;  %v6927_v9 = vld [vmem:[%s9023_s14 + $0x70] sm:$0xff] }
 0xa0d   : > { %v3394_v0 = vpop.f32.mrf.mxu3 }
 0xa0e   : > { %v3415_v39 = vadd.f32 %v3394_v0, %v3207_v33  ;;  %v6938_v33 = vld [vmem:[%s9023_s14 + $0x88] sm:$0xff] }
 0xa0f   : > { %4464 = vmatpush.bf16.msrb.mxu0 %v6938_v33  ;;  %v6911_v33 = vld [vmem:[%s9022_s13 + $0x70] sm:$0xff] }
 0xa10   : > { %v3527_v41 = vadd.f32 %v3502_v37, %v3415_v39 }
 0xa12   : > { %v3543_v35 = vmax.f32 %v3527_v41, 0.0 }
 0xa13   : > { %4465 = vmatpush.bf16.msrb.mxu0 %v6937_v34  ;;  %v6899_v34 = vld [vmem:[%s9022_s13 + $0x30] sm:$0xff] }
 0xa14   : > { %v8384_v45 = vpack.c.bf16 %v3543_v35, %v3542_v44 }
 0xa15   : > { %v3397_v46 = vpop.f32.mrf.mxu3 }
 0xa16   : > { %6224 = vmatmul.msk.bf16.gmra.mxu0 %vm3586_vm6, %v8384_v45  ;;  %6256 = vmatmul.msk.bf16.gmra.mxu1 %vm3586_vm6, %v8384_v45  ;;  %v3416_v53 = vadd.f32 %v3397_v46, %v3210_v55 }
 0xa18   : > { %v3528_v32 = vadd.f32 %v3507_v54, %v3416_v53 }
 0xa1a   : > { %v3544_v61 = vmax.f32 %v3528_v32, 0.0 }
 0xa1d   : > { %v3399_v2 = vpop.f32.mrf.mxu3 }
 0xa1e   : > { %v3417_v57 = vadd.f32 %v3399_v2, %v3212_v6 }
 0xa20   : > { %v3529_v60 = vadd.f32 %v3512_v58, %v3417_v57 }
 0xa22   : > { %v3545_v22 = vmax.f32 %v3529_v60, 0.0 }
 0xa24   : > { %v8390_v62 = vpack.c.bf16 %v3545_v22, %v3544_v61 }
 0xa26   : > { %6225 = vmatmul.msk.bf16.gmra.mxu0 %vm3586_vm6, %v8390_v62  ;;  %6257 = vmatmul.msk.bf16.gmra.mxu1 %vm3586_vm6, %v8390_v62 }
 0xa33   : > { %v8396_v63 = vpop.f32.mrf.mxu0  ;;  %v8398_v16 = vpop.f32.mrf.mxu1 }
 0xa36   : > { %6362 = vmatmul.msk.bf16.vlgmr.msra.gmra.mxu0 %vm3586_vm6, %v8336_v29 }
 0xa3b   : > { %v8402_v1 = vpop.f32.mrf.mxu0  ;;  %v8404_v59 = vpop.f32.mrf.mxu1 }
 0xa3c   : > { %v3676_v30 = vpack.c.bf16 %v8402_v1, %v8396_v63  ;;  %v3783_v22 = vpack.c.bf16 %v8404_v59, %v8398_v16  ;;  %v6906_v59 = vld [vmem:[%s9022_s13 + $0x48] sm:$0xff] }
 0xa3d   : > { %v6894_v63 = vld [vmem:[%s9022_s13 + $0x8] sm:$0xff] }
 0xa43   : > { %v8408_v25 = vpop.f32.mrf.mxu0  ;;  %v8410_v51 = vpop.f32.mrf.mxu1 }
 0xa46   : > { %6363 = vmatmul.msk.bf16.gmra.mxu0 %vm3586_vm6, %v8342_v19 }
 0xa4b   : > { %v8414_v52 = vpop.f32.mrf.mxu0  ;;  %v8416_v3 = vpop.f32.mrf.mxu1 }
 0xa4c   : > { %v3677_v43 = vpack.c.bf16 %v8414_v52, %v8408_v25  ;;  %v3784_v61 = vpack.c.bf16 %v8416_v3, %v8410_v51  ;;  %v6907_v3 = vld [vmem:[%s9022_s13 + $0x50] sm:$0xff] }
 0xa53   : > { %v8420_v12 = vpop.f32.mrf.mxu0  ;;  %v8422_v13 = vpop.f32.mrf.mxu1 }
 0xa56   : > { %6364 = vmatmul.msk.bf16.gmra.mxu0 %vm3586_vm6, %v8348_v8 }
 0xa5b   : > { %v3632_v47 = vpop.f32.mrf.mxu0  ;;  %v3738_v14 = vpop.f32.mrf.mxu1 }
 0xa5c   : > { %v3678_v7 = vpack.c.bf16 %v3632_v47, %v8420_v12  ;;  %v3785_v58 = vpack.c.bf16 %v3738_v14, %v8422_v13  ;;  %v6905_v12 = vld [vmem:[%s9022_s13 + $0x40] sm:$0xff] }
 0xa5d   : > { %v6893_v13 = vld [vmem:[%s9022_s13] sm:$0xff] }
 0xa63   : > { %v3635_v5 = vpop.f32.mrf.mxu0  ;;  %v3741_v15 = vpop.f32.mrf.mxu1 }
 0xa66   : > { %6365 = vmatmul.msk.bf16.gmra.mxu0 %vm3586_vm6, %v8354_v56 }
 0xa6b   : > { %v3637_v17 = vpop.f32.mrf.mxu0  ;;  %v3743_v11 = vpop.f32.mrf.mxu1 }
 0xa6c   : > { %v3679_v36 = vpack.c.bf16 %v3637_v17, %v3635_v5  ;;  %v3786_v32 = vpack.c.bf16 %v3743_v11, %v3741_v15  ;;  %v6908_v5 = vld [vmem:[%s9022_s13 + $0x58] sm:$0xff] }
 0xa6d   : > { %v6896_v15 = vld [vmem:[%s9022_s13 + $0x18] sm:$0xff] }
 0xa73   : > { %v3640_v18 = vpop.f32.mrf.mxu0  ;;  %v3746_v27 = vpop.f32.mrf.mxu1 }
 0xa76   : > { %6366 = vmatmul.msk.bf16.gmra.mxu0 %vm3586_vm6, %v8360_v4 }
 0xa7b   : > { %v3642_v21 = vpop.f32.mrf.mxu0  ;;  %v3748_v23 = vpop.f32.mrf.mxu1 }
 0xa7c   : > { %v3680_v6 = vpack.c.bf16 %v3642_v21, %v3640_v18  ;;  %v3787_v54 = vpack.c.bf16 %v3748_v23, %v3746_v27  ;;  %v6897_v18 = vld [vmem:[%s9022_s13 + $0x20] sm:$0xff]  ;;  %v6928_v21 = vld [vmem:[%s9023_s14 + $0x78] sm:$0xff] }
 0xa83   : > { %v3645_v10 = vpop.f32.mrf.mxu0  ;;  %v3751_v24 = vpop.f32.mrf.mxu1 }
 0xa86   : > { %6367 = vmatmul.msk.bf16.gmra.mxu0 %vm3586_vm6, %v8366_v20 }
 0xa8b   : > { %v3647_v28 = vpop.f32.mrf.mxu0  ;;  %v3753_v31 = vpop.f32.mrf.mxu1 }
 0xa8c   : > { %v3681_v50 = vpack.c.bf16 %v3647_v28, %v3645_v10  ;;  %v3788_v53 = vpack.c.bf16 %v3753_v31, %v3751_v24  ;;  %v6910_v10 = vld [vmem:[%s9022_s13 + $0x68] sm:$0xff] }
 0xa8d   : > { %v6898_v24 = vld [vmem:[%s9022_s13 + $0x28] sm:$0xff] }
 0xa8e   : > { %v6926_v31 = vld [vmem:[%s9023_s14 + $0x68] sm:$0xff] }
 0xa93   : > { %v3650_v0 = vpop.f32.mrf.mxu0  ;;  %v3756_v37 = vpop.f32.mrf.mxu1 }
 0xa96   : > { %6368 = vmatmul.msk.bf16.gmra.mxu0 %vm3586_vm6, %v8384_v45 }
 0xa9b   : > { %v3652_v38 = vpop.f32.mrf.mxu0  ;;  %v3758_v39 = vpop.f32.mrf.mxu1 }
 0xa9c   : > { %v3682_v46 = vpack.c.bf16 %v3652_v38, %v3650_v0  ;;  %v3789_v55 = vpack.c.bf16 %v3758_v39, %v3756_v37  ;;  %v6925_v0 = vld [vmem:[%s9023_s14 + $0x60] sm:$0xff] }
 0xaa3   : > { %v3655_v40 = vpop.f32.mrf.mxu0  ;;  %v3761_v49 = vpop.f32.mrf.mxu1 }
 0xaa6   : > { %6369 = vmatmul.msk.bf16.gmra.mxu0 %vm3586_vm6, %v8390_v62 }
 0xaab   : > { %v3657_v41 = vpop.f32.mrf.mxu0  ;;  %v3763_v42 = vpop.f32.mrf.mxu1 }
 0xaac   : > { %v3683_v44 = vpack.c.bf16 %v3657_v41, %v3655_v40  ;;  %v3790_v35 = vpack.c.bf16 %v3763_v42, %v3761_v49  ;;  %v6912_v42 = vld [vmem:[%s9022_s13 + $0x78] sm:$0xff] }
 0xaae   : > { %3839 = vmatpush.bf16.msra.mxu2 %v3790_v35  ;;  %3936 = vmatpush.bf16.msra.mxu3 %v3683_v44  ;;  %v6900_v44 = vld [vmem:[%s9022_s13 + $0x38] sm:$0xff] }
 0xab2   : > { %3840 = vmatpush.bf16.msra.mxu2 %v3789_v55  ;;  %3937 = vmatpush.bf16.msra.mxu3 %v3682_v46 }
 0xab3   : > { %v8449_v48 = vpop.f32.mrf.mxu0 }
 0xab6   : > { %3841 = vmatpush.bf16.msra.mxu2 %v3788_v53  ;;  %3938 = vmatpush.bf16.msra.mxu3 %v3681_v50  ;;  %v6917_v50 = vld [vmem:[%s9022_s13 + $0x80] sm:$0xff] }
 0xab7   : > { %6522 = vmatmul.msk.bf16.vlgmr.msrb.gmra.mxu0 %vm3586_vm6, %v8336_v29 }
 0xaba   : > { %3842 = vmatpush.bf16.msra.mxu2 %v3787_v54  ;;  %3939 = vmatpush.bf16.msra.mxu3 %v3680_v6 }
 0xabb   : > { %v8453_v2 = vpop.f32.mrf.mxu0 }
 0xabc   : > { %v4084_v57 = vpack.c.bf16 %v8453_v2, %v8449_v48  ;;  %v6918_v48 = vld [vmem:[%s9022_s13 + $0x88] sm:$0xff] }
 0xabe   : > { %3843 = vmatpush.bf16.msra.mxu2 %v3786_v32  ;;  %3940 = vmatpush.bf16.msra.mxu3 %v3679_v36  ;;  %v6909_v36 = vld [vmem:[%s9022_s13 + $0x60] sm:$0xff] }
 0xac2   : > { %3844 = vmatpush.bf16.msra.mxu2 %v3785_v58  ;;  %3941 = vmatpush.bf16.msra.mxu3 %v3678_v7 }
 0xac3   : > { %v8458_v60 = vpop.f32.mrf.mxu0 }
 0xac6   : > { %3845 = vmatpush.bf16.msra.mxu2 %v3784_v61  ;;  %3942 = vmatpush.bf16.msra.mxu3 %v3677_v43  ;;  %v6895_v43 = vld [vmem:[%s9022_s13 + $0x10] sm:$0xff] }
 0xac7   : > { %6523 = vmatmul.msk.bf16.gmra.mxu0 %vm3586_vm6, %v8342_v19 }
 0xaca   : > { %3846 = vmatpush.bf16.msra.mxu2 %v3783_v22  ;;  %3943 = vmatpush.bf16.msra.mxu3 %v3676_v30 }
 0xacb   : > { %v8478_v25 = vpop.f32.mrf.mxu0 }
 0xacc   : > { %v4085_v51 = vpack.c.bf16 %v8478_v25, %v8458_v60 }
 0xacd   : > { %3847 = vmatmul.bf16.vlgmr.msra.gmra.mxu2 %v6905_v12  ;;  %3944 = vmatmul.bf16.vlgmr.msra.gmra.mxu3 %v6893_v13 }
 0xace   : > { %4242 = vmatpush.bf16.msrb.mxu2 %v6928_v21 }
 0xad2   : > { %4243 = vmatpush.bf16.msrb.mxu2 %v6927_v9  ;;  %v6922_v9 = vld [vmem:[%s9022_s13 + $0xa8] sm:$0xff] }
 0xad3   : > { %v8482_v16 = vpop.f32.mrf.mxu0 }
 0xad6   : > { %4244 = vmatpush.bf16.msrb.mxu2 %v6926_v31 }
 0xad7   : > { %6524 = vmatmul.msk.bf16.gmra.mxu0 %vm3586_vm6, %v8348_v8 }
 0xada   : > { %4245 = vmatpush.bf16.msrb.mxu2 %v6925_v0 }
 0xadb   : > { %v8492_v1 = vpop.f32.mrf.mxu0 }
 0xadc   : > { %v4086_v30 = vpack.c.bf16 %v8492_v1, %v8482_v16 }
 0xadd   : > { %3852 = vmatmul.bf16.gmra.mxu2 %v6906_v59  ;;  %3949 = vmatmul.bf16.gmra.mxu3 %v6894_v63  ;;  %v6919_v59 = vld [vmem:[%s9022_s13 + $0x90] sm:$0xff] }
 0xae3   : > { %v4042_v52 = vpop.f32.mrf.mxu0 }
 0xae7   : > { %6525 = vmatmul.msk.bf16.gmra.mxu0 %vm3586_vm6, %v8354_v56 }
 0xaeb   : > { %v4044_v47 = vpop.f32.mrf.mxu0 }
 0xaec   : > { %v4087_v14 = vpack.c.bf16 %v4044_v47, %v4042_v52 }
 0xaed   : > { %3857 = vmatmul.bf16.gmra.mxu2 %v6907_v3  ;;  %3954 = vmatmul.bf16.gmra.mxu3 %v6895_v43 }
 0xaf3   : > { %v4047_v7 = vpop.f32.mrf.mxu0 }
 0xaf7   : > { %6526 = vmatmul.msk.bf16.gmra.mxu0 %vm3586_vm6, %v8360_v4 }
 0xafb   : > { %v4049_v17 = vpop.f32.mrf.mxu0 }
 0xafc   : > { %v4088_v41 = vpack.c.bf16 %v4049_v17, %v4047_v7 }
 0xafd   : > { %3862 = vmatmul.bf16.gmra.mxu2 %v6908_v5  ;;  %3959 = vmatmul.bf16.gmra.mxu3 %v6896_v15 }
 0xb03   : > { %v4052_v11 = vpop.f32.mrf.mxu0 }
 0xb07   : > { %6527 = vmatmul.msk.bf16.gmra.mxu0 %vm3586_vm6, %v8366_v20 }
 0xb0b   : > { %v4054_v27 = vpop.f32.mrf.mxu0 }
 0xb0c   : > { %v4089_v40 = vpack.c.bf16 %v4054_v27, %v4052_v11 }
 0xb0d   : > { %3867 = vmatmul.bf16.gmra.mxu2 %v6909_v36  ;;  %3964 = vmatmul.bf16.gmra.mxu3 %v6897_v18  ;;  %v6921_v18 = vld [vmem:[%s9022_s13 + $0xa0] sm:$0xff] }
 0xb13   : > { %v4057_v23 = vpop.f32.mrf.mxu0 }
 0xb17   : > { %6528 = vmatmul.msk.bf16.gmra.mxu0 %vm3586_vm6, %v8384_v45 }
 0xb1b   : > { %v4059_v26 = vpop.f32.mrf.mxu0 }
 0xb1c   : > { %v4090_v39 = vpack.c.bf16 %v4059_v26, %v4057_v23 }
 0xb1d   : > { %3872 = vmatmul.bf16.gmra.mxu2 %v6910_v10  ;;  %3969 = vmatmul.bf16.gmra.mxu3 %v6898_v24 }
 0xb23   : > { %v4062_v28 = vpop.f32.mrf.mxu0 }
 0xb27   : > { %6529 = vmatmul.msk.bf16.gmra.mxu0 %vm3586_vm6, %v8390_v62 }
 0xb2b   : > { %v4064_v37 = vpop.f32.mrf.mxu0 }
 0xb2c   : > { %v4091_v38 = vpack.c.bf16 %v4064_v37, %v4062_v28 }
 0xb2d   : > { %3877 = vmatmul.bf16.gmra.mxu2 %v6911_v33  ;;  %3974 = vmatmul.bf16.gmra.mxu3 %v6899_v34 }
 0xb2e   : > { %4140 = vmatpush.bf16.msra.mxu1 %v4091_v38  ;;  %v6923_v38 = vld [vmem:[%s9022_s13 + $0xb0] sm:$0xff] }
 0xb32   : > { %4141 = vmatpush.bf16.msra.mxu1 %v4090_v39 }
 0xb34   : > { %v8548_v49 = vpop.f32.mrf.mxu0 }
 0xb36   : > { %4142 = vmatpush.bf16.msra.mxu1 %v4089_v40 }
 0xb3a   : > { %4143 = vmatpush.bf16.msra.mxu1 %v4088_v41 }
 0xb3c   : > { %v8556_v35 = vpop.f32.mrf.mxu0 }
 0xb3d   : > { %v4524_v46 = vpack.c.bf16 %v8556_v35, %v8548_v49  ;;  %3882 = vmatmul.bf16.gmra.mxu2 %v6912_v42  ;;  %3979 = vmatmul.bf16.gmra.mxu3 %v6900_v44 }
 0xb3e   : > { %4144 = vmatpush.bf16.msra.mxu1 %v4087_v14  ;;  %v6920_v14 = vld [vmem:[%s9022_s13 + $0x98] sm:$0xff] }
 0xb42   : > { %4145 = vmatpush.bf16.msra.mxu1 %v4086_v30 }
 0xb44   : > { %v8560_v55 = vpop.f32.mrf.mxu0 }
 0xb46   : > { %4146 = vmatpush.bf16.msra.mxu1 %v4085_v51 }
 0xb4a   : > { %4147 = vmatpush.bf16.msra.mxu1 %v4084_v57 }
 0xb4c   : > { %v8571_v53 = vpop.f32.mrf.mxu0 }
 0xb4d   : > { %v4525_v6 = vpack.c.bf16 %v8571_v53, %v8560_v55  ;;  %4148 = vmatmul.bf16.vlgmr.msra.gmra.mxu1 %v6917_v50  ;;  %6442 = vmatmul.msk.bf16.vlgmr.msrb.gmra.mxu2 %vm3586_vm6, %v8336_v29 }
 0xb50   : > { %v3848_v54 = vpop.f32.mrf.mxu2  ;;  %v3945_v32 = vpop.f32.mrf.mxu3 }
 0xb51   : > { %v8577_v58 = vadd.f32 %v3945_v32, %v3848_v54 }
 0xb54   : > { %v8579_v60 = vpop.f32.mrf.mxu0 }
 0xb58   : > { %v8581_v61 = vpop.f32.mrf.mxu2  ;;  %v8583_v22 = vpop.f32.mrf.mxu3 }
 0xb5c   : > { %v8588_v2 = vpop.f32.mrf.mxu0 }
 0xb5d   : > { %v4526_v57 = vpack.c.bf16 %v8588_v2, %v8579_v60  ;;  %4153 = vmatmul.bf16.gmra.mxu1 %v6918_v48  ;;  %6443 = vmatmul.msk.bf16.gmra.mxu2 %vm3586_vm6, %v8342_v19 }
 0xb60   : > { %v3853_v29 = vpop.f32.mrf.mxu2  ;;  %v3950_v12 = vpop.f32.mrf.mxu3 }
 0xb61   : > { %v8594_v13 = vadd.f32 %v3950_v12, %v3853_v29  ;;  %v6924_v29 = vld [vmem:[%s9022_s13 + $0xb8] sm:$0xff] }
 0xb64   : > { %v8596_v25 = vpop.f32.mrf.mxu0 }
 0xb68   : > { %v8598_v51 = vpop.f32.mrf.mxu2  ;;  %v8600_v16 = vpop.f32.mrf.mxu3 }
 0xb6c   : > { %v4484_v63 = vpop.f32.mrf.mxu0 }
 0xb6d   : > { %v4527_v1 = vpack.c.bf16 %v4484_v63, %v8596_v25  ;;  %4158 = vmatmul.bf16.gmra.mxu1 %v6919_v59  ;;  %6444 = vmatmul.msk.bf16.gmra.mxu2 %vm3586_vm6, %v8348_v8 }
 0xb70   : > { %v3858_v19 = vpop.f32.mrf.mxu2  ;;  %v3955_v30 = vpop.f32.mrf.mxu3 }
 0xb71   : > { %v8608_v52 = vadd.f32 %v3955_v30, %v3858_v19 }
 0xb74   : > { %v4487_v3 = vpop.f32.mrf.mxu0 }
 0xb78   : > { %v8610_v43 = vpop.f32.mrf.mxu2  ;;  %v8612_v47 = vpop.f32.mrf.mxu3 }
 0xb7c   : > { %v4489_v7 = vpop.f32.mrf.mxu0 }
 0xb7d   : > { %4163 = vmatmul.bf16.gmra.mxu1 %v6920_v14  ;;  %6445 = vmatmul.msk.bf16.gmra.mxu2 %vm3586_vm6, %v8354_v56  ;;  %v4528_v48 = vpack.c.bf16 %v4489_v7, %v4487_v3 }
 0xb80   : > { %v3863_v5 = vpop.f32.mrf.mxu2  ;;  %v3960_v8 = vpop.f32.mrf.mxu3 }
 0xb81   : > { %v8619_v15 = vadd.f32 %v3960_v8, %v3863_v5 }
 0xb84   : > { %v4492_v17 = vpop.f32.mrf.mxu0 }
 0xb88   : > { %v8621_v11 = vpop.f32.mrf.mxu2  ;;  %v8623_v36 = vpop.f32.mrf.mxu3 }
 0xb8c   : > { %v4494_v27 = vpop.f32.mrf.mxu0 }
 0xb8d   : > { %4168 = vmatmul.bf16.gmra.mxu1 %v6921_v18  ;;  %6446 = vmatmul.msk.bf16.gmra.mxu2 %vm3586_vm6, %v8360_v4  ;;  %v4529_v50 = vpack.c.bf16 %v4494_v27, %v4492_v17 }
 0xb90   : > { %v3868_v21 = vpop.f32.mrf.mxu2  ;;  %v3965_v56 = vpop.f32.mrf.mxu3 }
 0xb91   : > { %v8630_v23 = vadd.f32 %v3965_v56, %v3868_v21 }
 0xb94   : > { %v4497_v10 = vpop.f32.mrf.mxu0 }
 0xb98   : > { %v8632_v24 = vpop.f32.mrf.mxu2  ;;  %v8634_v26 = vpop.f32.mrf.mxu3 }
 0xb9c   : > { %v4499_v28 = vpop.f32.mrf.mxu0 }
 0xb9d   : > { %4173 = vmatmul.bf16.gmra.mxu1 %v6922_v9  ;;  %6447 = vmatmul.msk.bf16.gmra.mxu2 %vm3586_vm6, %v8366_v20  ;;  %v4530_v42 = vpack.c.bf16 %v4499_v28, %v4497_v10 }
 0xba0   : > { %v3873_v31 = vpop.f32.mrf.mxu2  ;;  %v3970_v4 = vpop.f32.mrf.mxu3 }
 0xba1   : > { %v3971_v33 = vadd.f32 %v3970_v4, %v3873_v31 }
 0xba4   : > { %v4502_v34 = vpop.f32.mrf.mxu0 }
 0xba8   : > { %v8641_v0 = vpop.f32.mrf.mxu2  ;;  %v8643_v37 = vpop.f32.mrf.mxu3 }
 0xbac   : > { %v4504_v39 = vpop.f32.mrf.mxu0 }
 0xbad   : > { %v4531_v40 = vpack.c.bf16 %v4504_v39, %v4502_v34  ;;  %4178 = vmatmul.bf16.gmra.mxu1 %v6923_v38  ;;  %6448 = vmatmul.msk.bf16.gmra.mxu2 %vm3586_vm6, %v8384_v45 }
 0xbaf   : > { %4580 = vmatpush.bf16.msrb.mxu1 %v4531_v40 }
 0xbb0   : > { %v3878_v20 = vpop.f32.mrf.mxu2  ;;  %v3975_v41 = vpop.f32.mrf.mxu3 }
 0xbb1   : > { %v3976_v44 = vadd.f32 %v3975_v41, %v3878_v20 }
 0xbb3   : > { %4581 = vmatpush.bf16.msrb.mxu1 %v4530_v42 }
 0xbb7   : > { %4582 = vmatpush.bf16.msrb.mxu1 %v4529_v50 }
 0xbb8   : > { %v8650_v54 = vpop.f32.mrf.mxu2  ;;  %v8652_v32 = vpop.f32.mrf.mxu3 }
 0xbbb   : > { %4583 = vmatpush.bf16.msrb.mxu1 %v4528_v48 }
 0xbbd   : > { %4183 = vmatmul.bf16.gmra.mxu1 %v6924_v29  ;;  %6449 = vmatmul.msk.bf16.gmra.mxu2 %vm3586_vm6, %v8390_v62  ;;  %v6942_v29 = vld [vmem:[%s9022_s13 + $0x108] sm:$0xff] }
 0xbbf   : > { %4584 = vmatpush.bf16.msrb.mxu1 %v4527_v1 }
 0xbc0   : > { %v3883_v45 = vpop.f32.mrf.mxu2  ;;  %v3980_v12 = vpop.f32.mrf.mxu3 }
 0xbc1   : > { %v3981_v25 = vadd.f32 %v3980_v12, %v3883_v45 }
 0xbc3   : > { %4585 = vmatpush.bf16.msrb.mxu1 %v4526_v57 }
 0xbc7   : > { %4586 = vmatpush.bf16.msrb.mxu1 %v4525_v6 }
 0xbc8   : > { %v8665_v59 = vpop.f32.mrf.mxu2 }
 0xbca   : > { %v4149_v63 = vpop.f32.mrf.mxu1 }
 0xbcb   : > { %v8668_v19 = vadd.f32 %v4149_v63, %v8577_v58  ;;  %4587 = vmatpush.bf16.msrb.mxu1 %v4524_v46  ;;  %v6929_v63 = vld [vmem:[%s9022_s13 + $0xc0] sm:$0xff] }
 0xbd0   : > { %v4247_v62 = vpop.f32.mrf.mxu2 }
 0xbd2   : > { %v8673_v1 = vpop.f32.mrf.mxu1 }
 0xbd8   : > { %v4249_v30 = vpop.f32.mrf.mxu2 }
 0xbda   : > { %v4154_v60 = vpop.f32.mrf.mxu1 }
 0xbdb   : > { %v8676_v2 = vadd.f32 %v4154_v60, %v8594_v13  ;;  %v6943_v60 = vld [vmem:[%s9022_s13 + $0x110] sm:$0xff] }
 0xbe0   : > { %v4252_v55 = vpop.f32.mrf.mxu2 }
 0xbe2   : > { %v8678_v53 = vpop.f32.mrf.mxu1 }
 0xbe8   : > { %v4254_v6 = vpop.f32.mrf.mxu2 }
 0xbe9   : > { %v4305_v12 = vpack.c.bf16 %v4254_v6, %v4252_v55  ;;  %v6944_v55 = vld [vmem:[%s9022_s13 + $0x118] sm:$0xff] }
 0xbea   : > { %v4159_v57 = vpop.f32.mrf.mxu1  ;;  %v6932_v6 = vld [vmem:[%s9022_s13 + $0xd8] sm:$0xff] }
 0xbeb   : > { %v8681_v58 = vadd.f32 %v4159_v57, %v8608_v52  ;;  %v6930_v57 = vld [vmem:[%s9022_s13 + $0xc8] sm:$0xff] }
 0xbf0   : > { %v4257_v3 = vpop.f32.mrf.mxu2 }
 0xbf2   : > { %v8683_v14 = vpop.f32.mrf.mxu1 }
 0xbf8   : > { %v4259_v49 = vpop.f32.mrf.mxu2 }
 0xbf9   : > { %v4306_v45 = vpack.c.bf16 %v4259_v49, %v4257_v3  ;;  %v6946_v3 = vld [vmem:[%s9022_s13 + $0x128] sm:$0xff]  ;;  %v6933_v49 = vld [vmem:[%s9022_s13 + $0xe0] sm:$0xff] }
 0xbfa   : > { %v4164_v35 = vpop.f32.mrf.mxu1 }
 0xbfb   : > { %v8686_v46 = vadd.f32 %v4164_v35, %v8619_v15  ;;  %v6947_v35 = vld [vmem:[%s9022_s13 + $0x130] sm:$0xff] }
 0xc00   : > { %v4262_v7 = vpop.f32.mrf.mxu2 }
 0xc02   : > { %v8688_v5 = vpop.f32.mrf.mxu1 }
 0xc08   : > { %v4264_v13 = vpop.f32.mrf.mxu2 }
 0xc09   : > { %v4307_v48 = vpack.c.bf16 %v4264_v13, %v4262_v7  ;;  %v6934_v7 = vld [vmem:[%s9022_s13 + $0xe8] sm:$0xff]  ;;  %v6948_v13 = vld [vmem:[%s9022_s13 + $0x138] sm:$0xff] }
 0xc0a   : > { %v4169_v8 = vpop.f32.mrf.mxu1 }
 0xc0b   : > { %v8691_v17 = vadd.f32 %v4169_v8, %v8630_v23  ;;  %v6956_v8 = vld [vmem:[%s9026_s17 + $0x38] sm:$0xff] }
 0xc0c   : > { %4845 = vmatpush.bf16.msra.mxu2 %v6956_v8  ;;  %v4669_v8 = vpop.permute.xlu2 %4668 }
 0xc10   : > { %v4267_v18 = vpop.f32.mrf.mxu2 }
 0xc12   : > { %v8693_v27 = vpop.f32.mrf.mxu1 }
 0xc18   : > { %v4269_v52 = vpop.f32.mrf.mxu2 }
 0xc19   : > { %v4308_v50 = vpack.c.bf16 %v4269_v52, %v4267_v18  ;;  %v6968_v18 = vld [vmem:[%s9026_s17 + $0x78] sm:$0xff]  ;;  %v6955_v52 = vld [vmem:[%s9026_s17 + $0x30] sm:$0xff] }
 0xc1a   : > { %v4174_v21 = vpop.f32.mrf.mxu1  ;;  %4846 = vmatpush.bf16.msra.mxu2 %v6955_v52 }
 0xc1b   : > { %v8695_v56 = vadd.f32 %v4174_v21, %v3971_v33  ;;  %v6941_v33 = vld [vmem:[%s9022_s13 + $0x100] sm:$0xff]  ;;  %v6967_v21 = vld [vmem:[%s9026_s17 + $0x70] sm:$0xff] }
 0xc1c   : > { %4588 = vmatmul.bf16.vlgmr.msrb.gmra.mxu1 %v6941_v33  ;;  %v6951_v33 = vld [vmem:[%s9026_s17 + $0x10] sm:$0xff] }
 0xc20   : > { %v4272_v10 = vpop.f32.mrf.mxu2 }
 0xc22   : > { %v8697_v9 = vpop.f32.mrf.mxu1 }
 0xc28   : > { %v4274_v15 = vpop.f32.mrf.mxu2 }
 0xc2a   : > { %v4179_v28 = vpop.f32.mrf.mxu1 }
 0xc2b   : > { %v8699_v31 = vadd.f32 %v4179_v28, %v3976_v44  ;;  %v4309_v44 = vpack.c.bf16 %v4274_v15, %v4272_v10  ;;  %v6954_v10 = vld [vmem:[%s9026_s17 + $0x28] sm:$0xff]  ;;  %v6935_v28 = vld [vmem:[%s9022_s13 + $0xf0] sm:$0xff] }
 0xc2c   : > { %4593 = vmatmul.bf16.gmra.mxu1 %v6942_v29  ;;  %v6966_v15 = vld [vmem:[%s9026_s17 + $0x68] sm:$0xff]  ;;  %4847 = vmatpush.bf16.msra.mxu2 %v6954_v10 }
 0xc30   : > { %v4277_v4 = vpop.f32.mrf.mxu2 }
 0xc32   : > { %v8701_v34 = vpop.f32.mrf.mxu1 }
 0xc38   : > { %v4279_v38 = vpop.f32.mrf.mxu2 }
 0xc39   : > { %v4310_v42 = vpack.c.bf16 %v4279_v38, %v4277_v4  ;;  %v6953_v38 = vld [vmem:[%s9026_s17 + $0x20] sm:$0xff] }
 0xc3a   : > { %v4184_v23 = vpop.f32.mrf.mxu1  ;;  %4848 = vmatpush.bf16.msra.mxu2 %v6953_v38 }
 0xc3b   : > { %v8703_v39 = vadd.f32 %v4184_v23, %v3981_v25  ;;  %v4304_v25 = vpack.c.bf16 %v4249_v30, %v4247_v62  ;;  %v6931_v62 = vld [vmem:[%s9022_s13 + $0xd0] sm:$0xff]  ;;  %v6945_v30 = vld [vmem:[%s9022_s13 + $0x120] sm:$0xff] }
 0xc3c   : > { %4598 = vmatmul.bf16.gmra.mxu1 %v6943_v60  ;;  %v6965_v23 = vld [vmem:[%s9026_s17 + $0x60] sm:$0xff] }
 0xc40   : > { %v4282_v40 = vpop.f32.mrf.mxu2 }
 0xc42   : > { %v8768_v4 = vpop.f32.mrf.mxu1 }
 0xc48   : > { %v4284_v20 = vpop.f32.mrf.mxu2 }
 0xc49   : > { %v4311_v41 = vpack.c.bf16 %v4284_v20, %v4282_v40  ;;  %v6952_v40 = vld [vmem:[%s9026_s17 + $0x18] sm:$0xff] }
 0xc4a   : > { %v6964_v20 = vld [vmem:[%s9026_s17 + $0x58] sm:$0xff]  ;;  %4849 = vmatpush.bf16.msra.mxu2 %v6952_v40 }
 0xc4b   : > { %4360 = vmatpush.bf16.msrb.mxu3 %v4311_v41 }
 0xc4c   : > { %4603 = vmatmul.bf16.gmra.mxu1 %v6944_v55 }
 0xc4e   : > { %4850 = vmatpush.bf16.msra.mxu2 %v6951_v33 }
 0xc4f   : > { %4361 = vmatpush.bf16.msrb.mxu3 %v4310_v42  ;;  %v6963_v42 = vld [vmem:[%s9026_s17 + $0x50] sm:$0xff] }
 0xc53   : > { %4362 = vmatpush.bf16.msrb.mxu3 %v4309_v44  ;;  %v6936_v44 = vld [vmem:[%s9022_s13 + $0xf8] sm:$0xff] }
 0xc57   : > { %4363 = vmatpush.bf16.msrb.mxu3 %v4308_v50  ;;  %v6950_v50 = vld [vmem:[%s9026_s17 + $0x8] sm:$0xff] }
 0xc58   : > { %4851 = vmatpush.bf16.msra.mxu2 %v6950_v50 }
 0xc5b   : > { %4364 = vmatpush.bf16.msrb.mxu3 %v4307_v48  ;;  %v6962_v48 = vld [vmem:[%s9026_s17 + $0x48] sm:$0xff] }
 0xc5c   : > { %4608 = vmatmul.bf16.gmra.mxu1 %v6945_v30 }
 0xc5f   : > { %4365 = vmatpush.bf16.msrb.mxu3 %v4306_v45  ;;  %v6949_v45 = vld [vmem:[%s9026_s17] sm:$0xff] }
 0xc60   : > { %4852 = vmatpush.bf16.msra.mxu2 %v6949_v45 }
 0xc63   : > { %4366 = vmatpush.bf16.msrb.mxu3 %v4305_v12  ;;  %v6961_v12 = vld [vmem:[%s9026_s17 + $0x40] sm:$0xff] }
 0xc67   : > { %4367 = vmatpush.bf16.msrb.mxu3 %v4304_v25  ;;  %v8803_v25 = vpop.f32.mrf.mxu3 }
 0xc6a   : > { %4368 = vmatmul.bf16.vlgmr.msrb.gmra.mxu3 %v6929_v63 }
 0xc6b   : > { %4975 = vmatpush.bf16.msra.mxu3 %v6968_v18 }
 0xc6c   : > { %4613 = vmatmul.bf16.gmra.mxu1 %v6946_v3 }
 0xc6f   : > { %4976 = vmatpush.bf16.msra.mxu3 %v6967_v21 }
 0xc73   : > { %4977 = vmatpush.bf16.msra.mxu3 %v6966_v15 }
 0xc77   : > { %4978 = vmatpush.bf16.msra.mxu3 %v6965_v23 }
 0xc7a   : > { %4373 = vmatmul.bf16.gmra.mxu3 %v6930_v57 }
 0xc7b   : > { %4979 = vmatpush.bf16.msra.mxu3 %v6964_v20  ;;  %v4674_v20 = vpop.permute.xlu0 %4673 }
 0xc7c   : > { %4618 = vmatmul.bf16.gmra.mxu1 %v6947_v35  ;;  %v4664_v35 = vpop.permute.xlu1 %4663 }
 0xc7f   : > { %4980 = vmatpush.bf16.msra.mxu3 %v6963_v42 }
 0xc83   : > { %4981 = vmatpush.bf16.msra.mxu3 %v6962_v48 }
 0xc84   : > { %v4679_v42 = vpop.permute.xlu1 %4678 }
 0xc87   : > { %4982 = vmatpush.bf16.msra.mxu3 %v6961_v12 }
 0xc8a   : > { %4378 = vmatmul.bf16.gmra.mxu3 %v6931_v62  ;;  %v3948_v62 = vadd.f32 %v8583_v22, %v8581_v61  ;;  %v3953_v61 = vadd.f32 %v8600_v16, %v8598_v51  ;;  %v3958_v51 = vadd.f32 %v8612_v47, %v8610_v43  ;;  %v3963_v47 = vadd.f32 %v8623_v36, %v8621_v11 }
 0xc8b   : > { %v3968_v11 = vadd.f32 %v8634_v26, %v8632_v24  ;;  %v6980_v24 = vld [vmem:[%s9026_s17 + $0xb8] sm:$0xff]  ;;  %v3973_v26 = vadd.f32 %v8643_v37, %v8641_v0 }
 0xc8c   : > { %4623 = vmatmul.bf16.gmra.mxu1 %v6948_v13  ;;  %v4190_v30 = vadd.f32 %v8673_v1, %v3948_v62  ;;  %v4192_v1 = vadd.f32 %v8678_v53, %v3953_v61  ;;  %v4194_v16 = vadd.f32 %v8683_v14, %v3958_v51  ;;  %v4196_v14 = vadd.f32 %v8688_v5, %v3963_v47  ;;  %v6976_v47 = vld [vmem:[%s9026_s17 + $0x98] sm:$0xff] }
 0xc8d   : > { %v4198_v36 = vadd.f32 %v8693_v27, %v3968_v11  ;;  %5212 = vmatpush.bf16.msrb.mxu2 %v6980_v24  ;;  %v4200_v27 = vadd.f32 %v8697_v9, %v3973_v26  ;;  %v6977_v9 = vld [vmem:[%s9026_s17 + $0xa0] sm:$0xff] }
 0xc99   : > { %v4589_v41 = vpop.f32.mrf.mxu1 }
 0xc9a   : > { %4383 = vmatmul.bf16.gmra.mxu3 %v6932_v6 }
 0xca1   : > { %v4591_v29 = vpop.f32.mrf.mxu1 }
 0xca9   : > { %v4594_v63 = vpop.f32.mrf.mxu1 }
 0xcaa   : > { %4388 = vmatmul.bf16.gmra.mxu3 %v6933_v49 }
 0xcb1   : > { %v4596_v57 = vpop.f32.mrf.mxu1 }
 0xcb9   : > { %v4599_v18 = vpop.f32.mrf.mxu1 }
 0xcba   : > { %4393 = vmatmul.bf16.gmra.mxu3 %v6934_v7 }
 0xcc1   : > { %v4601_v22 = vpop.f32.mrf.mxu1 }
 0xcca   : > { %4398 = vmatmul.bf16.gmra.mxu3 %v6935_v28 }
 0xcda   : > { %4403 = vmatmul.bf16.gmra.mxu3 %v6936_v44 }
 0xced   : > { %v4369_v60 = vpop.f32.mrf.mxu3 }
 0xcee   : > { %v4409_v55 = vadd.f32 %v4369_v60, %v8668_v19 }
 0xcf0   : > { %v4629_v6 = vadd.f32 %v4589_v41, %v4409_v55 }
 0xcf2   : > { %v4741_v7 = vadd.f32 %v4664_v35, %v4629_v6  ;;  %v4689_v6 = vpop.permute.xlu0 %4688 }
 0xcf4   : > { %v4757_v21 = vmax.f32 %v4741_v7, 0.0 }
 0xcf5   : > { %v4371_v3 = vpop.f32.mrf.mxu3 }
 0xcf6   : > { %v4410_v49 = vadd.f32 %v4371_v3, %v4190_v30 }
 0xcf8   : > { %v4630_v13 = vadd.f32 %v4591_v29, %v4410_v49  ;;  %v4604_v29 = vpop.f32.mrf.mxu1 }
 0xcfa   : > { %v4742_v52 = vadd.f32 %v4669_v8, %v4630_v13 }
 0xcfc   : > { %v4758_v10 = vmax.f32 %v4742_v52, 0.0 }
 0xcfd   : > { %v4374_v15 = vpop.f32.mrf.mxu3 }
 0xcfe   : > { %v8809_v28 = vpack.c.bf16 %v4758_v10, %v4757_v21  ;;  %v4411_v19 = vadd.f32 %v4374_v15, %v8676_v2  ;;  %v4694_v21 = vpop.permute.xlu1 %4693 }
 0xd00   : > { %4853 = vmatmul.bf16.vlgmr.msra.gmra.mxu2 %v8809_v28  ;;  %4983 = vmatmul.bf16.vlgmr.msra.gmra.mxu3 %v8809_v28  ;;  %v4631_v38 = vadd.f32 %v4594_v63, %v4411_v19  ;;  %v4606_v55 = vpop.f32.mrf.mxu1 }
 0xd02   : > { %v4743_v41 = vadd.f32 %v4674_v20, %v4631_v38 }
 0xd04   : > { %v4759_v50 = vmax.f32 %v4743_v41, 0.0 }
 0xd05   : > { %v4376_v23 = vpop.f32.mrf.mxu3 }
 0xd06   : > { %v4412_v40 = vadd.f32 %v4376_v23, %v4192_v1 }
 0xd08   : > { %v4632_v33 = vadd.f32 %v4596_v57, %v4412_v40  ;;  %v4684_v57 = vpop.permute.xlu2 %4683  ;;  %v4609_v43 = vpop.f32.mrf.mxu1 }
 0xd0a   : > { %v4744_v44 = vadd.f32 %v4679_v42, %v4632_v33  ;;  %v4704_v42 = vpop.permute.xlu0 %4703 }
 0xd0c   : > { %v4760_v2 = vmax.f32 %v4744_v44, 0.0 }
 0xd0d   : > { %v4379_v48 = vpop.f32.mrf.mxu3 }
 0xd0e   : > { %v8817_v45 = vpack.c.bf16 %v4760_v2, %v4759_v50  ;;  %v4413_v12 = vadd.f32 %v4379_v48, %v8681_v58  ;;  %v4709_v2 = vpop.permute.xlu1 %4708 }
 0xd10   : > { %4858 = vmatmul.bf16.gmra.mxu2 %v8817_v45  ;;  %4988 = vmatmul.bf16.gmra.mxu3 %v8817_v45  ;;  %v4633_v53 = vadd.f32 %v4599_v18, %v4413_v12  ;;  %v4699_v19 = vpop.permute.xlu2 %4698 }
 0xd12   : > { %v4745_v62 = vadd.f32 %v4684_v57, %v4633_v53 }
 0xd14   : > { %v4761_v49 = vmax.f32 %v4745_v62, 0.0 }
 0xd15   : > { %v4381_v63 = vpop.f32.mrf.mxu3 }
 0xd16   : > { %v4414_v60 = vadd.f32 %v4381_v63, %v4194_v16 }
 0xd18   : > { %v4634_v30 = vadd.f32 %v4601_v22, %v4414_v60  ;;  %v4611_v22 = vpop.f32.mrf.mxu1  ;;  %v6979_v60 = vld [vmem:[%s9026_s17 + $0xb0] sm:$0xff] }
 0xd19   : > { %5213 = vmatpush.bf16.msrb.mxu2 %v6979_v60 }
 0xd1a   : > { %v4746_v3 = vadd.f32 %v4689_v6, %v4634_v30  ;;  %v6978_v6 = vld [vmem:[%s9026_s17 + $0xa8] sm:$0xff] }
 0xd1c   : > { %v4762_v58 = vmax.f32 %v4746_v3, 0.0  ;;  %v4719_v3 = vpop.permute.xlu0 %4718 }
 0xd1d   : > { %v4384_v35 = vpop.f32.mrf.mxu3  ;;  %5214 = vmatpush.bf16.msrb.mxu2 %v6978_v6 }
 0xd1e   : > { %v8825_v7 = vpack.c.bf16 %v4762_v58, %v4761_v49  ;;  %v4415_v13 = vadd.f32 %v4384_v35, %v8686_v46 }
 0xd20   : > { %4863 = vmatmul.bf16.gmra.mxu2 %v8825_v7  ;;  %4993 = vmatmul.bf16.gmra.mxu3 %v8825_v7  ;;  %v4635_v8 = vadd.f32 %v4604_v29, %v4415_v13  ;;  %v4614_v41 = vpop.f32.mrf.mxu1 }
 0xd21   : > { %5215 = vmatpush.bf16.msrb.mxu2 %v6977_v9 }
 0xd22   : > { %v4747_v10 = vadd.f32 %v4694_v21, %v4635_v8  ;;  %v6975_v8 = vld [vmem:[%s9026_s17 + $0x90] sm:$0xff] }
 0xd24   : > { %v4763_v46 = vmax.f32 %v4747_v10, 0.0 }
 0xd25   : > { %v4386_v18 = vpop.f32.mrf.mxu3  ;;  %5216 = vmatpush.bf16.msrb.mxu2 %v6976_v47 }
 0xd26   : > { %v4416_v52 = vadd.f32 %v4386_v18, %v4196_v14  ;;  %v3978_v14 = vadd.f32 %v8652_v32, %v8650_v54 }
 0xd28   : > { %v4636_v15 = vadd.f32 %v4606_v55, %v4416_v52  ;;  %v4616_v16 = vpop.f32.mrf.mxu1  ;;  %v4714_v55 = vpop.permute.xlu2 %4713  ;;  %v4202_v52 = vadd.f32 %v8701_v34, %v3978_v14 }
 0xd29   : > { %5217 = vmatpush.bf16.msrb.mxu2 %v6975_v8 }
 0xd2a   : > { %v4748_v61 = vadd.f32 %v4699_v19, %v4636_v15  ;;  %v6974_v15 = vld [vmem:[%s9026_s17 + $0x88] sm:$0xff]  ;;  %v4724_v19 = vpop.permute.xlu1 %4723 }
 0xd2c   : > { %v4764_v1 = vmax.f32 %v4748_v61, 0.0 }
 0xd2d   : > { %v4389_v38 = vpop.f32.mrf.mxu3  ;;  %5218 = vmatpush.bf16.msrb.mxu2 %v6974_v15 }
 0xd2e   : > { %v8833_v23 = vpack.c.bf16 %v4764_v1, %v4763_v46  ;;  %v4417_v40 = vadd.f32 %v4389_v38, %v8691_v17  ;;  %v6973_v46 = vld [vmem:[%s9026_s17 + $0x80] sm:$0xff] }
 0xd30   : > { %4868 = vmatmul.bf16.gmra.mxu2 %v8833_v23  ;;  %4998 = vmatmul.bf16.gmra.mxu3 %v8833_v23  ;;  %v4637_v5 = vadd.f32 %v4609_v43, %v4417_v40  ;;  %v4619_v0 = vpop.f32.mrf.mxu1  ;;  %v4729_v54 = vpop.permute.xlu2 %4728 }
 0xd31   : > { %5219 = vmatpush.bf16.msrb.mxu2 %v6973_v46 }
 0xd32   : > { %v4749_v44 = vadd.f32 %v4704_v42, %v4637_v5  ;;  %v3983_v5 = vadd.f32 %v8803_v25, %v8665_v59 }
 0xd34   : > { %v4765_v29 = vmax.f32 %v4749_v44, 0.0  ;;  %v4734_v44 = vpop.permute.xlu0 %4733 }
 0xd35   : > { %v4391_v20 = vpop.f32.mrf.mxu3 }
 0xd36   : > { %v4418_v33 = vadd.f32 %v4391_v20, %v4198_v36  ;;  %v4204_v20 = vadd.f32 %v8768_v4, %v3983_v5 }
 0xd38   : > { %v4638_v50 = vadd.f32 %v4611_v22, %v4418_v33  ;;  %v4621_v18 = vpop.f32.mrf.mxu1 }
 0xd3a   : > { %v4750_v48 = vadd.f32 %v4709_v2, %v4638_v50 }
 0xd3c   : > { %v4766_v17 = vmax.f32 %v4750_v48, 0.0 }
 0xd3d   : > { %v4394_v12 = vpop.f32.mrf.mxu3 }
 0xd3e   : > { %v8841_v51 = vpack.c.bf16 %v4766_v17, %v4765_v29  ;;  %v4419_v53 = vadd.f32 %v4394_v12, %v8695_v56  ;;  %v4739_v29 = vpop.permute.xlu1 %4738 }
 0xd40   : > { %4873 = vmatmul.bf16.gmra.mxu2 %v8841_v51  ;;  %5003 = vmatmul.bf16.gmra.mxu3 %v8841_v51  ;;  %v4639_v63 = vadd.f32 %v4614_v41, %v4419_v53  ;;  %v4624_v38 = vpop.f32.mrf.mxu1 }
 0xd42   : > { %v4751_v62 = vadd.f32 %v4714_v55, %v4639_v63 }
 0xd44   : > { %v4767_v49 = vmax.f32 %v4751_v62, 0.0 }
 0xd45   : > { %v4396_v56 = vpop.f32.mrf.mxu3 }
 0xd46   : > { %v4420_v57 = vadd.f32 %v4396_v56, %v4200_v27 }
 0xd48   : > { %v4640_v30 = vadd.f32 %v4616_v16, %v4420_v57  ;;  %v4626_v50 = vpop.f32.mrf.mxu1 }
 0xd4a   : > { %v4752_v37 = vadd.f32 %v4719_v3, %v4640_v30 }
 0xd4c   : > { %v4768_v58 = vmax.f32 %v4752_v37, 0.0 }
 0xd4d   : > { %v4399_v35 = vpop.f32.mrf.mxu3 }
 0xd4e   : > { %v8861_v13 = vpack.c.bf16 %v4768_v58, %v4767_v49  ;;  %v4421_v43 = vadd.f32 %v4399_v35, %v8699_v31 }
 0xd50   : > { %4878 = vmatmul.bf16.gmra.mxu2 %v8861_v13  ;;  %5008 = vmatmul.bf16.gmra.mxu3 %v8861_v13  ;;  %v4641_v31 = vadd.f32 %v4619_v0, %v4421_v43 }
 0xd52   : > { %v4753_v61 = vadd.f32 %v4724_v19, %v4641_v31 }
 0xd54   : > { %v4769_v1 = vmax.f32 %v4753_v61, 0.0 }
 0xd55   : > { %v4401_v21 = vpop.f32.mrf.mxu3 }
 0xd56   : > { %v4422_v10 = vadd.f32 %v4401_v21, %v4202_v52 }
 0xd58   : > { %v4642_v22 = vadd.f32 %v4621_v18, %v4422_v10 }
 0xd5a   : > { %v4754_v32 = vadd.f32 %v4729_v54, %v4642_v22 }
 0xd5c   : > { %v4770_v34 = vmax.f32 %v4754_v32, 0.0 }
 0xd5d   : > { %v4404_v40 = vpop.f32.mrf.mxu3 }
 0xd5e   : > { %v4779_v11 = vpack.c.bf16 %v4770_v34, %v4769_v1  ;;  %v4423_v36 = vadd.f32 %v4404_v40, %v8703_v39 }
 0xd60   : > { %4883 = vmatmul.bf16.gmra.mxu2 %v4779_v11  ;;  %5013 = vmatmul.bf16.gmra.mxu3 %v4779_v11  ;;  %v4643_v41 = vadd.f32 %v4624_v38, %v4423_v36 }
 0xd62   : > { %v4755_v2 = vadd.f32 %v4734_v44, %v4643_v41 }
 0xd64   : > { %v4771_v12 = vmax.f32 %v4755_v2, 0.0 }
 0xd65   : > { %v4406_v33 = vpop.f32.mrf.mxu3 }
 0xd66   : > { %v4424_v42 = vadd.f32 %v4406_v33, %v4204_v20 }
 0xd68   : > { %v4644_v48 = vadd.f32 %v4626_v50, %v4424_v42 }
 0xd6a   : > { %v4756_v17 = vadd.f32 %v4739_v29, %v4644_v48 }
 0xd6c   : > { %v4772_v16 = vmax.f32 %v4756_v17, 0.0 }
 0xd6e   : > { %v4780_v53 = vpack.c.bf16 %v4772_v16, %v4771_v12 }
 0xd70   : > { %4888 = vmatmul.bf16.gmra.mxu2 %v4780_v53  ;;  %5018 = vmatmul.bf16.gmra.mxu3 %v4780_v53 }
 0xd80   : > { %5220 = vmatmul.bf16.vlgmr.msrb.gmra.mxu2 %v8809_v28 }
 0xd83   : > { %v8886_v39 = vpop.f32.mrf.mxu2  ;;  %v8888_v59 = vpop.f32.mrf.mxu3 }
 0xd8b   : > { %v8890_v4 = vpop.f32.mrf.mxu2  ;;  %v8892_v25 = vpop.f32.mrf.mxu3 }
 0xd8c   : > { %v4902_v24 = vpack.c.bf16 %v8890_v4, %v8886_v39  ;;  %v5033_v26 = vpack.c.bf16 %v8892_v25, %v8888_v59  ;;  %v6969_v39 = vld [vmem:[%s9025_s16 + $0x20] sm:$0xff] }
 0xd8d   : > { %v6957_v4 = vld [vmem:[%s9025_s16] sm:$0xff] }
 0xd90   : > { %5225 = vmatmul.bf16.gmra.mxu2 %v8817_v45 }
 0xd93   : > { %v8899_v27 = vpop.f32.mrf.mxu2  ;;  %v8901_v63 = vpop.f32.mrf.mxu3 }
 0xd9b   : > { %v8903_v28 = vpop.f32.mrf.mxu2  ;;  %v4991_v60 = vpop.f32.mrf.mxu3 }
 0xd9c   : > { %v4903_v56 = vpack.c.bf16 %v8903_v28, %v8899_v27  ;;  %v5034_v57 = vpack.c.bf16 %v4991_v60, %v8901_v63 }
 0xda0   : > { %5230 = vmatmul.bf16.gmra.mxu2 %v8825_v7 }
 0xda3   : > { %v4864_v55 = vpop.f32.mrf.mxu2  ;;  %v4994_v62 = vpop.f32.mrf.mxu3 }
 0xdab   : > { %v4866_v30 = vpop.f32.mrf.mxu2  ;;  %v4996_v6 = vpop.f32.mrf.mxu3 }
 0xdac   : > { %v4904_v3 = vpack.c.bf16 %v4866_v30, %v4864_v55  ;;  %v5035_v45 = vpack.c.bf16 %v4996_v6, %v4994_v62  ;;  %v6971_v55 = vld [vmem:[%s9025_s16 + $0x30] sm:$0xff]  ;;  %v6981_v30 = vld [vmem:[%s9025_s16 + $0x40] sm:$0xff]  ;;  %v6972_v6 = vld [vmem:[%s9025_s16 + $0x38] sm:$0xff] }
 0xdad   : > { %v6959_v62 = vld [vmem:[%s9025_s16 + $0x10] sm:$0xff] }
 0xdb0   : > { %5235 = vmatmul.bf16.gmra.mxu2 %v8833_v23 }
 0xdb3   : > { %v4869_v0 = vpop.f32.mrf.mxu2  ;;  %v4999_v37 = vpop.f32.mrf.mxu3 }
 0xdbb   : > { %v4871_v9 = vpop.f32.mrf.mxu2  ;;  %v5001_v49 = vpop.f32.mrf.mxu3 }
 0xdbc   : > { %v4905_v58 = vpack.c.bf16 %v4871_v9, %v4869_v0  ;;  %v5036_v35 = vpack.c.bf16 %v5001_v49, %v4999_v37  ;;  %v6983_v0 = vld [vmem:[%s9025_s16 + $0x50] sm:$0xff]  ;;  %v6984_v37 = vld [vmem:[%s9025_s16 + $0x58] sm:$0xff] }
 0xdc0   : > { %5240 = vmatmul.bf16.gmra.mxu2 %v8841_v51 }
 0xdc3   : > { %v4874_v43 = vpop.f32.mrf.mxu2  ;;  %v5004_v47 = vpop.f32.mrf.mxu3 }
 0xdcb   : > { %v4876_v14 = vpop.f32.mrf.mxu2  ;;  %v5006_v7 = vpop.f32.mrf.mxu3 }
 0xdcc   : > { %v4906_v40 = vpack.c.bf16 %v4876_v14, %v4874_v43 }
 0xdd0   : > { %5245 = vmatmul.bf16.gmra.mxu2 %v8861_v13 }
 0xdd3   : > { %v4879_v8 = vpop.f32.mrf.mxu2  ;;  %v5009_v18 = vpop.f32.mrf.mxu3 }
 0xddb   : > { %v4881_v52 = vpop.f32.mrf.mxu2  ;;  %v5011_v31 = vpop.f32.mrf.mxu3 }
 0xddc   : > { %v4907_v34 = vpack.c.bf16 %v4881_v52, %v4879_v8  ;;  %v5038_v38 = vpack.c.bf16 %v5011_v31, %v5009_v18  ;;  %v5350_v8 = vpop.permute.xlu2 %5349 }
 0xde0   : > { %5250 = vmatmul.bf16.gmra.mxu2 %v4779_v11  ;;  %v5037_v11 = vpack.c.bf16 %v5006_v7, %v5004_v47 }
 0xde3   : > { %v4884_v23 = vpop.f32.mrf.mxu2  ;;  %v5014_v21 = vpop.f32.mrf.mxu3 }
 0xdeb   : > { %v4886_v10 = vpop.f32.mrf.mxu2  ;;  %v5016_v15 = vpop.f32.mrf.mxu3 }
 0xdec   : > { %v4908_v46 = vpack.c.bf16 %v4886_v10, %v4884_v23  ;;  %v5039_v13 = vpack.c.bf16 %v5016_v15, %v5014_v21  ;;  %v5355_v10 = vpop.permute.xlu0 %5354 }
 0xdf0   : > { %5255 = vmatmul.bf16.gmra.mxu2 %v4780_v53 }
 0xdf3   : > { %v4889_v19 = vpop.f32.mrf.mxu2  ;;  %v5019_v61 = vpop.f32.mrf.mxu3 }
 0xdfb   : > { %v4891_v22 = vpop.f32.mrf.mxu2  ;;  %v5021_v51 = vpop.f32.mrf.mxu3 }
 0xdfc   : > { %v4909_v54 = vpack.c.bf16 %v4891_v22, %v4889_v19  ;;  %v5040_v32 = vpack.c.bf16 %v5021_v51, %v5019_v61 }
 0xdfe   : > { %5065 = vmatpush.bf16.msra.mxu0 %v5040_v32  ;;  %5118 = vmatpush.bf16.msra.mxu1 %v4909_v54  ;;  %v5360_v32 = vpop.permute.xlu1 %5359 }
 0xe02   : > { %5066 = vmatpush.bf16.msra.mxu0 %v5039_v13  ;;  %5119 = vmatpush.bf16.msra.mxu1 %v4908_v46 }
 0xe03   : > { %v5221_v1 = vpop.f32.mrf.mxu2 }
 0xe06   : > { %5067 = vmatpush.bf16.msra.mxu0 %v5038_v38  ;;  %5120 = vmatpush.bf16.msra.mxu1 %v4907_v34 }
 0xe0a   : > { %5068 = vmatpush.bf16.msra.mxu0 %v5037_v11  ;;  %5121 = vmatpush.bf16.msra.mxu1 %v4906_v40  ;;  %v5365_v11 = vpop.permute.xlu2 %5364 }
 0xe0b   : > { %v5223_v36 = vpop.f32.mrf.mxu2 }
 0xe0c   : > { %v5270_v5 = vpack.c.bf16 %v5223_v36, %v5221_v1 }
 0xe0e   : > { %5069 = vmatpush.bf16.msra.mxu0 %v5036_v35  ;;  %5122 = vmatpush.bf16.msra.mxu1 %v4905_v58 }
 0xe12   : > { %5070 = vmatpush.bf16.msra.mxu0 %v5035_v45  ;;  %5123 = vmatpush.bf16.msra.mxu1 %v4904_v3  ;;  %v6960_v3 = vld [vmem:[%s9025_s16 + $0x18] sm:$0xff]  ;;  %v6982_v45 = vld [vmem:[%s9025_s16 + $0x48] sm:$0xff] }
 0xe13   : > { %v5226_v20 = vpop.f32.mrf.mxu2 }
 0xe16   : > { %5071 = vmatpush.bf16.msra.mxu0 %v5034_v57  ;;  %5124 = vmatpush.bf16.msra.mxu1 %v4903_v56  ;;  %v6970_v56 = vld [vmem:[%s9025_s16 + $0x28] sm:$0xff] }
 0xe17   : > { %v6958_v57 = vld [vmem:[%s9025_s16 + $0x8] sm:$0xff] }
 0xe1a   : > { %5072 = vmatpush.bf16.msra.mxu0 %v5033_v26  ;;  %5125 = vmatpush.bf16.msra.mxu1 %v4902_v24 }
 0xe1b   : > { %v5228_v41 = vpop.f32.mrf.mxu2 }
 0xe1c   : > { %v5271_v33 = vpack.c.bf16 %v5228_v41, %v5226_v20 }
 0xe1d   : > { %5073 = vmatmul.bf16.vlgmr.msra.gmra.mxu0 %v6969_v39  ;;  %5126 = vmatmul.bf16.vlgmr.msra.gmra.mxu1 %v6957_v4  ;;  %v5380_v39 = vpop.permute.xlu2 %5379 }
 0xe23   : > { %v5231_v42 = vpop.f32.mrf.mxu2 }
 0xe2b   : > { %v5233_v44 = vpop.f32.mrf.mxu2 }
 0xe2c   : > { %v5272_v50 = vpack.c.bf16 %v5233_v44, %v5231_v42  ;;  %v5370_v44 = vpop.permute.xlu0 %5369 }
 0xe2d   : > { %5078 = vmatmul.bf16.gmra.mxu0 %v6970_v56  ;;  %5131 = vmatmul.bf16.gmra.mxu1 %v6958_v57 }
 0xe33   : > { %v5236_v2 = vpop.f32.mrf.mxu2 }
 0xe34   : > { %v5385_v56 = vpop.permute.xlu0 %5384 }
 0xe3b   : > { %v5238_v48 = vpop.f32.mrf.mxu2 }
 0xe3c   : > { %v5273_v29 = vpack.c.bf16 %v5238_v48, %v5236_v2 }
 0xe3d   : > { %5083 = vmatmul.bf16.gmra.mxu0 %v6971_v55  ;;  %5136 = vmatmul.bf16.gmra.mxu1 %v6959_v62 }
 0xe43   : > { %v5241_v17 = vpop.f32.mrf.mxu2 }
 0xe4b   : > { %v5243_v12 = vpop.f32.mrf.mxu2 }
 0xe4c   : > { %v5274_v60 = vpack.c.bf16 %v5243_v12, %v5241_v17 }
 0xe4d   : > { %5088 = vmatmul.bf16.gmra.mxu0 %v6972_v6  ;;  %5141 = vmatmul.bf16.gmra.mxu1 %v6960_v3 }
 0xe53   : > { %v5246_v16 = vpop.f32.mrf.mxu2 }
 0xe5b   : > { %v5248_v53 = vpop.f32.mrf.mxu2 }
 0xe5c   : > { %v5275_v28 = vpack.c.bf16 %v5248_v53, %v5246_v16 }
 0xe63   : > { %v5251_v27 = vpop.f32.mrf.mxu2 }
 0xe6b   : > { %v5253_v63 = vpop.f32.mrf.mxu2 }
 0xe6c   : > { %v5276_v26 = vpack.c.bf16 %v5253_v63, %v5251_v27 }
 0xe73   : > { %v5256_v59 = vpop.f32.mrf.mxu2 }
 0xe7b   : > { %v5258_v25 = vpop.f32.mrf.mxu2 }
 0xe7c   : > { %v5277_v24 = vpack.c.bf16 %v5258_v25, %v5256_v59 }
 0xe7e   : > { %5302 = vmatpush.bf16.msrb.mxu3 %v5277_v24 }
 0xe82   : > { %5303 = vmatpush.bf16.msrb.mxu3 %v5276_v26 }
 0xe86   : > { %5304 = vmatpush.bf16.msrb.mxu3 %v5275_v28 }
 0xe8a   : > { %5305 = vmatpush.bf16.msrb.mxu3 %v5274_v60 }
 0xe8e   : > { %5306 = vmatpush.bf16.msrb.mxu3 %v5273_v29  ;;  %v5375_v29 = vpop.permute.xlu1 %5374 }
 0xe92   : > { %5307 = vmatpush.bf16.msrb.mxu3 %v5272_v50 }
 0xe96   : > { %5308 = vmatpush.bf16.msrb.mxu3 %v5271_v33 }
 0xe9a   : > { %5309 = vmatpush.bf16.msrb.mxu3 %v5270_v5  ;;  %v5074_v9 = vpop.f32.mrf.mxu0  ;;  %v5127_v49 = vpop.f32.mrf.mxu1 }
 0xe9b   : > { %v5128_v43 = vadd.f32 %v5127_v49, %v5074_v9 }
 0xe9d   : > { %5310 = vmatmul.bf16.vlgmr.msrb.gmra.mxu3 %v6981_v30 }
 0xea2   : > { %v5076_v58 = vpop.f32.mrf.mxu0  ;;  %v5129_v35 = vpop.f32.mrf.mxu1 }
 0xea3   : > { %v5130_v31 = vadd.f32 %v5129_v35, %v5076_v58 }
 0xeaa   : > { %v5079_v7 = vpop.f32.mrf.mxu0  ;;  %v5132_v18 = vpop.f32.mrf.mxu1 }
 0xeab   : > { %v5133_v22 = vadd.f32 %v5132_v18, %v5079_v7 }
 0xead   : > { %5315 = vmatmul.bf16.gmra.mxu3 %v6982_v45 }
 0xeb2   : > { %v5081_v19 = vpop.f32.mrf.mxu0  ;;  %v5134_v61 = vpop.f32.mrf.mxu1 }
 0xeb3   : > { %v5135_v34 = vadd.f32 %v5134_v61, %v5081_v19 }
 0xeba   : > { %v5084_v13 = vpop.f32.mrf.mxu0  ;;  %v5137_v1 = vpop.f32.mrf.mxu1 }
 0xebb   : > { %v5138_v5 = vadd.f32 %v5137_v1, %v5084_v13 }
 0xebd   : > { %5320 = vmatmul.bf16.gmra.mxu3 %v6983_v0 }
 0xec2   : > { %v5086_v20 = vpop.f32.mrf.mxu0  ;;  %v5139_v33 = vpop.f32.mrf.mxu1 }
 0xec3   : > { %v5140_v2 = vadd.f32 %v5139_v33, %v5086_v20 }
 0xeca   : > { %v5089_v12 = vpop.f32.mrf.mxu0  ;;  %v5142_v16 = vpop.f32.mrf.mxu1 }
 0xecb   : > { %v5143_v27 = vadd.f32 %v5142_v16, %v5089_v12 }
 0xecd   : > { %5325 = vmatmul.bf16.gmra.mxu3 %v6984_v37 }
 0xed2   : > { %v5091_v25 = vpop.f32.mrf.mxu0  ;;  %v5144_v24 = vpop.f32.mrf.mxu1 }
 0xed3   : > { %v5145_v26 = vadd.f32 %v5144_v24, %v5091_v25 }
 0xf20   : > { %v5311_v47 = vpop.f32.mrf.mxu3 }
 0xf21   : > { %v5331_v14 = vadd.f32 %v5311_v47, %v5128_v43 }
 0xf23   : > { %v5387_v52 = vadd.f32 %v5350_v8, %v5331_v14 }
 0xf25   : > { %5395 = vst.msk [vmem:[%s8957_s21] sm:$0xff] %vm2831_vm5, %v5387_v52 }
 0xf28   : > { %v5313_v23 = vpop.f32.mrf.mxu3 }
 0xf29   : > { %v5332_v21 = vadd.f32 %v5313_v23, %v5130_v31 }
 0xf2b   : > { %v5388_v15 = vadd.f32 %v5355_v10, %v5332_v21 }
 0xf2d   : > { %5396 = vst.msk [vmem:[%s8957_s21 + $0x8] sm:$0xff] %vm2831_vm5, %v5388_v15 }
 0xf30   : > { %v5316_v51 = vpop.f32.mrf.mxu3 }
 0xf31   : > { %v5333_v54 = vadd.f32 %v5316_v51, %v5133_v22 }
 0xf33   : > { %v5389_v46 = vadd.f32 %v5360_v32, %v5333_v54 }
 0xf35   : > { %5397 = vst.msk [vmem:[%s8957_s21 + $0x10] sm:$0xff] %vm2831_vm5, %v5389_v46 }
 0xf38   : > { %v5318_v38 = vpop.f32.mrf.mxu3 }
 0xf39   : > { %v5334_v40 = vadd.f32 %v5318_v38, %v5135_v34 }
 0xf3b   : > { %v5390_v36 = vadd.f32 %v5365_v11, %v5334_v40 }
 0xf3d   : > { %5398 = vst.msk [vmem:[%s8957_s21 + $0x18] sm:$0xff] %vm2831_vm5, %v5390_v36 }
 0xf40   : > { %v5321_v41 = vpop.f32.mrf.mxu3 }
 0xf41   : > { %v5335_v42 = vadd.f32 %v5321_v41, %v5138_v5 }
 0xf43   : > { %v5391_v50 = vadd.f32 %v5370_v44, %v5335_v42 }
 0xf45   : > { %5399 = vst.msk [vmem:[%s8957_s21 + $0x20] sm:$0xff] %vm2831_vm5, %v5391_v50 }
 0xf48   : > { %v5323_v48 = vpop.f32.mrf.mxu3 }
 0xf49   : > { %v5336_v17 = vadd.f32 %v5323_v48, %v5140_v2 }
 0xf4b   : > { %v5392_v53 = vadd.f32 %v5375_v29, %v5336_v17 }
 0xf4d   : > { %5400 = vst.msk [vmem:[%s8957_s21 + $0x28] sm:$0xff] %vm2831_vm5, %v5392_v53 }
 0xf50   : > { %v5326_v63 = vpop.f32.mrf.mxu3 }
 0xf51   : > { %v5337_v59 = vadd.f32 %v5326_v63, %v5143_v27 }
 0xf53   : > { %v5393_v4 = vadd.f32 %v5380_v39, %v5337_v59 }
 0xf55   : > { %5401 = vst.msk [vmem:[%s8957_s21 + $0x30] sm:$0xff] %vm2831_vm5, %v5393_v4 }
 0xf58   : > { %v5328_v28 = vpop.f32.mrf.mxu3 }
 0xf59   : > { %v5338_v60 = vadd.f32 %v5328_v28, %v5145_v26 }
 0xf5b   : > { %v5394_v57 = vadd.f32 %v5385_v56, %v5338_v60 }
 0xf5d   : > { %5402 = vst.msk [vmem:[%s8957_s21 + $0x38] sm:$0xff] %vm2831_vm5, %v5394_v57 }
 0xf5e   : > { %7152 = shalt.err (!%p7149_p8)
}
 0xf5f   : > { %s7204_s0 = smov 128   ;;  %s7205_s21 = smov 8  }
 0xf60   : > { %7003 = dma.vmem_to_hbm [thread:$0]  (%p7344_p5), %s5417_s28, 1024, %s5419_s29, %s5404_s1, %s7204_s0, %s7204_s0, %s7205_s21  }
 0xf61 PF: > { %s9066_s5 = sld [smem:[#allocation13_spill]] }
 0xf62   : > { %s9067_s6 = sld [smem:[#allocation11_spill]] }
 0xf67   : > { %p7020_p9 = scmp.ge.s32.totalorder %s9066_s5, 2 }
 0xf68   : > { %s5433_s2 = sand.u32 1, %s9067_s6  }
 0xf69   : > { %p7013_p10 = pnand %p7020_p9, %p7348_p6  ;;  %s5434_s4 = scalar_lea.sflag [#allocation4], %s5433_s2 }
 0xf6b   : > { %p7014_p11 = pneg %p7013_p10 }
 0xf6d   : > { %7178 = dma.done.wait (%p7014_p11), %s5434_s4, 1024  }
 0xf6e   : > { %7180 = vsyncadd (%p7014_p11), %s5434_s4, 4294966272  ;;  %s9069_s21 = sld [smem:[#allocation14_spill]]  ;;  %s9072_s0 = smov %s7187_s30 }
 0xf6f   : > { %s9070_s22 = sld [smem:[#allocation12_spill]] }
 0xf70   : > { %s9071_s20 = sld [smem:[#allocation15_spill]] }
 0xf74   : > { %p31_p12 = scmp.ge.s32.totalorder %s9069_s21, 4  }
 0xf75   : > { %s9073_s30 = smov %s9070_s22 }
 0xf76   :  { %33 = sbr.rel (!%p31_p12) target bundleno = 14 (0xe), region = 168 }
 0xf7b   :  { %5440 = vsyncpa [#allocation3], 1 }
 0xf7c   :  { %5442 = vsyncpa [#allocation3 + $0x1], 1 }
 0xf7d   :  { %5443 = vsyncpa [#allocation6], 1 }
 0xf7e   :  { %5444 = vsyncpa [#allocation4], 1 }
 0xf7f   :  { %5446 = vsyncpa [#allocation4 + $0x1], 1 }

</bundles_post_ra>
